<compile_context>
chip_gen: v7x
topology: tpu7x:2x2x1
jax: 0.10.0
libtpu: 0.0.40
codegen_flags: <defaults>
</compile_context>

<pallas_src>
import jax
import jax.numpy as jnp
from jax.experimental import pallas as pl
from jax.experimental.pallas import tpu as pltpu


_HALO = 4  # receptive-field half-width of the four stacked k=3 convs


def _round_up(x, m):
    return ((x + m - 1) // m) * m


# ---------------------------------------------------------------------------
# Kernel factory: fused encoder(x2) + fusion + decoder for one (batch, L) tile.
# ---------------------------------------------------------------------------
def _make_kernel(TB, l_tile, L_valid):
    S = 2 * TB                  # meow + instr streams (shared encoder weights)
    Lw = l_tile + 2 * _HALO     # per-tile time window incl. halo rows
    S8 = _round_up(max(S, 8), 8)
    T8 = _round_up(max(TB, 8), 8)

    def kernel(meow_ref, instr_ref,
               w1_ref, b1_ref, w2_ref, b2_ref,
               wf_ref, bf_ref, w3_ref, b3_ref, w4_ref, b4_ref,
               out_ref):
        lt = pl.program_id(1)
        off = pl.multiple_of(lt * l_tile, l_tile)

        # -- time-shift helpers: axis -2 is the time axis everywhere below ----
        def prev_t(a):           # row t holds a[t-1]; zero row at window row 0
            z = jnp.zeros_like(a[..., :1, :])
            return jnp.concatenate([z, a[..., :-1, :]], axis=-2)

        def next_t(a):           # row t holds a[t+1]; zero row at window row Lw-1
            z = jnp.zeros_like(a[..., :1, :])
            return jnp.concatenate([a[..., 1:, :], z], axis=-2)

        # -- validity mask: zero activations outside the true sequence so the
        #    module's per-layer zero padding is reproduced at sequence ends. --
        pos = jax.lax.broadcasted_iota(jnp.int32, (Lw, 1), 0) + (off - _HALO)
        vmask = ((pos >= 0) & (pos < L_valid)).astype(jnp.float32)   # [Lw, 1]
        vmask3 = vmask[None]                                         # [1, Lw, 1]

        # -- lane-dense input windows -> time-on-sublane columns --------------
        xm = meow_ref[:, pl.ds(off, Lw)]                  # [TB, Lw]
        xi = instr_ref[:, pl.ds(off, Lw)]                 # [TB, Lw]
        x = jnp.concatenate([xm, xi], axis=0)             # [S, Lw]
        if S8 > S:                                        # pad sublanes for transpose
            x = jnp.concatenate([x, jnp.zeros((S8 - S, Lw), jnp.float32)], axis=0)
        xt = jnp.transpose(x)                             # [Lw, S8] (tiny relayout)

        # -- encoder conv1: Conv1d(1, 64, 3, p=1) + ReLU (Cin=1 -> VPU broadcasts)
        w1p, w1c, w1n = w1_ref[0:1, :], w1_ref[1:2, :], w1_ref[2:3, :]
        slabs = []
        for r in range(S):
            col = xt[:, r:r + 1]                                          # [Lw, 1]
            h = prev_t(col) * w1p + col * w1c + next_t(col) * w1n + b1_ref[...]
            slabs.append(jnp.maximum(h, 0.0)[None])                       # [1, Lw, 64]
        h1 = jnp.concatenate(slabs, axis=0) * vmask3                      # [S, Lw, 64]

        # -- k=3 conv as one tap-folded MXU matmul (K = 3*Ci) ------------------
        def conv3_fold(a, w_ref, b_ref):
            s, lw, ci = a.shape
            x3 = jnp.concatenate([prev_t(a), a, next_t(a)], axis=-1)      # [s, lw, 3*ci]
            y = jnp.dot(x3.reshape(s * lw, 3 * ci), w_ref[...],
                        preferred_element_type=jnp.float32) + b_ref[...]
            return y.reshape(s, lw, y.shape[-1])

        # -- encoder conv2: Conv1d(64, 128, 3, p=1) + ReLU ---------------------
        h2 = jnp.maximum(conv3_fold(h1, w2_ref, b2_ref), 0.0)             # [S, Lw, 128]

        # -- fusion: Conv1d(256, 128, 1) over cat([x1, x2], channels) + ReLU ---
        h2m = h2[0:TB].reshape(TB * Lw, 128)
        h2i = h2[TB:S].reshape(TB * Lw, 128)
        f = (jnp.dot(h2m, wf_ref[0:128, :], preferred_element_type=jnp.float32)
             + jnp.dot(h2i, wf_ref[128:256, :], preferred_element_type=jnp.float32)
             + bf_ref[...])
        f = jnp.maximum(f, 0.0).reshape(TB, Lw, 128) * vmask3             # [TB, Lw, 128]

        # -- decoder deconv1 == Conv1d(128, 64, 3, p=1) (taps pre-flipped) + ReLU
        d1 = jnp.maximum(conv3_fold(f, w3_ref, b3_ref), 0.0) * vmask3     # [TB, Lw, 64]

        # -- decoder deconv2 == Conv1d(64, 1, 3, p=1): shift-after narrow matmul
        taps = jnp.dot(d1.reshape(TB * Lw, 64), w4_ref[...],
                       preferred_element_type=jnp.float32).reshape(TB, Lw, 3)
        y = prev_t(taps[:, :, 0:1]) + taps[:, :, 1:2] + next_t(taps[:, :, 2:3])

        # -- crop the halo and store one lane-dense [TB, l_tile] block ---------
        cols = [y[b] for b in range(TB)]                                  # [Lw, 1] each
        if T8 > TB:
            cols.append(jnp.zeros((Lw, T8 - TB), jnp.float32))
        yt = jnp.transpose(jnp.concatenate(cols, axis=1))                 # [T8, Lw]
        out_ref[...] = yt[0:TB, _HALO:_HALO + l_tile] + b4_ref[...]

    return kernel


# ---------------------------------------------------------------------------
# Wrapper: PyTorch layout [B, 1, L] in/out, lane-dense [B, L] inside.
# ---------------------------------------------------------------------------
def vocalnet_cnn_forward(meow, instr, kernel_params, *, l_tile=256, tb=None):
    (w1k, b1k, w2k, b2k, wfk, bfk, w3k, b3k, w4k, b4k) = kernel_params
    B, c_in, L = meow.shape
    assert c_in == 1 and instr.shape == meow.shape
    assert l_tile % 128 == 0, "l_tile must be a multiple of 128 (lane-dense blocks)"

    TB = B if tb is None else tb
    assert TB == B or (TB % 8 == 0 and B % TB == 0)
    n_bb = B // TB
    n_lt = -(-L // l_tile)
    L_core = n_lt * l_tile
    L_pad = L_core + 2 * _HALO

    def pad_io(a):  # [B, 1, L] -> zero-padded lane-dense [B, L_pad]
        a2 = a[:, 0, :].astype(jnp.float32)
        return jnp.pad(a2, ((0, 0), (_HALO, L_pad - L - _HALO)))

    meow_p, instr_p = pad_io(meow), pad_io(instr)

    io_spec = pl.BlockSpec((TB, L_pad), lambda bb, lt: (bb, 0))

    def const_spec(arr):  # weights: VMEM-resident, fetched once
        return pl.BlockSpec(arr.shape, lambda bb, lt, _n=arr.ndim: (0,) * _n)

    out = pl.pallas_call(
        _make_kernel(TB, l_tile, L),
        out_shape=jax.ShapeDtypeStruct((B, L_core), jnp.float32),
        grid_spec=pltpu.PrefetchScalarGridSpec(
            num_scalar_prefetch=0,
            grid=(n_bb, n_lt),
            in_specs=[io_spec, io_spec,
                      const_spec(w1k), const_spec(b1k),
                      const_spec(w2k), const_spec(b2k),
                      const_spec(wfk), const_spec(bfk),
                      const_spec(w3k), const_spec(b3k),
                      const_spec(w4k), const_spec(b4k)],
            out_specs=pl.BlockSpec((TB, l_tile), lambda bb, lt: (bb, lt)),
        ),
        compiler_params=pltpu.CompilerParams(
            dimension_semantics=("parallel", "parallel"),
        ),
    )(meow_p, instr_p, w1k, b1k, w2k, b2k, wfk, bfk, w3k, b3k, w4k, b4k)

    return out[:, None, :L]                                  # [B, 1, L]


# ---------------------------------------------------------------------------
# Parameter setup (deterministic, PyTorch layouts) + conversion to kernel layout.
# ---------------------------------------------------------------------------
def init_torch_params(key):
    def uniform(k, shape, fan_in):
        bound = 1.0 / (fan_in ** 0.5)
        return jax.random.uniform(k, shape, jnp.float32, -bound, bound)

    ks = jax.random.split(key, 10)
    # Conv1d weight: [out, in, k]; ConvTranspose1d weight: [in, out, k]
    w1 = uniform(ks[0], (64, 1, 3), 1 * 3);     b1 = uniform(ks[1], (64,), 1 * 3)
    w2 = uniform(ks[2], (128, 64, 3), 64 * 3);  b2 = uniform(ks[3], (128,), 64 * 3)
    wf = uniform(ks[4], (128, 256, 1), 256);    bf = uniform(ks[5], (128,), 256)
    w3 = uniform(ks[6], (128, 64, 3), 128 * 3); b3 = uniform(ks[7], (64,), 128 * 3)
    w4 = uniform(ks[8], (64, 1, 3), 64 * 3);    b4 = uniform(ks[9], (1,), 64 * 3)
    return (w1, b1, w2, b2, wf, bf, w3, b3, w4, b4)


def to_kernel_params(tp):
    w1, b1, w2, b2, wf, bf, w3, b3, w4, b4 = tp
    w1k = jnp.transpose(w1[:, 0, :], (1, 0))                              # [3, 64]
    w2k = jnp.transpose(w2, (2, 1, 0)).reshape(3 * 64, 128)               # [3*64, 128]
    wfk = jnp.transpose(wf[:, :, 0], (1, 0))                              # [256, 128]
    # stride-1 ConvTranspose1d(pad=1) == Conv1d(pad=1) with flipped taps.
    w3k = jnp.transpose(jnp.flip(w3, axis=2), (2, 0, 1)).reshape(3 * 128, 64)  # [3*128, 64]
    w4k = jnp.flip(w4[:, 0, :], axis=1)                                   # [64, 3] (col k = tap k)
    return (w1k, b1[None, :], w2k, b2[None, :], wfk, bf[None, :],
            w3k, b3[None, :], w4k, b4[None, :])


# ---------------------------------------------------------------------------
# Independent pure-JAX reference (PyTorch Conv1d / ConvTranspose1d semantics).
# ---------------------------------------------------------------------------
def _conv1d_ref(x, w, b, pad):
    # x: [B, L, Ci]; w: [Co, Ci, K] (Conv1d layout); stride 1.
    L, K = x.shape[1], w.shape[2]
    xp = jnp.pad(x, ((0, 0), (pad, pad), (0, 0)))
    out = b[None, None, :]
    for k in range(K):
        out = out + jnp.einsum('bli,oi->blo', xp[:, k:k + L, :], w[:, :, k],
                               precision=jax.lax.Precision.HIGHEST)
    return out


def _conv_transpose1d_ref(x, w, b, pad):
    # x: [B, L, Ci]; w: [Ci, Co, K] (ConvTranspose1d layout); stride 1.
    L, K = x.shape[1], w.shape[2]
    xp = jnp.pad(x, ((0, 0), (K - 1 - pad, pad), (0, 0)))
    out = b[None, None, :]
    for k in range(K):
        s = K - 1 - k
        out = out + jnp.einsum('bli,io->blo', xp[:, s:s + L, :], w[:, :, k],
                               precision=jax.lax.Precision.HIGHEST)
    return out


def reference_forward(meow, instr, torch_params):
    w1, b1, w2, b2, wf, bf, w3, b3, w4, b4 = torch_params

    def encoder(x):
        h = jax.nn.relu(_conv1d_ref(x, w1, b1, pad=1))
        return jax.nn.relu(_conv1d_ref(h, w2, b2, pad=1))

    x1 = encoder(jnp.transpose(meow, (0, 2, 1)))
    x2 = encoder(jnp.transpose(instr, (0, 2, 1)))
    cat = jnp.concatenate([x1, x2], axis=-1)                    # [B, L, 256]
    f = jax.nn.relu(_conv1d_ref(cat, wf, bf, pad=0))
    d = jax.nn.relu(_conv_transpose1d_ref(f, w3, b3, pad=1))
    y = _conv_transpose1d_ref(d, w4, b4, pad=1)                 # [B, L, 1]
    return jnp.transpose(y, (0, 2, 1))                          # [B, 1, L]


if __name__ == "__main__":
    B, L = 2, 300   # L not a multiple of the tile -> exercises cropping + masks

    key = jax.random.PRNGKey(0)
    k_m, k_i, k_p = jax.random.split(key, 3)
    meow = jax.random.normal(k_m, (B, 1, L), dtype=jnp.float32)
    instr = jax.random.normal(k_i, (B, 1, L), dtype=jnp.float32)

    torch_params = init_torch_params(k_p)
    kernel_params = to_kernel_params(torch_params)

    out = vocalnet_cnn_forward(meow, instr, kernel_params, l_tile=128)
    out = jax.block_until_ready(out)
    assert out.shape == (B, 1, L)

    ref = reference_forward(meow, instr, torch_params)
    max_err = jnp.max(jnp.abs(out - ref))
    assert jnp.allclose(out, ref, atol=5e-3, rtol=5e-3), f"mismatch: max abs err {max_err}"

    print("KERNEL_OK")
</pallas_src>

<mosaic_0001>
module attributes {stable_mosaic.version = 11 : i64} {
  func.func @kernel(%arg0: i32, %arg1: i32, %arg2: memref<2x392xf32, #tpu.memory_space<vmem>>, %arg3: memref<2x392xf32, #tpu.memory_space<vmem>>, %arg4: memref<3x64xf32, #tpu.memory_space<vmem>>, %arg5: memref<1x64xf32, #tpu.memory_space<vmem>>, %arg6: memref<192x128xf32, #tpu.memory_space<vmem>>, %arg7: memref<1x128xf32, #tpu.memory_space<vmem>>, %arg8: memref<256x128xf32, #tpu.memory_space<vmem>>, %arg9: memref<1x128xf32, #tpu.memory_space<vmem>>, %arg10: memref<384x64xf32, #tpu.memory_space<vmem>>, %arg11: memref<1x64xf32, #tpu.memory_space<vmem>>, %arg12: memref<64x3xf32, #tpu.memory_space<vmem>>, %arg13: memref<1x1xf32, #tpu.memory_space<vmem>>, %arg14: memref<2x128xf32, #tpu.memory_space<vmem>>) attributes {dimension_semantics = [#tpu.dimension_semantics<parallel>, #tpu.dimension_semantics<parallel>], iteration_bounds = array<i64: 1, 3>, scalar_prefetch = 0 : i64, scratch_operands = 0 : i64, tpu.core_type = #tpu.core_type<tc>, window_params = [{transform_indices = @transform_0, window_bounds = array<i64: 2, 392>}, {transform_indices = @transform_1, window_bounds = array<i64: 2, 392>}, {pipeline_mode = #tpu.pipeline_mode<synchronous>, transform_indices = @transform_2, window_bounds = array<i64: 3, 64>}, {pipeline_mode = #tpu.pipeline_mode<synchronous>, transform_indices = @transform_3, window_bounds = array<i64: 1, 64>}, {pipeline_mode = #tpu.pipeline_mode<synchronous>, transform_indices = @transform_4, window_bounds = array<i64: 192, 128>}, {pipeline_mode = #tpu.pipeline_mode<synchronous>, transform_indices = @transform_5, window_bounds = array<i64: 1, 128>}, {pipeline_mode = #tpu.pipeline_mode<synchronous>, transform_indices = @transform_6, window_bounds = array<i64: 256, 128>}, {pipeline_mode = #tpu.pipeline_mode<synchronous>, transform_indices = @transform_7, window_bounds = array<i64: 1, 128>}, {pipeline_mode = #tpu.pipeline_mode<synchronous>, transform_indices = @transform_8, window_bounds = array<i64: 384, 64>}, {pipeline_mode = #tpu.pipeline_mode<synchronous>, transform_indices = @transform_9, window_bounds = array<i64: 1, 64>}, {pipeline_mode = #tpu.pipeline_mode<synchronous>, transform_indices = @transform_10, window_bounds = array<i64: 64, 3>}, {pipeline_mode = #tpu.pipeline_mode<synchronous>, transform_indices = @transform_11, window_bounds = array<i64: 1, 1>}, {transform_indices = @transform_12, window_bounds = array<i64: 2, 128>}]} {
    %c128_i32 = arith.constant 128 : i32
    %0 = arith.muli %arg1, %c128_i32 : i32
    %1 = tpu.assume_multiple %0, 128 : i32
    %2 = tpu.iota {dimensions = array<i32: 0>} : vector<136x1xi32>
    %c4_i32 = arith.constant 4 : i32
    %3 = arith.subi %1, %c4_i32 : i32
    %4 = vector.broadcast %3 : i32 to vector<136x1xi32>
    %5 = arith.addi %2, %4 : vector<136x1xi32>
    %c0_i32 = arith.constant 0 : i32
    %6 = vector.broadcast %c0_i32 : i32 to vector<136x1xi32>
    %7 = arith.cmpi sge, %5, %6 : vector<136x1xi32>
    %c300_i32 = arith.constant 300 : i32
    %8 = vector.broadcast %c300_i32 : i32 to vector<136x1xi32>
    %9 = arith.cmpi slt, %5, %8 : vector<136x1xi32>
    %10 = arith.andi %7, %9 : vector<136x1xi1>
    %11 = arith.extui %10 : vector<136x1xi1> to vector<136x1xi32>
    %12 = arith.sitofp %11 : vector<136x1xi32> to vector<136x1xf32>
    %13 = vector.shape_cast %12 : vector<136x1xf32> to vector<1x136x1xf32>
    %c0 = arith.constant 0 : index
    %14 = arith.index_cast %1 : i32 to index
    %15 = vector.load %arg2[%c0, %14] : memref<2x392xf32, #tpu.memory_space<vmem>>, vector<2x136xf32>
    %c0_0 = arith.constant 0 : index
    %16 = arith.index_cast %1 : i32 to index
    %17 = vector.load %arg3[%c0_0, %16] : memref<2x392xf32, #tpu.memory_space<vmem>>, vector<2x136xf32>
    %18 = tpu.concatenate %15, %17 in 0 : vector<2x136xf32>, vector<2x136xf32> -> vector<4x136xf32>
    %cst = arith.constant 0.000000e+00 : f32
    %19 = vector.broadcast %cst : f32 to vector<4x136xf32>
    %20 = tpu.concatenate %18, %19 in 0 : vector<4x136xf32>, vector<4x136xf32> -> vector<8x136xf32>
    %21 = tpu.transpose %20, [1, 0] : vector<8x136xf32> -> vector<136x8xf32>
    %c0_1 = arith.constant 0 : index
    %c0_2 = arith.constant 0 : index
    %22 = vector.load %arg4[%c0_1, %c0_2] : memref<3x64xf32, #tpu.memory_space<vmem>>, vector<1x64xf32>
    %c1 = arith.constant 1 : index
    %c0_3 = arith.constant 0 : index
    %23 = vector.load %arg4[%c1, %c0_3] : memref<3x64xf32, #tpu.memory_space<vmem>>, vector<1x64xf32>
    %c2 = arith.constant 2 : index
    %c0_4 = arith.constant 0 : index
    %24 = vector.load %arg4[%c2, %c0_4] : memref<3x64xf32, #tpu.memory_space<vmem>>, vector<1x64xf32>
    %25 = vector.extract_strided_slice %21 {offsets = [0, 0], sizes = [136, 1], strides = [1, 1]} : vector<136x8xf32> to vector<136x1xf32>
    %cst_5 = arith.constant 0.000000e+00 : f32
    %26 = vector.broadcast %cst_5 : f32 to vector<1x1xf32>
    %27 = vector.extract_strided_slice %25 {offsets = [0, 0], sizes = [135, 1], strides = [1, 1]} : vector<136x1xf32> to vector<135x1xf32>
    %28 = tpu.concatenate %26, %27 in 0 : vector<1x1xf32>, vector<135x1xf32> -> vector<136x1xf32>
    %29 = vector.broadcast %28 : vector<136x1xf32> to vector<136x64xf32>
    %30 = vector.broadcast %22 : vector<1x64xf32> to vector<136x64xf32>
    %31 = arith.mulf %29, %30 : vector<136x64xf32>
    %32 = vector.broadcast %25 : vector<136x1xf32> to vector<136x64xf32>
    %33 = vector.broadcast %23 : vector<1x64xf32> to vector<136x64xf32>
    %34 = arith.mulf %32, %33 : vector<136x64xf32>
    %35 = arith.addf %31, %34 : vector<136x64xf32>
    %cst_6 = arith.constant 0.000000e+00 : f32
    %36 = vector.broadcast %cst_6 : f32 to vector<1x1xf32>
    %37 = vector.extract_strided_slice %25 {offsets = [1, 0], sizes = [135, 1], strides = [1, 1]} : vector<136x1xf32> to vector<135x1xf32>
    %38 = tpu.concatenate %37, %36 in 0 : vector<135x1xf32>, vector<1x1xf32> -> vector<136x1xf32>
    %39 = vector.broadcast %38 : vector<136x1xf32> to vector<136x64xf32>
    %40 = vector.broadcast %24 : vector<1x64xf32> to vector<136x64xf32>
    %41 = arith.mulf %39, %40 : vector<136x64xf32>
    %42 = arith.addf %35, %41 : vector<136x64xf32>
    %c0_7 = arith.constant 0 : index
    %c0_8 = arith.constant 0 : index
    %43 = vector.load %arg5[%c0_7, %c0_8] : memref<1x64xf32, #tpu.memory_space<vmem>>, vector<1x64xf32>
    %44 = vector.broadcast %43 : vector<1x64xf32> to vector<136x64xf32>
    %45 = arith.addf %42, %44 : vector<136x64xf32>
    %cst_9 = arith.constant 0.000000e+00 : f32
    %46 = vector.broadcast %cst_9 : f32 to vector<136x64xf32>
    %47 = arith.maximumf %45, %46 : vector<136x64xf32>
    %48 = vector.shape_cast %47 : vector<136x64xf32> to vector<1x136x64xf32>
    %49 = vector.extract_strided_slice %21 {offsets = [0, 1], sizes = [136, 1], strides = [1, 1]} : vector<136x8xf32> to vector<136x1xf32>
    %cst_10 = arith.constant 0.000000e+00 : f32
    %50 = vector.broadcast %cst_10 : f32 to vector<1x1xf32>
    %51 = vector.extract_strided_slice %49 {offsets = [0, 0], sizes = [135, 1], strides = [1, 1]} : vector<136x1xf32> to vector<135x1xf32>
    %52 = tpu.concatenate %50, %51 in 0 : vector<1x1xf32>, vector<135x1xf32> -> vector<136x1xf32>
    %53 = vector.broadcast %52 : vector<136x1xf32> to vector<136x64xf32>
    %54 = vector.broadcast %22 : vector<1x64xf32> to vector<136x64xf32>
    %55 = arith.mulf %53, %54 : vector<136x64xf32>
    %56 = vector.broadcast %49 : vector<136x1xf32> to vector<136x64xf32>
    %57 = vector.broadcast %23 : vector<1x64xf32> to vector<136x64xf32>
    %58 = arith.mulf %56, %57 : vector<136x64xf32>
    %59 = arith.addf %55, %58 : vector<136x64xf32>
    %cst_11 = arith.constant 0.000000e+00 : f32
    %60 = vector.broadcast %cst_11 : f32 to vector<1x1xf32>
    %61 = vector.extract_strided_slice %49 {offsets = [1, 0], sizes = [135, 1], strides = [1, 1]} : vector<136x1xf32> to vector<135x1xf32>
    %62 = tpu.concatenate %61, %60 in 0 : vector<135x1xf32>, vector<1x1xf32> -> vector<136x1xf32>
    %63 = vector.broadcast %62 : vector<136x1xf32> to vector<136x64xf32>
    %64 = vector.broadcast %24 : vector<1x64xf32> to vector<136x64xf32>
    %65 = arith.mulf %63, %64 : vector<136x64xf32>
    %66 = arith.addf %59, %65 : vector<136x64xf32>
    %c0_12 = arith.constant 0 : index
    %c0_13 = arith.constant 0 : index
    %67 = vector.load %arg5[%c0_12, %c0_13] : memref<1x64xf32, #tpu.memory_space<vmem>>, vector<1x64xf32>
    %68 = vector.broadcast %67 : vector<1x64xf32> to vector<136x64xf32>
    %69 = arith.addf %66, %68 : vector<136x64xf32>
    %cst_14 = arith.constant 0.000000e+00 : f32
    %70 = vector.broadcast %cst_14 : f32 to vector<136x64xf32>
    %71 = arith.maximumf %69, %70 : vector<136x64xf32>
    %72 = vector.shape_cast %71 : vector<136x64xf32> to vector<1x136x64xf32>
    %73 = vector.extract_strided_slice %21 {offsets = [0, 2], sizes = [136, 1], strides = [1, 1]} : vector<136x8xf32> to vector<136x1xf32>
    %cst_15 = arith.constant 0.000000e+00 : f32
    %74 = vector.broadcast %cst_15 : f32 to vector<1x1xf32>
    %75 = vector.extract_strided_slice %73 {offsets = [0, 0], sizes = [135, 1], strides = [1, 1]} : vector<136x1xf32> to vector<135x1xf32>
    %76 = tpu.concatenate %74, %75 in 0 : vector<1x1xf32>, vector<135x1xf32> -> vector<136x1xf32>
    %77 = vector.broadcast %76 : vector<136x1xf32> to vector<136x64xf32>
    %78 = vector.broadcast %22 : vector<1x64xf32> to vector<136x64xf32>
    %79 = arith.mulf %77, %78 : vector<136x64xf32>
    %80 = vector.broadcast %73 : vector<136x1xf32> to vector<136x64xf32>
    %81 = vector.broadcast %23 : vector<1x64xf32> to vector<136x64xf32>
    %82 = arith.mulf %80, %81 : vector<136x64xf32>
    %83 = arith.addf %79, %82 : vector<136x64xf32>
    %cst_16 = arith.constant 0.000000e+00 : f32
    %84 = vector.broadcast %cst_16 : f32 to vector<1x1xf32>
    %85 = vector.extract_strided_slice %73 {offsets = [1, 0], sizes = [135, 1], strides = [1, 1]} : vector<136x1xf32> to vector<135x1xf32>
    %86 = tpu.concatenate %85, %84 in 0 : vector<135x1xf32>, vector<1x1xf32> -> vector<136x1xf32>
    %87 = vector.broadcast %86 : vector<136x1xf32> to vector<136x64xf32>
    %88 = vector.broadcast %24 : vector<1x64xf32> to vector<136x64xf32>
    %89 = arith.mulf %87, %88 : vector<136x64xf32>
    %90 = arith.addf %83, %89 : vector<136x64xf32>
    %c0_17 = arith.constant 0 : index
    %c0_18 = arith.constant 0 : index
    %91 = vector.load %arg5[%c0_17, %c0_18] : memref<1x64xf32, #tpu.memory_space<vmem>>, vector<1x64xf32>
    %92 = vector.broadcast %91 : vector<1x64xf32> to vector<136x64xf32>
    %93 = arith.addf %90, %92 : vector<136x64xf32>
    %cst_19 = arith.constant 0.000000e+00 : f32
    %94 = vector.broadcast %cst_19 : f32 to vector<136x64xf32>
    %95 = arith.maximumf %93, %94 : vector<136x64xf32>
    %96 = vector.shape_cast %95 : vector<136x64xf32> to vector<1x136x64xf32>
    %97 = vector.extract_strided_slice %21 {offsets = [0, 3], sizes = [136, 1], strides = [1, 1]} : vector<136x8xf32> to vector<136x1xf32>
    %cst_20 = arith.constant 0.000000e+00 : f32
    %98 = vector.broadcast %cst_20 : f32 to vector<1x1xf32>
    %99 = vector.extract_strided_slice %97 {offsets = [0, 0], sizes = [135, 1], strides = [1, 1]} : vector<136x1xf32> to vector<135x1xf32>
    %100 = tpu.concatenate %98, %99 in 0 : vector<1x1xf32>, vector<135x1xf32> -> vector<136x1xf32>
    %101 = vector.broadcast %100 : vector<136x1xf32> to vector<136x64xf32>
    %102 = vector.broadcast %22 : vector<1x64xf32> to vector<136x64xf32>
    %103 = arith.mulf %101, %102 : vector<136x64xf32>
    %104 = vector.broadcast %97 : vector<136x1xf32> to vector<136x64xf32>
    %105 = vector.broadcast %23 : vector<1x64xf32> to vector<136x64xf32>
    %106 = arith.mulf %104, %105 : vector<136x64xf32>
    %107 = arith.addf %103, %106 : vector<136x64xf32>
    %cst_21 = arith.constant 0.000000e+00 : f32
    %108 = vector.broadcast %cst_21 : f32 to vector<1x1xf32>
    %109 = vector.extract_strided_slice %97 {offsets = [1, 0], sizes = [135, 1], strides = [1, 1]} : vector<136x1xf32> to vector<135x1xf32>
    %110 = tpu.concatenate %109, %108 in 0 : vector<135x1xf32>, vector<1x1xf32> -> vector<136x1xf32>
    %111 = vector.broadcast %110 : vector<136x1xf32> to vector<136x64xf32>
    %112 = vector.broadcast %24 : vector<1x64xf32> to vector<136x64xf32>
    %113 = arith.mulf %111, %112 : vector<136x64xf32>
    %114 = arith.addf %107, %113 : vector<136x64xf32>
    %c0_22 = arith.constant 0 : index
    %c0_23 = arith.constant 0 : index
    %115 = vector.load %arg5[%c0_22, %c0_23] : memref<1x64xf32, #tpu.memory_space<vmem>>, vector<1x64xf32>
    %116 = vector.broadcast %115 : vector<1x64xf32> to vector<136x64xf32>
    %117 = arith.addf %114, %116 : vector<136x64xf32>
    %cst_24 = arith.constant 0.000000e+00 : f32
    %118 = vector.broadcast %cst_24 : f32 to vector<136x64xf32>
    %119 = arith.maximumf %117, %118 : vector<136x64xf32>
    %120 = vector.shape_cast %119 : vector<136x64xf32> to vector<1x136x64xf32>
    %121 = tpu.concatenate %48, %72, %96, %120 in 0 : vector<1x136x64xf32>, vector<1x136x64xf32>, vector<1x136x64xf32>, vector<1x136x64xf32> -> vector<4x136x64xf32>
    %122 = vector.broadcast %13 : vector<1x136x1xf32> to vector<4x136x64xf32>
    %123 = arith.mulf %121, %122 : vector<4x136x64xf32>
    %cst_25 = arith.constant 0.000000e+00 : f32
    %124 = vector.broadcast %cst_25 : f32 to vector<4x1x64xf32>
    %125 = vector.extract_strided_slice %123 {offsets = [0, 0, 0], sizes = [4, 135, 64], strides = [1, 1, 1]} : vector<4x136x64xf32> to vector<4x135x64xf32>
    %126 = tpu.concatenate %124, %125 in 1 : vector<4x1x64xf32>, vector<4x135x64xf32> -> vector<4x136x64xf32>
    %cst_26 = arith.constant 0.000000e+00 : f32
    %127 = vector.broadcast %cst_26 : f32 to vector<4x1x64xf32>
    %128 = vector.extract_strided_slice %123 {offsets = [0, 1, 0], sizes = [4, 135, 64], strides = [1, 1, 1]} : vector<4x136x64xf32> to vector<4x135x64xf32>
    %129 = tpu.concatenate %128, %127 in 1 : vector<4x135x64xf32>, vector<4x1x64xf32> -> vector<4x136x64xf32>
    %130 = tpu.concatenate %126, %123, %129 in 2 : vector<4x136x64xf32>, vector<4x136x64xf32>, vector<4x136x64xf32> -> vector<4x136x192xf32>
    %131 = vector.shape_cast %130 : vector<4x136x192xf32> to vector<544x192xf32>
    %c0_27 = arith.constant 0 : index
    %c0_28 = arith.constant 0 : index
    %132 = vector.load %arg6[%c0_27, %c0_28] : memref<192x128xf32, #tpu.memory_space<vmem>>, vector<192x128xf32>
    %cst_29 = arith.constant dense<0.000000e+00> : vector<544x128xf32>
    %133 = tpu.matmul %131, %132, %cst_29 {dimension_numbers = #tpu.dot_dimension_numbers<[1], [0], [0], [1], [0, 0, 1, 1], [], []>} : vector<544x192xf32>, vector<192x128xf32>, vector<544x128xf32> -> vector<544x128xf32>
    %c0_30 = arith.constant 0 : index
    %c0_31 = arith.constant 0 : index
    %134 = vector.load %arg7[%c0_30, %c0_31] : memref<1x128xf32, #tpu.memory_space<vmem>>, vector<1x128xf32>
    %135 = vector.broadcast %134 : vector<1x128xf32> to vector<544x128xf32>
    %136 = arith.addf %133, %135 : vector<544x128xf32>
    %137 = vector.shape_cast %136 : vector<544x128xf32> to vector<4x136x128xf32>
    %cst_32 = arith.constant 0.000000e+00 : f32
    %138 = vector.broadcast %cst_32 : f32 to vector<4x136x128xf32>
    %139 = arith.maximumf %137, %138 : vector<4x136x128xf32>
    %140 = vector.extract_strided_slice %139 {offsets = [0, 0, 0], sizes = [2, 136, 128], strides = [1, 1, 1]} : vector<4x136x128xf32> to vector<2x136x128xf32>
    %141 = vector.shape_cast %140 : vector<2x136x128xf32> to vector<272x128xf32>
    %142 = vector.extract_strided_slice %139 {offsets = [2, 0, 0], sizes = [2, 136, 128], strides = [1, 1, 1]} : vector<4x136x128xf32> to vector<2x136x128xf32>
    %143 = vector.shape_cast %142 : vector<2x136x128xf32> to vector<272x128xf32>
    %c0_33 = arith.constant 0 : index
    %c0_34 = arith.constant 0 : index
    %144 = vector.load %arg8[%c0_33, %c0_34] : memref<256x128xf32, #tpu.memory_space<vmem>>, vector<128x128xf32>
    %cst_35 = arith.constant dense<0.000000e+00> : vector<272x128xf32>
    %145 = tpu.matmul %141, %144, %cst_35 {dimension_numbers = #tpu.dot_dimension_numbers<[1], [0], [0], [1], [0, 0, 1, 1], [], []>} : vector<272x128xf32>, vector<128x128xf32>, vector<272x128xf32> -> vector<272x128xf32>
    %c128 = arith.constant 128 : index
    %c0_36 = arith.constant 0 : index
    %146 = vector.load %arg8[%c128, %c0_36] : memref<256x128xf32, #tpu.memory_space<vmem>>, vector<128x128xf32>
    %cst_37 = arith.constant dense<0.000000e+00> : vector<272x128xf32>
    %147 = tpu.matmul %143, %146, %cst_37 {dimension_numbers = #tpu.dot_dimension_numbers<[1], [0], [0], [1], [0, 0, 1, 1], [], []>} : vector<272x128xf32>, vector<128x128xf32>, vector<272x128xf32> -> vector<272x128xf32>
    %148 = arith.addf %145, %147 : vector<272x128xf32>
    %c0_38 = arith.constant 0 : index
    %c0_39 = arith.constant 0 : index
    %149 = vector.load %arg9[%c0_38, %c0_39] : memref<1x128xf32, #tpu.memory_space<vmem>>, vector<1x128xf32>
    %150 = vector.broadcast %149 : vector<1x128xf32> to vector<272x128xf32>
    %151 = arith.addf %148, %150 : vector<272x128xf32>
    %cst_40 = arith.constant 0.000000e+00 : f32
    %152 = vector.broadcast %cst_40 : f32 to vector<272x128xf32>
    %153 = arith.maximumf %151, %152 : vector<272x128xf32>
    %154 = vector.shape_cast %153 : vector<272x128xf32> to vector<2x136x128xf32>
    %155 = vector.broadcast %13 : vector<1x136x1xf32> to vector<2x136x128xf32>
    %156 = arith.mulf %154, %155 : vector<2x136x128xf32>
    %cst_41 = arith.constant 0.000000e+00 : f32
    %157 = vector.broadcast %cst_41 : f32 to vector<2x1x128xf32>
    %158 = vector.extract_strided_slice %156 {offsets = [0, 0, 0], sizes = [2, 135, 128], strides = [1, 1, 1]} : vector<2x136x128xf32> to vector<2x135x128xf32>
    %159 = tpu.concatenate %157, %158 in 1 : vector<2x1x128xf32>, vector<2x135x128xf32> -> vector<2x136x128xf32>
    %cst_42 = arith.constant 0.000000e+00 : f32
    %160 = vector.broadcast %cst_42 : f32 to vector<2x1x128xf32>
    %161 = vector.extract_strided_slice %156 {offsets = [0, 1, 0], sizes = [2, 135, 128], strides = [1, 1, 1]} : vector<2x136x128xf32> to vector<2x135x128xf32>
    %162 = tpu.concatenate %161, %160 in 1 : vector<2x135x128xf32>, vector<2x1x128xf32> -> vector<2x136x128xf32>
    %163 = tpu.concatenate %159, %156, %162 in 2 : vector<2x136x128xf32>, vector<2x136x128xf32>, vector<2x136x128xf32> -> vector<2x136x384xf32>
    %164 = vector.shape_cast %163 : vector<2x136x384xf32> to vector<272x384xf32>
    %c0_43 = arith.constant 0 : index
    %c0_44 = arith.constant 0 : index
    %165 = vector.load %arg10[%c0_43, %c0_44] : memref<384x64xf32, #tpu.memory_space<vmem>>, vector<384x64xf32>
    %cst_45 = arith.constant dense<0.000000e+00> : vector<272x64xf32>
    %166 = tpu.matmul %164, %165, %cst_45 {dimension_numbers = #tpu.dot_dimension_numbers<[1], [0], [0], [1], [0, 0, 1, 1], [], []>} : vector<272x384xf32>, vector<384x64xf32>, vector<272x64xf32> -> vector<272x64xf32>
    %c0_46 = arith.constant 0 : index
    %c0_47 = arith.constant 0 : index
    %167 = vector.load %arg11[%c0_46, %c0_47] : memref<1x64xf32, #tpu.memory_space<vmem>>, vector<1x64xf32>
    %168 = vector.broadcast %167 : vector<1x64xf32> to vector<272x64xf32>
    %169 = arith.addf %166, %168 : vector<272x64xf32>
    %170 = vector.shape_cast %169 : vector<272x64xf32> to vector<2x136x64xf32>
    %cst_48 = arith.constant 0.000000e+00 : f32
    %171 = vector.broadcast %cst_48 : f32 to vector<2x136x64xf32>
    %172 = arith.maximumf %170, %171 : vector<2x136x64xf32>
    %173 = vector.broadcast %13 : vector<1x136x1xf32> to vector<2x136x64xf32>
    %174 = arith.mulf %172, %173 : vector<2x136x64xf32>
    %175 = vector.shape_cast %174 : vector<2x136x64xf32> to vector<272x64xf32>
    %c0_49 = arith.constant 0 : index
    %c0_50 = arith.constant 0 : index
    %176 = vector.load %arg12[%c0_49, %c0_50] : memref<64x3xf32, #tpu.memory_space<vmem>>, vector<64x3xf32>
    %cst_51 = arith.constant dense<0.000000e+00> : vector<272x3xf32>
    %177 = tpu.matmul %175, %176, %cst_51 {dimension_numbers = #tpu.dot_dimension_numbers<[1], [0], [0], [1], [0, 0, 1, 1], [], []>} : vector<272x64xf32>, vector<64x3xf32>, vector<272x3xf32> -> vector<272x3xf32>
    %178 = vector.shape_cast %177 : vector<272x3xf32> to vector<2x136x3xf32>
    %179 = vector.extract_strided_slice %178 {offsets = [0, 0, 0], sizes = [2, 136, 1], strides = [1, 1, 1]} : vector<2x136x3xf32> to vector<2x136x1xf32>
    %cst_52 = arith.constant 0.000000e+00 : f32
    %180 = vector.broadcast %cst_52 : f32 to vector<2x1x1xf32>
    %181 = vector.extract_strided_slice %179 {offsets = [0, 0, 0], sizes = [2, 135, 1], strides = [1, 1, 1]} : vector<2x136x1xf32> to vector<2x135x1xf32>
    %182 = tpu.concatenate %180, %181 in 1 : vector<2x1x1xf32>, vector<2x135x1xf32> -> vector<2x136x1xf32>
    %183 = vector.extract_strided_slice %178 {offsets = [0, 0, 1], sizes = [2, 136, 1], strides = [1, 1, 1]} : vector<2x136x3xf32> to vector<2x136x1xf32>
    %184 = arith.addf %182, %183 : vector<2x136x1xf32>
    %185 = vector.extract_strided_slice %178 {offsets = [0, 0, 2], sizes = [2, 136, 1], strides = [1, 1, 1]} : vector<2x136x3xf32> to vector<2x136x1xf32>
    %cst_53 = arith.constant 0.000000e+00 : f32
    %186 = vector.broadcast %cst_53 : f32 to vector<2x1x1xf32>
    %187 = vector.extract_strided_slice %185 {offsets = [0, 1, 0], sizes = [2, 135, 1], strides = [1, 1, 1]} : vector<2x136x1xf32> to vector<2x135x1xf32>
    %188 = tpu.concatenate %187, %186 in 1 : vector<2x135x1xf32>, vector<2x1x1xf32> -> vector<2x136x1xf32>
    %189 = arith.addf %184, %188 : vector<2x136x1xf32>
    %190 = vector.extract_strided_slice %189 {offsets = [0, 0, 0], sizes = [1, 136, 1], strides = [1, 1, 1]} : vector<2x136x1xf32> to vector<1x136x1xf32>
    %191 = vector.shape_cast %190 : vector<1x136x1xf32> to vector<136x1xf32>
    %192 = vector.extract_strided_slice %189 {offsets = [1, 0, 0], sizes = [1, 136, 1], strides = [1, 1, 1]} : vector<2x136x1xf32> to vector<1x136x1xf32>
    %193 = vector.shape_cast %192 : vector<1x136x1xf32> to vector<136x1xf32>
    %cst_54 = arith.constant 0.000000e+00 : f32
    %194 = vector.broadcast %cst_54 : f32 to vector<136x6xf32>
    %195 = tpu.concatenate %191, %193, %194 in 1 : vector<136x1xf32>, vector<136x1xf32>, vector<136x6xf32> -> vector<136x8xf32>
    %196 = tpu.transpose %195, [1, 0] : vector<136x8xf32> -> vector<8x136xf32>
    %197 = vector.extract_strided_slice %196 {offsets = [0, 4], sizes = [2, 128], strides = [1, 1]} : vector<8x136xf32> to vector<2x128xf32>
    %c0_55 = arith.constant 0 : index
    %c0_56 = arith.constant 0 : index
    %198 = vector.load %arg13[%c0_55, %c0_56] : memref<1x1xf32, #tpu.memory_space<vmem>>, vector<1x1xf32>
    %199 = vector.broadcast %198 : vector<1x1xf32> to vector<2x128xf32>
    %200 = arith.addf %197, %199 : vector<2x128xf32>
    %c0_57 = arith.constant 0 : index
    %c0_58 = arith.constant 0 : index
    %201 = vector.load %arg14[%c0_57, %c0_58] : memref<2x128xf32, #tpu.memory_space<vmem>>, vector<2x128xf32>
    tpu.vector_store %arg14[%c0_57, %c0_58], %200 {strides = array<i32>} : memref<2x128xf32, #tpu.memory_space<vmem>>, vector<2x128xf32>,
    return
  }
  func.func @transform_0(%arg0: i32, %arg1: i32) -> (i32, i32) {
    %c0_i32 = arith.constant 0 : i32
    %c0_i32_0 = arith.constant 0 : i32
    return %arg0, %c0_i32 : i32, i32
  }
  func.func @transform_1(%arg0: i32, %arg1: i32) -> (i32, i32) {
    %c0_i32 = arith.constant 0 : i32
    %c0_i32_0 = arith.constant 0 : i32
    return %arg0, %c0_i32 : i32, i32
  }
  func.func @transform_2(%arg0: i32, %arg1: i32) -> (i32, i32) {
    %c0_i32 = arith.constant 0 : i32
    %c0_i32_0 = arith.constant 0 : i32
    %c0_i32_1 = arith.constant 0 : i32
    return %c0_i32, %c0_i32_0 : i32, i32
  }
  func.func @transform_3(%arg0: i32, %arg1: i32) -> (i32, i32) {
    %c0_i32 = arith.constant 0 : i32
    %c0_i32_0 = arith.constant 0 : i32
    %c0_i32_1 = arith.constant 0 : i32
    return %c0_i32, %c0_i32_0 : i32, i32
  }
  func.func @transform_4(%arg0: i32, %arg1: i32) -> (i32, i32) {
    %c0_i32 = arith.constant 0 : i32
    %c0_i32_0 = arith.constant 0 : i32
    %c0_i32_1 = arith.constant 0 : i32
    return %c0_i32, %c0_i32_0 : i32, i32
  }
  func.func @transform_5(%arg0: i32, %arg1: i32) -> (i32, i32) {
    %c0_i32 = arith.constant 0 : i32
    %c0_i32_0 = arith.constant 0 : i32
    %c0_i32_1 = arith.constant 0 : i32
    return %c0_i32, %c0_i32_0 : i32, i32
  }
  func.func @transform_6(%arg0: i32, %arg1: i32) -> (i32, i32) {
    %c0_i32 = arith.constant 0 : i32
    %c0_i32_0 = arith.constant 0 : i32
    %c0_i32_1 = arith.constant 0 : i32
    return %c0_i32, %c0_i32_0 : i32, i32
  }
  func.func @transform_7(%arg0: i32, %arg1: i32) -> (i32, i32) {
    %c0_i32 = arith.constant 0 : i32
    %c0_i32_0 = arith.constant 0 : i32
    %c0_i32_1 = arith.constant 0 : i32
    return %c0_i32, %c0_i32_0 : i32, i32
  }
  func.func @transform_8(%arg0: i32, %arg1: i32) -> (i32, i32) {
    %c0_i32 = arith.constant 0 : i32
    %c0_i32_0 = arith.constant 0 : i32
    %c0_i32_1 = arith.constant 0 : i32
    return %c0_i32, %c0_i32_0 : i32, i32
  }
  func.func @transform_9(%arg0: i32, %arg1: i32) -> (i32, i32) {
    %c0_i32 = arith.constant 0 : i32
    %c0_i32_0 = arith.constant 0 : i32
    %c0_i32_1 = arith.constant 0 : i32
    return %c0_i32, %c0_i32_0 : i32, i32
  }
  func.func @transform_10(%arg0: i32, %arg1: i32) -> (i32, i32) {
    %c0_i32 = arith.constant 0 : i32
    %c0_i32_0 = arith.constant 0 : i32
    %c0_i32_1 = arith.constant 0 : i32
    return %c0_i32, %c0_i32_0 : i32, i32
  }
  func.func @transform_11(%arg0: i32, %arg1: i32) -> (i32, i32) {
    %c0_i32 = arith.constant 0 : i32
    %c0_i32_0 = arith.constant 0 : i32
    %c0_i32_1 = arith.constant 0 : i32
    return %c0_i32, %c0_i32_0 : i32, i32
  }
  func.func @transform_12(%arg0: i32, %arg1: i32) -> (i32, i32) {
    %c0_i32 = arith.constant 0 : i32
    return %arg0, %arg1 : i32, i32
  }
}

</mosaic_0001>

<bundles_post_ra>
// kernel: tpu_custom_call.1
= control target key start
LH: loop header
LB: loop body
LE: loop exit
PB: predicated region body
PF: predicated region fallthrough
CT: control target
= control target key end

     0   :  { %s11525_s0 = inlined_call_operand.vmem [shape: f32[2,392], index: 0, kind: input, shape index: {}]   ;;  %s11526_s1 = inlined_call_operand.vmem [shape: f32[2,392], index: 1, kind: input, shape index: {}]   ;;  %s11527_s2 = inlined_call_operand.vmem [shape: f32[3,64], index: 2, kind: input, shape index: {}]   ;;  %s11528_s3 = inlined_call_operand.vmem [shape: f32[1,64], index: 3, kind: input, shape index: {}]   ;;  %s11529_s4 = inlined_call_operand.vmem [shape: f32[192,128], index: 4, kind: input, shape index: {}]   ;;  %s11530_s5 = inlined_call_operand.vmem [shape: f32[1,128], index: 5, kind: input, shape index: {}]   ;;  %s11531_s6 = inlined_call_operand.vmem [shape: f32[256,128], index: 6, kind: input, shape index: {}]   ;;  %s11532_s7 = inlined_call_operand.vmem [shape: f32[1,128], index: 7, kind: input, shape index: {}]   ;;  %s11533_s8 = inlined_call_operand.vmem [shape: f32[384,64], index: 8, kind: input, shape index: {}]   ;;  %s11534_s9 = inlined_call_operand.vmem [shape: f32[1,64], index: 9, kind: input, shape index: {}]   ;;  %s11535_s10 = inlined_call_operand.vmem [shape: f32[64,3], index: 10, kind: input, shape index: {}]   ;;  %s11536_s11 = inlined_call_operand.<no memory space> [shape: f32[1,1], index: 11, kind: input, shape index: {}]   ;;  %s11537_s12 = inlined_call_operand.hbm [shape: f32[2,384], index: 12, kind: output, shape index: {}]  }
   0x1   :  { %11728 = sst [smem:[#allocation89_spill]] %s11525_s0  ;;  %v17_v0 = vstv %s11536_s11 }
   0x2   :  { %11729 = sst [smem:[#allocation90_spill]] %s11526_s1  ;;  %18 = vst [vmem:[#allocation2] sm:$0x1] %v17_v0 }
   0x3   :  { %19 = vsyncpa [#allocation4], 0 }
   0x4   :  { %21 = vsyncpa [#allocation4 + $0x1], 0  ;;  %s7477_s23 = smov 0   ;;  %s7479_s24 = smov 0  }
   0x5   :  { %s7481_s25 = smov 0   ;;  %s7483_s26 = smov 0  }
   0x6   :  { %s7485_s27 = smov 0   ;;  %s7487_s28 = smov 0  }
   0x7 LB: > { %s6149_s11 = sadd.s32 4294967295, %s7393_s28   ;;  %s6150_s29 = sadd.s32 4294967294, %s7393_s28   ;;  %s7393_s28 = sphi %s7487_s28, %s27_s28   ;;  %s7389_s27 = sphi %s7485_s27, %s12197_s27   ;;  %s7385_s26 = sphi %s7483_s26, %s12196_s26   ;;  %s7381_s25 = sphi %s7481_s25, %s12195_s25   ;;  %s7377_s24 = sphi %s7479_s24, %s12194_s24   ;;  %s7373_s23 = sphi %s7477_s23, %s12193_s23  }
   0x8   : > { %s36_s30 = sadd.s32 1, %s7389_s27  ;;  %s310_s13 = sadd.s32 1, %s7381_s25 }
   0x9   : > { %p37_p0 = scmp.ge.s32.totalorder %s36_s30, 3  ;;  %p320_p1 = scmp.ne.s32.totalorder %s7381_s25, %s7377_s24 }
   0xa   : > { %p321_p2 = scmp.eq.s32.totalorder %s6149_s11, 2  ;;  %p326_p3 = scmp.ne.s32.totalorder %s7377_s24, %s7373_s23 }
   0xb   : > { %s12199_s30 = smov (%p37_p0, %s36_s30), 0  ;;  %p327_p5 = scmp.eq.s32.totalorder %s6150_s29, 2 }
   0xc   : > { %p7517_p4 = por %p321_p2, %p320_p1  ;;  %s306_s15 = ssub.s32 %s7389_s27, %s12199_s30 }
   0xd   : > { %p6154_p6 = scmp.ge.s32.totalorder %s7393_s28, 1  ;;  %p308_p7 = scmp.eq.s32.totalorder %s306_s15, 0 }
   0xe   : > { %p7524_p8 = por %p327_p5, %p326_p3  ;;  %p391_p9 = scmp.lt.s32.totalorder %s7393_s28, 4 }
   0xf   : > { %s7530_s17 = scalar_select %p308_p7, %s7381_s25, %s310_s13  }
  0x10   : > { %p392_p10 = pnand %p6154_p6, %p391_p9 }
  0x12   : > { %395 = sbr.rel (%p392_p10) target bundleno = 2804 (0xaf4), region = 68 }
  0x19   : > { %s6156_s18 = sshll.u32 %s7385_s26, 7  ;;  %v449_v1 = vlaneseq  ;;  %v7395_v2 = vmov 1983009808   ;;  %s11732_s0 = sld [smem:[#allocation89_spill]]  ;;  %vm602_vm0 = vcmask 1041408   ;;  %vm605_vm1 = vcmask 1043456  }
  0x1a   : > { %s571_s19 = sshra.s32 %s6156_s18, 7  ;;  %v593_v3 = vunpack.c.l.s4 %v7395_v2  ;;  %s11733_s1 = sld [smem:[#allocation90_spill]]  ;;  %v11538_v16 = vmov 0   ;;  %vm692_vm2 = vcmask 1040384   ;;  %vm924_vm3 = vcmask 1046528  }
  0x1b   : > { %v7535_v4 = vshrl.u32 %v449_v1, 7  ;;  %s6175_s20 = sshll.u32 %s571_s19, 1  ;;  %s11700_s19 = smov 127   ;;  %vm2872_vm10 = vcmask 523264  }
  0x1c   : > { %v594_v5 = vunpack.c.0.s8 %v593_v3  ;;  %s6157_s22 = sadd.s32 4294967292, %s6156_s18  ;;  %s11698_s21 = smov 126  }
  0x1d   : > { %s7407_s13 = smov 124  }
  0x1e   : > { %v597_v7 = vsub.s32 %v594_v5, %v7535_v4 }
  0x1f   : > { %s574_s11 = scalar_lea.vmem %s11732_s0, %s6175_s20  ;;  %s12052_s0 = smov 64  }
  0x20   : > { %s577_s15 = scalar_lea.vmem %s11733_s1, %s6175_s20  ;;  %v6177_v8 = vld.sshfl [vmem:[%s574_s11] sm:$0x33 pattern:$0x76325410]  ;;  %s11703_s20 = smov 64  }
  0x21   : > { %v7302_v6 = vld [vmem:[%s577_s15] ss:$0 sps:$4 sm:$0xff]   ;;  %v587_v10 = vcombine.high %v6177_v8, %v6177_v8  ;;  %s435_s15 = sand.u32 1, %s7377_s24  }
  0x22   : > { %v598_v9 = vrot.slane %v7302_v6, %v597_v7  ;;  %s6155_s18 = sshll.u32 %s435_s15, 1 }
  0x23   : > { %s437_s11 = scalar_lea.vmem [#allocation3], %s6155_s18 }
  0x24   : > { %v603_v11 = vsel %vm602_vm0, %v6177_v8, %v598_v9  ;;  %v599_v12 = vcombine.high %v598_v9, %v598_v9  ;;  %s6058_s29 = sshll.u32 %s437_s11, 4  ;;  %s11480_s29 = int_to_ptr.vmem [resolvable:$true] %s6058_s29 }
  0x25   : > { %v606_v13 = vsel %vm605_vm1, %v603_v11, 0.0 }
  0x26   : > { %608 = vxpose.xlu0.b32.start.end [1/1] (short) %v606_v13, 128  ;;  %v604_v14 = vsel %vm602_vm0, %v587_v10, %v599_v12 }
  0x27   : > { %v607_v15 = vsel %vm605_vm1, %v604_v14, 0.0 }
  0x28   : > { %640 = vxpose.xlu1.b32.start.end [1/1] (short) (narrow) %v607_v15, 8 }
  0x46   : > { %7113 = vset.pattern.permute.xlu1 %v11538_v16 }
  0x4f   : > { %7112 = vset.pattern.permute.xlu0 %v11538_v16  ;;  %v7816_v16 = vstv %s6157_s22  ;;  %s7404_s22 = smov 125  }
  0xa6   : > { %v7546_v17 = vpop.trf.xlu0 }
  0xa7   : > { %11734 = vst [vmem:[#allocation6_spill] sm:$0xff] %v7546_v17  ;;  %819 = vperm.xlu1 %7113, %v7546_v17   ;;  %v7550_v18 = vrot.slane %v7546_v17, 7  ;;  %v925_v23 = vrot.slane %v7546_v17, 1 }
  0xa9   : > { %11735 = vst [vmem:[#allocation7_spill] sm:$0xff] %v7550_v18  ;;  %v727_v19 = vsel %vm692_vm2, 0.0, %v7550_v18 }
  0xaa   : > { %730 = vperm.xlu0 %7112, %v727_v19   ;;  %v7554_v20 = vpop.trf.xlu0 }
  0xab   : > { %11736 = vst [vmem:[#allocation8_spill] sm:$0xff] %v7554_v20  ;;  %1108 = vrot.lane.b32.xlu1 %v7550_v18, %s11700_s19  ;;  %v926_v22 = vrot.slane %v7554_v20, 1  ;;  %v694_v26 = vrot.slane %v7554_v20, 7 }
  0xad   : > { %v7566_v25 = vsel %vm924_vm3, %v925_v23, %v926_v22  ;;  %v7574_v28 = vsel %vm692_vm2, %v7550_v18, %v694_v26 }
  0xae   : > { %v7558_v21 = vpop.trf.xlu0  ;;  %11739 = vst [vmem:[#allocation11_spill] sm:$0xff] %v7566_v25  ;;  %11741 = vst [vmem:[#allocation13_spill] sm:$0xff] %v7574_v28 }
  0xaf   : > { %11737 = vst [vmem:[#allocation9_spill] sm:$0xff] %v7558_v21  ;;  %823 = vperm.xlu1 %7113, %v7554_v20   ;;  %v928_v31 = vrot.slane %v7558_v21, 1  ;;  %v696_v37 = vrot.slane %v7558_v21, 7 }
  0xb1   : > { %v7594_v36 = vsel %vm924_vm3, %v926_v22, %v928_v31  ;;  %v7601_v39 = vsel %vm692_vm2, %v694_v26, %v696_v37 }
  0xb2   : > { %v7563_v24 = vpop.trf.xlu0  ;;  %11745 = vst [vmem:[#allocation17_spill] sm:$0xff] %v7594_v36  ;;  %11746 = vst [vmem:[#allocation18_spill] sm:$0xff] %v7601_v39 }
  0xb3   : > { %11738 = vst [vmem:[#allocation10_spill] sm:$0xff] %v7563_v24  ;;  %961 = vperm.xlu1 %7113, %v7566_v25   ;;  %v930_v43 = vrot.slane %v7563_v24, 1  ;;  %v698_v44 = vrot.slane %v7563_v24, 7 }
  0xb5   : > { %v7620_v47 = vsel %vm924_vm3, %v928_v31, %v930_v43  ;;  %v7628_v49 = vsel %vm692_vm2, %v696_v37, %v698_v44 }
  0xb6   : > { %v7570_v27 = vpop.trf.xlu0  ;;  %11749 = vst [vmem:[#allocation21_spill] sm:$0xff] %v7620_v47  ;;  %11751 = vst [vmem:[#allocation23_spill] sm:$0xff] %v7628_v49 }
  0xb7   : > { %11740 = vst [vmem:[#allocation12_spill] sm:$0xff] %v7570_v27  ;;  %734 = vperm.xlu1 %7113, %v7574_v28   ;;  %v700_v42 = vrot.slane %v7570_v27, 7  ;;  %v932_v51 = vrot.slane %v7570_v27, 1 }
  0xb9   : > { %v7614_v45 = vsel %vm692_vm2, %v698_v44, %v700_v42  ;;  %v7643_v54 = vsel %vm924_vm3, %v930_v43, %v932_v51  ;;  %v7762_v44 = vpop.trf.xlu1 }
  0xba   : > { %v7577_v29 = vpop.trf.xlu0  ;;  %11748 = vst [vmem:[#allocation20_spill] sm:$0xff] %v7614_v45  ;;  %11754 = vst [vmem:[#allocation26_spill] sm:$0xff] %v7643_v54 }
  0xbb   : > { %11742 = vst [vmem:[#allocation14_spill] sm:$0xff] %v7577_v29  ;;  %1110 = vrot.lane.b32.xlu1 %v7574_v28, %s11700_s19  ;;  %v702_v32 = vrot.slane %v7577_v29, 7  ;;  %v934_v57 = vrot.slane %v7577_v29, 1  ;;  %11777 = vst [vmem:[#allocation49_spill] sm:$0xff] %v7762_v44 }
  0xbd   : > { %v7637_v52 = vsel %vm692_vm2, %v700_v42, %v702_v32  ;;  %v7657_v59 = vsel %vm924_vm3, %v932_v51, %v934_v57 }
  0xbe   : > { %v7581_v30 = vpop.trf.xlu0  ;;  %11753 = vst [vmem:[#allocation25_spill] sm:$0xff] %v7637_v52  ;;  %11757 = vst [vmem:[#allocation29_spill] sm:$0xff] %v7657_v59 }
  0xbf   : > { %11743 = vst [vmem:[#allocation15_spill] sm:$0xff] %v7581_v30  ;;  %827 = vperm.xlu1 %7113, %v7558_v21   ;;  %v704_v33 = vrot.slane %v7581_v30, 7  ;;  %v936_v40 = vrot.slane %v7581_v30, 1 }
  0xc1   : > { %v7588_v34 = vsel %vm692_vm2, %v702_v32, %v704_v33  ;;  %v7678_v0 = vsel %vm924_vm3, %v934_v57, %v936_v40 }
  0xc2   : > { %754 = vperm.xlu0 %7112, %v7588_v34   ;;  %v7591_v35 = vpop.trf.xlu0  ;;  %11760 = vst [vmem:[#allocation32_spill] sm:$0xff] %v7678_v0 }
  0xc3   : > { %11744 = vst [vmem:[#allocation16_spill] sm:$0xff] %v7591_v35  ;;  %965 = vperm.xlu1 %7113, %v7594_v36   ;;  %v938_v38 = vrot.slane %v7591_v35, 1  ;;  %v706_v46 = vrot.slane %v7591_v35, 7 }
  0xc5   : > { %v7606_v41 = vsel %vm924_vm3, %v936_v40, %v938_v38  ;;  %v7624_v48 = vsel %vm692_vm2, %v704_v33, %v706_v46 }
  0xc6   : > { %843 = vperm.xlu0 %7112, %v7581_v30   ;;  %11747 = vst [vmem:[#allocation19_spill] sm:$0xff] %v7606_v41  ;;  %11750 = vst [vmem:[#allocation22_spill] sm:$0xff] %v7624_v48  ;;  %v7631_v50 = vpop.trf.xlu0 }
  0xc7   : > { %738 = vperm.xlu1 %7113, %v7601_v39   ;;  %11752 = vst [vmem:[#allocation24_spill] sm:$0xff] %v7631_v50  ;;  %v708_v53 = vrot.slane %v7631_v50, 7  ;;  %v940_v60 = vrot.slane %v7631_v50, 1 }
  0xc9   : > { %v7647_v55 = vsel %vm692_vm2, %v706_v46, %v708_v53  ;;  %v7689_v2 = vsel %vm924_vm3, %v938_v38, %v940_v60 }
  0xca   : > { %985 = vperm.xlu0 %7112, %v7606_v41   ;;  %11755 = vst [vmem:[#allocation27_spill] sm:$0xff] %v7647_v55  ;;  %v7649_v56 = vpop.trf.xlu0  ;;  %11762 = vst [vmem:[#allocation34_spill] sm:$0xff] %v7689_v2 }
  0xcb   : > { %831 = vperm.xlu1 %7113, %v7563_v24   ;;  %11756 = vst [vmem:[#allocation28_spill] sm:$0xff] %v7649_v56  ;;  %v942_v58 = vrot.slane %v7649_v56, 1  ;;  %v710_v62 = vrot.slane %v7649_v56, 7 }
  0xcd   : > { %v7662_v61 = vsel %vm924_vm3, %v940_v60, %v942_v58  ;;  %v7672_v63 = vsel %vm692_vm2, %v708_v53, %v710_v62 }
  0xce   : > { %1116 = vrot.lane.b32.xlu0 %v7614_v45, %s11700_s19  ;;  %11758 = vst [vmem:[#allocation30_spill] sm:$0xff] %v7662_v61  ;;  %11759 = vst [vmem:[#allocation31_spill] sm:$0xff] %v7672_v63  ;;  %v7683_v1 = vpop.trf.xlu0 }
  0xcf   : > { %969 = vperm.xlu1 %7113, %v7620_v47   ;;  %11761 = vst [vmem:[#allocation33_spill] sm:$0xff] %v7683_v1  ;;  %v944_v3 = vrot.slane %v7683_v1, 1  ;;  %v712_v6 = vrot.slane %v7683_v1, 7 }
  0xd1   : > { %v7696_v5 = vsel %vm924_vm3, %v942_v58, %v944_v3  ;;  %v7704_v8 = vsel %vm692_vm2, %v710_v62, %v712_v6 }
  0xd2   : > { %758 = vperm.xlu0 %7112, %v7624_v48   ;;  %11763 = vst [vmem:[#allocation35_spill] sm:$0xff] %v7696_v5  ;;  %v7699_v7 = vpop.trf.xlu0  ;;  %11765 = vst [vmem:[#allocation37_spill] sm:$0xff] %v7704_v8 }
  0xd3   : > { %742 = vperm.xlu1 %7113, %v7628_v49   ;;  %11764 = vst [vmem:[#allocation36_spill] sm:$0xff] %v7699_v7  ;;  %v946_v9 = vrot.slane %v7699_v7, 1  ;;  %v714_v11 = vrot.slane %v7699_v7, 7 }
  0xd5   : > { %v7711_v10 = vsel %vm924_vm3, %v944_v3, %v946_v9  ;;  %v7719_v13 = vsel %vm692_vm2, %v712_v6, %v714_v11  ;;  %v956_v3 = vrot.slane %v7762_v44, 1 }
  0xd6   : > { %847 = vperm.xlu0 %7112, %v7591_v35   ;;  %11766 = vst [vmem:[#allocation38_spill] sm:$0xff] %v7711_v10  ;;  %v7714_v12 = vpop.trf.xlu0  ;;  %11768 = vst [vmem:[#allocation40_spill] sm:$0xff] %v7719_v13 }
  0xd7   : > { %835 = vperm.xlu1 %7113, %v7570_v27   ;;  %11767 = vst [vmem:[#allocation39_spill] sm:$0xff] %v7714_v12  ;;  %v948_v14 = vrot.slane %v7714_v12, 1  ;;  %v716_v19 = vrot.slane %v7714_v12, 7 }
  0xd9   : > { %v7726_v15 = vsel %vm924_vm3, %v946_v9, %v948_v14  ;;  %v7734_v23 = vsel %vm692_vm2, %v714_v11, %v716_v19  ;;  %v724_v11 = vrot.slane %v7762_v44, 7 }
  0xda   : > { %1118 = vrot.lane.b32.xlu0 %v7637_v52, %s11700_s19  ;;  %11769 = vst [vmem:[#allocation41_spill] sm:$0xff] %v7726_v15  ;;  %v7729_v22 = vpop.trf.xlu0  ;;  %11771 = vst [vmem:[#allocation43_spill] sm:$0xff] %v7734_v23 }
  0xdb   : > { %973 = vperm.xlu1 %7113, %v7643_v54   ;;  %11770 = vst [vmem:[#allocation42_spill] sm:$0xff] %v7729_v22  ;;  %v950_v26 = vrot.slane %v7729_v22, 1  ;;  %v718_v32 = vrot.slane %v7729_v22, 7 }
  0xdd   : > { %v7741_v31 = vsel %vm924_vm3, %v948_v14, %v950_v26  ;;  %v7749_v37 = vsel %vm692_vm2, %v716_v19, %v718_v32 }
  0xde   : > { %762 = vperm.xlu0 %7112, %v7647_v55   ;;  %11772 = vst [vmem:[#allocation44_spill] sm:$0xff] %v7741_v31  ;;  %v7744_v33 = vpop.trf.xlu0  ;;  %11774 = vst [vmem:[#allocation46_spill] sm:$0xff] %v7749_v37 }
  0xdf   : > { %746 = vperm.xlu1 %7113, %v7614_v45   ;;  %11773 = vst [vmem:[#allocation45_spill] sm:$0xff] %v7744_v33  ;;  %v952_v38 = vrot.slane %v7744_v33, 1  ;;  %v720_v42 = vrot.slane %v7744_v33, 7 }
  0xe1   : > { %v7756_v40 = vsel %vm924_vm3, %v950_v26, %v952_v38  ;;  %v7766_v46 = vsel %vm692_vm2, %v718_v32, %v720_v42  ;;  %v7796_v26 = vld [vmem:[%s11527_s2] ss:$0 sm:$0xff] }
  0xe2   : > { %851 = vperm.xlu0 %7112, %v7631_v50   ;;  %11775 = vst [vmem:[#allocation47_spill] sm:$0xff] %v7756_v40  ;;  %v7759_v43 = vpop.trf.xlu0  ;;  %11778 = vst [vmem:[#allocation50_spill] sm:$0xff] %v7766_v46 }
  0xe3   : > { %977 = vperm.xlu1 %7113, %v7657_v59   ;;  %11776 = vst [vmem:[#allocation48_spill] sm:$0xff] %v7759_v43  ;;  %v954_v51 = vrot.slane %v7759_v43, 1  ;;  %v722_v58 = vrot.slane %v7759_v43, 7 }
  0xe5   : > { %v7773_v57 = vsel %vm924_vm3, %v952_v38, %v954_v51  ;;  %v7779_v62 = vsel %vm692_vm2, %v720_v42, %v722_v58  ;;  %v7786_v9 = vsel %vm924_vm3, %v954_v51, %v956_v3  ;;  %v7791_v19 = vsel %vm692_vm2, %v722_v58, %v724_v11  ;;  %v7807_v42 = vld [vmem:[%s11527_s2 + $0x1] ss:$0 sm:$0xff]  ;;  %v7812_v51 = vld [vmem:[%s11527_s2 + $0x2] ss:$0 sm:$0xff] }
  0xe6   : > { %993 = vperm.xlu0 %7112, %v7662_v61   ;;  %11779 = vst [vmem:[#allocation51_spill] sm:$0xff] %v7773_v57  ;;  %11780 = vst [vmem:[#allocation52_spill] sm:$0xff] %v7779_v62  ;;  %v7800_v38 = vsel %vm924_vm3, %v956_v3, 0.0 }
  0xe7   : > { %1112 = vrot.lane.b32.xlu1 %v7601_v39, %s11700_s19  ;;  %11781 = vst [vmem:[#allocation53_spill] sm:$0xff] %v7786_v9  ;;  %11782 = vst [vmem:[#allocation54_spill] sm:$0xff] %v7791_v19 }
  0xe8   : > { %11783 = vst [vmem:[#allocation55_spill] sm:$0xff] %v7800_v38 }
  0xea   : > { %1120 = vrot.lane.b32.xlu0 %v7588_v34, %s11700_s19 }
  0xeb   : > { %750 = vperm.xlu1 %7113, %v7637_v52  }
  0xee   : > { %766 = vperm.xlu0 %7112, %v7672_v63  }
  0xef   : > { %839 = vperm.xlu1 %7113, %v7577_v29  }
  0xf2   : > { %855 = vperm.xlu0 %7112, %v7649_v56  }
  0xf3   : > { %981 = vperm.xlu1 %7113, %v7678_v0  }
  0xf6   : > { %1122 = vrot.lane.b32.xlu0 %v7624_v48, %s11700_s19 }
  0xf7   : > { %1114 = vrot.lane.b32.xlu1 %v7628_v49, %s11700_s19 }
  0xfa   : > { %859 = vperm.xlu0 %7112, %v7683_v1  }
  0xfb   : > { %989 = vperm.xlu1 %7113, %v7689_v2  }
  0xfe   : > { %1124 = vrot.lane.b32.xlu0 %v7647_v55, %s11700_s19 }
  0xff   : > { %997 = vperm.xlu1 %7113, %v7696_v5  }
 0x102   : > { %863 = vperm.xlu0 %7112, %v7699_v7  }
 0x103   : > { %770 = vperm.xlu1 %7113, %v7704_v8  }
 0x106   : > { %1126 = vrot.lane.b32.xlu0 %v7672_v63, %s11700_s19 }
 0x107   : > { %1001 = vperm.xlu1 %7113, %v7711_v10  }
 0x10a   : > { %867 = vperm.xlu0 %7112, %v7714_v12   ;;  %v2953_v12 = vld [vmem:[%s11529_s4 + $0x60] sm:$0xff] }
 0x10b   : > { %774 = vperm.xlu1 %7113, %v7719_v13  }
 0x10e   : > { %1128 = vrot.lane.b32.xlu0 %v7704_v8, %s11700_s19 }
 0x10f   : > { %1005 = vperm.xlu1 %7113, %v7726_v15  }
 0x112   : > { %871 = vperm.xlu0 %7112, %v7729_v22  }
 0x113   : > { %778 = vperm.xlu1 %7113, %v7734_v23  }
 0x116   : > { %1130 = vrot.lane.b32.xlu0 %v7719_v13, %s11700_s19 }
 0x117   : > { %1009 = vperm.xlu1 %7113, %v7741_v31  }
 0x11a   : > { %875 = vperm.xlu0 %7112, %v7744_v33  }
 0x11b   : > { %782 = vperm.xlu1 %7113, %v7749_v37  }
 0x11e   : > { %1132 = vrot.lane.b32.xlu0 %v7734_v23, %s11700_s19 }
 0x11f   : > { %1013 = vperm.xlu1 %7113, %v7756_v40  }
 0x122   : > { %879 = vperm.xlu0 %7112, %v7759_v43   ;;  %v469_v43 = vadd.s32 %v7816_v16, %v7535_v4 }
 0x123   : > { %786 = vperm.xlu1 %7113, %v7766_v46  }
 0x124   : > { %vm486_vm4 = vcmp.ge.s32.totalorder %v469_v43, 0  ;;  %vm503_vm5 = vcmp.lt.s32.totalorder %v469_v43, 300  ;;  %v2942_v43 = vld [vmem:[%s11529_s4 + $0x8] sm:$0xff] }
 0x125   : > { %vm520_vm6 = vmand %vm486_vm4, %vm503_vm5 }
 0x126   : > { %1134 = vrot.lane.b32.xlu0 %v7749_v37, %s11700_s19  ;;  %v820_v53 = vpop.permute.xlu1 %819  ;;  %v451_v37 = vadd.s32 8, %v7535_v4 }
 0x127   : > { %1017 = vperm.xlu1 %7113, %v7773_v57   ;;  %v890_v3 = vmul.f32 %v7807_v42, %v820_v53 }
 0x129   : > { %v731_v32 = vpop.permute.xlu0 %730 }
 0x12a   : > { %883 = vperm.xlu0 %7112, %v7762_v44   ;;  %v1109_v60 = vpop.permute.xlu1 %1108  ;;  %v801_v58 = vmul.f32 %v7796_v26, %v731_v32 }
 0x12b   : > { %790 = vperm.xlu1 %7113, %v7779_v62   ;;  %v1143_v57 = vsel %vm692_vm2, 0.0, %v1109_v60 }
 0x12e   : > { %1136 = vrot.lane.b32.xlu0 %v7766_v46, %s11700_s19  ;;  %v824_v6 = vpop.permute.xlu1 %823 }
 0x12f   : > { %1021 = vperm.xlu1 %7113, %v7786_v9   ;;  %v907_v9 = vadd.f32 %v890_v3, %v801_v58 }
 0x132   : > { %v962_v14 = vpop.permute.xlu1 %961 }
 0x133   : > { %794 = vperm.xlu1 %7113, %v7791_v19   ;;  %v1033_v46 = vmul.f32 %v7812_v51, %v962_v14  ;;  %v470_v14 = vadd.s32 %v7816_v16, %v451_v37  ;;  %v2941_v37 = vld [vmem:[%s11529_s4] sm:$0xff] }
 0x135   : > { %v1050_v32 = vadd.f32 %v1033_v46, %v907_v9  ;;  %v11554_v46 = vmov 1   ;;  %vm487_vm7 = vcmp.ge.s32.totalorder %v470_v14, 0  ;;  %vm504_vm8 = vcmp.lt.s32.totalorder %v470_v14, 300 }
 0x136   : > { %v735_v11 = vpop.permute.xlu1 %734  ;;  %vm521_vm9 = vmand %vm487_vm7, %vm504_vm8 }
 0x137   : > { %1026 = vperm.xlu1 %7113, %v7800_v38   ;;  %v7827_v38 = vld [vmem:[%s11528_s3] ss:$0 sm:$0xff]  ;;  %v802_v60 = vmul.f32 %v7796_v26, %v735_v11  ;;  %v6807_v11 = vpack.c.bf16 %v2942_v43, %v2941_v37  ;;  %v452_v37 = vadd.s32 16, %v7535_v4 }
 0x13a   : > { %v1111_v44 = vpop.permute.xlu1 %1110 }
 0x13b   : > { %1146 = vperm.xlu1 %7113, %v1143_v57   ;;  %1150 = vperm.xlu0 %7112, %v1111_v44   ;;  %v1074_v44 = vadd.f32 %v7827_v38, %v1050_v32  ;;  %v891_v57 = vmul.f32 %v7807_v42, %v824_v6 }
 0x13d   : > { %v908_v3 = vadd.f32 %v891_v57, %v802_v60  ;;  %v1091_v6 = vmax.f32 %v1074_v44, 0.0  ;;  %v2943_v60 = vld [vmem:[%s11529_s4 + $0x10] sm:$0xff]  ;;  %v2944_v44 = vld [vmem:[%s11529_s4 + $0x18] sm:$0xff] }
 0x13e   : > { %v828_v53 = vpop.permute.xlu1 %827  ;;  %v6810_v43 = vpack.c.bf16 %v2944_v44, %v2943_v60  ;;  %v471_v44 = vadd.s32 %v7816_v16, %v452_v37 }
 0x13f   : > { %1138 = vrot.lane.b32.xlu1 %v7779_v62, %s11700_s19  ;;  %1468 = vrot.lane.b32.xlu0 %v7550_v18, %s11698_s21  ;;  %v11564_v18 = vmov 0.0  }
 0x140   : > { %7114 = vset.pattern.permute.xlu1 %v11554_v46  ;;  %v11572_v46 = vmov 0.0|0.0   ;;  %v7852_v62 = vsel %vm520_vm6, 1.0, %v11564_v18  ;;  %vm488_vm11 = vcmp.ge.s32.totalorder %v471_v44, 0  ;;  %vm505_vm12 = vcmp.lt.s32.totalorder %v471_v44, 300 }
 0x141   : > { %v7838_v9 = vpop.permute.xlu0 %754  ;;  %6806 = vmatprep.subr.bf16.mxu0 %v11572_v46  ;;  %11784 = vst [vmem:[#allocation56_spill] sm:$0xff] %v7852_v62  ;;  %vm522_vm13 = vmand %vm488_vm11, %vm505_vm12 }
 0x142   : > { %v966_v58 = vpop.permute.xlu1 %965  ;;  %6808 = vmatpush1.bf16.msra.mxu0 %v6807_v11  ;;  %v7867_v11 = vmul.f32 %v7852_v62, %v1091_v6  ;;  %v11786_v62 = vmov 0  }
 0x143   : > { %v1034_v32 = vmul.f32 %v7812_v51, %v966_v58  ;;  %1333 = vperm.xlu1 %7114, %v7566_v25   ;;  %1470 = vrot.lane.b32.xlu0 %v7574_v28, %s11698_s21  ;;  %v2945_v25 = vld [vmem:[%s11529_s4 + $0x20] sm:$0xff] }
 0x144   : > { %6809 = vmatprep.subr.bf16.mxu0 %v11572_v46 }
 0x145   : > { %v1051_v23 = vadd.f32 %v1034_v32, %v908_v3  ;;  %v7854_v14 = vpop.permute.xlu0 %843  ;;  %v7870_v3 = vsel %vm521_vm9, 1.0, %v11564_v18 }
 0x146   : > { %v739_v57 = vpop.permute.xlu1 %738  ;;  %11785 = vst [vmem:[#allocation57_spill] sm:$0xff] %v7870_v3  ;;  %6811 = vmatpush1.bf16.msra.mxu0 %v6810_v43  ;;  %v2528_v43 = vrot.slane %v7867_v11, 1 }
 0x147   : > { %v1075_v58 = vadd.f32 %v7827_v38, %v1051_v23  ;;  %1235 = vperm.xlu1 %7114, %v7554_v20   ;;  %v2946_v23 = vld [vmem:[%s11529_s4 + $0x28] sm:$0xff]  ;;  %6812 = vmatprep.subr.bf16.mxu0 %v11572_v46  ;;  %v892_v20 = vmul.f32 %v7807_v42, %v828_v53  ;;  %v11787_v53 = vmov 0.0|0.0  }
 0x148   : > { %v6813_v6 = vpack.c.bf16 %v2946_v23, %v2945_v25  ;;  %v2947_v25 = vld [vmem:[%s11529_s4 + $0x30] sm:$0xff] }
 0x149   : > { %v1092_v32 = vmax.f32 %v1075_v58, 0.0  ;;  %v7872_v28 = vpop.permute.xlu0 %985  ;;  %v803_v58 = vmul.f32 %v7796_v26, %v739_v57  ;;  %v2948_v57 = vld [vmem:[%s11529_s4 + $0x38] sm:$0xff] }
 0x14a   : > { %v832_v60 = vpop.permute.xlu1 %831  ;;  %6814 = vmatpush1.bf16.msra.mxu0 %v6813_v6 }
 0x14b   : > { %v7883_v18 = vmul.f32 %v7870_v3, %v1092_v32  ;;  %1140 = vrot.lane.b32.xlu1 %v7791_v19, %s11700_s19  ;;  %v11586_v32 = vrot.slane %v7867_v11, 7  ;;  %6815 = vmatprep.subr.bf16.mxu0 %v11787_v53  ;;  %v6816_v3 = vpack.c.bf16 %v2948_v57, %v2947_v25  ;;  %v909_v19 = vadd.f32 %v892_v20, %v803_v58  ;;  %v2949_v20 = vld [vmem:[%s11529_s4 + $0x40] sm:$0xff] }
 0x14c   : > { %7115 = vset.pattern.permute.xlu1 %v11786_v62  ;;  %v453_v58 = vadd.s32 24, %v7535_v4 }
 0x14d   : > { %v7891_v40 = vpop.permute.xlu0 %1116  ;;  %v2529_v37 = vrot.slane %v7883_v18, 1  ;;  %v2325_v23 = vrot.slane %v7883_v18, 7 }
 0x14e   : > { %v970_v46 = vpop.permute.xlu1 %969  ;;  %6817 = vmatpush1.bf16.msra.mxu0 %v6816_v3 }
 0x14f   : > { %v1035_v6 = vmul.f32 %v7812_v51, %v970_v46  ;;  %v2530_v33 = vsel %vm924_vm3, %v2528_v43, %v2529_v37  ;;  %v7908_v22 = vsel %vm692_vm2, %v11586_v32, %v2325_v23  ;;  %v2950_v46 = vld [vmem:[%s11529_s4 + $0x48] sm:$0xff]  ;;  %6818 = vmatprep.subr.bf16.mxu0 %v11787_v53  ;;  %v2952_v32 = vld [vmem:[%s11529_s4 + $0x58] sm:$0xff] }
 0x150   : > { %11788 = vst [vmem:[#allocation58_spill] sm:$0xff] %v7908_v22  ;;  %6183 = vmatprep.mubr.msk.f32.mxu0 %vm2872_vm10, %v2530_v33  ;;  %v6819_v43 = vpack.c.bf16 %v2950_v46, %v2949_v20  ;;  %v472_v20 = vadd.s32 %v7816_v16, %v453_v58  ;;  %v2954_v58 = vld [vmem:[%s11529_s4 + $0x68] sm:$0xff] }
 0x151   : > { %v1052_v13 = vadd.f32 %v1035_v6, %v909_v19  ;;  %v7911_v8 = vpop.permute.xlu0 %758  ;;  %v11789_v19 = vmov 0.0   ;;  %v2951_v6 = vld [vmem:[%s11529_s4 + $0x50] sm:$0xff] }
 0x152   : > { %v743_v44 = vpop.permute.xlu1 %742  ;;  %v7923_v25 = vsel %vm522_vm13, 1.0, %v11789_v19  ;;  %6820 = vmatpush1.bf16.msra.mxu0 %v6819_v43  ;;  %v893_v43 = vmul.f32 %v7807_v42, %v832_v60  ;;  %vm489_vm14 = vcmp.ge.s32.totalorder %v472_v20, 0  ;;  %vm506_vm15 = vcmp.lt.s32.totalorder %v472_v20, 300  ;;  %v2955_v20 = vld [vmem:[%s11529_s4 + $0x70] sm:$0xff] }
 0x153   : > { %v1076_v33 = vadd.f32 %v7827_v38, %v1052_v13  ;;  %11790 = vst [vmem:[#allocation59_spill] sm:$0xff] %v7923_v25  ;;  %6821 = vmatprep.subr.bf16.mxu0 %v11787_v53  ;;  %v6822_v13 = vpack.c.bf16 %v2952_v32, %v2951_v6  ;;  %v454_v60 = vadd.s32 32, %v7535_v4  ;;  %vm523_vm0 = vmand %vm489_vm14, %vm506_vm15 }
 0x155   : > { %v1093_v3 = vmax.f32 %v1076_v33, 0.0  ;;  %v7925_v57 = vpop.permute.xlu0 %847  ;;  %v804_v33 = vmul.f32 %v7796_v26, %v743_v44  ;;  %v6825_v44 = vpack.c.bf16 %v2954_v58, %v2953_v12  ;;  %v2956_v12 = vld [vmem:[%s11529_s4 + $0x78] sm:$0xff] }
 0x156   : > { %v836_v22 = vpop.permute.xlu1 %835  ;;  %6823 = vmatpush1.bf16.msra.mxu0 %v6822_v13 }
 0x157   : > { %v7936_v46 = vmul.f32 %v7923_v25, %v1093_v3  ;;  %6824 = vmatprep.subr.bf16.mxu0 %v11787_v53  ;;  %v910_v6 = vadd.f32 %v893_v43, %v804_v33  ;;  %v6828_v33 = vpack.c.bf16 %v2956_v12, %v2955_v20  ;;  %v2958_v20 = vld [vmem:[%s11529_s4 + $0x88] sm:$0xff] }
 0x159   : > { %v1119_v31 = vpop.permute.xlu0 %1118  ;;  %v2531_v7 = vrot.slane %v7936_v46, 1  ;;  %v2327_v32 = vrot.slane %v7936_v46, 7 }
 0x15a   : > { %1166 = vperm.xlu0 %7112, %v1119_v31   ;;  %v974_v3 = vpop.permute.xlu1 %973  ;;  %6826 = vmatpush1.bf16.msra.mxu0 %v6825_v44  ;;  %v894_v44 = vmul.f32 %v7807_v42, %v836_v22 }
 0x15b   : > { %v1036_v13 = vmul.f32 %v7812_v51, %v974_v3  ;;  %v7952_v25 = vsel %vm924_vm3, %v2529_v37, %v2531_v7  ;;  %v7955_v15 = vsel %vm692_vm2, %v2325_v23, %v2327_v32  ;;  %v473_v23 = vadd.s32 %v7816_v16, %v454_v60  ;;  %6827 = vmatprep.subr.bf16.mxu0 %v11787_v53  ;;  %v2957_v60 = vld [vmem:[%s11529_s4 + $0x80] sm:$0xff] }
 0x15c   : > { %11791 = vst [vmem:[#allocation60_spill] sm:$0xff] %v7952_v25  ;;  %11792 = vst [vmem:[#allocation61_spill] sm:$0xff] %v7955_v15  ;;  %v7972_v3 = vsel %vm523_vm0, 1.0, %v11789_v19  ;;  %v6831_v22 = vpack.c.bf16 %v2958_v20, %v2957_v60  ;;  %v896_v60 = vmul.f32 %v7807_v42, %v7854_v14 }
 0x15d   : > { %v1053_v1 = vadd.f32 %v1036_v13, %v910_v6  ;;  %v7957_v31 = vpop.permute.xlu0 %762  ;;  %11793 = vst [vmem:[#allocation62_spill] sm:$0xff] %v7972_v3  ;;  %vm490_vm1 = vcmp.ge.s32.totalorder %v473_v23, 0  ;;  %vm507_vm4 = vcmp.lt.s32.totalorder %v473_v23, 300  ;;  %v2959_v23 = vld [vmem:[%s11529_s4 + $0x90] sm:$0xff] }
 0x15e   : > { %1474 = vrot.lane.b32.xlu0 %v7628_v49, %s11698_s21  ;;  %v747_v37 = vpop.permute.xlu1 %746  ;;  %6829 = vmatpush1.bf16.msra.mxu0 %v6828_v33  ;;  %vm7991_vm5 = vmand %vm490_vm1, %vm507_vm4 }
 0x15f   : > { %v1077_v43 = vadd.f32 %v7827_v38, %v1053_v1  ;;  %v805_v58 = vmul.f32 %v7796_v26, %v747_v37  ;;  %6830 = vmatprep.subr.bf16.mxu0 %v11787_v53 }
 0x161   : > { %v1094_v6 = vmax.f32 %v1077_v43, 0.0  ;;  %v7975_v13 = vpop.permute.xlu0 %851  ;;  %v911_v37 = vadd.f32 %v894_v44, %v805_v58  ;;  %v456_v43 = vadd.s32 48, %v7535_v4 }
 0x162   : > { %1476 = vrot.lane.b32.xlu0 %v7614_v45, %s11698_s21  ;;  %v978_v1 = vpop.permute.xlu1 %977  ;;  %6832 = vmatpush1.bf16.msra.mxu0 %v6831_v22 }
 0x163   : > { %v7987_v12 = vmul.f32 %v7972_v3, %v1094_v6  ;;  %v1037_v33 = vmul.f32 %v7812_v51, %v978_v1  ;;  %v2960_v6 = vld [vmem:[%s11529_s4 + $0x98] sm:$0xff]  ;;  %6833 = vmatprep.subr.bf16.mxu0 %v11787_v53  ;;  %v807_v3 = vmul.f32 %v7796_v26, %v7838_v9  ;;  %v475_v14 = vadd.s32 %v7816_v16, %v456_v43  ;;  %v2962_v9 = vld [vmem:[%s11529_s4 + $0xa8] sm:$0xff] }
 0x164   : > { %v6834_v1 = vpack.c.bf16 %v2960_v6, %v2959_v23  ;;  %v8023_v23 = vsel %vm7991_vm5, 1.0, %v11789_v19 }
 0x165   : > { %v1054_v15 = vadd.f32 %v1037_v33, %v911_v37  ;;  %v994_v45 = vpop.permute.xlu0 %993  ;;  %v2533_v58 = vrot.slane %v7987_v12, 1  ;;  %v2329_v44 = vrot.slane %v7987_v12, 7  ;;  %11798 = vst [vmem:[#allocation65_spill] sm:$0xff] %v8023_v23  ;;  %vm492_vm6 = vcmp.ge.s32.totalorder %v475_v14, 0 }
 0x166   : > { %1478 = vrot.lane.b32.xlu0 %v7637_v52, %s11698_s21  ;;  %v1113_v20 = vpop.permute.xlu1 %1112  ;;  %v1039_v52 = vmul.f32 %v7812_v51, %v7872_v28  ;;  %6835 = vmatpush1.bf16.msra.mxu0 %v6834_v1  ;;  %v455_v28 = vadd.s32 40, %v7535_v4  ;;  %vm509_vm7 = vcmp.lt.s32.totalorder %v475_v14, 300 }
 0x167   : > { %v1078_v22 = vadd.f32 %v7827_v38, %v1054_v15  ;;  %1154 = vperm.xlu1 %7115, %v1113_v20   ;;  %v8010_v37 = vsel %vm924_vm3, %v2531_v7, %v2533_v58  ;;  %v8013_v33 = vsel %vm692_vm2, %v2327_v32, %v2329_v44  ;;  %v2961_v7 = vld [vmem:[%s11529_s4 + $0xa0] sm:$0xff]  ;;  %v913_v32 = vadd.f32 %v896_v60, %v807_v3  ;;  %v2963_v3 = vld [vmem:[%s11529_s4 + $0xb0] sm:$0xff]  ;;  %v2964_v60 = vld [vmem:[%s11529_s4 + $0xb8] sm:$0xff] }
 0x168   : > { %11796 = vst [vmem:[#allocation63_spill] sm:$0xff] %v8010_v37  ;;  %11797 = vst [vmem:[#allocation64_spill] sm:$0xff] %v8013_v33  ;;  %6836 = vmatprep.subr.bf16.mxu0 %v11787_v53  ;;  %v6837_v49 = vpack.c.bf16 %v2962_v9, %v2961_v7 }
 0x169   : > { %v1095_v15 = vmax.f32 %v1078_v22, 0.0  ;;  %v8025_v6 = vpop.permute.xlu0 %1120  ;;  %v11799_v22 = vmov 1   ;;  %v1056_v1 = vadd.f32 %v1039_v52, %v913_v32  ;;  %v458_v52 = vadd.s32 64, %v7535_v4  ;;  %vm526_vm8 = vmand %vm492_vm6, %vm509_vm7 }
 0x16a   : > { %v751_v43 = vpop.permute.xlu1 %750  ;;  %6838 = vmatpush1.bf16.msra.mxu0 %v6837_v49  ;;  %v7117_v32 = vpack.i.bf16 %v7883_v18, %v7867_v11  ;;  %v474_v49 = vadd.s32 %v7816_v16, %v455_v28  ;;  %v1041_v28 = vmul.f32 %v7812_v51, %v994_v45 }
 0x16b   : > { %v8036_v20 = vmul.f32 %v8023_v23, %v1095_v15  ;;  %7116 = vset.pattern.permute.xlu1 %v11799_v22  ;;  %6839 = vmatprep.subr.bf16.mxu0 %v11787_v53  ;;  %v6840_v23 = vpack.c.bf16 %v2964_v60, %v2963_v3  ;;  %v1080_v18 = vadd.f32 %v7827_v38, %v1056_v1 }
 0x16c   : > { %1239 = vperm.xlu1 %7116, %v7558_v21   ;;  %v898_v21 = vmul.f32 %v7807_v42, %v7975_v13  ;;  %v809_v13 = vmul.f32 %v7796_v26, %v7957_v31  ;;  %v806_v3 = vmul.f32 %v7796_v26, %v751_v43  ;;  %vm491_vm9 = vcmp.ge.s32.totalorder %v474_v49, 0 }
 0x16d   : > { %v8040_v33 = vpop.permute.xlu0 %766  ;;  %v11610_v15 = vrot.slane %v8036_v20, 1  ;;  %v11800_v25 = vrot.slane %v8036_v20, 7  ;;  %vm508_vm11 = vcmp.lt.s32.totalorder %v474_v49, 300  ;;  %v8081_v43 = vsel %vm526_vm8, 1.0, %v11789_v19 }
 0x16e   : > { %v840_v9 = vpop.permute.xlu1 %839  ;;  %6841 = vmatpush1.bf16.msra.mxu0 %v6840_v23  ;;  %v915_v1 = vadd.f32 %v898_v21, %v809_v13  ;;  %11801 = vst [vmem:[#allocation66_spill] sm:$0xff] %v8081_v43  ;;  %vm525_vm12 = vmand %vm491_vm9, %vm508_vm11  ;;  %v897_v21 = vmul.f32 %v7807_v42, %v7925_v57 }
 0x16f   : > { %v895_v37 = vmul.f32 %v7807_v42, %v840_v9  ;;  %v8061_v7 = vsel %vm924_vm3, %v2533_v58, %v11610_v15  ;;  %v8066_v61 = vsel %vm692_vm2, %v2329_v44, %v11800_v25  ;;  %v477_v25 = vadd.s32 %v7816_v16, %v458_v52 }
 0x170   : > { %7118 = vrot.lane.b32.xlu1 %v7117_v32, %s11703_s20  ;;  %v457_v44 = vadd.s32 56, %v7535_v4  ;;  %v1097_v9 = vmax.f32 %v1080_v18, 0.0  ;;  %v1058_v32 = vadd.f32 %v1041_v28, %v915_v1  ;;  %v459_v15 = vadd.s32 72, %v7535_v4 }
 0x171   : > { %v856_v60 = vpop.permute.xlu0 %855  ;;  %7122 = vset.pattern.permute.xlu1 %v11786_v62  ;;  %v912_v31 = vadd.f32 %v895_v37, %v806_v3  ;;  %vm494_vm13 = vcmp.ge.s32.totalorder %v477_v25, 0  ;;  %vm511_vm14 = vcmp.lt.s32.totalorder %v477_v25, 300  ;;  %v8094_v13 = vsel %vm525_vm12, 1.0, %v11789_v19 }
 0x172   : > { %v982_v58 = vpop.permute.xlu1 %981  ;;  %v476_v49 = vadd.s32 %v7816_v16, %v457_v44  ;;  %v8091_v18 = vmul.f32 %v8081_v43, %v1097_v9  ;;  %11802 = vst [vmem:[#allocation67_spill] sm:$0xff] %v8094_v13  ;;  %v808_v28 = vmul.f32 %v7796_v26, %v7911_v8  ;;  %vm528_vm15 = vmand %vm494_vm13, %vm511_vm14  ;;  %v1082_v3 = vadd.f32 %v7827_v38, %v1058_v32 }
 0x173   : > { %v1038_v45 = vmul.f32 %v7812_v51, %v982_v58  ;;  %v899_v44 = vmul.f32 %v7807_v42, %v856_v60  ;;  %v478_v1 = vadd.s32 %v7816_v16, %v459_v15  ;;  %v8107_v8 = vsel %vm528_vm15, 1.0, %v11789_v19 }
 0x174   : > { %vm493_vm0 = vcmp.ge.s32.totalorder %v476_v49, 0  ;;  %vm510_vm1 = vcmp.lt.s32.totalorder %v476_v49, 300  ;;  %11803 = vst [vmem:[#allocation68_spill] sm:$0xff] %v8107_v8  ;;  %v810_v32 = vmul.f32 %v7796_v26, %v8040_v33  ;;  %v460_v60 = vadd.s32 80, %v7535_v4 }
 0x175   : > { %v1055_v23 = vadd.f32 %v1038_v45, %v912_v31  ;;  %v8083_v14 = vpop.permute.xlu0 %1122  ;;  %v914_v31 = vadd.f32 %v897_v21, %v808_v28  ;;  %v2539_v15 = vrot.slane %v8091_v18, 1  ;;  %vm527_vm4 = vmand %vm493_vm0, %vm510_vm1  ;;  %vm495_vm5 = vcmp.ge.s32.totalorder %v478_v1, 0 }
 0x176   : > { %v1115_v52 = vpop.permute.xlu1 %1114  ;;  %v916_v28 = vadd.f32 %v899_v44, %v810_v32  ;;  %vm512_vm6 = vcmp.lt.s32.totalorder %v478_v1, 300  ;;  %v2335_v33 = vrot.slane %v8091_v18, 7  ;;  %v479_v44 = vadd.s32 %v7816_v16, %v460_v60 }
 0x177   : > { %v1079_v37 = vadd.f32 %v7827_v38, %v1055_v23  ;;  %1158 = vperm.xlu1 %7122, %v1115_v52   ;;  %v1099_v23 = vmax.f32 %v1082_v3, 0.0  ;;  %v11804_v3 = vrot.slane %v8036_v20, 1  ;;  %v11807_v1 = vrot.slane %v8036_v20, 7  ;;  %vm529_vm7 = vmand %vm495_vm5, %vm512_vm6 }
 0x178   : > { %vm496_vm8 = vcmp.ge.s32.totalorder %v479_v44, 0  ;;  %vm513_vm9 = vcmp.lt.s32.totalorder %v479_v44, 300 }
 0x179   : > { %v1096_v25 = vmax.f32 %v1079_v37, 0.0  ;;  %v860_v58 = vpop.permute.xlu0 %859  ;;  %vm530_vm11 = vmand %vm496_vm8, %vm513_vm9 }
 0x17a   : > { %v990_v57 = vpop.permute.xlu1 %989 }
 0x17b   : > { %v8102_v45 = vmul.f32 %v8094_v13, %v1096_v25  ;;  %v1040_v9 = vmul.f32 %v7812_v51, %v990_v57  ;;  %7123 = vset.pattern.permute.xlu1 %v11799_v22 }
 0x17c   : > { %1345 = vperm.xlu1 %7123, %v7643_v54   ;;  %v8130_v54 = vsel %vm527_vm4, 1.0, %v11789_v19 }
 0x17d   : > { %v1057_v52 = vadd.f32 %v1040_v9, %v914_v31  ;;  %v8114_v49 = vpop.permute.xlu0 %1124  ;;  %v2537_v21 = vrot.slane %v8102_v45, 1  ;;  %v2333_v37 = vrot.slane %v8102_v45, 7  ;;  %11806 = vst [vmem:[#allocation70_spill] sm:$0xff] %v8130_v54 }
 0x17e   : > { %v998_v25 = vpop.permute.xlu1 %997 }
 0x17f   : > { %v1081_v57 = vadd.f32 %v7827_v38, %v1057_v52  ;;  %v1042_v53 = vmul.f32 %v7812_v51, %v998_v25  ;;  %v8124_v31 = vsel %vm924_vm3, %v11804_v3, %v2537_v21  ;;  %v8127_v9 = vsel %vm924_vm3, %v2537_v21, %v2539_v15 }
 0x180   : > { %11805 = vst [vmem:[#allocation69_spill] sm:$0xff] %v8127_v9  ;;  %7124 = vset.pattern.permute.xlu1 %v11786_v62  ;;  %v8137_v32 = vsel %vm692_vm2, %v11807_v1, %v2333_v37  ;;  %v8140_v52 = vsel %vm692_vm2, %v2333_v37, %v2335_v33  ;;  %v8143_v25 = vmul.f32 %v8107_v8, %v1099_v23 }
 0x181   : > { %v1098_v21 = vmax.f32 %v1081_v57, 0.0  ;;  %v1059_v3 = vadd.f32 %v1042_v53, %v916_v28  ;;  %v864_v43 = vpop.permute.xlu0 %863  ;;  %1162 = vperm.xlu1 %7124, %v7891_v40   ;;  %v7125_v37 = vpack.i.bf16 %v7987_v12, %v7936_v46  ;;  %v900_v23 = vmul.f32 %v7807_v42, %v860_v58 }
 0x182   : > { %v771_v13 = vpop.permute.xlu1 %770  ;;  %v8155_v57 = vsel %vm529_vm7, 1.0, %v11789_v19  ;;  %v461_v46 = vadd.s32 88, %v7535_v4  ;;  %v2339_v58 = vrot.slane %v8143_v25, 7 }
 0x183   : > { %v8147_v60 = vmul.f32 %v8130_v54, %v1098_v21  ;;  %v1083_v9 = vadd.f32 %v7827_v38, %v1059_v3  ;;  %v811_v1 = vmul.f32 %v7796_v26, %v771_v13  ;;  %11808 = vst [vmem:[#allocation71_spill] sm:$0xff] %v8155_v57  ;;  %v2543_v21 = vrot.slane %v8143_v25, 1 }
 0x185   : > { %v1100_v53 = vmax.f32 %v1083_v9, 0.0  ;;  %v1127_v28 = vpop.permute.xlu0 %1126  ;;  %7126 = vrot.lane.b32.xlu1 %v7125_v37, %s11703_s20  ;;  %v2541_v40 = vrot.slane %v8147_v60, 1  ;;  %v917_v3 = vadd.f32 %v900_v23, %v811_v1  ;;  %v2337_v12 = vrot.slane %v8147_v60, 7 }
 0x186   : > { %1182 = vperm.xlu0 %7112, %v1127_v28   ;;  %v1002_v13 = vpop.permute.xlu1 %1001  ;;  %7130 = vset.pattern.permute.xlu1 %v11799_v22 }
 0x187   : > { %v8165_v9 = vmul.f32 %v8155_v57, %v1100_v53  ;;  %v1043_v37 = vmul.f32 %v7812_v51, %v1002_v13  ;;  %v8169_v8 = vsel %vm924_vm3, %v2539_v15, %v2541_v40  ;;  %v8172_v1 = vsel %vm924_vm3, %v2541_v40, %v2543_v21 }
 0x188   : > { %v8175_v23 = vsel %vm692_vm2, %v2335_v33, %v2337_v12  ;;  %v8178_v28 = vsel %vm692_vm2, %v2337_v12, %v2339_v58  ;;  %v480_v40 = vadd.s32 %v7816_v16, %v461_v46  ;;  %v8198_v57 = vsel %vm530_vm11, 1.0, %v11789_v19 }
 0x189   : > { %11809 = vst [vmem:[#allocation72_spill] sm:$0xff] %v8178_v28  ;;  %v1060_v54 = vadd.f32 %v1043_v37, %v917_v3  ;;  %v868_v53 = vpop.permute.xlu0 %867  ;;  %1472 = vrot.lane.b32.xlu1 %v7601_v39, %s11698_s21  ;;  %v2545_v15 = vrot.slane %v8165_v9, 1  ;;  %v2341_v13 = vrot.slane %v8165_v9, 7  ;;  %11811 = vst [vmem:[#allocation74_spill] sm:$0xff] %v8198_v57  ;;  %v901_v39 = vmul.f32 %v7807_v42, %v864_v43 }
 0x18a   : > { %1482 = vrot.lane.b32.xlu0 %v7624_v48, %s11698_s21  ;;  %v775_v33 = vpop.permute.xlu1 %774  ;;  %vm497_vm12 = vcmp.ge.s32.totalorder %v480_v40, 0  ;;  %vm514_vm13 = vcmp.lt.s32.totalorder %v480_v40, 300 }
 0x18b   : > { %v1084_v12 = vadd.f32 %v7827_v38, %v1060_v54  ;;  %v812_v44 = vmul.f32 %v7796_v26, %v775_v33  ;;  %v8192_v3 = vsel %vm924_vm3, %v2543_v21, %v2545_v15  ;;  %v8195_v37 = vsel %vm692_vm2, %v2339_v58, %v2341_v13  ;;  %vm531_vm14 = vmand %vm497_vm12, %vm514_vm13 }
 0x18c   : > { %11810 = vst [vmem:[#allocation73_spill] sm:$0xff] %v8195_v37  ;;  %v462_v21 = vadd.s32 96, %v7535_v4 }
 0x18d   : > { %v1101_v28 = vmax.f32 %v1084_v12, 0.0  ;;  %v8201_v48 = vpop.permute.xlu0 %1128  ;;  %1251 = vperm.xlu1 %7130, %v7577_v29   ;;  %v918_v58 = vadd.f32 %v901_v39, %v812_v44 }
 0x18e   : > { %1484 = vrot.lane.b32.xlu0 %v7647_v55, %s11698_s21  ;;  %v1006_v54 = vpop.permute.xlu1 %1005  ;;  %v481_v37 = vadd.s32 %v7816_v16, %v462_v21 }
 0x18f   : > { %v8208_v46 = vmul.f32 %v8198_v57, %v1101_v28  ;;  %v1044_v33 = vmul.f32 %v7812_v51, %v1006_v54 }
 0x190   : > { %vm498_vm15 = vcmp.ge.s32.totalorder %v481_v37, 0  ;;  %vm515_vm0 = vcmp.lt.s32.totalorder %v481_v37, 300 }
 0x191   : > { %v1061_v43 = vadd.f32 %v1044_v33, %v918_v58  ;;  %v872_v12 = vpop.permute.xlu0 %871  ;;  %1353 = vperm.xlu1 %7130, %v7678_v0   ;;  %v2547_v29 = vrot.slane %v8208_v46, 1  ;;  %v2343_v55 = vrot.slane %v8208_v46, 7  ;;  %v8226_v58 = vsel %vm531_vm14, 1.0, %v11789_v19  ;;  %vm532_vm1 = vmand %vm498_vm15, %vm515_vm0 }
 0x192   : > { %1486 = vrot.lane.b32.xlu0 %v7672_v63, %s11698_s21  ;;  %v779_v40 = vpop.permute.xlu1 %778  ;;  %11814 = vst [vmem:[#allocation77_spill] sm:$0xff] %v8226_v58  ;;  %v902_v33 = vmul.f32 %v7807_v42, %v868_v53  ;;  %v7132_v53 = vpack.i.bf16 %v8102_v45, %v8036_v20 }
 0x193   : > { %v1085_v28 = vadd.f32 %v7827_v38, %v1061_v43  ;;  %v813_v39 = vmul.f32 %v7796_v26, %v779_v40  ;;  %v8220_v44 = vsel %vm924_vm3, %v2545_v15, %v2547_v29  ;;  %v8223_v54 = vsel %vm692_vm2, %v2341_v13, %v2343_v55 }
 0x194   : > { %11812 = vst [vmem:[#allocation75_spill] sm:$0xff] %v8220_v44  ;;  %11813 = vst [vmem:[#allocation76_spill] sm:$0xff] %v8223_v54  ;;  %v463_v15 = vadd.s32 104, %v7535_v4 }
 0x195   : > { %v1102_v57 = vmax.f32 %v1085_v28, 0.0  ;;  %v8229_v63 = vpop.permute.xlu0 %1130  ;;  %7131 = vset.pattern.permute.xlu1 %v11786_v62  ;;  %v919_v43 = vadd.f32 %v902_v33, %v813_v39  ;;  %v8254_v33 = vsel %vm532_vm1, 1.0, %v11789_v19  ;;  %vm10336_vm1 = vmneg %vm692_vm2 }
 0x196   : > { %v1010_v21 = vpop.permute.xlu1 %1009  ;;  %1170 = vperm.xlu1 %7131, %v8025_v6   ;;  %v482_v6 = vadd.s32 %v7816_v16, %v463_v15  ;;  %11816 = vst [vmem:[#allocation79_spill] sm:$0xff] %v8254_v33 }
 0x197   : > { %v8235_v13 = vmul.f32 %v8226_v58, %v1102_v57  ;;  %v1045_v40 = vmul.f32 %v7812_v51, %v1010_v21  ;;  %v903_v21 = vmul.f32 %v7807_v42, %v872_v12 }
 0x198   : > { %vm499_vm4 = vcmp.ge.s32.totalorder %v482_v6, 0  ;;  %vm516_vm5 = vcmp.lt.s32.totalorder %v482_v6, 300 }
 0x199   : > { %v1062_v28 = vadd.f32 %v1045_v40, %v919_v43  ;;  %v876_v54 = vpop.permute.xlu0 %875  ;;  %v2549_v0 = vrot.slane %v8235_v13, 1  ;;  %v2345_v37 = vrot.slane %v8235_v13, 7  ;;  %vm533_vm6 = vmand %vm499_vm4, %vm516_vm5 }
 0x19a   : > { %v783_v44 = vpop.permute.xlu1 %782  ;;  %7133 = vrot.lane.b32.xlu1 %v7132_v53, %s11703_s20 }
 0x19b   : > { %v1086_v57 = vadd.f32 %v7827_v38, %v1062_v28  ;;  %v814_v39 = vmul.f32 %v7796_v26, %v783_v44  ;;  %7137 = vset.pattern.permute.xlu1 %v11799_v22  ;;  %v8248_v20 = vsel %vm924_vm3, %v2547_v29, %v2549_v0  ;;  %v8251_v45 = vsel %vm692_vm2, %v2343_v55, %v2345_v37 }
 0x19c   : > { %11815 = vst [vmem:[#allocation78_spill] sm:$0xff] %v8251_v45  ;;  %v464_v44 = vadd.s32 112, %v7535_v4 }
 0x19d   : > { %v1103_v43 = vmax.f32 %v1086_v57, 0.0  ;;  %v8257_v40 = vpop.permute.xlu0 %1132  ;;  %v920_v55 = vadd.f32 %v903_v21, %v814_v39 }
 0x19e   : > { %v1014_v15 = vpop.permute.xlu1 %1013  ;;  %1357 = vperm.xlu1 %7137, %v7606_v41   ;;  %v483_v6 = vadd.s32 %v7816_v16, %v464_v44 }
 0x19f   : > { %v8262_v29 = vmul.f32 %v8254_v33, %v1103_v43  ;;  %v1046_v53 = vmul.f32 %v7812_v51, %v1014_v15  ;;  %v8279_v15 = vsel %vm533_vm6, 1.0, %v11789_v19 }
 0x1a0   : > { %11817 = vst [vmem:[#allocation80_spill] sm:$0xff] %v8279_v15  ;;  %vm500_vm7 = vcmp.ge.s32.totalorder %v483_v6, 0  ;;  %vm517_vm8 = vcmp.lt.s32.totalorder %v483_v6, 300 }
 0x1a1   : > { %v1063_v28 = vadd.f32 %v1046_v53, %v920_v55  ;;  %v880_v45 = vpop.permute.xlu0 %879  ;;  %v2551_v12 = vrot.slane %v8262_v29, 1  ;;  %v2347_v57 = vrot.slane %v8262_v29, 7  ;;  %v904_v55 = vmul.f32 %v7807_v42, %v876_v54  ;;  %vm534_vm9 = vmand %vm500_vm7, %vm517_vm8 }
 0x1a2   : > { %v787_v58 = vpop.permute.xlu1 %786  ;;  %7138 = vset.pattern.permute.xlu1 %v11786_v62 }
 0x1a3   : > { %v1087_v41 = vadd.f32 %v7827_v38, %v1063_v28  ;;  %v815_v43 = vmul.f32 %v7796_v26, %v787_v58  ;;  %1174 = vperm.xlu1 %7138, %v8083_v14   ;;  %v8273_v39 = vsel %vm924_vm3, %v2549_v0, %v2551_v12  ;;  %v8276_v21 = vsel %vm692_vm2, %v2345_v37, %v2347_v57 }
 0x1a4   : > { %v465_v58 = vadd.s32 120, %v7535_v4 }
 0x1a5   : > { %v1104_v53 = vmax.f32 %v1087_v41, 0.0  ;;  %v1135_v33 = vpop.permute.xlu0 %1134  ;;  %v921_v0 = vadd.f32 %v904_v55, %v815_v43 }
 0x1a6   : > { %1198 = vperm.xlu0 %7112, %v1135_v33   ;;  %v1018_v44 = vpop.permute.xlu1 %1017  ;;  %v484_v6 = vadd.s32 %v7816_v16, %v465_v58 }
 0x1a7   : > { %v8284_v14 = vmul.f32 %v8279_v15, %v1104_v53  ;;  %v1047_v37 = vmul.f32 %v7812_v51, %v1018_v44  ;;  %7139 = vset.pattern.permute.xlu1 %v11799_v22 }
 0x1a8   : > { %1361 = vperm.xlu1 %7139, %v7689_v2   ;;  %vm501_vm11 = vcmp.ge.s32.totalorder %v484_v6, 0  ;;  %vm518_vm12 = vcmp.lt.s32.totalorder %v484_v6, 300 }
 0x1a9   : > { %v1064_v54 = vadd.f32 %v1047_v37, %v921_v0  ;;  %v2553_v41 = vrot.slane %v8284_v14, 1  ;;  %v2349_v33 = vrot.slane %v8284_v14, 7  ;;  %v8303_v0 = vsel %vm534_vm9, 1.0, %v11789_v19  ;;  %vm535_vm13 = vmand %vm501_vm11, %vm518_vm12 }
 0x1aa   : > { %7162 = vset.pattern.permute.xlu0 %v11799_v22  ;;  %v791_v28 = vpop.permute.xlu1 %790  ;;  %11819 = vst [vmem:[#allocation82_spill] sm:$0xff] %v8303_v0  ;;  %v905_v37 = vmul.f32 %v7807_v42, %v880_v45 }
 0x1ab   : > { %v1088_v53 = vadd.f32 %v7827_v38, %v1064_v54  ;;  %v816_v43 = vmul.f32 %v7796_v26, %v791_v28  ;;  %1231 = vperm.xlu0 %7162, %v7546_v17   ;;  %v8297_v55 = vsel %vm924_vm3, %v2551_v12, %v2553_v41  ;;  %v8300_v44 = vsel %vm692_vm2, %v2347_v57, %v2349_v33 }
 0x1ac   : > { %11818 = vst [vmem:[#allocation81_spill] sm:$0xff] %v8300_v44  ;;  %7140 = vset.pattern.permute.xlu1 %v11786_v62  ;;  %v7141_v28 = vpack.i.bf16 %v8147_v60, %v8091_v18  ;;  %v8328_v18 = vsel %vm535_vm13, 1.0, %v11789_v19 }
 0x1ad   : > { %v1105_v58 = vmax.f32 %v1088_v53, 0.0  ;;  %1178 = vperm.xlu1 %7140, %v8114_v49   ;;  %v922_v12 = vadd.f32 %v905_v37, %v816_v43  ;;  %11821 = vst [vmem:[#allocation84_spill] sm:$0xff] %v8328_v18 }
 0x1ae   : > { %v1022_v54 = vpop.permute.xlu1 %1021 }
 0x1af   : > { %v8309_v26 = vmul.f32 %v8303_v0, %v1105_v58  ;;  %v1048_v57 = vmul.f32 %v7812_v51, %v1022_v54  ;;  %1337 = vperm.xlu0 %7162, %v7594_v36   ;;  %v7148_v58 = vpack.i.bf16 %v8165_v9, %v8143_v25  ;;  %v11826_v25 = vld [vmem:[#allocation33_spill] sm:$0xff] }
 0x1b0   : > { %v11827_v9 = vld [vmem:[#allocation41_spill] sm:$0xff] }
 0x1b1   : > { %v1065_v44 = vadd.f32 %v1048_v57, %v922_v12  ;;  %7142 = vrot.lane.b32.xlu1 %v7141_v28, %s11703_s20  ;;  %v2555_v42 = vrot.slane %v8309_v26, 1  ;;  %v2351_v49 = vrot.slane %v8309_v26, 7  ;;  %v11828_v28 = vld [vmem:[#allocation36_spill] sm:$0xff] }
 0x1b2   : > { %7146 = vset.pattern.permute.xlu1 %v11799_v22 }
 0x1b3   : > { %v1089_v45 = vadd.f32 %v7827_v38, %v1065_v44  ;;  %1341 = vperm.xlu0 %7162, %v7620_v47   ;;  %v8322_v51 = vsel %vm924_vm3, %v2553_v41, %v2555_v42  ;;  %v8325_v6 = vsel %vm692_vm2, %v2349_v33, %v2351_v49  ;;  %v8351_v44 = vpop.permute.xlu1 %794 }
 0x1b4   : > { %11820 = vst [vmem:[#allocation83_spill] sm:$0xff] %v8325_v6  ;;  %v11838_v6 = vld [vmem:[#allocation48_spill] sm:$0xff] }
 0x1b5   : > { %v1106_v60 = vmax.f32 %v1089_v45, 0.0  ;;  %1480 = vrot.lane.b32.xlu1 %v7588_v34, %s11698_s21  ;;  %v8386_v45 = vpop.permute.xlu0 %883 }
 0x1b7   : > { %v8333_v53 = vmul.f32 %v8328_v18, %v1106_v60  ;;  %1243 = vperm.xlu0 %7162, %v7563_v24   ;;  %v8357_v37 = vpop.permute.xlu1 %1026  ;;  %v11830_v60 = vld [vmem:[#allocation44_spill] sm:$0xff]  ;;  %v11839_v18 = vrot.slane %v7867_v11, 7 }
 0x1b9   : > { %11822 = vst [vmem:[#allocation85_spill] sm:$0xff] %v8333_v53  ;;  %1267 = vperm.xlu1 %7146, %v7649_v56   ;;  %v11641_v38 = vrot.slane %v8333_v53, 1  ;;  %v11640_v41 = vrot.slane %v8333_v53, 7 }
 0x1bb   : > { %1247 = vperm.xlu0 %7162, %v7570_v27   ;;  %v8343_v33 = vsel %vm924_vm3, %v2555_v42, %v11641_v38  ;;  %v8348_v43 = vsel %vm692_vm2, %v2351_v49, %v11640_v41  ;;  %v8364_v54 = vpop.permute.xlu1 %1146  ;;  %v11829_v42 = vld [vmem:[#allocation39_spill] sm:$0xff]  ;;  %v1137_v38 = vpop.permute.xlu0 %1136 }
 0x1bc   : > { %11823 = vst [vmem:[#allocation86_spill] sm:$0xff] %v8343_v33  ;;  %11824 = vst [vmem:[#allocation87_spill] sm:$0xff] %v8348_v43  ;;  %v11835_v43 = vld [vmem:[#allocation47_spill] sm:$0xff] }
 0x1bd   : > { %1369 = vperm.xlu1 %7146, %v7696_v5  }
 0x1bf   : > { %1349 = vperm.xlu0 %7162, %v7657_v59   ;;  %v1139_v12 = vpop.permute.xlu1 %1138 }
 0x1c1   : > { %7147 = vset.pattern.permute.xlu1 %v11786_v62 }
 0x1c2   : > { %1186 = vperm.xlu1 %7147, %v8201_v48   ;;  %v11825_v48 = vld [vmem:[#allocation30_spill] sm:$0xff] }
 0x1c3   : > { %1255 = vperm.xlu0 %7162, %v7581_v30   ;;  %v8374_v57 = vpop.permute.xlu1 %1333 }
 0x1c6   : > { %7149 = vrot.lane.b32.xlu1 %v7148_v58, %s11703_s20  ;;  %v11831_v58 = vld [vmem:[#allocation37_spill] sm:$0xff] }
 0x1c7   : > { %1259 = vperm.xlu0 %7162, %v7591_v35   ;;  %7153 = vset.pattern.permute.xlu1 %v11799_v22  ;;  %v8382_v49 = vpop.permute.xlu1 %1235 }
 0x1ca   : > { %1373 = vperm.xlu1 %7153, %v7711_v10  }
 0x1cb   : > { %1263 = vperm.xlu0 %7162, %v7631_v50   ;;  %v1141_v41 = vpop.permute.xlu1 %1140 }
 0x1ce   : > { %7154 = vset.pattern.permute.xlu1 %v11786_v62 }
 0x1cf   : > { %1365 = vperm.xlu0 %7162, %v11825_v48   ;;  %1190 = vperm.xlu1 %7154, %v8229_v63   ;;  %v7157_v63 = vpack.i.bf16 %v8235_v13, %v8208_v46  ;;  %v11834_v13 = vld [vmem:[#allocation45_spill] sm:$0xff] }
 0x1d3   : > { %1271 = vperm.xlu0 %7162, %v11826_v25   ;;  %7155 = vset.pattern.permute.xlu1 %v11799_v22 }
 0x1d4   : > { %1377 = vperm.xlu1 %7155, %v11827_v9  }
 0x1d7   : > { %1275 = vperm.xlu0 %7162, %v11828_v28  }
 0x1d8   : > { %7156 = vset.pattern.permute.xlu1 %v11786_v62 }
 0x1d9   : > { %1194 = vperm.xlu1 %7156, %v8257_v40   ;;  %v11832_v40 = vld [vmem:[#allocation40_spill] sm:$0xff] }
 0x1db   : > { %1279 = vperm.xlu0 %7162, %v11829_v42   ;;  %v11833_v42 = vld [vmem:[#allocation42_spill] sm:$0xff] }
 0x1dd   : > { %7158 = vrot.lane.b32.xlu1 %v7157_v63, %s11703_s20  ;;  %v8397_v63 = vpop.permute.xlu0 %1150 }
 0x1de   : > { %7163 = vset.pattern.permute.xlu1 %v11799_v22 }
 0x1df   : > { %1381 = vperm.xlu0 %7162, %v11830_v60   ;;  %v11836_v60 = vld [vmem:[#allocation43_spill] sm:$0xff] }
 0x1e1   : > { %1488 = vrot.lane.b32.xlu1 %v11831_v58, %s11698_s21 }
 0x1e3   : > { %1490 = vrot.lane.b32.xlu0 %v11832_v40, %s11698_s21  ;;  %v8405_v40 = vpop.permute.xlu0 %1468 }
 0x1e4   : > { %11837 = vst [vmem:[#allocation88_spill] sm:$0xff] %v8405_v40  ;;  %v11841_v40 = vld [vmem:[#allocation60_spill] sm:$0xff] }
 0x1e5   : > { %1283 = vperm.xlu1 %7163, %v11833_v42  }
 0x1e6   : > { %v8394_v46 = vpop.permute.xlu1 %1154 }
 0x1e7   : > { %1287 = vperm.xlu0 %7162, %v11834_v13   ;;  %v7165_v13 = vpack.i.bf16 %v8284_v14, %v8262_v29  ;;  %v11842_v29 = vld [vmem:[#allocation51_spill] sm:$0xff]  ;;  %v11843_v14 = vld [vmem:[#allocation58_spill] sm:$0xff] }
 0x1e9   : > { %1385 = vperm.xlu1 %7163, %v11835_v43   ;;  %v2524_v43 = vsel %vm692_vm2, 0.0, %v11839_v18 }
 0x1eb   : > { %1492 = vrot.lane.b32.xlu0 %v11836_v60, %s11698_s21  ;;  %v8402_v10 = vpop.permute.xlu1 %1239 }
 0x1ed   : > { %7164 = vset.pattern.permute.xlu1 %v11786_v62 }
 0x1ee   : > { %1202 = vperm.xlu1 %7164, %v1137_v38   ;;  %v11840_v38 = vld [vmem:[#allocation46_spill] sm:$0xff] }
 0x1ef   : > { %1291 = vperm.xlu0 %7162, %v11838_v6   ;;  %v7119_v42 = vpop.permute.xlu1 %7118  ;;  %v1471_v6 = vpop.permute.xlu0 %1470 }
 0x1f0   : > { %v7120_v58 = vunpack.i.l.bf16 %v7119_v42  ;;  %v7121_v9 = vunpack.i.h.bf16 %v7119_v42  ;;  %v11844_v42 = vld [vmem:[#allocation49_spill] sm:$0xff] }
 0x1f2   : > { %7166 = vrot.lane.b32.xlu1 %v7165_v13, %s11703_s20  ;;  %v2873_v60 = vsel %vm2872_vm10, %v2524_v43, %v7120_v58  ;;  %v2874_v18 = vsel %vm2872_vm10, %v11843_v14, %v7121_v9  ;;  %v11845_v43 = vld [vmem:[#allocation63_spill] sm:$0xff]  ;;  %v11848_v14 = vld [vmem:[#allocation53_spill] sm:$0xff] }
 0x1f3   : > { %1494 = vrot.lane.b32.xlu0 %v11840_v38, %s11698_s21  ;;  %3177 = vmatmul.mubr.f32.vlgmr.msra.gmra.mrb[0].mxu0 %v2873_v60  ;;  %v8428_v60 = vpop.permute.xlu0 %1166  ;;  %v11846_v58 = vld [vmem:[#allocation55_spill] sm:$0xff]  ;;  %v11648_v38 = vmov 2  }
 0x1f4   : > { %6184 = vmatprep.mubr.msk.f32.mxu0 %vm2872_vm10, %v11841_v40  ;;  %7170 = vset.pattern.permute.xlu1 %v11799_v22  ;;  %v11847_v9 = vld [vmem:[#allocation11_spill] sm:$0xff] }
 0x1f6   : > { %1389 = vperm.xlu1 %7170, %v11842_v29   ;;  %v8421_v11 = vpop.permute.xlu1 %1158  ;;  %v11850_v29 = vld [vmem:[#allocation61_spill] sm:$0xff] }
 0x1f7   : > { %1295 = vperm.xlu0 %7162, %v11844_v42   ;;  %3182 = vmatmul.mubr.f32.gmra.mrb[2].mxu0 %v2874_v18  ;;  %v8434_v13 = vpop.permute.xlu0 %1474 }
 0x1f8   : > { %6185 = vmatprep.mubr.msk.f32.mxu0 %vm2872_vm10, %v11845_v43 }
 0x1fa   : > { %7171 = vset.pattern.permute.xlu1 %v11786_v62 }
 0x1fb   : > { %1397 = vperm.xlu0 %7162, %v11846_v58   ;;  %1206 = vperm.xlu1 %7171, %v1139_v12   ;;  %v8432_v40 = vpop.permute.xlu1 %1345  ;;  %v8443_v58 = vpop.permute.xlu0 %1476 }
 0x1fc   : > { %11849 = vst [vmem:[#allocation60_spill] sm:$0xff] %v8443_v58  ;;  %v11852_v58 = vld [vmem:[#allocation64_spill] sm:$0xff] }
 0x1ff   : > { %7180 = vset.pattern.permute.xlu0 %v11648_v38  ;;  %7172 = vset.pattern.permute.xlu1 %v11799_v22  ;;  %v7174_v22 = vpack.i.bf16 %v8333_v53, %v8309_v26  ;;  %v11856_v53 = vld [vmem:[#allocation8_spill] sm:$0xff] }
 0x200   : > { %1693 = vperm.xlu0 %7180, %v11847_v9   ;;  %1393 = vperm.xlu1 %7172, %v11848_v14   ;;  %v8440_v18 = vpop.permute.xlu1 %1162  ;;  %v11851_v9 = vmov 2   ;;  %v8453_v14 = vpop.permute.xlu0 %1478 }
 0x204   : > { %7173 = vset.pattern.permute.xlu1 %v11786_v62  ;;  %v7127_v43 = vpop.permute.xlu1 %7126 }
 0x205   : > { %v7128_v12 = vunpack.i.l.bf16 %v7127_v43  ;;  %1210 = vperm.xlu1 %7173, %v1141_v41   ;;  %v7129_v42 = vunpack.i.h.bf16 %v7127_v43 }
 0x207   : > { %v2875_v5 = vsel %vm2872_vm10, %v11850_v29, %v7128_v12  ;;  %v2876_v41 = vsel %vm2872_vm10, %v11852_v58, %v7129_v42  ;;  %v11853_v29 = vld [vmem:[#allocation50_spill] sm:$0xff]  ;;  %v11854_v12 = vld [vmem:[#allocation52_spill] sm:$0xff] }
 0x208   : > { %v1473_v38 = vpop.permute.xlu1 %1472  ;;  %3187 = vmatmul.mubr.f32.gmra.mrb[4].mxu0 %v2875_v5  ;;  %v8463_v5 = vpop.permute.xlu0 %1182 }
 0x209   : > { %7175 = vrot.lane.b32.xlu1 %v7174_v22, %s11703_s20  ;;  %6186 = vmatprep.mubr.msk.f32.mxu0 %vm2872_vm10, %v8061_v7 }
 0x20a   : > { %7179 = vset.pattern.permute.xlu1 %v11851_v9 }
 0x20c   : > { %v8457_v43 = vpop.permute.xlu1 %1251  ;;  %3192 = vmatmul.mubr.f32.gmra.mrb[6].mxu0 %v2876_v41  ;;  %v8468_v7 = vpop.permute.xlu0 %1482 }
 0x20d   : > { %1496 = vrot.lane.b32.xlu1 %v11853_v29, %s11698_s21  ;;  %6187 = vmatprep.mubr.msk.f32.mxu0 %vm2872_vm10, %v8124_v31 }
 0x210   : > { %v8465_v26 = vpop.permute.xlu1 %1353  ;;  %v8475_v41 = vpop.permute.xlu0 %1484 }
 0x211   : > { %1591 = vperm.xlu1 %7179, %v7546_v17   ;;  %11855 = vst [vmem:[#allocation58_spill] sm:$0xff] %v8475_v41 }
 0x214   : > { %v8487_v28 = vpop.permute.xlu0 %1486 }
 0x215   : > { %1498 = vrot.lane.b32.xlu1 %v11854_v12, %s11698_s21  ;;  %v8472_v42 = vpop.permute.xlu1 %1170  ;;  %v11857_v12 = vld [vmem:[#allocation69_spill] sm:$0xff]  ;;  %11858 = vst [vmem:[#allocation63_spill] sm:$0xff] %v8487_v28 }
 0x216   : > { %7181 = vset.pattern.permute.xlu1 %v11786_v62 }
 0x219   : > { %1510 = vperm.xlu1 %7181, %v1471_v6   ;;  %v7134_v58 = vpop.permute.xlu1 %7133 }
 0x21a   : > { %v7135_v22 = vunpack.i.l.bf16 %v7134_v58  ;;  %v7136_v31 = vunpack.i.h.bf16 %v7134_v58  ;;  %v11859_v58 = vld [vmem:[#allocation54_spill] sm:$0xff] }
 0x21c   : > { %v2877_v29 = vsel %vm2872_vm10, %v8066_v61, %v7135_v22  ;;  %v2878_v6 = vsel %vm2872_vm10, %v8137_v32, %v7136_v31  ;;  %v466_v32 = vadd.s32 128, %v7535_v4  ;;  %v8507_v22 = vld [vmem:[%s11527_s2 + $0x1] ss:$0 sm:$0xff]  ;;  %v8514_v31 = vld [vmem:[%s11527_s2 + $0x2] ss:$0 sm:$0xff] }
 0x21d   : > { %7182 = vset.pattern.permute.xlu1 %v11851_v9  ;;  %v8480_v17 = vpop.permute.xlu1 %1357  ;;  %3197 = vmatmul.mubr.f32.gmra.mrb[8].mxu0 %v2877_v29  ;;  %v8498_v29 = vld [vmem:[%s11527_s2] ss:$0 sm:$0xff] }
 0x21e   : > { %1595 = vperm.xlu1 %7182, %v11856_v53   ;;  %6188 = vmatprep.mubr.msk.f32.mxu0 %vm2872_vm10, %v11857_v12  ;;  %v817_v12 = vmul.f32 %v8498_v29, %v8351_v44  ;;  %v1049_v44 = vmul.f32 %v8514_v31, %v8357_v37  ;;  %v1213_v28 = vmul.f32 %v8498_v29, %v8364_v54 }
 0x21f   : > { %v1299_v37 = vmul.f32 %v8507_v22, %v8382_v49  ;;  %v1400_v54 = vmul.f32 %v8514_v31, %v8374_v57 }
 0x221   : > { %3202 = vmatmul.mubr.f32.gmra.mrb[10].mxu0 %v2878_v6 }
 0x222   : > { %1500 = vrot.lane.b32.xlu1 %v11859_v58, %s11698_s21  ;;  %v8491_v61 = vpop.permute.xlu1 %1174  ;;  %6189 = vmatprep.mubr.msk.f32.mxu0 %vm2872_vm10, %v8169_v8  ;;  %v906_v8 = vmul.f32 %v8507_v22, %v8386_v45  ;;  %v485_v58 = vadd.s32 %v7816_v16, %v466_v32  ;;  %v11860_v45 = vld [vmem:[#allocation7_spill] sm:$0xff]  ;;  %v8535_v16 = vld [vmem:[%s11528_s3] ss:$0 sm:$0xff]  ;;  %v1214_v32 = vmul.f32 %v8498_v29, %v8397_v63  ;;  %s12164_s21 = smov 127  }
 0x223   : > { %7188 = vset.pattern.permute.xlu1 %v11786_v62 }
 0x224   : > { %v923_v4 = vadd.f32 %v906_v8, %v817_v12  ;;  %vm502_vm14 = vcmp.ge.s32.totalorder %v485_v58, 0  ;;  %vm519_vm15 = vcmp.lt.s32.totalorder %v485_v58, 300  ;;  %v1316_v8 = vadd.f32 %v1299_v37, %v1214_v32 }
 0x225   : > { %v8518_v6 = vpop.permute.xlu0 %1198  ;;  %vm536_vm0 = vmand %vm502_vm14, %vm519_vm15 }
 0x226   : > { %1514 = vperm.xlu1 %7188, %v1473_v38   ;;  %v1066_v41 = vadd.f32 %v1049_v44, %v923_v4 }
 0x227   : > { %v8520_v53 = vpop.permute.xlu1 %1361 }
 0x228   : > { %v1090_v12 = vadd.f32 %v8535_v16, %v1066_v41  ;;  %v1215_v41 = vmul.f32 %v8498_v29, %v8394_v46 }
 0x22a   : > { %v1232_v0 = vpop.permute.xlu0 %1231  ;;  %1828 = vrot.lane.b32.xlu1 %v11860_v45, %s7404_s22  ;;  %v1107_v63 = vmax.f32 %v1090_v12, 0.0  ;;  %v1303_v12 = vmul.f32 %v8507_v22, %v8457_v43  ;;  %v1216_v43 = vmul.f32 %v8498_v29, %v8421_v11  ;;  %v1403_v11 = vmul.f32 %v8514_v31, %v8432_v40 }
 0x22b   : > { %v1298_v33 = vmul.f32 %v8507_v22, %v1232_v0  ;;  %v1300_v0 = vmul.f32 %v8507_v22, %v8402_v10 }
 0x22c   : > { %v8530_v38 = vpop.permute.xlu1 %1178 }
 0x22d   : > { %v1315_v49 = vadd.f32 %v1298_v33, %v1213_v28  ;;  %v8550_v28 = vsel %vm536_vm0, 1.0, %v11789_v19  ;;  %v1317_v10 = vadd.f32 %v1300_v0, %v1215_v41  ;;  %v11862_v0 = vld [vmem:[#allocation56_spill] sm:$0xff] }
 0x22e   : > { %v1338_v58 = vpop.permute.xlu0 %1337  ;;  %1518 = vperm.xlu1 %7188, %v8434_v13   ;;  %11861 = vst [vmem:[#allocation61_spill] sm:$0xff] %v8550_v28  ;;  %v8562_v19 = vmul.f32 %v8550_v28, %v1107_v63 }
 0x22f   : > { %v1417_v44 = vadd.f32 %v1400_v54, %v1315_v49  ;;  %v1401_v4 = vmul.f32 %v8514_v31, %v1338_v58 }
 0x230   : > { %v7143_v45 = vpop.permute.xlu1 %7142 }
 0x231   : > { %v1434_v25 = vadd.f32 %v8535_v16, %v1417_v44  ;;  %v1418_v57 = vadd.f32 %v1401_v4, %v1316_v8  ;;  %v7144_v33 = vunpack.i.l.bf16 %v7143_v45  ;;  %v7145_v48 = vunpack.i.h.bf16 %v7143_v45  ;;  %v11863_v45 = vld [vmem:[#allocation57_spill] sm:$0xff] }
 0x232   : > { %v1342_v13 = vpop.permute.xlu0 %1341  ;;  %7194 = vset.pattern.permute.xlu1 %v11851_v9  ;;  %v1405_v44 = vmul.f32 %v8514_v31, %v8465_v26 }
 0x233   : > { %v1451_v37 = vmax.f32 %v1434_v25, 0.0  ;;  %v1435_v32 = vadd.f32 %v8535_v16, %v1418_v57  ;;  %v1402_v54 = vmul.f32 %v8514_v31, %v1342_v13  ;;  %v2879_v46 = vsel %vm2872_vm10, %v8140_v52, %v7144_v33 }
 0x234   : > { %v8559_v49 = vpop.permute.xlu1 %1480  ;;  %3207 = vmatmul.mubr.f32.gmra.mrb[12].mxu0 %v2879_v46  ;;  %v1218_v52 = vmul.f32 %v8498_v29, %v8428_v60  ;;  %v2880_v41 = vsel %vm2872_vm10, %v8175_v23, %v7145_v48 }
 0x235   : > { %v8565_v58 = vmul.f32 %v11862_v0, %v1451_v37  ;;  %v1452_v25 = vmax.f32 %v1435_v32, 0.0  ;;  %v1419_v8 = vadd.f32 %v1402_v54, %v1317_v10  ;;  %6190 = vmatprep.mubr.msk.f32.mxu0 %vm2872_vm10, %v8172_v1 }
 0x236   : > { %v1244_v4 = vpop.permute.xlu0 %1243  ;;  %v1320_v60 = vadd.f32 %v1303_v12, %v1218_v52  ;;  %v11864_v12 = vld [vmem:[#allocation59_spill] sm:$0xff] }
 0x237   : > { %v2206_v63 = vmul.f32 %v11863_v45, %v1452_v25  ;;  %v1436_v57 = vadd.f32 %v8535_v16, %v1419_v8  ;;  %v1301_v33 = vmul.f32 %v8507_v22, %v1244_v4  ;;  %v7183_v1 = vpack.i.bf16 %v8565_v58, %v8562_v19 }
 0x238   : > { %v1268_v10 = vpop.permute.xlu1 %1267  ;;  %3212 = vmatmul.mubr.f32.gmra.mrb[14].mxu0 %v2880_v41  ;;  %v1422_v48 = vadd.f32 %v1405_v44, %v1320_v60  ;;  %v2561_v32 = vrot.slane %v8565_v58, 1  ;;  %v11655_v54 = vrot.slane %v8565_v58, 7  ;;  %v1217_v44 = vmul.f32 %v8498_v29, %v8440_v18 }
 0x239   : > { %v1453_v26 = vmax.f32 %v1436_v57, 0.0  ;;  %v1318_v13 = vadd.f32 %v1301_v33, %v1216_v43  ;;  %7184 = vrot.lane.b32.xlu0 %v7183_v1, %s11703_s20  ;;  %6191 = vmatprep.mubr.msk.f32.mxu0 %vm2872_vm10, %v8192_v3  ;;  %v2562_v23 = vrot.slane %v2206_v63, 1  ;;  %v2358_v46 = vrot.slane %v2206_v63, 7 }
 0x23a   : > { %v1248_v37 = vpop.permute.xlu0 %1247  ;;  %v1439_v57 = vadd.f32 %v8535_v16, %v1422_v48  ;;  %v11866_v48 = vld [vmem:[#allocation9_spill] sm:$0xff] }
 0x23b   : > { %v2207_v25 = vmul.f32 %v11864_v12, %v1453_v26  ;;  %v1420_v8 = vadd.f32 %v1403_v11, %v1318_v13  ;;  %v1302_v40 = vmul.f32 %v8507_v22, %v1248_v37  ;;  %v8592_v43 = vsel %vm924_vm3, %v2561_v32, %v2562_v23  ;;  %v11865_v32 = vld [vmem:[#allocation62_spill] sm:$0xff] }
 0x23c   : > { %v1370_v52 = vpop.permute.xlu1 %1369  ;;  %v8597_v3 = vsel %vm692_vm2, %v11655_v54, %v2358_v46 }
 0x23d   : > { %v1437_v4 = vadd.f32 %v8535_v16, %v1420_v8  ;;  %1697 = vperm.xlu0 %7180, %v7594_v36   ;;  %v7189_v41 = vpack.i.bf16 %v2207_v25, %v2206_v63  ;;  %v2564_v1 = vrot.slane %v2207_v25, 1  ;;  %v2360_v60 = vrot.slane %v2207_v25, 7 }
 0x23e   : > { %v1350_v33 = vpop.permute.xlu0 %1349  ;;  %v1319_v26 = vadd.f32 %v1302_v40, %v1217_v44  ;;  %v1456_v25 = vmax.f32 %v1439_v57, 0.0  ;;  %v1219_v44 = vmul.f32 %v8498_v29, %v8472_v42  ;;  %v1407_v36 = vmul.f32 %v8514_v31, %v8520_v53 }
 0x23f   : > { %v1454_v11 = vmax.f32 %v1437_v4, 0.0  ;;  %v1404_v13 = vmul.f32 %v8514_v31, %v1350_v33  ;;  %7190 = vrot.lane.b32.xlu1 %v7189_v41, %s11703_s20  ;;  %v8607_v37 = vsel %vm924_vm3, %v2562_v23, %v2564_v1  ;;  %v8610_v18 = vsel %vm692_vm2, %v2358_v46, %v2360_v60  ;;  %v11867_v46 = vld [vmem:[#allocation13_spill] sm:$0xff] }
 0x240   : > { %v1222_v33 = vmul.f32 %v8498_v29, %v8463_v5  ;;  %v1409_v5 = vmul.f32 %v8514_v31, %v1370_v52 }
 0x241   : > { %v8613_v8 = vmul.f32 %v11865_v32, %v1454_v11  ;;  %v1421_v63 = vadd.f32 %v1404_v13, %v1319_v26  ;;  %1599 = vperm.xlu0 %7180, %v11866_v48   ;;  %v8616_v54 = vpop.permute.xlu1 %1186  ;;  %v1307_v11 = vmul.f32 %v8507_v22, %v1268_v10  ;;  %v1406_v26 = vmul.f32 %v8514_v31, %v8480_v17 }
 0x242   : > { %v1256_v40 = vpop.permute.xlu0 %1255  ;;  %v1220_v17 = vmul.f32 %v8498_v29, %v8491_v61 }
 0x243   : > { %v1438_v4 = vadd.f32 %v8535_v16, %v1421_v63  ;;  %v1304_v23 = vmul.f32 %v8507_v22, %v1256_v40  ;;  %1830 = vrot.lane.b32.xlu1 %v11867_v46, %s7404_s22  ;;  %v2566_v41 = vrot.slane %v8613_v8, 1  ;;  %v2362_v57 = vrot.slane %v8613_v8, 7  ;;  %v11868_v46 = vld [vmem:[#allocation67_spill] sm:$0xff] }
 0x244   : > { %v8636_v0 = vmul.f32 %v11868_v46, %v1456_v25  ;;  %v11871_v46 = vld [vmem:[#allocation72_spill] sm:$0xff] }
 0x245   : > { %v1455_v42 = vmax.f32 %v1438_v4, 0.0  ;;  %v1321_v13 = vadd.f32 %v1304_v23, %v1219_v44  ;;  %1701 = vperm.xlu0 %7180, %v7620_v47   ;;  %v7150_v63 = vpop.permute.xlu1 %7149  ;;  %v8633_v40 = vsel %vm924_vm3, %v2564_v1, %v2566_v41  ;;  %v8640_v48 = vsel %vm692_vm2, %v2360_v60, %v2362_v57  ;;  %v11870_v44 = vld [vmem:[#allocation65_spill] sm:$0xff] }
 0x246   : > { %v7151_v45 = vunpack.i.l.bf16 %v7150_v63  ;;  %v1260_v10 = vpop.permute.xlu0 %1259  ;;  %11869 = vst [vmem:[#allocation64_spill] sm:$0xff] %v8640_v48  ;;  %v1324_v1 = vadd.f32 %v1307_v11, %v1222_v33  ;;  %v7152_v25 = vunpack.i.h.bf16 %v7150_v63  ;;  %v2570_v33 = vrot.slane %v8636_v0, 1 }
 0x247   : > { %v2209_v4 = vmul.f32 %v11870_v44, %v1455_v42  ;;  %v1423_v23 = vadd.f32 %v1406_v26, %v1321_v13  ;;  %v1305_v47 = vmul.f32 %v8507_v22, %v1260_v10  ;;  %1607 = vperm.xlu1 %7194, %v7570_v27   ;;  %v11872_v10 = vld [vmem:[#allocation75_spill] sm:$0xff] }
 0x248   : > { %v2881_v52 = vsel %vm2872_vm10, %v11871_v46, %v7151_v45  ;;  %v1426_v42 = vadd.f32 %v1409_v5, %v1324_v1  ;;  %v2366_v45 = vrot.slane %v8636_v0, 7 }
 0x249   : > { %v1440_v60 = vadd.f32 %v8535_v16, %v1423_v23  ;;  %v1322_v48 = vadd.f32 %v1305_v47, %v1220_v17  ;;  %1603 = vperm.xlu0 %7180, %v7563_v24   ;;  %v1374_v61 = vpop.permute.xlu1 %1373  ;;  %3217 = vmatmul.mubr.f32.gmra.mrb[16].mxu0 %v2881_v52  ;;  %v2568_v26 = vrot.slane %v2209_v4, 1  ;;  %v2364_v11 = vrot.slane %v2209_v4, 7  ;;  %v11873_v17 = vld [vmem:[#allocation73_spill] sm:$0xff]  ;;  %v11881_v24 = vld [vmem:[#allocation68_spill] sm:$0xff] }
 0x24a   : > { %v1264_v13 = vpop.permute.xlu0 %1263  ;;  %6192 = vmatprep.mubr.msk.f32.mxu0 %vm2872_vm10, %v11872_v10  ;;  %v2882_v5 = vsel %vm2872_vm10, %v11873_v17, %v7152_v25  ;;  %v1443_v25 = vadd.f32 %v8535_v16, %v1426_v42  ;;  %v1223_v42 = vmul.f32 %v8498_v29, %v8616_v54 }
 0x24b   : > { %v1457_v63 = vmax.f32 %v1440_v60, 0.0  ;;  %v1424_v53 = vadd.f32 %v1407_v36, %v1322_v48  ;;  %v1306_v46 = vmul.f32 %v8507_v22, %v1264_v13  ;;  %1709 = vperm.xlu1 %7194, %v7657_v59   ;;  %v8660_v47 = vsel %vm924_vm3, %v2566_v41, %v2568_v26  ;;  %v11874_v48 = vld [vmem:[#allocation66_spill] sm:$0xff] }
 0x24c   : > { %v8665_v23 = vsel %vm924_vm3, %v2568_v26, %v2570_v33  ;;  %v8668_v1 = vsel %vm692_vm2, %v2362_v57, %v2364_v11  ;;  %v8671_v52 = vsel %vm692_vm2, %v2364_v11, %v2366_v45  ;;  %v1221_v36 = vmul.f32 %v8498_v29, %v8530_v38  ;;  %v11875_v13 = vld [vmem:[#allocation26_spill] sm:$0xff] }
 0x24d   : > { %v8676_v60 = vmul.f32 %v11874_v48, %v1457_v63  ;;  %v1441_v41 = vadd.f32 %v8535_v16, %v1424_v53  ;;  %1705 = vperm.xlu0 %7180, %v11875_v13   ;;  %3222 = vmatmul.mubr.f32.gmra.mrb[18].mxu0 %v2882_v5  ;;  %v11876_v53 = vld [vmem:[#allocation70_spill] sm:$0xff] }
 0x24e   : > { %v1366_v26 = vpop.permute.xlu0 %1365  ;;  %v1191_v10 = vpop.permute.xlu1 %1190  ;;  %6193 = vmatprep.mubr.msk.f32.mxu0 %vm2872_vm10, %v8248_v20  ;;  %v1323_v11 = vadd.f32 %v1306_v46, %v1221_v36  ;;  %v11877_v20 = vld [vmem:[#allocation18_spill] sm:$0xff]  ;;  %v1460_v46 = vmax.f32 %v1443_v25, 0.0  ;;  %v1410_v25 = vmul.f32 %v8514_v31, %v1374_v61 }
 0x24f   : > { %v1458_v57 = vmax.f32 %v1441_v41, 0.0  ;;  %v1408_v17 = vmul.f32 %v8514_v31, %v1366_v26  ;;  %7195 = vset.pattern.permute.xlu1 %v11786_v62  ;;  %v2572_v38 = vrot.slane %v8676_v60, 1  ;;  %v2368_v63 = vrot.slane %v8676_v60, 7 }
 0x250   : > { %1526 = vperm.xlu1 %7195, %v8453_v14   ;;  %v7196_v41 = vpack.i.bf16 %v2209_v4, %v8613_v8 }
 0x251   : > { %v8691_v5 = vmul.f32 %v11876_v53, %v1458_v57  ;;  %v1425_v27 = vadd.f32 %v1408_v17, %v1323_v11  ;;  %1832 = vrot.lane.b32.xlu0 %v11877_v20, %s7404_s22  ;;  %v8697_v14 = vsel %vm924_vm3, %v2570_v33, %v2572_v38  ;;  %v8700_v26 = vsel %vm692_vm2, %v2366_v45, %v2368_v63  ;;  %v11878_v33 = vld [vmem:[#allocation14_spill] sm:$0xff]  ;;  %v11880_v20 = vld [vmem:[#allocation71_spill] sm:$0xff] }
 0x252   : > { %v1272_v36 = vpop.permute.xlu0 %1271 }
 0x253   : > { %v1442_v13 = vadd.f32 %v8535_v16, %v1425_v27  ;;  %v1308_v54 = vmul.f32 %v8507_v22, %v1272_v36  ;;  %v1378_v57 = vpop.permute.xlu1 %1377  ;;  %v2574_v11 = vrot.slane %v8691_v5, 1  ;;  %v2370_v17 = vrot.slane %v8691_v5, 7 }
 0x254   : > { %7197 = vrot.lane.b32.xlu1 %v7196_v41, %s11703_s20  ;;  %v8717_v36 = vmul.f32 %v11880_v20, %v1460_v46  ;;  %v11883_v46 = vld [vmem:[#allocation23_spill] sm:$0xff] }
 0x255   : > { %v1459_v8 = vmax.f32 %v1442_v13, 0.0  ;;  %v1325_v4 = vadd.f32 %v1308_v54, %v1223_v42  ;;  %1611 = vperm.xlu0 %7180, %v11878_v33   ;;  %7201 = vset.pattern.permute.xlu1 %v11851_v9  ;;  %v8711_v45 = vsel %vm924_vm3, %v2572_v38, %v2574_v11  ;;  %v8714_v27 = vsel %vm692_vm2, %v2368_v63, %v2370_v17  ;;  %v11882_v54 = vld [vmem:[#allocation32_spill] sm:$0xff] }
 0x256   : > { %11879 = vst [vmem:[#allocation69_spill] sm:$0xff] %v8714_v27  ;;  %v1276_v59 = vpop.permute.xlu0 %1275  ;;  %v1224_v13 = vmul.f32 %v8498_v29, %v1191_v10  ;;  %v1411_v63 = vmul.f32 %v8514_v31, %v1378_v57  ;;  %v11887_v27 = vld [vmem:[#allocation74_spill] sm:$0xff] }
 0x257   : > { %v8720_v61 = vmul.f32 %v11881_v24, %v1459_v8  ;;  %v1427_v42 = vadd.f32 %v1410_v25, %v1325_v4  ;;  %v1309_v41 = vmul.f32 %v8507_v22, %v1276_v59  ;;  %v2578_v24 = vrot.slane %v8717_v36, 1 }
 0x258   : > { %1713 = vperm.xlu1 %7201, %v11882_v54   ;;  %v1195_v33 = vpop.permute.xlu1 %1194  ;;  %v2374_v59 = vrot.slane %v8717_v36, 7 }
 0x259   : > { %v1444_v38 = vadd.f32 %v8535_v16, %v1427_v42  ;;  %v1326_v44 = vadd.f32 %v1309_v41, %v1224_v13  ;;  %1834 = vrot.lane.b32.xlu0 %v11883_v46, %s7404_s22  ;;  %v2576_v8 = vrot.slane %v8720_v61, 1  ;;  %v2372_v10 = vrot.slane %v8720_v61, 7 }
 0x25a   : > { %v1280_v20 = vpop.permute.xlu0 %1279 }
 0x25b   : > { %v1461_v25 = vmax.f32 %v1444_v38, 0.0  ;;  %v1428_v4 = vadd.f32 %v1411_v63, %v1326_v44  ;;  %v1310_v54 = vmul.f32 %v8507_v22, %v1280_v20  ;;  %v8736_v13 = vsel %vm924_vm3, %v2574_v11, %v2576_v8 }
 0x25c   : > { %7202 = vset.pattern.permute.xlu1 %v11786_v62  ;;  %v7159_v57 = vpop.permute.xlu1 %7158  ;;  %v8739_v42 = vsel %vm924_vm3, %v2576_v8, %v2578_v24  ;;  %v8742_v41 = vsel %vm692_vm2, %v2370_v17, %v2372_v10  ;;  %v8745_v46 = vsel %vm692_vm2, %v2372_v10, %v2374_v59  ;;  %v1225_v20 = vmul.f32 %v8498_v29, %v1195_v33 }
 0x25d   : > { %11884 = vst [vmem:[#allocation7_spill] sm:$0xff] %v8739_v42  ;;  %11885 = vst [vmem:[#allocation13_spill] sm:$0xff] %v8742_v41  ;;  %v8748_v38 = vmul.f32 %v11887_v27, %v1461_v25  ;;  %v1445_v44 = vadd.f32 %v8535_v16, %v1428_v4  ;;  %1615 = vperm.xlu0 %7180, %v7581_v30   ;;  %1530 = vperm.xlu1 %7202, %v8559_v49   ;;  %v7160_v11 = vunpack.i.l.bf16 %v7159_v57  ;;  %v11889_v27 = vld [vmem:[#allocation77_spill] sm:$0xff] }
 0x25e   : > { %11886 = vst [vmem:[#allocation72_spill] sm:$0xff] %v8745_v46  ;;  %v1382_v63 = vpop.permute.xlu0 %1381  ;;  %v1327_v42 = vadd.f32 %v1310_v54, %v1225_v20  ;;  %v7161_v41 = vunpack.i.h.bf16 %v7159_v57  ;;  %v11888_v46 = vld [vmem:[#allocation76_spill] sm:$0xff] }
 0x25f   : > { %v1462_v8 = vmax.f32 %v1445_v44, 0.0  ;;  %v1412_v17 = vmul.f32 %v8514_v31, %v1382_v63  ;;  %v2883_v25 = vsel %vm2872_vm10, %v11888_v46, %v7160_v11  ;;  %v2580_v4 = vrot.slane %v8748_v38, 1  ;;  %v11890_v44 = vld [vmem:[#allocation20_spill] sm:$0xff] }
 0x260   : > { %v8755_v10 = vpop.permute.xlu1 %1488  ;;  %v2376_v33 = vrot.slane %v8748_v38, 7  ;;  %3227 = vmatmul.mubr.f32.gmra.mrb[20].mxu0 %v2883_v25 }
 0x261   : > { %v8762_v30 = vmul.f32 %v11889_v27, %v1462_v8  ;;  %v1429_v49 = vadd.f32 %v1412_v17, %v1327_v42  ;;  %1836 = vrot.lane.b32.xlu0 %v11890_v44, %s7404_s22  ;;  %7203 = vset.pattern.permute.xlu1 %v11851_v9  ;;  %v8772_v57 = vsel %vm924_vm3, %v2578_v24, %v2580_v4  ;;  %v11891_v42 = vld [vmem:[#allocation19_spill] sm:$0xff]  ;;  %v11892_v17 = vld [vmem:[#allocation78_spill] sm:$0xff] }
 0x262   : > { %6194 = vmatprep.mubr.msk.f32.mxu0 %vm2872_vm10, %v8273_v39  ;;  %v8769_v54 = vpop.permute.xlu0 %1490  ;;  %v8775_v46 = vsel %vm692_vm2, %v2374_v59, %v2376_v33  ;;  %1717 = vperm.xlu1 %7203, %v11891_v42   ;;  %v2884_v39 = vsel %vm2872_vm10, %v11892_v17, %v7161_v41  ;;  %v1226_v42 = vmul.f32 %v8498_v29, %v8518_v6  ;;  %v11893_v41 = vld [vmem:[#allocation79_spill] sm:$0xff] }
 0x263   : > { %v1446_v20 = vadd.f32 %v8535_v16, %v1429_v49  ;;  %v2582_v11 = vrot.slane %v8762_v30, 1  ;;  %v2378_v63 = vrot.slane %v8762_v30, 7  ;;  %v7205_v6 = vpack.i.bf16 %v8676_v60, %v8636_v0  ;;  %v11894_v60 = vld [vmem:[#allocation25_spill] sm:$0xff] }
 0x264   : > { %v1284_v8 = vpop.permute.xlu1 %1283  ;;  %3232 = vmatmul.mubr.f32.gmra.mrb[22].mxu0 %v2884_v39 }
 0x265   : > { %v1463_v25 = vmax.f32 %v1446_v20, 0.0  ;;  %v1311_v44 = vmul.f32 %v8507_v22, %v1284_v8  ;;  %1619 = vperm.xlu0 %7180, %v7591_v35   ;;  %v8786_v24 = vsel %vm924_vm3, %v2580_v4, %v2582_v11  ;;  %v8789_v59 = vsel %vm692_vm2, %v2376_v33, %v2378_v63  ;;  %6195 = vmatprep.mubr.msk.f32.mxu0 %vm2872_vm10, %v8297_v55 }
 0x266   : > { %v1288_v49 = vpop.permute.xlu0 %1287  ;;  %7204 = vset.pattern.permute.xlu1 %v11786_v62 }
 0x267   : > { %v8796_v20 = vmul.f32 %v11893_v41, %v1463_v25  ;;  %1534 = vperm.xlu1 %7204, %v8468_v7   ;;  %v1328_v4 = vadd.f32 %v1311_v44, %v1226_v42 }
 0x268   : > { %v1386_v8 = vpop.permute.xlu1 %1385 }
 0x269   : > { %v1413_v17 = vmul.f32 %v8514_v31, %v1386_v8  ;;  %1721 = vperm.xlu0 %7180, %v7689_v2   ;;  %v2584_v33 = vrot.slane %v8796_v20, 1  ;;  %v2380_v55 = vrot.slane %v8796_v20, 7 }
 0x26a   : > { %v8812_v7 = vpop.permute.xlu0 %1492 }
 0x26b   : > { %v1430_v39 = vadd.f32 %v1413_v17, %v1328_v4  ;;  %v8807_v25 = vsel %vm924_vm3, %v2582_v11, %v2584_v33  ;;  %v8810_v35 = vsel %vm692_vm2, %v2378_v63, %v2380_v55  ;;  %7206 = vrot.lane.b32.xlu1 %v7205_v6, %s11703_s20 }
 0x26c   : > { %7210 = vset.pattern.permute.xlu1 %v11851_v9 }
 0x26d   : > { %v1447_v42 = vadd.f32 %v8535_v16, %v1430_v39  ;;  %1840 = vrot.lane.b32.xlu0 %v7588_v34, %s7404_s22  ;;  %v1203_v44 = vpop.permute.xlu1 %1202  ;;  %v1312_v39 = vmul.f32 %v8507_v22, %v1288_v49 }
 0x26e   : > { %v1227_v8 = vmul.f32 %v8498_v29, %v1203_v44  ;;  %v1292_v4 = vpop.permute.xlu0 %1291 }
 0x26f   : > { %v1464_v0 = vmax.f32 %v1447_v42, 0.0  ;;  %1838 = vrot.lane.b32.xlu1 %v11894_v60, %s7404_s22  ;;  %v11895_v60 = vld [vmem:[#allocation22_spill] sm:$0xff] }
 0x270   : > { %v1329_v41 = vadd.f32 %v1312_v39, %v1227_v8  ;;  %v11900_v8 = vld [vmem:[#allocation86_spill] sm:$0xff]  ;;  %v11902_v39 = vld [vmem:[#allocation27_spill] sm:$0xff] }
 0x271   : > { %v8822_v11 = vmul.f32 %v8279_v15, %v1464_v0  ;;  %1627 = vperm.xlu0 %7180, %v7649_v56   ;;  %v7167_v63 = vpop.permute.xlu1 %7166 }
 0x272   : > { %v7168_v17 = vunpack.i.l.bf16 %v7167_v63  ;;  %v7169_v42 = vunpack.i.h.bf16 %v7167_v63  ;;  %v8843_v63 = vpop.permute.xlu0 %1494 }
 0x273   : > { %v2586_v6 = vrot.slane %v8822_v11, 1  ;;  %v2382_v34 = vrot.slane %v8822_v11, 7  ;;  %1623 = vperm.xlu1 %7210, %v7631_v50   ;;  %v11899_v50 = vld [vmem:[#allocation33_spill] sm:$0xff] }
 0x274   : > { %v2885_v0 = vsel %vm2872_vm10, %v8276_v21, %v7168_v17  ;;  %v11897_v17 = vld [vmem:[#allocation30_spill] sm:$0xff] }
 0x275   : > { %1842 = vrot.lane.b32.xlu0 %v11895_v60, %s7404_s22  ;;  %v1390_v56 = vpop.permute.xlu1 %1389  ;;  %3237 = vmatmul.mubr.f32.gmra.mrb[24].mxu0 %v2885_v0  ;;  %v8835_v44 = vsel %vm924_vm3, %v2584_v33, %v2586_v6  ;;  %v8838_v2 = vsel %vm692_vm2, %v2380_v55, %v2382_v34  ;;  %v11898_v60 = vld [vmem:[#allocation81_spill] sm:$0xff] }
 0x276   : > { %11896 = vst [vmem:[#allocation75_spill] sm:$0xff] %v8838_v2  ;;  %v1414_v49 = vmul.f32 %v8514_v31, %v1390_v56  ;;  %6196 = vmatprep.mubr.msk.f32.mxu0 %vm2872_vm10, %v8322_v51  ;;  %v2886_v0 = vsel %vm2872_vm10, %v11898_v60, %v7169_v42  ;;  %v1313_v42 = vmul.f32 %v8507_v22, %v1292_v4 }
 0x277   : > { %1725 = vperm.xlu1 %7210, %v11897_v17   ;;  %v11909_v17 = vld [vmem:[#allocation84_spill] sm:$0xff] }
 0x278   : > { %v1431_v21 = vadd.f32 %v1414_v49, %v1329_v41  ;;  %v11901_v41 = vld [vmem:[#allocation63_spill] sm:$0xff]  ;;  %v11903_v49 = vld [vmem:[#allocation82_spill] sm:$0xff] }
 0x279   : > { %1631 = vperm.xlu0 %7180, %v11899_v50   ;;  %3242 = vmatmul.mubr.f32.gmra.mrb[26].mxu0 %v2886_v0 }
 0x27a   : > { %v1448_v33 = vadd.f32 %v8535_v16, %v1431_v21  ;;  %v1207_v55 = vpop.permute.xlu1 %1206  ;;  %6197 = vmatprep.mubr.msk.f32.mxu0 %vm2872_vm10, %v11900_v8  ;;  %v1296_v21 = vpop.permute.xlu0 %1295  ;;  %v7212_v8 = vpack.i.bf16 %v8720_v61, %v8691_v5 }
 0x27b   : > { %v1228_v51 = vmul.f32 %v8498_v29, %v1207_v55  ;;  %7211 = vset.pattern.permute.xlu1 %v11786_v62 }
 0x27c   : > { %v1465_v56 = vmax.f32 %v1448_v33, 0.0  ;;  %1542 = vperm.xlu1 %7211, %v11901_v41   ;;  %v11904_v41 = vld [vmem:[#allocation36_spill] sm:$0xff] }
 0x27d   : > { %1844 = vrot.lane.b32.xlu0 %v11902_v39, %s7404_s22  ;;  %v1330_v33 = vadd.f32 %v1313_v42, %v1228_v51  ;;  %v1314_v42 = vmul.f32 %v8507_v22, %v1296_v21 }
 0x27e   : > { %v8859_v60 = vmul.f32 %v11903_v49, %v1465_v56  ;;  %v1398_v5 = vpop.permute.xlu0 %1397 }
 0x27f   : > { %v1394_v0 = vpop.permute.xlu1 %1393 }
 0x280   : > { %v1415_v55 = vmul.f32 %v8514_v31, %v1394_v0  ;;  %v2588_v50 = vrot.slane %v8859_v60, 1  ;;  %7213 = vrot.lane.b32.xlu1 %v7212_v8, %s11703_s20  ;;  %v2384_v39 = vrot.slane %v8859_v60, 7  ;;  %v11907_v0 = vld [vmem:[#allocation35_spill] sm:$0xff] }
 0x281   : > { %1635 = vperm.xlu0 %7180, %v11904_v41   ;;  %7217 = vset.pattern.permute.xlu1 %v11851_v9  ;;  %v11908_v41 = vld [vmem:[#allocation41_spill] sm:$0xff] }
 0x282   : > { %v1432_v4 = vadd.f32 %v1415_v55, %v1330_v33  ;;  %v8870_v56 = vsel %vm924_vm3, %v2586_v6, %v2588_v50  ;;  %v8873_v49 = vsel %vm692_vm2, %v2382_v34, %v2384_v39  ;;  %v1416_v55 = vmul.f32 %v8514_v31, %v1398_v5 }
 0x283   : > { %11905 = vst [vmem:[#allocation73_spill] sm:$0xff] %v8870_v56  ;;  %11906 = vst [vmem:[#allocation18_spill] sm:$0xff] %v8873_v49  ;;  %v2559_v49 = vrot.slane %v8562_v19, 1  ;;  %v11914_v56 = vld [vmem:[#allocation42_spill] sm:$0xff] }
 0x284   : > { %v1449_v61 = vadd.f32 %v8535_v16, %v1432_v4  ;;  %v1211_v51 = vpop.permute.xlu1 %1210  ;;  %1729 = vperm.xlu1 %7217, %v11907_v0   ;;  %v11910_v0 = vld [vmem:[#allocation37_spill] sm:$0xff] }
 0x285   : > { %v1229_v8 = vmul.f32 %v8498_v29, %v1211_v51  ;;  %1737 = vperm.xlu0 %7180, %v11908_v41  }
 0x286   : > { %v1466_v33 = vmax.f32 %v1449_v61, 0.0 }
 0x287   : > { %v1331_v6 = vadd.f32 %v1314_v42, %v1229_v8  ;;  %v11911_v8 = vld [vmem:[#allocation83_spill] sm:$0xff] }
 0x288   : > { %v8882_v2 = vmul.f32 %v11909_v17, %v1466_v33  ;;  %v7176_v34 = vpop.permute.xlu1 %7175  ;;  %7218 = vset.pattern.permute.xlu1 %v11786_v62 }
 0x289   : > { %v1433_v4 = vadd.f32 %v1416_v55, %v1331_v6  ;;  %v7177_v21 = vunpack.i.l.bf16 %v7176_v34  ;;  %1848 = vrot.lane.b32.xlu0 %v11910_v0, %s7404_s22  ;;  %1546 = vperm.xlu1 %7218, %v8755_v10   ;;  %v7178_v42 = vunpack.i.h.bf16 %v7176_v34  ;;  %v11912_v55 = vld [vmem:[#allocation85_spill] sm:$0xff] }
 0x28a   : > { %v2590_v61 = vrot.slane %v8882_v2, 1  ;;  %v2386_v5 = vrot.slane %v8882_v2, 7  ;;  %v11913_v6 = vrot.slane %v11912_v55, 1 }
 0x28b   : > { %v1450_v51 = vadd.f32 %v8535_v16, %v1433_v4  ;;  %v2887_v33 = vsel %vm2872_vm10, %v11911_v8, %v7177_v21  ;;  %v11915_v4 = vld [vmem:[#allocation38_spill] sm:$0xff]  ;;  %v11916_v21 = vld [vmem:[#allocation87_spill] sm:$0xff] }
 0x28c   : > { %v8894_v17 = vpop.permute.xlu1 %1496  ;;  %3247 = vmatmul.mubr.f32.gmra.mrb[28].mxu0 %v2887_v33  ;;  %v2560_v41 = vsel %vm924_vm3, %v11913_v6, %v2559_v49  ;;  %v8900_v0 = vsel %vm924_vm3, %v2588_v50, %v2590_v61  ;;  %v8903_v10 = vsel %vm692_vm2, %v2384_v39, %v2386_v5  ;;  %v2888_v8 = vsel %vm2872_vm10, %v11916_v21, %v7178_v42  ;;  %v11919_v6 = vld [vmem:[#allocation45_spill] sm:$0xff] }
 0x28d   : > { %v1467_v15 = vmax.f32 %v1450_v51, 0.0  ;;  %1643 = vperm.xlu0 %7180, %v11914_v56   ;;  %6198 = vmatprep.mubr.msk.f32.mxu0 %vm2872_vm10, %v2560_v41  ;;  %v2664_v39 = vsel %vm924_vm3, %v2559_v49, 0.0  ;;  %v11917_v51 = vld [vmem:[#allocation40_spill] sm:$0xff]  ;;  %v7221_v21 = vpack.i.bf16 %v8748_v38, %v8717_v36 }
 0x28e   : > { %7219 = vset.pattern.permute.xlu1 %v11851_v9  ;;  %v11925_v38 = vld [vmem:[#allocation44_spill] sm:$0xff] }
 0x28f   : > { %v8909_v34 = vmul.f32 %v8550_v28, %v1467_v15  ;;  %1733 = vperm.xlu1 %7219, %v11915_v4   ;;  %v8952_v28 = vpop.permute.xlu0 %1693  ;;  %v11927_v56 = vld [vmem:[#allocation60_spill] sm:$0xff] }
 0x290   : > { %v8914_v50 = vpop.permute.xlu1 %1591  ;;  %3252 = vmatmul.mubr.f32.gmra.mrb[30].mxu0 %v2888_v8 }
 0x291   : > { %1850 = vrot.lane.b32.xlu0 %v11917_v51, %s7404_s22  ;;  %6199 = vmatprep.mubr.msk.f32.mxu0 %vm2872_vm10, %v2664_v39  ;;  %v11668_v41 = vrot.slane %v8909_v34, 1  ;;  %v2388_v15 = vrot.slane %v8909_v34, 7  ;;  %v11920_v39 = vld [vmem:[#allocation43_spill] sm:$0xff] }
 0x292   : > { %v11923_v51 = vld [vmem:[#allocation39_spill] sm:$0xff] }
 0x293   : > { %7220 = vset.pattern.permute.xlu1 %v11786_v62  ;;  %v8926_v42 = vsel %vm924_vm3, %v2590_v61, %v11668_v41  ;;  %v8929_v33 = vsel %vm692_vm2, %v2386_v5, %v2388_v15  ;;  %v11921_v61 = vld [vmem:[#allocation31_spill] sm:$0xff]  ;;  %v11922_v5 = vld [vmem:[#allocation48_spill] sm:$0xff]  ;;  %v11924_v15 = vld [vmem:[#allocation53_spill] sm:$0xff] }
 0x294   : > { %11918 = vst [vmem:[#allocation23_spill] sm:$0xff] %v8929_v33  ;;  %1550 = vperm.xlu1 %7220, %v8769_v54   ;;  %v1499_v49 = vpop.permute.xlu1 %1498 }
 0x295   : > { %1647 = vperm.xlu0 %7180, %v11919_v6   ;;  %v11928_v6 = vrot.slane %v11912_v55, 7 }
 0x298   : > { %7222 = vrot.lane.b32.xlu1 %v7221_v21, %s11703_s20  ;;  %v8936_v8 = vpop.permute.xlu1 %1510  ;;  %v11926_v21 = vld [vmem:[#allocation88_spill] sm:$0xff] }
 0x299   : > { %1852 = vrot.lane.b32.xlu0 %v11920_v39, %s7404_s22  ;;  %7226 = vset.pattern.permute.xlu1 %v11851_v9  ;;  %v1503_v41 = vsel %vm692_vm2, 0.0, %v11926_v21  ;;  %v7228_v21 = vpack.i.bf16 %v8796_v20, %v8762_v30  ;;  %v11930_v30 = vld [vmem:[#allocation47_spill] sm:$0xff] }
 0x29c   : > { %1846 = vrot.lane.b32.xlu1 %v11921_v61, %s7404_s22 }
 0x29d   : > { %1651 = vperm.xlu0 %7180, %v11922_v5   ;;  %v8944_v54 = vpop.permute.xlu1 %1595 }
 0x2a0   : > { %1639 = vperm.xlu1 %7226, %v11923_v51  }
 0x2a1   : > { %1753 = vperm.xlu0 %7180, %v11924_v15   ;;  %v1501_v36 = vpop.permute.xlu1 %1500  ;;  %v2355_v15 = vrot.slane %v8562_v19, 7 }
 0x2a4   : > { %1741 = vperm.xlu1 %7226, %v11925_v38   ;;  %v2356_v38 = vsel %vm692_vm2, %v11928_v6, %v2355_v15 }
 0x2a5   : > { %7242 = vset.pattern.permute.xlu0 %v11786_v62  ;;  %v1515_v39 = vpop.permute.xlu1 %1514 }
 0x2a6   : > { %1506 = vperm.xlu0 %7242, %v1503_v41  }
 0x2a8   : > { %7227 = vset.pattern.permute.xlu1 %v11786_v62 }
 0x2a9   : > { %1558 = vperm.xlu1 %7227, %v8843_v63   ;;  %v8956_v61 = vpop.permute.xlu1 %1828  ;;  %v11929_v63 = vld [vmem:[#allocation58_spill] sm:$0xff] }
 0x2aa   : > { %1522 = vperm.xlu0 %7242, %v11927_v56   ;;  %v11931_v56 = vrot.slane %v8565_v58, 7 }
 0x2ab   : > { %v7185_v51 = vpop.permute.xlu0 %7184 }
 0x2ac   : > { %v7186_v5 = vunpack.i.l.bf16 %v7185_v51  ;;  %v7187_v33 = vunpack.i.h.bf16 %v7185_v51  ;;  %v2525_v55 = vsel %vm692_vm2, 0.0, %v11931_v56  ;;  %v7237_v51 = vpack.i.bf16 %v8859_v60, %v8822_v11 }
 0x2ad   : > { %7229 = vrot.lane.b32.xlu1 %v7228_v21, %s11703_s20  ;;  %v1519_v41 = vpop.permute.xlu1 %1518 }
 0x2ae   : > { %1538 = vperm.xlu0 %7242, %v11929_v63   ;;  %7233 = vset.pattern.permute.xlu1 %v11851_v9  ;;  %v2889_v19 = vsel %vm2872_vm10, %v2356_v38, %v7186_v5  ;;  %v2890_v6 = vsel %vm2872_vm10, %v2525_v55, %v7187_v33  ;;  %v1576_v55 = vmul.f32 %v8498_v29, %v1519_v41 }
 0x2af   : > { %3257 = vmatmul.mubr.f32.gmra.mrb[32].mxu0 %v2889_v19 }
 0x2b0   : > { %6200 = vmatprep.mubr.msk.f32.mxu0 %vm2872_vm10, %v8592_v43  ;;  %v11932_v43 = vld [vmem:[#allocation50_spill] sm:$0xff] }
 0x2b1   : > { %1745 = vperm.xlu1 %7233, %v11930_v30   ;;  %v7191_v20 = vpop.permute.xlu1 %7190 }
 0x2b2   : > { %v7192_v21 = vunpack.i.l.bf16 %v7191_v20  ;;  %1554 = vperm.xlu0 %7242, %v8812_v7   ;;  %v7193_v5 = vunpack.i.h.bf16 %v7191_v20  ;;  %v11933_v7 = vld [vmem:[#allocation51_spill] sm:$0xff]  ;;  %v11935_v20 = vld [vmem:[#allocation46_spill] sm:$0xff] }
 0x2b3   : > { %3262 = vmatmul.mubr.f32.gmra.mrb[34].mxu0 %v2890_v6  ;;  %v11937_v6 = vld [vmem:[#allocation49_spill] sm:$0xff] }
 0x2b4   : > { %6201 = vmatprep.mubr.msk.f32.mxu0 %vm2872_vm10, %v8607_v37  ;;  %v2891_v58 = vsel %vm2872_vm10, %v8597_v3, %v7192_v21  ;;  %v2892_v37 = vsel %vm2872_vm10, %v8610_v18, %v7193_v5  ;;  %v1575_v18 = vmul.f32 %v8498_v29, %v1515_v39 }
 0x2b5   : > { %7234 = vset.pattern.permute.xlu1 %v11786_v62  ;;  %v8997_v33 = vpop.permute.xlu1 %1830 }
 0x2b6   : > { %1562 = vperm.xlu1 %7234, %v8894_v17   ;;  %1570 = vperm.xlu0 %7242, %v1501_v36  }
 0x2b7   : > { %3267 = vmatmul.mubr.f32.gmra.mrb[36].mxu0 %v2891_v58 }
 0x2b8   : > { %6202 = vmatprep.mubr.msk.f32.mxu0 %vm2872_vm10, %v8633_v40 }
 0x2ba   : > { %7235 = vset.pattern.permute.xlu1 %v11851_v9  ;;  %1856 = vrot.lane.b32.xlu0 %v11932_v43, %s7404_s22 }
 0x2bb   : > { %1749 = vperm.xlu1 %7235, %v11933_v7   ;;  %3272 = vmatmul.mubr.f32.gmra.mrb[38].mxu0 %v2892_v37 }
 0x2bc   : > { %v8991_v17 = vpop.permute.xlu0 %1697  ;;  %6203 = vmatprep.mubr.msk.f32.mxu0 %vm2872_vm10, %v8660_v47 }
 0x2bf   : > { %7236 = vset.pattern.permute.xlu1 %v11786_v62 }
 0x2c0   : > { %1566 = vperm.xlu1 %7236, %v1499_v49   ;;  %v1600_v3 = vpop.permute.xlu0 %1599 }
 0x2c1   : > { %v1660_v40 = vmul.f32 %v8507_v22, %v1600_v3 }
 0x2c3   : > { %v1677_v36 = vadd.f32 %v1660_v40, %v1575_v18 }
 0x2c4   : > { %7238 = vrot.lane.b32.xlu1 %v7237_v51, %s11703_s20  ;;  %v1702_v15 = vpop.permute.xlu0 %1701  ;;  %v11938_v51 = vld [vmem:[#allocation55_spill] sm:$0xff] }
 0x2c5   : > { %v1762_v38 = vmul.f32 %v8514_v31, %v1702_v15  ;;  %7243 = vset.pattern.permute.xlu1 %v11851_v9 }
 0x2c6   : > { %v9005_v47 = vpop.permute.xlu1 %1607  ;;  %v9007_v49 = vpop.f32.mrb[0].mxu0 }
 0x2c7   : > { %11934 = vst [vmem:[#allocation76_spill] sm:$0xff] %v9007_v49  ;;  %v1779_v63 = vadd.f32 %v1762_v38, %v1677_v36  ;;  %v3180_v19 = vpop.f32.mrb[1].mxu0 }
 0x2c8   : > { %1854 = vrot.lane.b32.xlu1 %v11935_v20, %s7404_s22  ;;  %v1604_v11 = vpop.permute.xlu0 %1603 }
 0x2c9   : > { %v1661_v60 = vmul.f32 %v8507_v22, %v1604_v11  ;;  %v1796_v9 = vadd.f32 %v8535_v16, %v1779_v63  ;;  %v1863_v63 = vsel %vm692_vm2, 0.0, %v8956_v61 }
 0x2ca   : > { %v9012_v39 = vpop.permute.xlu1 %1709  ;;  %v9014_v56 = vpop.f32.mrb[2].mxu0 }
 0x2cb   : > { %11936 = vst [vmem:[#allocation20_spill] sm:$0xff] %v9014_v56  ;;  %v3185_v21 = vpop.f32.mrb[3].mxu0  ;;  %v1678_v58 = vadd.f32 %v1661_v60, %v1576_v55  ;;  %v1813_v37 = vmax.f32 %v1796_v9, 0.0  ;;  %v11939_v55 = vld [vmem:[#allocation64_spill] sm:$0xff] }
 0x2cc   : > { %1655 = vperm.xlu1 %7243, %v11937_v6   ;;  %v1706_v5 = vpop.permute.xlu0 %1705  ;;  %v7245_v21 = vpack.i.bf16 %v8909_v34, %v8882_v2 }
 0x2cd   : > { %v1763_v43 = vmul.f32 %v8514_v31, %v1706_v5  ;;  %v9025_v41 = vmul.f32 %v11864_v12, %v1813_v37 }
 0x2cf   : > { %v1780_v3 = vadd.f32 %v1763_v43, %v1678_v58  ;;  %v9020_v40 = vpop.permute.xlu1 %1526  ;;  %v11672_v61 = vrot.slane %v9025_v41, 1  ;;  %v11671_v43 = vrot.slane %v9025_v41, 7 }
 0x2d0   : > { %1757 = vperm.xlu1 %7243, %v11938_v51   ;;  %v1833_v18 = vpop.permute.xlu0 %1832 }
 0x2d1   : > { %v1797_v15 = vadd.f32 %v8535_v16, %v1780_v3 }
 0x2d3   : > { %v1814_v36 = vmax.f32 %v1797_v15, 0.0  ;;  %v7198_v38 = vpop.permute.xlu1 %7197 }
 0x2d4   : > { %7244 = vset.pattern.permute.xlu1 %v11786_v62  ;;  %v7199_v19 = vunpack.i.l.bf16 %v7198_v38  ;;  %v9030_v20 = vpop.permute.xlu0 %1611  ;;  %v7200_v60 = vunpack.i.h.bf16 %v7198_v38 }
 0x2d5   : > { %v9033_v11 = vmul.f32 %v11865_v32, %v1814_v36  ;;  %1866 = vperm.xlu1 %7244, %v1863_v63  }
 0x2d6   : > { %v2893_v9 = vsel %vm2872_vm10, %v11939_v55, %v7199_v19  ;;  %v2894_v36 = vsel %vm2872_vm10, %v8668_v1, %v7200_v60  ;;  %v11943_v19 = vld [vmem:[#allocation52_spill] sm:$0xff] }
 0x2d7   : > { %v9039_v5 = vpop.permute.xlu1 %1713  ;;  %3277 = vmatmul.mubr.f32.gmra.mrb[40].mxu0 %v2893_v9  ;;  %v11674_v58 = vrot.slane %v9033_v11, 1  ;;  %v11673_v37 = vrot.slane %v9033_v11, 7 }
 0x2d8   : > { %v9045_v3 = vpop.permute.xlu0 %1834  ;;  %6204 = vmatprep.mubr.msk.f32.mxu0 %vm2872_vm10, %v8665_v23 }
 0x2d9   : > { %7246 = vrot.lane.b32.xlu1 %v7245_v21, %s11703_s20  ;;  %v9055_v2 = vsel %vm924_vm3, %v11672_v61, %v11674_v58  ;;  %v9062_v15 = vsel %vm692_vm2, %v11671_v43, %v11673_v37 }
 0x2da   : > { %11940 = vst [vmem:[#allocation78_spill] sm:$0xff] %v9055_v2  ;;  %11941 = vst [vmem:[#allocation25_spill] sm:$0xff] %v9062_v15  ;;  %v11955_v15 = vld [vmem:[#allocation71_spill] sm:$0xff] }
 0x2db   : > { %v9066_v23 = vpop.f32.mrb[4].mxu0  ;;  %3282 = vmatmul.mubr.f32.gmra.mrb[42].mxu0 %v2894_v36 }
 0x2dc   : > { %11942 = vst [vmem:[#allocation22_spill] sm:$0xff] %v9066_v23  ;;  %v1616_v38 = vpop.permute.xlu0 %1615  ;;  %v1531_v63 = vpop.permute.xlu1 %1530  ;;  %6205 = vmatprep.mubr.msk.f32.mxu0 %vm2872_vm10, %v8697_v14 }
 0x2dd   : > { %1858 = vrot.lane.b32.xlu1 %v11943_v19, %s7404_s22  ;;  %v3190_v55 = vpop.f32.mrb[5].mxu0  ;;  %v1664_v9 = vmul.f32 %v8507_v22, %v1616_v38  ;;  %v1579_v21 = vmul.f32 %v8498_v29, %v1531_v63  ;;  %v11945_v19 = vld [vmem:[#allocation54_spill] sm:$0xff] }
 0x2df   : > { %v9074_v43 = vpop.f32.mrb[6].mxu0  ;;  %v1681_v36 = vadd.f32 %v1664_v9, %v1579_v21 }
 0x2e0   : > { %11944 = vst [vmem:[#allocation81_spill] sm:$0xff] %v9074_v43  ;;  %v1837_v61 = vpop.permute.xlu0 %1836  ;;  %v3195_v1 = vpop.f32.mrb[7].mxu0 }
 0x2e1   : > { %1870 = vperm.xlu1 %7244, %v8997_v33   ;;  %1882 = vperm.xlu0 %7242, %v1837_v61   ;;  %v1718_v60 = vpop.permute.xlu1 %1717 }
 0x2e2   : > { %v1766_v37 = vmul.f32 %v8514_v31, %v1718_v60 }
 0x2e4   : > { %v1620_v14 = vpop.permute.xlu0 %1619  ;;  %v1783_v58 = vadd.f32 %v1766_v37, %v1681_v36 }
 0x2e5   : > { %1860 = vrot.lane.b32.xlu1 %v11945_v19, %s7404_s22  ;;  %v1665_v63 = vmul.f32 %v8507_v22, %v1620_v14  ;;  %s6295_s22 = sshll.u32 %s7385_s26, 5  ;;  %s7408_s26 = smov [#allocation3]  }
 0x2e6   : > { %v1535_v55 = vpop.permute.xlu1 %1534  ;;  %v1800_v38 = vadd.f32 %v8535_v16, %v1783_v58  ;;  %s7319_s18 = sshll.u32 %s7408_s26, 4  ;;  %s7320_s18 = int_to_ptr.vmem [resolvable:$false] %s7319_s18 }
 0x2e7   : > { %v1580_v43 = vmul.f32 %v8498_v29, %v1535_v55  ;;  %s7321_s1 = scalar_lea.vmem %s7320_s18, 64  ;;  %p7322_p0 = scmp.lt.s32.totalorder %s11480_s29, %s7320_s18 }
 0x2e8   : > { %v1722_v1 = vpop.permute.xlu0 %1721  ;;  %v1817_v21 = vmax.f32 %v1800_v38, 0.0 }
 0x2e9   : > { %v1767_v33 = vmul.f32 %v8514_v31, %v1722_v1  ;;  %1874 = vperm.xlu1 %7244, %v1833_v18   ;;  %v1682_v61 = vadd.f32 %v1665_v63, %v1580_v43 }
 0x2ea   : > { %v7207_v9 = vpop.permute.xlu1 %7206  ;;  %v9092_v29 = vmul.f32 %v11874_v48, %v1817_v21 }
 0x2eb   : > { %v1784_v60 = vadd.f32 %v1767_v33, %v1682_v61  ;;  %v7208_v23 = vunpack.i.l.bf16 %v7207_v9  ;;  %v7209_v19 = vunpack.i.h.bf16 %v7207_v9 }
 0x2ec   : > { %v9084_v37 = vpop.permute.xlu0 %1840  ;;  %v11676_v1 = vrot.slane %v9092_v29, 7 }
 0x2ed   : > { %v1801_v36 = vadd.f32 %v8535_v16, %v1784_v60  ;;  %v2895_v58 = vsel %vm2872_vm10, %v8671_v52, %v7208_v23  ;;  %v2896_v52 = vsel %vm2872_vm10, %v8700_v26, %v7209_v19 }
 0x2ee   : > { %v9089_v22 = vpop.permute.xlu1 %1838  ;;  %3287 = vmatmul.mubr.f32.gmra.mrb[44].mxu0 %v2895_v58 }
 0x2ef   : > { %v1818_v31 = vmax.f32 %v1801_v36, 0.0  ;;  %6206 = vmatprep.mubr.msk.f32.mxu0 %vm2872_vm10, %v8711_v45  ;;  %v11675_v45 = vrot.slane %v9092_v29, 1 }
 0x2f0   : > { %v1628_v18 = vpop.permute.xlu0 %1627  ;;  %v9096_v43 = vpop.f32.mrb[8].mxu0 }
 0x2f1   : > { %11946 = vst [vmem:[#allocation86_spill] sm:$0xff] %v9096_v43  ;;  %v3200_v14 = vpop.f32.mrb[9].mxu0  ;;  %v9099_v16 = vmul.f32 %v11876_v53, %v1818_v31  ;;  %v9148_v43 = vld [vmem:[%s11527_s2 + $0x2] ss:$0 sm:$0xff] }
 0x2f2   : > { %v9103_v23 = vpop.permute.xlu1 %1623  ;;  %3292 = vmatmul.mubr.f32.gmra.mrb[46].mxu0 %v2896_v52  ;;  %v9134_v14 = vld [vmem:[%s11527_s2] ss:$0 sm:$0xff] }
 0x2f3   : > { %6207 = vmatprep.mubr.msk.f32.mxu0 %vm2872_vm10, %v8736_v13  ;;  %v11678_v63 = vrot.slane %v9099_v16, 1  ;;  %v11677_v33 = vrot.slane %v9099_v16, 7 }
 0x2f4   : > { %v9107_v55 = vpop.permute.xlu0 %1842  ;;  %v9109_v38 = vpop.f32.mrb[10].mxu0 }
 0x2f5   : > { %11947 = vst [vmem:[#allocation63_spill] sm:$0xff] %v9109_v38  ;;  %v3205_v61 = vpop.f32.mrb[11].mxu0  ;;  %v9120_v26 = vsel %vm924_vm3, %v11675_v45, %v11678_v63  ;;  %v9127_v13 = vsel %vm692_vm2, %v11676_v1, %v11677_v33  ;;  %v11950_v45 = vld [vmem:[#allocation69_spill] sm:$0xff] }
 0x2f6   : > { %11948 = vst [vmem:[#allocation27_spill] sm:$0xff] %v9120_v26  ;;  %11949 = vst [vmem:[#allocation37_spill] sm:$0xff] %v9127_v13  ;;  %v9129_v9 = vpop.permute.xlu1 %1725 }
 0x2f8   : > { %v1632_v21 = vpop.permute.xlu0 %1631 }
 0x2fb   : > { %v1543_v60 = vpop.permute.xlu1 %1542 }
 0x2fc   : > { %v1845_v36 = vpop.permute.xlu0 %1844  ;;  %v1582_v52 = vmul.f32 %v9134_v14, %v1543_v60 }
 0x2fd   : > { %1898 = vperm.xlu0 %7242, %v1845_v36   ;;  %v9142_v36 = vld [vmem:[%s11527_s2 + $0x1] ss:$0 sm:$0xff] }
 0x2fe   : > { %v1667_v38 = vmul.f32 %v9142_v36, %v1628_v18 }
 0x2ff   : > { %v7214_v19 = vpop.permute.xlu1 %7213 }
 0x300   : > { %v1636_v58 = vpop.permute.xlu0 %1635  ;;  %v7215_v31 = vunpack.i.l.bf16 %v7214_v19  ;;  %v7216_v61 = vunpack.i.h.bf16 %v7214_v19  ;;  %v11951_v19 = vld [vmem:[#allocation7_spill] sm:$0xff] }
 0x302   : > { %v2897_v1 = vsel %vm2872_vm10, %v11950_v45, %v7215_v31  ;;  %v1684_v45 = vadd.f32 %v1667_v38, %v1582_v52  ;;  %v11953_v31 = vld [vmem:[#allocation13_spill] sm:$0xff]  ;;  %v1668_v52 = vmul.f32 %v9142_v36, %v1632_v21  ;;  %v1669_v21 = vmul.f32 %v9142_v36, %v1636_v58 }
 0x303   : > { %v1730_v33 = vpop.permute.xlu1 %1729  ;;  %3297 = vmatmul.mubr.f32.gmra.mrb[48].mxu0 %v2897_v1  ;;  %v2898_v56 = vsel %vm2872_vm10, %v11953_v31, %v7216_v61 }
 0x304   : > { %v1738_v63 = vpop.permute.xlu0 %1737  ;;  %v1769_v60 = vmul.f32 %v9148_v43, %v1730_v33  ;;  %6208 = vmatprep.mubr.msk.f32.mxu0 %vm2872_vm10, %v11951_v19 }
 0x306   : > { %v1786_v13 = vadd.f32 %v1769_v60, %v1684_v45 }
 0x307   : > { %v9153_v1 = vpop.f32.mrb[12].mxu0  ;;  %3302 = vmatmul.mubr.f32.gmra.mrb[50].mxu0 %v2898_v56  ;;  %v9170_v56 = vld [vmem:[%s11528_s3] ss:$0 sm:$0xff] }
 0x308   : > { %11952 = vst [vmem:[#allocation83_spill] sm:$0xff] %v9153_v1  ;;  %v9157_v49 = vpop.permute.xlu0 %1848  ;;  %v3210_v18 = vpop.f32.mrb[13].mxu0  ;;  %6209 = vmatprep.mubr.msk.f32.mxu0 %vm2872_vm10, %v8772_v57  ;;  %v1803_v61 = vadd.f32 %v9170_v56, %v1786_v13 }
 0x309   : > { %v1547_v53 = vpop.permute.xlu1 %1546 }
 0x30a   : > { %v1583_v33 = vmul.f32 %v9134_v14, %v1547_v53  ;;  %v1820_v53 = vmax.f32 %v1803_v61, 0.0 }
 0x30b   : > { %v9162_v26 = vpop.f32.mrb[14].mxu0 }
 0x30c   : > { %11954 = vst [vmem:[#allocation85_spill] sm:$0xff] %v9162_v26  ;;  %v9164_v19 = vpop.permute.xlu0 %1643  ;;  %v3215_v38 = vpop.f32.mrb[15].mxu0  ;;  %v1685_v45 = vadd.f32 %v1668_v52, %v1583_v33  ;;  %v9182_v32 = vmul.f32 %v11955_v15, %v1820_v53  ;;  %v1771_v33 = vmul.f32 %v9148_v43, %v1738_v63 }
 0x30e   : > { %v1734_v60 = vpop.permute.xlu1 %1733  ;;  %v11683_v58 = vrot.slane %v9182_v32, 1  ;;  %v11684_v2 = vrot.slane %v9182_v32, 7 }
 0x30f   : > { %v1770_v57 = vmul.f32 %v9148_v43, %v1734_v60  ;;  %v11956_v60 = vld [vmem:[#allocation74_spill] sm:$0xff] }
 0x310   : > { %v9174_v31 = vpop.permute.xlu0 %1850 }
 0x311   : > { %v1787_v18 = vadd.f32 %v1770_v57, %v1685_v45 }
 0x313   : > { %v1804_v26 = vadd.f32 %v9170_v56, %v1787_v18  ;;  %v1551_v38 = vpop.permute.xlu1 %1550 }
 0x314   : > { %v1584_v1 = vmul.f32 %v9134_v14, %v1551_v38  ;;  %v9179_v48 = vpop.permute.xlu0 %1647 }
 0x315   : > { %v1821_v13 = vmax.f32 %v1804_v26, 0.0 }
 0x316   : > { %v1686_v52 = vadd.f32 %v1669_v21, %v1584_v1  ;;  %v11957_v1 = vld [vmem:[#allocation72_spill] sm:$0xff] }
 0x317   : > { %v9186_v12 = vmul.f32 %v11956_v60, %v1821_v13  ;;  %v7223_v61 = vpop.permute.xlu1 %7222 }
 0x318   : > { %v1788_v45 = vadd.f32 %v1771_v33, %v1686_v52  ;;  %v7224_v57 = vunpack.i.l.bf16 %v7223_v61  ;;  %v1853_v18 = vpop.permute.xlu0 %1852  ;;  %v7225_v63 = vunpack.i.h.bf16 %v7223_v61 }
 0x319   : > { %1914 = vperm.xlu0 %7242, %v1853_v18   ;;  %v2613_v38 = vrot.slane %v9186_v12, 1  ;;  %v2409_v53 = vrot.slane %v9186_v12, 7 }
 0x31a   : > { %v1805_v26 = vadd.f32 %v9170_v56, %v1788_v45  ;;  %v2899_v21 = vsel %vm2872_vm10, %v11957_v1, %v7224_v57  ;;  %v1659_v57 = vmul.f32 %v9142_v36, %v8944_v54  ;;  %v11685_v1 = vmov 3  }
 0x31b   : > { %v9195_v13 = vpop.permute.xlu1 %1846  ;;  %3307 = vmatmul.mubr.f32.gmra.mrb[52].mxu0 %v2899_v21  ;;  %v9200_v33 = vsel %vm924_vm3, %v11683_v58, %v2613_v38  ;;  %v9205_v52 = vsel %vm692_vm2, %v11684_v2, %v2409_v53  ;;  %v11961_v2 = vld [vmem:[#allocation6_spill] sm:$0xff] }
 0x31c   : > { %11958 = vst [vmem:[#allocation38_spill] sm:$0xff] %v9200_v33  ;;  %11959 = vst [vmem:[#allocation87_spill] sm:$0xff] %v9205_v52  ;;  %v1822_v18 = vmax.f32 %v1805_v26, 0.0  ;;  %6210 = vmatprep.mubr.msk.f32.mxu0 %vm2872_vm10, %v8786_v24  ;;  %v9209_v61 = vpop.permute.xlu0 %1651  ;;  %v9211_v45 = vpop.f32.mrb[16].mxu0  ;;  %v2900_v26 = vsel %vm2872_vm10, %v8775_v46, %v7225_v63  ;;  %v1574_v24 = vmul.f32 %v9134_v14, %v8936_v8 }
 0x31d   : > { %11960 = vst [vmem:[#allocation40_spill] sm:$0xff] %v9211_v45  ;;  %7284 = vset.pattern.permute.xlu0 %v11685_v1  ;;  %v3220_v21 = vpop.f32.mrb[17].mxu0  ;;  %v1761_v45 = vmul.f32 %v9148_v43, %v8991_v17  ;;  %v11963_v1 = vld [vmem:[#allocation11_spill] sm:$0xff] }
 0x31e   : > { %v9217_v58 = vmul.f32 %v11889_v27, %v1822_v18  ;;  %1951 = vperm.xlu0 %7284, %v11961_v2   ;;  %v1676_v46 = vadd.f32 %v1659_v57, %v1574_v24  ;;  %v1658_v27 = vmul.f32 %v9142_v36, %v8914_v50  ;;  %v11966_v24 = vld [vmem:[#allocation8_spill] sm:$0xff] }
 0x31f   : > { %v1640_v52 = vpop.permute.xlu1 %1639  ;;  %3312 = vmatmul.mubr.f32.gmra.mrb[54].mxu0 %v2900_v26 }
 0x320   : > { %6211 = vmatprep.mubr.msk.f32.mxu0 %vm2872_vm10, %v8807_v25  ;;  %v9228_v54 = vpop.permute.xlu0 %1753  ;;  %v9230_v18 = vpop.f32.mrb[18].mxu0  ;;  %v11688_v2 = vrot.slane %v9217_v58, 1  ;;  %v11689_v21 = vrot.slane %v9217_v58, 7  ;;  %v1778_v17 = vadd.f32 %v1761_v45, %v1676_v46 }
 0x321   : > { %11962 = vst [vmem:[#allocation43_spill] sm:$0xff] %v9230_v18  ;;  %v3225_v63 = vpop.f32.mrb[19].mxu0 }
 0x322   : > { %2053 = vperm.xlu0 %7284, %v11963_v1   ;;  %v9238_v8 = vsel %vm924_vm3, %v2613_v38, %v11688_v2  ;;  %v9243_v25 = vsel %vm692_vm2, %v2409_v53, %v11689_v21  ;;  %v1795_v1 = vadd.f32 %v9170_v56, %v1778_v17  ;;  %v1760_v38 = vmul.f32 %v9148_v43, %v8952_v28  ;;  %v11967_v21 = vld [vmem:[#allocation17_spill] sm:$0xff] }
 0x323   : > { %11964 = vst [vmem:[#allocation31_spill] sm:$0xff] %v9238_v8  ;;  %11965 = vst [vmem:[#allocation88_spill] sm:$0xff] %v9243_v25  ;;  %v1742_v26 = vpop.permute.xlu1 %1741  ;;  %v1662_v53 = vmul.f32 %v9142_v36, %v9005_v47  ;;  %v1666_v47 = vmul.f32 %v9142_v36, %v9103_v23  ;;  %v11970_v23 = vld [vmem:[#allocation56_spill] sm:$0xff] }
 0x324   : > { %v1812_v50 = vmax.f32 %v1795_v1, 0.0  ;;  %v11969_v1 = vld [vmem:[#allocation57_spill] sm:$0xff] }
 0x325   : > { %v1507_v18 = vpop.permute.xlu0 %1506 }
 0x326   : > { %v1573_v57 = vmul.f32 %v9134_v14, %v1507_v18  ;;  %1955 = vperm.xlu0 %7284, %v11966_v24   ;;  %v1764_v18 = vmul.f32 %v9148_v43, %v9012_v39  ;;  %v9265_v60 = vmul.f32 %v11969_v1, %v1812_v50  ;;  %v1671_v39 = vmul.f32 %v9142_v36, %v9164_v19 }
 0x327   : > { %v1670_v50 = vmul.f32 %v9142_v36, %v1640_v52 }
 0x328   : > { %v1675_v63 = vadd.f32 %v1658_v27, %v1573_v57  ;;  %v1559_v2 = vpop.permute.xlu1 %1558 }
 0x329   : > { %v1523_v8 = vpop.permute.xlu0 %1522  ;;  %v1586_v28 = vmul.f32 %v9134_v14, %v1559_v2 }
 0x32a   : > { %v1777_v45 = vadd.f32 %v1760_v38, %v1675_v63  ;;  %v1577_v46 = vmul.f32 %v9134_v14, %v1523_v8  ;;  %2057 = vperm.xlu0 %7284, %v11967_v21   ;;  %v11968_v21 = vld [vmem:[#allocation9_spill] sm:$0xff] }
 0x32c   : > { %v1794_v17 = vadd.f32 %v9170_v56, %v1777_v45  ;;  %v1679_v24 = vadd.f32 %v1662_v53, %v1577_v46  ;;  %v7230_v25 = vpop.permute.xlu1 %7229  ;;  %v1768_v45 = vmul.f32 %v9148_v43, %v9129_v9 }
 0x32d   : > { %v7231_v27 = vunpack.i.l.bf16 %v7230_v25  ;;  %v1539_v57 = vpop.permute.xlu0 %1538  ;;  %v7232_v53 = vunpack.i.h.bf16 %v7230_v25 }
 0x32e   : > { %v1811_v38 = vmax.f32 %v1794_v17, 0.0  ;;  %v1781_v63 = vadd.f32 %v1764_v18, %v1679_v24  ;;  %v1581_v8 = vmul.f32 %v9134_v14, %v1539_v57  ;;  %1959 = vperm.xlu0 %7284, %v11968_v21   ;;  %v1688_v57 = vadd.f32 %v1671_v39, %v1586_v28  ;;  %v11972_v28 = vld [vmem:[#allocation65_spill] sm:$0xff] }
 0x32f   : > { %v2901_v2 = vsel %vm2872_vm10, %v8789_v59, %v7231_v27  ;;  %v2902_v52 = vsel %vm2872_vm10, %v8810_v35, %v7232_v53 }
 0x330   : > { %v9274_v46 = vmul.f32 %v11970_v23, %v1811_v38  ;;  %v1798_v18 = vadd.f32 %v9170_v56, %v1781_v63  ;;  %v1683_v17 = vadd.f32 %v1666_v47, %v1581_v8  ;;  %v1746_v24 = vpop.permute.xlu1 %1745  ;;  %3317 = vmatmul.mubr.f32.gmra.mrb[56].mxu0 %v2901_v2  ;;  %v11971_v38 = vld [vmem:[#allocation21_spill] sm:$0xff]  ;;  %v1772_v63 = vmul.f32 %v9148_v43, %v1742_v26 }
 0x331   : > { %v1773_v19 = vmul.f32 %v9148_v43, %v1746_v24  ;;  %6212 = vmatprep.mubr.msk.f32.mxu0 %vm2872_vm10, %v8835_v44  ;;  %v1555_v59 = vpop.permute.xlu0 %1554  ;;  %v11975_v24 = vld [vmem:[#allocation10_spill] sm:$0xff] }
 0x332   : > { %v1815_v25 = vmax.f32 %v1798_v18, 0.0  ;;  %v1785_v27 = vadd.f32 %v1768_v45, %v1683_v17  ;;  %v1585_v9 = vmul.f32 %v9134_v14, %v1555_v59  ;;  %2061 = vperm.xlu0 %7284, %v11971_v38   ;;  %v7250_v47 = vpack.i.bf16 %v9265_v60, %v9274_v46  ;;  %v11974_v17 = vld [vmem:[#allocation73_spill] sm:$0xff] }
 0x333   : > { %v1790_v8 = vadd.f32 %v1773_v19, %v1688_v57  ;;  %v9292_v2 = vpop.f32.mrb[20].mxu0  ;;  %v11976_v19 = vld [vmem:[#allocation68_spill] sm:$0xff] }
 0x334   : > { %v9289_v21 = vmul.f32 %v11972_v28, %v1815_v25  ;;  %v1802_v44 = vadd.f32 %v9170_v56, %v1785_v27  ;;  %v1687_v39 = vadd.f32 %v1670_v50, %v1585_v9  ;;  %11973 = vst [vmem:[#allocation60_spill] sm:$0xff] %v9292_v2  ;;  %3322 = vmatmul.mubr.f32.gmra.mrb[58].mxu0 %v2902_v52  ;;  %v3230_v26 = vpop.f32.mrb[21].mxu0  ;;  %v11979_v52 = vrot.slane %v9033_v11, 1 }
 0x335   : > { %7251 = vrot.lane.b32.xlu1 %v7250_v47, %s11703_s20  ;;  %v1807_v45 = vadd.f32 %v9170_v56, %v1790_v8  ;;  %v9296_v18 = vpop.permute.xlu1 %1562  ;;  %6213 = vmatprep.mubr.msk.f32.mxu0 %vm2872_vm10, %v11974_v17  ;;  %v11982_v17 = vld [vmem:[#allocation79_spill] sm:$0xff] }
 0x336   : > { %v1819_v35 = vmax.f32 %v1802_v44, 0.0  ;;  %v1789_v53 = vadd.f32 %v1772_v63, %v1687_v39  ;;  %1963 = vperm.xlu0 %7284, %v11975_v24   ;;  %v11691_v27 = vrot.slane %v9289_v21, 1  ;;  %v11690_v38 = vrot.slane %v9289_v21, 7  ;;  %v11978_v63 = vld [vmem:[#allocation29_spill] sm:$0xff]  ;;  %v11980_v39 = vld [vmem:[#allocation80_spill] sm:$0xff] }
 0x337   : > { %v1824_v57 = vmax.f32 %v1807_v45, 0.0  ;;  %v9305_v25 = vpop.f32.mrb[22].mxu0 }
 0x338   : > { %v9302_v50 = vmul.f32 %v11976_v19, %v1819_v35  ;;  %v1806_v59 = vadd.f32 %v9170_v56, %v1789_v53  ;;  %11977 = vst [vmem:[#allocation58_spill] sm:$0xff] %v9305_v25  ;;  %v3235_v9 = vpop.f32.mrb[23].mxu0  ;;  %v9318_v44 = vsel %vm924_vm3, %v11979_v52, %v11691_v27  ;;  %v11983_v53 = vmov 3  }
 0x339   : > { %1878 = vperm.xlu1 %7244, %v9045_v3   ;;  %v9321_v45 = vmul.f32 %v11980_v39, %v1824_v57  ;;  %v11981_v3 = vrot.slane %v9033_v11, 7  ;;  %v11984_v9 = vld [vmem:[#allocation26_spill] sm:$0xff]  ;;  %v1663_v57 = vmul.f32 %v9142_v36, %v9030_v20  ;;  %v11986_v52 = vrot.slane %v9099_v16, 1 }
 0x33a   : > { %v1823_v47 = vmax.f32 %v1806_v59, 0.0  ;;  %v9310_v8 = vpop.permute.xlu1 %1749  ;;  %2069 = vperm.xlu0 %7284, %v11978_v63   ;;  %v2609_v24 = vrot.slane %v9302_v50, 1  ;;  %v2405_v59 = vrot.slane %v9302_v50, 7  ;;  %v11985_v63 = vld [vmem:[#allocation32_spill] sm:$0xff]  ;;  %v11988_v27 = vrot.slane %v9099_v16, 7 }
 0x33b   : > { %v9328_v26 = vsel %vm692_vm2, %v11981_v3, %v11690_v38  ;;  %v11990_v20 = vrot.slane %v9182_v32, 7  ;;  %v11692_v2 = vrot.slane %v9321_v45, 1 }
 0x33c   : > { %v9331_v35 = vmul.f32 %v11982_v17, %v1823_v47  ;;  %v9343_v3 = vsel %vm924_vm3, %v11986_v52, %v2609_v24  ;;  %v11987_v47 = vrot.slane %v9182_v32, 1  ;;  %v9353_v25 = vsel %vm692_vm2, %v11988_v27, %v2405_v59  ;;  %v11992_v27 = vld [vmem:[#allocation12_spill] sm:$0xff] }
 0x33d   : > { %7255 = vset.pattern.permute.xlu1 %v11983_v53  ;;  %11989 = vst [vmem:[#allocation47_spill] sm:$0xff] %v9353_v25  ;;  %v11993_v17 = vrot.slane %v9217_v58, 1 }
 0x33e   : > { %2065 = vperm.xlu1 %7255, %v11984_v9   ;;  %2073 = vperm.xlu0 %7284, %v11985_v63   ;;  %v9348_v38 = vsel %vm924_vm3, %v2609_v24, %v11987_v47  ;;  %v9360_v63 = vsel %vm692_vm2, %v2405_v59, %v11990_v20  ;;  %v2617_v52 = vrot.slane %v9331_v35, 1  ;;  %v2413_v39 = vrot.slane %v9331_v35, 7  ;;  %v11998_v24 = vld [vmem:[#allocation15_spill] sm:$0xff] }
 0x33f   : > { %v9355_v9 = vpop.permute.xlu1 %1566  ;;  %11991 = vst [vmem:[#allocation50_spill] sm:$0xff] %v9360_v63  ;;  %v1578_v47 = vmul.f32 %v9134_v14, %v9020_v40  ;;  %v11996_v20 = vrot.slane %v9217_v58, 7  ;;  %v11999_v40 = vrot.slane %v9321_v45, 7 }
 0x340   : > { %v9372_v33 = vsel %vm924_vm3, %v11993_v17, %v2617_v52  ;;  %v9377_v59 = vsel %vm924_vm3, %v2617_v52, %v11692_v2  ;;  %v1765_v17 = vmul.f32 %v9148_v43, %v9039_v5  ;;  %v7256_v52 = vpack.i.bf16 %v9033_v11, %v9025_v41 }
 0x341   : > { %11994 = vst [vmem:[#allocation51_spill] sm:$0xff] %v9372_v33  ;;  %11995 = vst [vmem:[#allocation46_spill] sm:$0xff] %v9377_v59  ;;  %v9382_v63 = vsel %vm692_vm2, %v11996_v20, %v2413_v39  ;;  %v1680_v25 = vadd.f32 %v1663_v57, %v1578_v47 }
 0x342   : > { %1967 = vperm.xlu1 %7255, %v11992_v27   ;;  %11997 = vst [vmem:[#allocation49_spill] sm:$0xff] %v9382_v63  ;;  %1975 = vperm.xlu0 %7284, %v11998_v24   ;;  %v9388_v27 = vsel %vm692_vm2, %v2413_v39, %v11999_v40  ;;  %v12000_v63 = vld [vmem:[#allocation19_spill] sm:$0xff] }
 0x343   : > { %v7239_v33 = vpop.permute.xlu1 %7238  ;;  %v12001_v24 = vld [vmem:[#allocation75_spill] sm:$0xff]  ;;  %v1782_v39 = vadd.f32 %v1765_v17, %v1680_v25 }
 0x344   : > { %v7240_v2 = vunpack.i.l.bf16 %v7239_v33  ;;  %v7241_v20 = vunpack.i.h.bf16 %v7239_v33  ;;  %v12002_v33 = vld [vmem:[#allocation16_spill] sm:$0xff] }
 0x346   : > { %7257 = vrot.lane.b32.xlu1 %v7256_v52, %s11703_s20  ;;  %2077 = vperm.xlu0 %7284, %v12000_v63   ;;  %v2903_v59 = vsel %vm2872_vm10, %v12001_v24, %v7240_v2  ;;  %v12003_v63 = vld [vmem:[#allocation18_spill] sm:$0xff]  ;;  %v1799_v2 = vadd.f32 %v9170_v56, %v1782_v39  ;;  %v12007_v24 = vld [vmem:[#allocation67_spill] sm:$0xff] }
 0x347   : > { %7261 = vset.pattern.permute.xlu1 %v11786_v62  ;;  %v9399_v57 = vpop.permute.xlu1 %1854  ;;  %3327 = vmatmul.mubr.f32.gmra.mrb[60].mxu0 %v2903_v59  ;;  %v2904_v47 = vsel %vm2872_vm10, %v12003_v63, %v7241_v20  ;;  %v12005_v59 = vld [vmem:[#allocation14_spill] sm:$0xff]  ;;  %v12006_v20 = vld [vmem:[#allocation35_spill] sm:$0xff] }
 0x348   : > { %6214 = vmatprep.mubr.msk.f32.mxu0 %vm2872_vm10, %v8900_v0  ;;  %v9403_v5 = vpop.f32.mrb[24].mxu0  ;;  %v1816_v17 = vmax.f32 %v1799_v2, 0.0 }
 0x349   : > { %v3240_v11 = vpop.f32.mrb[25].mxu0 }
 0x34a   : > { %1886 = vperm.xlu1 %7261, %v9089_v22   ;;  %1979 = vperm.xlu0 %7284, %v12002_v33   ;;  %v12004_v22 = vld [vmem:[#allocation30_spill] sm:$0xff]  ;;  %v9424_v39 = vmul.f32 %v12007_v24, %v1816_v17  ;;  %v12008_v33 = vld [vmem:[#allocation33_spill] sm:$0xff]  ;;  %v12010_v17 = vld [vmem:[#allocation36_spill] sm:$0xff] }
 0x34b   : > { %v9410_v40 = vpop.permute.xlu1 %1655  ;;  %3332 = vmatmul.mubr.f32.gmra.mrb[62].mxu0 %v2904_v47 }
 0x34c   : > { %6215 = vmatprep.mubr.msk.f32.mxu0 %vm2872_vm10, %v8926_v42  ;;  %v9414_v25 = vpop.f32.mrb[26].mxu0  ;;  %v7264_v11 = vpack.i.bf16 %v9424_v39, %v9289_v21 }
 0x34d   : > { %v3245_v0 = vpop.f32.mrb[27].mxu0 }
 0x34e   : > { %7262 = vset.pattern.permute.xlu1 %v11983_v53  ;;  %2085 = vperm.xlu0 %7284, %v12004_v22  }
 0x34f   : > { %1971 = vperm.xlu1 %7262, %v12005_v59   ;;  %v9419_v52 = vpop.permute.xlu1 %1757  ;;  %v2594_v59 = vrot.slane %v9274_v46, 1 }
 0x352   : > { %2089 = vperm.xlu0 %7284, %v12006_v20   ;;  %v2595_v20 = vrot.slane %v9265_v60, 1 }
 0x353   : > { %7263 = vset.pattern.permute.xlu1 %v11786_v62 }
 0x354   : > { %1890 = vperm.xlu1 %7263, %v9084_v37   ;;  %v9427_v42 = vpop.permute.xlu1 %1866  ;;  %v12009_v37 = vrot.slane %v8909_v34, 1  ;;  %v2596_v34 = vsel %vm924_vm3, %v2594_v59, %v2595_v20  ;;  %v12015_v59 = vld [vmem:[#allocation45_spill] sm:$0xff] }
 0x356   : > { %1991 = vperm.xlu0 %7284, %v12008_v33   ;;  %v2665_v22 = vsel %vm924_vm3, %v12009_v37, 0.0 }
 0x358   : > { %7265 = vrot.lane.b32.xlu1 %v7264_v11, %s11703_s20  ;;  %v7247_v63 = vpop.permute.xlu1 %7246  ;;  %v12012_v11 = vld [vmem:[#allocation34_spill] sm:$0xff] }
 0x359   : > { %v7248_v47 = vunpack.i.l.bf16 %v7247_v63  ;;  %v7249_v2 = vunpack.i.h.bf16 %v7247_v63  ;;  %v12013_v63 = vld [vmem:[#allocation44_spill] sm:$0xff] }
 0x35a   : > { %2093 = vperm.xlu0 %7284, %v11915_v4  }
 0x35b   : > { %v2905_v0 = vsel %vm2872_vm10, %v8903_v10, %v7248_v47 }
 0x35c   : > { %1894 = vperm.xlu1 %7263, %v9107_v55   ;;  %3337 = vmatmul.mubr.f32.gmra.mrb[64].mxu0 %v2905_v0  ;;  %v12011_v55 = vld [vmem:[#allocation23_spill] sm:$0xff]  ;;  %v12014_v0 = vld [vmem:[#allocation24_spill] sm:$0xff] }
 0x35d   : > { %6216 = vmatprep.mubr.msk.f32.mxu0 %vm2872_vm10, %v2665_v22  ;;  %v2906_v10 = vsel %vm2872_vm10, %v12011_v55, %v7249_v2  ;;  %v7270_v2 = vpack.i.bf16 %v9099_v16, %v9092_v29  ;;  %v1859_v22 = vpop.permute.xlu1 %1858  ;;  %v12016_v55 = vld [vmem:[#allocation28_spill] sm:$0xff] }
 0x35e   : > { %1995 = vperm.xlu0 %7284, %v12010_v17  }
 0x35f   : > { %v9445_v4 = vpop.f32.mrb[28].mxu0 }
 0x360   : > { %7269 = vset.pattern.permute.xlu1 %v11983_v53  ;;  %3342 = vmatmul.mubr.f32.gmra.mrb[66].mxu0 %v2906_v10  ;;  %v3250_v33 = vpop.f32.mrb[29].mxu0  ;;  %v12018_v10 = vld [vmem:[#allocation41_spill] sm:$0xff] }
 0x361   : > { %2081 = vperm.xlu1 %7269, %v12012_v11   ;;  %6217 = vmatprep.mubr.msk.f32.mxu0 %vm2872_vm10, %v2596_v34  ;;  %v9466_v17 = vpop.permute.xlu1 %1870  ;;  %v1571_v11 = vpop.permute.xlu0 %1570 }
 0x362   : > { %2101 = vperm.xlu0 %7284, %v12013_v63  }
 0x363   : > { %v9455_v47 = vpop.f32.mrb[30].mxu0 }
 0x364   : > { %v3255_v37 = vpop.f32.mrb[31].mxu0 }
 0x365   : > { %1983 = vperm.xlu1 %7269, %v12014_v0   ;;  %v1861_v16 = vpop.permute.xlu1 %1860  ;;  %v1857_v63 = vpop.permute.xlu0 %1856 }
 0x366   : > { %2105 = vperm.xlu0 %7284, %v11930_v30   ;;  %v12017_v30 = vld [vmem:[#allocation48_spill] sm:$0xff] }
 0x369   : > { %7271 = vrot.lane.b32.xlu1 %v7270_v2, %s11703_s20  ;;  %v9497_v2 = vpop.permute.xlu0 %1882 }
 0x36a   : > { %7275 = vset.pattern.permute.xlu1 %v11786_v62  ;;  %2007 = vperm.xlu0 %7284, %v12015_v59  }
 0x36d   : > { %1902 = vperm.xlu1 %7275, %v9195_v13   ;;  %v7278_v13 = vpack.i.bf16 %v9182_v32, %v9302_v50  ;;  %v12020_v32 = vld [vmem:[#allocation39_spill] sm:$0xff] }
 0x36e   : > { %2109 = vperm.xlu0 %7284, %v11933_v7  }
 0x371   : > { %7276 = vset.pattern.permute.xlu1 %v11983_v53 }
 0x372   : > { %1987 = vperm.xlu1 %7276, %v12016_v55   ;;  %2011 = vperm.xlu0 %7284, %v12017_v30   ;;  %v1587_v55 = vmul.f32 %v9134_v14, %v9296_v18  ;;  %v1672_v30 = vmul.f32 %v9142_v36, %v9179_v48  ;;  %v1933_v48 = vmul.f32 %v9134_v14, %v9427_v42 }
 0x376   : > { %7277 = vset.pattern.permute.xlu1 %v11786_v62  ;;  %7299 = vset.pattern.permute.xlu0 %v11786_v62 }
 0x377   : > { %1906 = vperm.xlu1 %7277, %v9157_v49   ;;  %1930 = vperm.xlu0 %7299, %v1861_v16   ;;  %v1774_v16 = vmul.f32 %v9148_v43, %v9310_v8  ;;  %v1674_v8 = vmul.f32 %v9142_v36, %v9410_v40 }
 0x37b   : > { %7279 = vrot.lane.b32.xlu1 %v7278_v13, %s11703_s20  ;;  %7300 = vset.pattern.permute.xlu0 %v11983_v53  ;;  %v1588_v13 = vmul.f32 %v9134_v14, %v9355_v9  ;;  %v1775_v9 = vmul.f32 %v9148_v43, %v9228_v54 }
 0x37c   : > { %2117 = vperm.xlu0 %7300, %v11938_v51   ;;  %v7285_v51 = vpack.i.bf16 %v9217_v58, %v9186_v12  ;;  %v9500_v59 = vpop.permute.xlu0 %1898  ;;  %v12023_v12 = vld [vmem:[#allocation42_spill] sm:$0xff] }
 0x37f   : > { %1910 = vperm.xlu1 %7277, %v9174_v31  }
 0x380   : > { %7301 = vset.pattern.permute.xlu0 %v11786_v62 }
 0x382   : > { %v9482_v7 = vpop.f32.mrb[32].mxu0 }
 0x383   : > { %7283 = vset.pattern.permute.xlu1 %v11983_v53  ;;  %v3260_v49 = vpop.f32.mrb[33].mxu0 }
 0x384   : > { %2097 = vperm.xlu1 %7283, %v12018_v10   ;;  %v1689_v49 = vadd.f32 %v1672_v30, %v1587_v55 }
 0x386   : > { %v9485_v34 = vpop.f32.mrb[34].mxu0 }
 0x387   : > { %12019 = vst [vmem:[#allocation55_spill] sm:$0xff] %v9485_v34  ;;  %v3265_v50 = vpop.f32.mrb[35].mxu0 }
 0x388   : > { %1999 = vperm.xlu1 %7283, %v12020_v32   ;;  %v1791_v32 = vadd.f32 %v1774_v16, %v1689_v49  ;;  %v12024_v16 = vld [vmem:[#allocation53_spill] sm:$0xff]  ;;  %v1934_v49 = vmul.f32 %v9134_v14, %v9466_v17 }
 0x38a   : > { %v9490_v33 = vpop.f32.mrb[36].mxu0  ;;  %v1808_v42 = vadd.f32 %v9170_v56, %v1791_v32 }
 0x38b   : > { %12021 = vst [vmem:[#allocation64_spill] sm:$0xff] %v9490_v33  ;;  %v3270_v31 = vpop.f32.mrb[37].mxu0 }
 0x38c   : > { %7286 = vrot.lane.b32.xlu1 %v7285_v51, %s11703_s20  ;;  %v1875_v51 = vpop.permute.xlu1 %1874 }
 0x38d   : > { %7290 = vset.pattern.permute.xlu1 %v11786_v62 }
 0x38e   : > { %v9494_v0 = vpop.f32.mrb[38].mxu0 }
 0x38f   : > { %12022 = vst [vmem:[#allocation52_spill] sm:$0xff] %v9494_v0  ;;  %v3275_v37 = vpop.f32.mrb[39].mxu0 }
 0x390   : > { %1918 = vperm.xlu1 %7290, %v9399_v57   ;;  %v7293_v57 = vpack.i.bf16 %v9321_v45, %v9331_v35  ;;  %v1776_v37 = vmul.f32 %v9148_v43, %v9419_v52 }
 0x394   : > { %7291 = vset.pattern.permute.xlu1 %v11983_v53 }
 0x395   : > { %2003 = vperm.xlu1 %7291, %v12023_v12   ;;  %v2390_v12 = vrot.slane %v9274_v46, 7  ;;  %v1825_v46 = vmax.f32 %v1808_v42, 0.0 }
 0x397   : > { %v2526_v52 = vsel %vm692_vm2, 0.0, %v2390_v12 }
 0x398   : > { %v9503_v58 = vpop.permute.xlu0 %1914 }
 0x399   : > { %7292 = vset.pattern.permute.xlu1 %v11786_v62  ;;  %v1673_v62 = vmul.f32 %v9142_v36, %v9209_v61 }
 0x39a   : > { %1922 = vperm.xlu1 %7292, %v1857_v63   ;;  %v1589_v63 = vmul.f32 %v9134_v14, %v1571_v11 }
 0x39b   : > { %v1690_v35 = vadd.f32 %v1673_v62, %v1588_v13 }
 0x39d   : > { %v1952_v10 = vpop.permute.xlu0 %1951  ;;  %v1792_v55 = vadd.f32 %v1775_v9, %v1690_v35 }
 0x39e   : > { %7294 = vrot.lane.b32.xlu1 %v7293_v57, %s11703_s20  ;;  %v2018_v18 = vmul.f32 %v9142_v36, %v1952_v10  ;;  %v1691_v57 = vadd.f32 %v1674_v8, %v1589_v63 }
 0x39f   : > { %v1809_v62 = vadd.f32 %v9170_v56, %v1792_v55  ;;  %v12027_v55 = vld [vmem:[#allocation82_spill] sm:$0xff] }
 0x3a0   : > { %v2035_v31 = vadd.f32 %v2018_v18, %v1933_v48  ;;  %v1793_v13 = vadd.f32 %v1776_v37, %v1691_v57  ;;  %v12025_v48 = vrot.slane %v9025_v41, 1 }
 0x3a1   : > { %v2054_v50 = vpop.permute.xlu0 %2053  ;;  %v1826_v42 = vmax.f32 %v1809_v62, 0.0 }
 0x3a2   : > { %1926 = vperm.xlu1 %7292, %v1859_v22   ;;  %v2120_v61 = vmul.f32 %v9148_v43, %v2054_v50  ;;  %v2598_v8 = vsel %vm924_vm3, %v2595_v20, %v12025_v48  ;;  %v1810_v63 = vadd.f32 %v9170_v56, %v1793_v13 }
 0x3a4   : > { %v2137_v40 = vadd.f32 %v2120_v61, %v2035_v31  ;;  %v11694_v61 = vrot.slane %v9265_v60, 7 }
 0x3a5   : > { %v1956_v22 = vpop.permute.xlu0 %1955 }
 0x3a6   : > { %7298 = vset.pattern.permute.xlu1 %v11983_v53  ;;  %v2154_v54 = vadd.f32 %v9170_v56, %v2137_v40  ;;  %v2019_v30 = vmul.f32 %v9142_v36, %v1956_v22  ;;  %v2392_v40 = vsel %vm692_vm2, %v2390_v12, %v11694_v61  ;;  %v1935_v12 = vmul.f32 %v9134_v14, %v1875_v51 }
 0x3a7   : > { %2113 = vperm.xlu1 %7298, %v12024_v16   ;;  %v7252_v11 = vpop.permute.xlu1 %7251 }
 0x3a8   : > { %v7253_v10 = vunpack.i.l.bf16 %v7252_v11  ;;  %v2171_v18 = vmax.f32 %v2154_v54, 0.0  ;;  %v7254_v32 = vunpack.i.h.bf16 %v7252_v11  ;;  %v2036_v50 = vadd.f32 %v2019_v30, %v1934_v49 }
 0x3a9   : > { %v2058_v53 = vpop.permute.xlu0 %2057  ;;  %v1827_v11 = vmax.f32 %v1810_v63, 0.0 }
 0x3aa   : > { %v2907_v35 = vsel %vm2872_vm10, %v2526_v52, %v7253_v10  ;;  %v2121_v9 = vmul.f32 %v9148_v43, %v2058_v53  ;;  %v9548_v31 = vpop.f32.mrb[40].mxu0  ;;  %v9551_v17 = vmul.f32 %v11970_v23, %v2171_v18  ;;  %v2908_v22 = vsel %vm2872_vm10, %v2392_v40, %v7254_v32  ;;  %v12029_v10 = vld [vmem:[#allocation78_spill] sm:$0xff] }
 0x3ab   : > { %2015 = vperm.xlu1 %7298, %v11937_v6   ;;  %12026 = vst [vmem:[#allocation54_spill] sm:$0xff] %v9548_v31  ;;  %3347 = vmatmul.mubr.f32.gmra.mrb[68].mxu0 %v2907_v35  ;;  %v3280_v37 = vpop.f32.mrb[41].mxu0  ;;  %v9559_v6 = vmul.f32 %v12027_v55, %v1825_v46  ;;  %v12030_v46 = vld [vmem:[#allocation84_spill] sm:$0xff]  ;;  %v12031_v35 = vld [vmem:[#allocation61_spill] sm:$0xff] }
 0x3ac   : > { %6218 = vmatprep.mubr.msk.f32.mxu0 %vm2872_vm10, %v2598_v8  ;;  %v2138_v20 = vadd.f32 %v2121_v9, %v2036_v50  ;;  %2770 = vrot.lane.b32.xlu0 %v9551_v17, %s11703_s20  ;;  %v9575_v62 = vmul.f32 %v12030_v46, %v1826_v42  ;;  %v9582_v48 = vmul.f32 %v12031_v35, %v1827_v11  ;;  %v2627_v8 = vrot.slane %v9551_v17, 1 }
 0x3ad   : > { %v1960_v57 = vpop.permute.xlu0 %1959  ;;  %v11693_v9 = vrot.slane %v9551_v17, 7 }
 0x3ae   : > { %v2155_v54 = vadd.f32 %v9170_v56, %v2138_v20  ;;  %v2020_v30 = vmul.f32 %v9142_v36, %v1960_v57  ;;  %v9569_v16 = vpop.f32.mrb[42].mxu0 }
 0x3af   : > { %2764 = vrot.lane.b32.xlu1 %v9559_v6, %s11703_s20  ;;  %12028 = vst [vmem:[#allocation69_spill] sm:$0xff] %v9569_v16  ;;  %3352 = vmatmul.mubr.f32.gmra.mrb[70].mxu0 %v2908_v22  ;;  %v3285_v13 = vpop.f32.mrb[43].mxu0 }
 0x3b0   : > { %6219 = vmatprep.mubr.msk.f32.mxu0 %vm2872_vm10, %v12029_v10  ;;  %v2172_v52 = vmax.f32 %v2155_v54, 0.0  ;;  %v2037_v18 = vadd.f32 %v2020_v30, %v1935_v12  ;;  %v12032_v30 = vld [vmem:[#allocation59_spill] sm:$0xff] }
 0x3b1   : > { %v2062_v49 = vpop.permute.xlu0 %2061 }
 0x3b2   : > { %v2122_v32 = vmul.f32 %v9148_v43, %v2062_v49  ;;  %v2240_v53 = vmul.f32 %v11969_v1, %v2172_v52 }
 0x3b3   : > { %2766 = vrot.lane.b32.xlu1 %v9575_v62, %s11703_s20 }
 0x3b4   : > { %v2139_v50 = vadd.f32 %v2122_v32, %v2037_v18  ;;  %v2628_v51 = vrot.slane %v2240_v53, 1  ;;  %v2424_v63 = vrot.slane %v2240_v53, 7 }
 0x3b5   : > { %v1964_v22 = vpop.permute.xlu0 %1963 }
 0x3b6   : > { %v2156_v37 = vadd.f32 %v9170_v56, %v2139_v50  ;;  %v9590_v42 = vsel %vm924_vm3, %v2627_v8, %v2628_v51  ;;  %v9595_v20 = vsel %vm692_vm2, %v11693_v9, %v2424_v63  ;;  %v2021_v13 = vmul.f32 %v9142_v36, %v1964_v22 }
 0x3b7   : > { %2768 = vrot.lane.b32.xlu1 %v9582_v48, %s11703_s20 }
 0x3b8   : > { %v1879_v40 = vpop.permute.xlu1 %1878  ;;  %v2173_v57 = vmax.f32 %v2156_v37, 0.0 }
 0x3b9   : > { %v1936_v54 = vmul.f32 %v9134_v14, %v1879_v40  ;;  %v1937_v40 = vmul.f32 %v9134_v14, %v9497_v2  ;;  %v12036_v2 = vrot.slane %v9025_v41, 7  ;;  %v2603_v41 = vrot.slane %v9424_v39, 1 }
 0x3ba   : > { %v2241_v11 = vmul.f32 %v12032_v30, %v2173_v57  ;;  %v12035_v30 = vld [vmem:[#allocation62_spill] sm:$0xff] }
 0x3bb   : > { %2772 = vrot.lane.b32.xlu1 %v2240_v53, %s11703_s20  ;;  %v2038_v49 = vadd.f32 %v2021_v13, %v1936_v54  ;;  %v2070_v53 = vpop.permute.xlu0 %2069 }
 0x3bc   : > { %2774 = vrot.lane.b32.xlu0 %v2241_v11, %s11703_s20  ;;  %v2630_v12 = vrot.slane %v2241_v11, 1  ;;  %v2426_v52 = vrot.slane %v2241_v11, 7  ;;  %v2124_v54 = vmul.f32 %v9148_v43, %v2070_v53 }
 0x3bd   : > { %v2066_v10 = vpop.permute.xlu1 %2065 }
 0x3be   : > { %v2123_v18 = vmul.f32 %v9148_v43, %v2066_v10  ;;  %v9604_v32 = vsel %vm924_vm3, %v2628_v51, %v2630_v12  ;;  %v9607_v8 = vsel %vm692_vm2, %v2424_v63, %v2426_v52 }
 0x3c0   : > { %v2140_v50 = vadd.f32 %v2123_v18, %v2038_v49  ;;  %v2074_v49 = vpop.permute.xlu0 %2073 }
 0x3c1   : > { %v1968_v37 = vpop.permute.xlu1 %1967  ;;  %v9613_v11 = vpop.f32.mrb[44].mxu0 }
 0x3c2   : > { %v2157_v57 = vadd.f32 %v9170_v56, %v2140_v50  ;;  %v2022_v22 = vmul.f32 %v9142_v36, %v1968_v37  ;;  %12033 = vst [vmem:[#allocation7_spill] sm:$0xff] %v9613_v11  ;;  %v3290_v10 = vpop.f32.mrb[45].mxu0  ;;  %v12037_v50 = vrot.slane %v9265_v60, 7 }
 0x3c4   : > { %v2174_v13 = vmax.f32 %v2157_v57, 0.0  ;;  %v2039_v51 = vadd.f32 %v2022_v22, %v1937_v40  ;;  %v2394_v37 = vsel %vm692_vm2, %v12037_v50, %v12036_v2  ;;  %v1976_v2 = vpop.permute.xlu0 %1975 }
 0x3c5   : > { %v7258_v9 = vpop.permute.xlu1 %7257  ;;  %v9616_v18 = vpop.f32.mrb[46].mxu0 }
 0x3c6   : > { %v2141_v63 = vadd.f32 %v2124_v54, %v2039_v51  ;;  %v7259_v61 = vunpack.i.l.bf16 %v7258_v9  ;;  %12034 = vst [vmem:[#allocation13_spill] sm:$0xff] %v9616_v18  ;;  %v2242_v23 = vmul.f32 %v12035_v30, %v2174_v13  ;;  %v7260_v53 = vunpack.i.h.bf16 %v7258_v9  ;;  %v3295_v57 = vpop.f32.mrb[47].mxu0  ;;  %v12038_v13 = vld [vmem:[#allocation25_spill] sm:$0xff] }
 0x3c8   : > { %v2158_v1 = vadd.f32 %v9170_v56, %v2141_v63  ;;  %v2909_v40 = vsel %vm2872_vm10, %v2394_v37, %v7259_v61  ;;  %2776 = vrot.lane.b32.xlu1 %v2242_v23, %s11703_s20  ;;  %v2632_v54 = vrot.slane %v2242_v23, 1  ;;  %v2428_v51 = vrot.slane %v2242_v23, 7 }
 0x3c9   : > { %v1887_v22 = vpop.permute.xlu1 %1886  ;;  %3357 = vmatmul.mubr.f32.gmra.mrb[72].mxu0 %v2909_v40  ;;  %v2910_v61 = vsel %vm2872_vm10, %v12038_v13, %v7260_v53  ;;  %v2125_v40 = vmul.f32 %v9148_v43, %v2074_v49  ;;  %v2078_v13 = vpop.permute.xlu0 %2077 }
 0x3ca   : > { %v2175_v10 = vmax.f32 %v2158_v1, 0.0  ;;  %6220 = vmatprep.mubr.msk.f32.mxu0 %vm2872_vm10, %v9318_v44  ;;  %v9631_v60 = vsel %vm924_vm3, %v2630_v12, %v2632_v54  ;;  %v9634_v9 = vsel %vm692_vm2, %v2426_v52, %v2428_v51  ;;  %v12039_v1 = vrot.slane %v9289_v21, 1 }
 0x3cb   : > { %v1938_v52 = vmul.f32 %v9134_v14, %v1887_v22 }
 0x3cc   : > { %v2243_v63 = vmul.f32 %v11972_v28, %v2175_v10  ;;  %v2604_v23 = vsel %vm924_vm3, %v12039_v1, %v2603_v41 }
 0x3cd   : > { %3362 = vmatmul.mubr.f32.gmra.mrb[74].mxu0 %v2910_v61 }
 0x3ce   : > { %2778 = vrot.lane.b32.xlu0 %v2243_v63, %s11703_s20  ;;  %v1972_v44 = vpop.permute.xlu1 %1971  ;;  %6221 = vmatprep.mubr.msk.f32.mxu0 %vm2872_vm10, %v2604_v23  ;;  %v2634_v12 = vrot.slane %v2243_v63, 1  ;;  %v2430_v50 = vrot.slane %v2243_v63, 7  ;;  %v2024_v23 = vmul.f32 %v9142_v36, %v1976_v2 }
 0x3cf   : > { %v2023_v37 = vmul.f32 %v9142_v36, %v1972_v44  ;;  %v2126_v44 = vmul.f32 %v9148_v43, %v2078_v13  ;;  %v12041_v13 = vrot.slane %v9092_v29, 1 }
 0x3d0   : > { %v9647_v53 = vsel %vm924_vm3, %v2632_v54, %v2634_v12  ;;  %v9650_v57 = vsel %vm692_vm2, %v2428_v51, %v2430_v50 }
 0x3d1   : > { %v2040_v10 = vadd.f32 %v2023_v37, %v1938_v52 }
 0x3d3   : > { %v2142_v61 = vadd.f32 %v2125_v40, %v2040_v10  ;;  %v1891_v1 = vpop.permute.xlu1 %1890 }
 0x3d4   : > { %v1939_v63 = vmul.f32 %v9134_v14, %v1891_v1 }
 0x3d5   : > { %v2159_v22 = vadd.f32 %v9170_v56, %v2142_v61  ;;  %v2399_v61 = vrot.slane %v9424_v39, 7 }
 0x3d6   : > { %v2041_v28 = vadd.f32 %v2024_v23, %v1939_v63  ;;  %v9657_v11 = vpop.f32.mrb[48].mxu0  ;;  %v1980_v63 = vpop.permute.xlu0 %1979 }
 0x3d7   : > { %v2176_v54 = vmax.f32 %v2159_v22, 0.0  ;;  %v7266_v30 = vpop.permute.xlu1 %7265  ;;  %12040 = vst [vmem:[#allocation72_spill] sm:$0xff] %v9657_v11  ;;  %v3300_v49 = vpop.f32.mrb[49].mxu0 }
 0x3d8   : > { %v2143_v18 = vadd.f32 %v2126_v44, %v2041_v28  ;;  %v7267_v51 = vunpack.i.l.bf16 %v7266_v30  ;;  %v7268_v40 = vunpack.i.h.bf16 %v7266_v30  ;;  %v2606_v28 = vsel %vm924_vm3, %v2603_v41, %v12041_v13  ;;  %v12044_v49 = vld [vmem:[#allocation66_spill] sm:$0xff] }
 0x3d9   : > { %v2244_v52 = vmul.f32 %v12007_v24, %v2176_v54 }
 0x3da   : > { %v2160_v37 = vadd.f32 %v9170_v56, %v2143_v18  ;;  %v2911_v2 = vsel %vm2872_vm10, %v9328_v26, %v7267_v51  ;;  %v9668_v44 = vpop.f32.mrb[50].mxu0  ;;  %v12043_v18 = vrot.slane %v9289_v21, 7 }
 0x3db   : > { %2780 = vrot.lane.b32.xlu1 %v2244_v52, %s11703_s20  ;;  %v1895_v10 = vpop.permute.xlu1 %1894  ;;  %3367 = vmatmul.mubr.f32.gmra.mrb[76].mxu0 %v2911_v2  ;;  %v2636_v1 = vrot.slane %v2244_v52, 1  ;;  %v2432_v23 = vrot.slane %v2244_v52, 7  ;;  %12042 = vst [vmem:[#allocation6_spill] sm:$0xff] %v9668_v44  ;;  %v3305_v30 = vpop.f32.mrb[51].mxu0  ;;  %v12059_v44 = vld [vmem:[#allocation77_spill] sm:$0xff] }
 0x3dc   : > { %v2177_v22 = vmax.f32 %v2160_v37, 0.0  ;;  %6222 = vmatprep.mubr.msk.f32.mxu0 %vm2872_vm10, %v2606_v28  ;;  %v1940_v26 = vmul.f32 %v9134_v14, %v1895_v10  ;;  %v2400_v54 = vsel %vm692_vm2, %v12043_v18, %v2399_v61  ;;  %v2025_v37 = vmul.f32 %v9142_v36, %v1980_v63  ;;  %v12045_v10 = vld [vmem:[#allocation27_spill] sm:$0xff]  ;;  %v2086_v63 = vpop.permute.xlu0 %2085 }
 0x3dd   : > { %v9676_v51 = vsel %vm924_vm3, %v2634_v12, %v2636_v1  ;;  %v9679_v39 = vsel %vm692_vm2, %v2430_v50, %v2432_v23  ;;  %v2912_v41 = vsel %vm2872_vm10, %v2400_v54, %v7268_v40  ;;  %v1941_v18 = vmul.f32 %v9134_v14, %v9500_v59 }
 0x3de   : > { %v2245_v52 = vmul.f32 %v12044_v49, %v2177_v22  ;;  %v2042_v12 = vadd.f32 %v2025_v37, %v1940_v26  ;;  %v3601_v26 = vld [vmem:[%s11531_s6 + $0x80] sm:$0xff] }
 0x3df   : > { %3372 = vmatmul.mubr.f32.gmra.mrb[78].mxu0 %v2912_v41 }
 0x3e0   : > { %2782 = vrot.lane.b32.xlu0 %v2245_v52, %s11703_s20  ;;  %v2082_v2 = vpop.permute.xlu1 %2081  ;;  %6223 = vmatprep.mubr.msk.f32.mxu0 %vm2872_vm10, %v12045_v10  ;;  %v2638_v21 = vrot.slane %v2245_v52, 1  ;;  %v2434_v13 = vrot.slane %v2245_v52, 7  ;;  %v2128_v52 = vmul.f32 %v9148_v43, %v2086_v63 }
 0x3e1   : > { %v2127_v28 = vmul.f32 %v9148_v43, %v2082_v2  ;;  %v12046_v43 = vld [vmem:[#allocation70_spill] sm:$0xff] }
 0x3e2   : > { %v9689_v50 = vsel %vm924_vm3, %v2636_v1, %v2638_v21  ;;  %v9692_v40 = vsel %vm692_vm2, %v2432_v23, %v2434_v13  ;;  %v3602_v1 = vld [vmem:[%s11531_s6 + $0x88] sm:$0xff]  ;;  %v3603_v23 = vld [vmem:[%s11531_s6 + $0x90] sm:$0xff] }
 0x3e3   : > { %v2144_v22 = vadd.f32 %v2127_v28, %v2042_v12  ;;  %v6842_v59 = vpack.c.bf16 %v3602_v1, %v3601_v26  ;;  %v3605_v12 = vld [vmem:[%s11531_s6 + $0xa0] sm:$0xff]  ;;  %v3606_v28 = vld [vmem:[%s11531_s6 + $0xa8] sm:$0xff] }
 0x3e4   : > { %v1984_v30 = vpop.permute.xlu1 %1983 }
 0x3e5   : > { %v2161_v54 = vadd.f32 %v9170_v56, %v2144_v22  ;;  %v2026_v41 = vmul.f32 %v9142_v36, %v1984_v30  ;;  %v3604_v36 = vld [vmem:[%s11531_s6 + $0x98] sm:$0xff]  ;;  %6843 = vmatprep.subr.bf16.mxu1 %v6842_v59 }
 0x3e6   : > { %v6846_v10 = vpack.c.bf16 %v3604_v36, %v3603_v23  ;;  %6845 = vmatpush3.bf16.msra.mxu1 %v6842_v59  ;;  %v6850_v36 = vpack.c.bf16 %v3606_v28, %v3605_v12  ;;  %v12049_v59 = vld [vmem:[#allocation37_spill] sm:$0xff] }
 0x3e7   : > { %v2178_v37 = vmax.f32 %v2161_v54, 0.0  ;;  %v2043_v14 = vadd.f32 %v2026_v41, %v1941_v18  ;;  %v2090_v18 = vpop.permute.xlu0 %2089  ;;  %v12047_v54 = vrot.slane %v9092_v29, 7 }
 0x3e8   : > { %v7272_v2 = vpop.permute.xlu1 %7271  ;;  %6847 = vmatprep.subr.bf16.mxu1 %v6846_v10 }
 0x3e9   : > { %v2145_v22 = vadd.f32 %v2128_v52, %v2043_v14  ;;  %v7273_v30 = vunpack.i.l.bf16 %v7272_v2  ;;  %v2246_v63 = vmul.f32 %v12046_v43, %v2178_v37  ;;  %v2402_v41 = vsel %vm692_vm2, %v2399_v61, %v12047_v54 }
 0x3ea   : > { %v7274_v1 = vunpack.i.h.bf16 %v7272_v2  ;;  %6849 = vmatpush3.bf16.msra.mxu1 %v6846_v10  ;;  %v9748_v10 = vld [vmem:[%s11527_s2] ss:$0 sm:$0xff] }
 0x3eb   : > { %v2162_v26 = vadd.f32 %v9170_v56, %v2145_v22  ;;  %2784 = vrot.lane.b32.xlu1 %v2246_v63, %s11703_s20  ;;  %v2913_v23 = vsel %vm2872_vm10, %v2402_v41, %v7273_v30  ;;  %v2640_v52 = vrot.slane %v2246_v63, 1  ;;  %v2436_v14 = vrot.slane %v2246_v63, 7  ;;  %6851 = vmatprep.subr.bf16.mxu1 %v6850_v36  ;;  %v1992_v28 = vpop.permute.xlu0 %1991  ;;  %v9754_v63 = vld [vmem:[%s11527_s2 + $0x1] ss:$0 sm:$0xff] }
 0x3ec   : > { %v1903_v49 = vpop.permute.xlu1 %1902  ;;  %3377 = vmatmul.mubr.f32.gmra.mrb[80].mxu0 %v2913_v23  ;;  %v2914_v2 = vsel %vm2872_vm10, %v12049_v59, %v7274_v1  ;;  %v3608_v1 = vld [vmem:[%s11531_s6 + $0xb8] sm:$0xff]  ;;  %v9774_v23 = vld [vmem:[%s11527_s2 + $0x2] ss:$0 sm:$0xff] }
 0x3ed   : > { %v2179_v37 = vmax.f32 %v2162_v26, 0.0  ;;  %6224 = vmatprep.mubr.msk.f32.mxu0 %vm2872_vm10, %v9343_v3  ;;  %v9727_v29 = vsel %vm924_vm3, %v2638_v21, %v2640_v52  ;;  %v9730_v56 = vsel %vm692_vm2, %v2434_v13, %v2436_v14  ;;  %v1942_v30 = vmul.f32 %v9748_v10, %v1903_v49  ;;  %v3607_v49 = vld [vmem:[%s11531_s6 + $0xb0] sm:$0xff] }
 0x3ee   : > { %v9732_v61 = vpop.f32.mrb[52].mxu0  ;;  %6853 = vmatpush3.bf16.msra.mxu1 %v6850_v36  ;;  %v2129_v36 = vmul.f32 %v9774_v23, %v2090_v18  ;;  %v6854_v59 = vpack.c.bf16 %v3608_v1, %v3607_v49  ;;  %v3610_v18 = vld [vmem:[%s11531_s6 + $0xc8] sm:$0xff]  ;;  %v3612_v1 = vld [vmem:[%s11531_s6 + $0xd8] sm:$0xff] }
 0x3ef   : > { %12048 = vst [vmem:[#allocation11_spill] sm:$0xff] %v9732_v61  ;;  %v9737_v12 = vmul.f32 %v11976_v19, %v2179_v37  ;;  %v3310_v22 = vpop.f32.mrb[53].mxu0  ;;  %v3609_v19 = vld [vmem:[%s11531_s6 + $0xc0] sm:$0xff] }
 0x3f0   : > { %3382 = vmatmul.mubr.f32.gmra.mrb[82].mxu0 %v2914_v2  ;;  %6855 = vmatprep.subr.bf16.mxu1 %v6854_v59  ;;  %v2028_v22 = vmul.f32 %v9754_v63, %v1992_v28  ;;  %v6858_v49 = vpack.c.bf16 %v3610_v18, %v3609_v19  ;;  %v3611_v28 = vld [vmem:[%s11531_s6 + $0xd0] sm:$0xff] }
 0x3f1   : > { %2786 = vrot.lane.b32.xlu0 %v9737_v12, %s11703_s20  ;;  %v1988_v3 = vpop.permute.xlu1 %1987  ;;  %6225 = vmatprep.mubr.msk.f32.mxu0 %vm2872_vm10, %v9348_v38  ;;  %v2642_v21 = vrot.slane %v9737_v12, 1  ;;  %v2438_v13 = vrot.slane %v9737_v12, 7  ;;  %s7406_s20 = smov 1  }
 0x3f2   : > { %v2027_v54 = vmul.f32 %v9754_v63, %v1988_v3  ;;  %v9757_v38 = vpop.f32.mrb[54].mxu0  ;;  %6857 = vmatpush3.bf16.msra.mxu1 %v6854_v59 }
 0x3f3   : > { %12050 = vst [vmem:[#allocation8_spill] sm:$0xff] %v9757_v38  ;;  %v9760_v41 = vsel %vm924_vm3, %v2640_v52, %v2642_v21  ;;  %v9763_v26 = vsel %vm692_vm2, %v2436_v14, %v2438_v13  ;;  %v3315_v37 = vpop.f32.mrb[55].mxu0  ;;  %v2094_v14 = vpop.permute.xlu0 %2093  ;;  %6859 = vmatprep.subr.bf16.mxu1 %v6858_v49  ;;  %v12051_v38 = vld [vmem:[#allocation47_spill] sm:$0xff] }
 0x3f4   : > { %v2044_v52 = vadd.f32 %v2027_v54, %v1942_v30  ;;  %v9788_v30 = vld [vmem:[%s11528_s3] ss:$0 sm:$0xff]  ;;  %v6862_v37 = vpack.c.bf16 %v3612_v1, %v3611_v28  ;;  %v12053_v1 = vld [vmem:[#allocation38_spill] sm:$0xff] }
 0x3f6   : > { %v2146_v2 = vadd.f32 %v2129_v36, %v2044_v52  ;;  %v1907_v12 = vpop.permute.xlu1 %1906  ;;  %v2130_v36 = vmul.f32 %v9774_v23, %v2094_v14  ;;  %6861 = vmatpush3.bf16.msra.mxu1 %v6858_v49 }
 0x3f7   : > { %v1943_v3 = vmul.f32 %v9748_v10, %v1907_v12  ;;  %6863 = vmatprep.subr.bf16.mxu1 %v6862_v37 }
 0x3f8   : > { %v2163_v54 = vadd.f32 %v9788_v30, %v2146_v2 }
 0x3f9   : > { %v2045_v52 = vadd.f32 %v2028_v22, %v1943_v3 }
 0x3fa   : > { %v2180_v59 = vmax.f32 %v2163_v54, 0.0  ;;  %v7280_v12 = vpop.permute.xlu1 %7279  ;;  %v1996_v54 = vpop.permute.xlu0 %1995  ;;  %6865 = vmatpush3.bf16.msra.mxu1 %v6862_v37 }
 0x3fb   : > { %v2147_v43 = vadd.f32 %v2130_v36, %v2045_v52  ;;  %v7281_v24 = vunpack.i.l.bf16 %v7280_v12  ;;  %v7282_v18 = vunpack.i.h.bf16 %v7280_v12  ;;  %v12054_v52 = vld [vmem:[#allocation50_spill] sm:$0xff] }
 0x3fc   : > { %v2248_v19 = vmul.f32 %v11955_v15, %v2180_v59  ;;  %v12055_v59 = vld [vmem:[#allocation74_spill] sm:$0xff] }
 0x3fd   : > { %v2164_v2 = vadd.f32 %v9788_v30, %v2147_v43  ;;  %v2915_v61 = vsel %vm2872_vm10, %v12051_v38, %v7281_v24  ;;  %v3613_v43 = vld [vmem:[%s11531_s6 + $0xe0] sm:$0xff]  ;;  %v3614_v24 = vld [vmem:[%s11531_s6 + $0xe8] sm:$0xff]  ;;  %v2916_v37 = vsel %vm2872_vm10, %v12054_v52, %v7282_v18  ;;  %v3616_v18 = vld [vmem:[%s11531_s6 + $0xf8] sm:$0xff] }
 0x3fe   : > { %2788 = vrot.lane.b32.xlu1 %v2248_v19, %s12052_s0  ;;  %v1911_v14 = vpop.permute.xlu1 %1910  ;;  %3387 = vmatmul.mubr.f32.gmra.mrb[84].mxu0 %v2915_v61  ;;  %v2644_v22 = vrot.slane %v2248_v19, 1  ;;  %v2440_v3 = vrot.slane %v2248_v19, 7  ;;  %v6866_v36 = vpack.c.bf16 %v3614_v24, %v3613_v43  ;;  %v2029_v19 = vmul.f32 %v9754_v63, %v1996_v54 }
 0x3ff   : > { %v2181_v28 = vmax.f32 %v2164_v2, 0.0  ;;  %6226 = vmatprep.mubr.msk.f32.mxu0 %vm2872_vm10, %v12053_v1  ;;  %v1944_v38 = vmul.f32 %v9748_v10, %v1911_v14  ;;  %v12056_v14 = vld [vmem:[#allocation31_spill] sm:$0xff] }
 0x400   : > { %v9813_v61 = vsel %vm924_vm3, %v2642_v21, %v2644_v22  ;;  %v9816_v49 = vsel %vm692_vm2, %v2438_v13, %v2440_v3  ;;  %6867 = vmatprep.subr.bf16.mxu1 %v6866_v36  ;;  %v3615_v13 = vld [vmem:[%s11531_s6 + $0xf0] sm:$0xff] }
 0x401   : > { %v2249_v12 = vmul.f32 %v12055_v59, %v2181_v28  ;;  %v2046_v28 = vadd.f32 %v2029_v19, %v1944_v38  ;;  %6869 = vmatpush3.bf16.msra.mxu1 %v6866_v36  ;;  %v6870_v24 = vpack.c.bf16 %v3616_v18, %v3615_v13  ;;  %v1945_v38 = vmul.f32 %v9748_v10, %v9503_v58 }
 0x402   : > { %3392 = vmatmul.mubr.f32.gmra.mrb[86].mxu0 %v2916_v37 }
 0x403   : > { %2790 = vrot.lane.b32.xlu0 %v2249_v12, %s12052_s0  ;;  %v2098_v2 = vpop.permute.xlu1 %2097  ;;  %6227 = vmatprep.mubr.msk.f32.mxu0 %vm2872_vm10, %v12056_v14  ;;  %v2646_v21 = vrot.slane %v2249_v12, 1  ;;  %v2442_v1 = vrot.slane %v2249_v12, 7  ;;  %v9832_v43 = vpop.f32.mrb[56].mxu0 }
 0x404   : > { %v2131_v54 = vmul.f32 %v9774_v23, %v2098_v2  ;;  %12057 = vst [vmem:[#allocation17_spill] sm:$0xff] %v9832_v43  ;;  %v3320_v52 = vpop.f32.mrb[57].mxu0  ;;  %v2102_v14 = vpop.permute.xlu0 %2101  ;;  %6871 = vmatprep.subr.bf16.mxu1 %v6870_v24 }
 0x405   : > { %v9835_v37 = vsel %vm924_vm3, %v2644_v22, %v2646_v21  ;;  %v9838_v12 = vsel %vm692_vm2, %v2440_v3, %v2442_v1  ;;  %6873 = vmatpush3.bf16.msra.mxu1 %v6870_v24  ;;  %v2132_v22 = vmul.f32 %v9774_v23, %v2102_v14 }
 0x406   : > { %v2148_v59 = vadd.f32 %v2131_v54, %v2046_v28 }
 0x407   : > { %v2000_v15 = vpop.permute.xlu1 %1999  ;;  %v9844_v36 = vpop.f32.mrb[58].mxu0 }
 0x408   : > { %v2165_v19 = vadd.f32 %v9788_v30, %v2148_v59  ;;  %v2030_v2 = vmul.f32 %v9754_v63, %v2000_v15  ;;  %12058 = vst [vmem:[#allocation9_spill] sm:$0xff] %v9844_v36  ;;  %v3325_v13 = vpop.f32.mrb[59].mxu0  ;;  %v2106_v43 = vpop.permute.xlu0 %2105  ;;  %v12060_v15 = vld [vmem:[#allocation87_spill] sm:$0xff] }
 0x40a   : > { %v2182_v18 = vmax.f32 %v2165_v19, 0.0  ;;  %v2047_v3 = vadd.f32 %v2030_v2, %v1945_v38  ;;  %v12061_v38 = vld [vmem:[#allocation51_spill] sm:$0xff] }
 0x40b   : > { %v7287_v52 = vpop.permute.xlu1 %7286 }
 0x40c   : > { %v2149_v28 = vadd.f32 %v2132_v22, %v2047_v3  ;;  %v7288_v54 = vunpack.i.l.bf16 %v7287_v52  ;;  %v2250_v11 = vmul.f32 %v12059_v44, %v2182_v18  ;;  %v7289_v16 = vunpack.i.h.bf16 %v7287_v52  ;;  %v2008_v18 = vpop.permute.xlu0 %2007  ;;  %v12062_v3 = vld [vmem:[#allocation88_spill] sm:$0xff] }
 0x40e   : > { %v2166_v58 = vadd.f32 %v9788_v30, %v2149_v28  ;;  %2792 = vrot.lane.b32.xlu1 %v2250_v11, %s12052_s0  ;;  %v2917_v59 = vsel %vm2872_vm10, %v12060_v15, %v7288_v54  ;;  %v2648_v24 = vrot.slane %v2250_v11, 1  ;;  %v2444_v14 = vrot.slane %v2250_v11, 7  ;;  %v12063_v28 = vld [vmem:[#allocation79_spill] sm:$0xff] }
 0x40f   : > { %v1919_v13 = vpop.permute.xlu1 %1918  ;;  %3397 = vmatmul.mubr.f32.gmra.mrb[88].mxu0 %v2917_v59  ;;  %v2918_v52 = vsel %vm2872_vm10, %v12062_v3, %v7289_v16 }
 0x410   : > { %v2183_v19 = vmax.f32 %v2166_v58, 0.0  ;;  %6228 = vmatprep.mubr.msk.f32.mxu0 %vm2872_vm10, %v12061_v38  ;;  %v9855_v2 = vsel %vm924_vm3, %v2646_v21, %v2648_v24  ;;  %v9858_v22 = vsel %vm692_vm2, %v2442_v1, %v2444_v14  ;;  %v12064_v58 = vld [vmem:[#allocation46_spill] sm:$0xff]  ;;  %v1946_v21 = vmul.f32 %v9748_v10, %v1919_v13 }
 0x412   : > { %v2251_v54 = vmul.f32 %v12063_v28, %v2183_v19  ;;  %v2133_v19 = vmul.f32 %v9774_v23, %v2106_v43  ;;  %v2621_v43 = vrot.slane %v9559_v6, 1 }
 0x413   : > { %3402 = vmatmul.mubr.f32.gmra.mrb[90].mxu0 %v2918_v52  ;;  %v2110_v52 = vpop.permute.xlu0 %2109 }
 0x414   : > { %2794 = vrot.lane.b32.xlu0 %v2251_v54, %s12052_s0  ;;  %v2004_v11 = vpop.permute.xlu1 %2003  ;;  %6229 = vmatprep.mubr.msk.f32.mxu0 %vm2872_vm10, %v12064_v58  ;;  %v2650_v15 = vrot.slane %v2251_v54, 1  ;;  %v2446_v59 = vrot.slane %v2251_v54, 7  ;;  %v2032_v58 = vmul.f32 %v9754_v63, %v2008_v18  ;;  %v12066_v18 = vld [vmem:[#allocation80_spill] sm:$0xff] }
 0x415   : > { %v2031_v1 = vmul.f32 %v9754_v63, %v2004_v11 }
 0x416   : > { %v9869_v38 = vsel %vm924_vm3, %v2648_v24, %v2650_v15  ;;  %v9872_v16 = vsel %vm692_vm2, %v2444_v14, %v2446_v59  ;;  %v2134_v24 = vmul.f32 %v9774_v23, %v2110_v52 }
 0x417   : > { %v2048_v3 = vadd.f32 %v2031_v1, %v1946_v21  ;;  %v2012_v21 = vpop.permute.xlu0 %2011 }
 0x419   : > { %v2150_v28 = vadd.f32 %v2133_v19, %v2048_v3  ;;  %v1923_v44 = vpop.permute.xlu1 %1922 }
 0x41a   : > { %v1947_v54 = vmul.f32 %v9748_v10, %v1923_v44  ;;  %v9878_v36 = vpop.f32.mrb[60].mxu0 }
 0x41b   : > { %v2167_v13 = vadd.f32 %v9788_v30, %v2150_v28  ;;  %12065 = vst [vmem:[#allocation21_spill] sm:$0xff] %v9878_v36  ;;  %v3330_v31 = vpop.f32.mrb[61].mxu0  ;;  %v12067_v36 = vld [vmem:[#allocation49_spill] sm:$0xff] }
 0x41c   : > { %v2049_v11 = vadd.f32 %v2032_v58, %v1947_v54  ;;  %v12068_v58 = vrot.slane %v9321_v45, 1 }
 0x41d   : > { %v2184_v14 = vmax.f32 %v2167_v13, 0.0  ;;  %v7295_v0 = vpop.permute.xlu1 %7294  ;;  %v2623_v13 = vrot.slane %v9575_v62, 1 }
 0x41e   : > { %v2151_v1 = vadd.f32 %v2134_v24, %v2049_v11  ;;  %v7296_v19 = vunpack.i.l.bf16 %v7295_v0  ;;  %v9882_v3 = vpop.f32.mrb[62].mxu0  ;;  %v7297_v28 = vunpack.i.h.bf16 %v7295_v0  ;;  %v2622_v54 = vsel %vm924_vm3, %v12068_v58, %v2621_v43 }
 0x41f   : > { %v2252_v33 = vmul.f32 %v12066_v18, %v2184_v14  ;;  %v3335_v34 = vpop.f32.mrb[63].mxu0  ;;  %v2033_v58 = vmul.f32 %v9754_v63, %v2012_v21 }
 0x420   : > { %v2168_v44 = vadd.f32 %v9788_v30, %v2151_v1  ;;  %v2919_v52 = vsel %vm2872_vm10, %v12067_v36, %v7296_v19  ;;  %v1931_v1 = vpop.permute.xlu0 %1930  ;;  %v2920_v19 = vsel %vm2872_vm10, %v9388_v27, %v7297_v28 }
 0x421   : > { %2796 = vrot.lane.b32.xlu1 %v2252_v33, %s12052_s0  ;;  %v1927_v31 = vpop.permute.xlu1 %1926  ;;  %3407 = vmatmul.mubr.f32.gmra.mrb[92].mxu0 %v2919_v52  ;;  %v2652_v24 = vrot.slane %v2252_v33, 1  ;;  %v2448_v11 = vrot.slane %v2252_v33, 7  ;;  %v2624_v33 = vsel %vm924_vm3, %v2621_v43, %v2623_v13  ;;  %v2417_v43 = vrot.slane %v9559_v6, 7 }
 0x422   : > { %v2185_v14 = vmax.f32 %v2168_v44, 0.0  ;;  %6230 = vmatprep.mubr.msk.f32.mxu0 %vm2872_vm10, %v2622_v54  ;;  %v1948_v34 = vmul.f32 %v9748_v10, %v1927_v31 }
 0x423   : > { %v9896_v0 = vsel %vm924_vm3, %v2650_v15, %v2652_v24  ;;  %v9899_v36 = vsel %vm692_vm2, %v2446_v59, %v2448_v11 }
 0x424   : > { %v2253_v52 = vmul.f32 %v12027_v55, %v2185_v14  ;;  %v2050_v59 = vadd.f32 %v2033_v58, %v1948_v34  ;;  %v2118_v28 = vpop.permute.xlu0 %2117  ;;  %v2625_v34 = vrot.slane %v9582_v48, 1 }
 0x425   : > { %3412 = vmatmul.mubr.f32.gmra.mrb[94].mxu0 %v2920_v19  ;;  %v1949_v19 = vmul.f32 %v9748_v10, %v1931_v1  ;;  %v2136_v58 = vmul.f32 %v9774_v23, %v2118_v28 }
 0x426   : > { %2798 = vrot.lane.b32.xlu0 %v2253_v52, %s12052_s0  ;;  %v2114_v44 = vpop.permute.xlu1 %2113  ;;  %6231 = vmatprep.mubr.msk.f32.mxu0 %vm2872_vm10, %v2624_v33  ;;  %v2654_v15 = vrot.slane %v2253_v52, 1  ;;  %v2450_v31 = vrot.slane %v2253_v52, 7 }
 0x427   : > { %v2135_v54 = vmul.f32 %v9774_v23, %v2114_v44 }
 0x428   : > { %v9910_v18 = vsel %vm924_vm3, %v2652_v24, %v2654_v15  ;;  %v9913_v27 = vsel %vm692_vm2, %v2448_v11, %v2450_v31  ;;  %v12069_v11 = vrot.slane %v9321_v45, 7 }
 0x429   : > { %v2152_v21 = vadd.f32 %v2135_v54, %v2050_v59  ;;  %v2419_v54 = vrot.slane %v9575_v62, 7 }
 0x42a   : > { %v2016_v14 = vpop.permute.xlu1 %2015  ;;  %v2418_v59 = vsel %vm692_vm2, %v12069_v11, %v2417_v43 }
 0x42b   : > { %v2169_v33 = vadd.f32 %v9788_v30, %v2152_v21  ;;  %v2034_v52 = vmul.f32 %v9754_v63, %v2016_v14  ;;  %v2626_v63 = vsel %vm924_vm3, %v2623_v13, %v2625_v34 }
 0x42d   : > { %v2186_v24 = vmax.f32 %v2169_v33, 0.0  ;;  %v2051_v44 = vadd.f32 %v2034_v52, %v1949_v19  ;;  %v2420_v19 = vsel %vm692_vm2, %v2417_v43, %v2419_v54 }
 0x42e   : > { %v2765_v55 = vpop.permute.xlu1 %2764 }
 0x42f   : > { %v2153_v6 = vadd.f32 %v2136_v58, %v2051_v44  ;;  %v2921_v10 = vsel %vm2872_vm10, %v2418_v59, %v2765_v55  ;;  %v2254_v1 = vmul.f32 %v12030_v46, %v2186_v24  ;;  %v9927_v21 = vpop.f32.mrb[64].mxu0  ;;  %v2421_v55 = vrot.slane %v9582_v48, 7 }
 0x430   : > { %3417 = vmatmul.mubr.f32.gmra.mrb[96].mxu0 %v2921_v10  ;;  %v3340_v28 = vpop.f32.mrb[65].mxu0  ;;  %v12070_v10 = vrot.slane %v9551_v17, 7 }
 0x431   : > { %v2170_v23 = vadd.f32 %v9788_v30, %v2153_v6  ;;  %2800 = vrot.lane.b32.xlu1 %v2254_v1, %s12052_s0  ;;  %6232 = vmatprep.mubr.msk.f32.mxu0 %vm2872_vm10, %v2626_v63  ;;  %v2656_v45 = vrot.slane %v2254_v1, 1  ;;  %v2452_v14 = vrot.slane %v2254_v1, 7  ;;  %v2666_v30 = vsel %vm924_vm3, %v2625_v34, 0.0 }
 0x432   : > { %v2767_v62 = vpop.permute.xlu1 %2766  ;;  %v2422_v11 = vsel %vm692_vm2, %v2419_v54, %v2421_v55  ;;  %v2527_v1 = vsel %vm692_vm2, 0.0, %v12070_v10 }
 0x433   : > { %v2187_v33 = vmax.f32 %v2170_v23, 0.0  ;;  %v2922_v52 = vsel %vm2872_vm10, %v2420_v19, %v2767_v62  ;;  %v9937_v58 = vsel %vm924_vm3, %v2654_v15, %v2656_v45  ;;  %v9939_v13 = vpop.f32.mrb[66].mxu0  ;;  %v9943_v24 = vsel %vm692_vm2, %v2450_v31, %v2452_v14  ;;  %v2771_v31 = vpop.permute.xlu0 %2770 }
 0x434   : > { %3422 = vmatmul.mubr.f32.gmra.mrb[98].mxu0 %v2922_v52  ;;  %v3345_v44 = vpop.f32.mrb[67].mxu0  ;;  %v2924_v63 = vsel %vm2872_vm10, %v2527_v1, %v2771_v31 }
 0x435   : > { %6233 = vmatprep.mubr.msk.f32.mxu0 %vm2872_vm10, %v2666_v30  ;;  %v9947_v43 = vmul.f32 %v12031_v35, %v2187_v33 }
 0x436   : > { %v2769_v48 = vpop.permute.xlu1 %2768 }
 0x437   : > { %2802 = vrot.lane.b32.xlu0 %v9947_v43, %s12052_s0  ;;  %v2923_v15 = vsel %vm2872_vm10, %v2422_v11, %v2769_v48  ;;  %v2658_v59 = vrot.slane %v9947_v43, 1  ;;  %v2454_v34 = vrot.slane %v9947_v43, 7  ;;  %v2775_v28 = vpop.permute.xlu0 %2774  ;;  %s12165_s0 = smov 126  }
 0x438   : > { %3427 = vmatmul.mubr.f32.gmra.mrb[100].mxu0 %v2923_v15  ;;  %v2926_v17 = vsel %vm2872_vm10, %v9607_v8, %v2775_v28 }
 0x439   : > { %6234 = vmatprep.mubr.msk.f32.mxu0 %vm2872_vm10, %v9590_v42  ;;  %v9960_v6 = vsel %vm924_vm3, %v2656_v45, %v2658_v59  ;;  %v9963_v54 = vsel %vm692_vm2, %v2452_v14, %v2454_v34 }
 0x43a   : > { %v2773_v23 = vpop.permute.xlu1 %2772 }
 0x43b   : > { %v2925_v42 = vsel %vm2872_vm10, %v9595_v20, %v2773_v23 }
 0x43c   : > { %3432 = vmatmul.mubr.f32.gmra.mrb[102].mxu0 %v2924_v63 }
 0x43d   : > { %6235 = vmatprep.mubr.msk.f32.mxu0 %vm2872_vm10, %v9604_v32 }
 0x43e   : > { %v2777_v45 = vpop.permute.xlu1 %2776 }
 0x43f   : > { %v2927_v14 = vsel %vm2872_vm10, %v9634_v9, %v2777_v45 }
 0x440   : > { %3437 = vmatmul.mubr.f32.gmra.mrb[104].mxu0 %v2925_v42  ;;  %v2779_v32 = vpop.permute.xlu0 %2778 }
 0x441   : > { %6236 = vmatprep.mubr.msk.f32.mxu0 %vm2872_vm10, %v9631_v60  ;;  %v2928_v20 = vsel %vm2872_vm10, %v9650_v57, %v2779_v32 }
 0x444   : > { %3442 = vmatmul.mubr.f32.gmra.mrb[106].mxu0 %v2926_v17 }
 0x445   : > { %6237 = vmatprep.mubr.msk.f32.mxu0 %vm2872_vm10, %v9647_v53 }
 0x448   : > { %3447 = vmatmul.mubr.f32.gmra.mrb[108].mxu0 %v2927_v14 }
 0x449   : > { %6238 = vmatprep.mubr.msk.f32.mxu0 %vm2872_vm10, %v9676_v51 }
 0x44c   : > { %3452 = vmatmul.mubr.f32.gmra.mrb[110].mxu0 %v2928_v20 }
 0x44d   : > { %v2781_v60 = vpop.permute.xlu1 %2780  ;;  %6239 = vmatprep.mubr.msk.f32.mxu0 %vm2872_vm10, %v9689_v50 }
 0x44e   : > { %v2929_v8 = vsel %vm2872_vm10, %v9679_v39, %v2781_v60 }
 0x450   : > { %3457 = vmatmul.mubr.f32.gmra.mrb[112].mxu0 %v2929_v8 }
 0x451   : > { %6240 = vmatprep.mubr.msk.f32.mxu0 %vm2872_vm10, %v9727_v29 }
 0x452   : > { %v2783_v9 = vpop.permute.xlu0 %2782 }
 0x453   : > { %v2930_v53 = vsel %vm2872_vm10, %v9692_v40, %v2783_v9 }
 0x454   : > { %3462 = vmatmul.mubr.f32.gmra.mrb[114].mxu0 %v2930_v53 }
 0x455   : > { %6241 = vmatprep.mubr.msk.f32.mxu0 %vm2872_vm10, %v9760_v41 }
 0x45d   : > { %v2785_v57 = vpop.permute.xlu1 %2784 }
 0x45e   : > { %v2931_v51 = vsel %vm2872_vm10, %v9730_v56, %v2785_v57 }
 0x45f   : > { %3467 = vmatmul.mubr.f32.gmra.mrb[116].mxu0 %v2931_v51 }
 0x460   : > { %6242 = vmatprep.mubr.msk.f32.mxu0 %vm2872_vm10, %v9813_v61 }
 0x463   : > { %v2787_v39 = vpop.permute.xlu0 %2786 }
 0x464   : > { %v2932_v50 = vsel %vm2872_vm10, %v9763_v26, %v2787_v39  ;;  %v10014_v26 = vld [vmem:[%s11530_s5] ss:$0 sm:$0xff] }
 0x465   : > { %3472 = vmatmul.mubr.f32.gmra.mrb[118].mxu0 %v2932_v50  ;;  %v3587_v50 = vld [vmem:[%s11531_s6 + $0x10] sm:$0xff] }
 0x466   : > { %6243 = vmatprep.mubr.msk.f32.mxu0 %vm2872_vm10, %v9835_v37 }
 0x470   : > { %v2789_v40 = vpop.permute.xlu1 %2788 }
 0x471   : > { %v2933_v29 = vsel %vm2872_vm10, %v9816_v49, %v2789_v40  ;;  %v3588_v40 = vld [vmem:[%s11531_s6 + $0x18] sm:$0xff] }
 0x472   : > { %3477 = vmatmul.mubr.f32.gmra.mrb[120].mxu0 %v2933_v29  ;;  %v6878_v29 = vpack.c.bf16 %v3588_v40, %v3587_v50 }
 0x473   : > { %6244 = vmatprep.mubr.msk.f32.mxu0 %vm2872_vm10, %v9855_v2 }
 0x475   : > { %v2791_v56 = vpop.permute.xlu0 %2790 }
 0x476   : > { %v2934_v41 = vsel %vm2872_vm10, %v9838_v12, %v2791_v56  ;;  %v3589_v56 = vld [vmem:[%s11531_s6 + $0x20] sm:$0xff] }
 0x477   : > { %3482 = vmatmul.mubr.f32.gmra.mrb[122].mxu0 %v2934_v41  ;;  %v3590_v41 = vld [vmem:[%s11531_s6 + $0x28] sm:$0xff] }
 0x478   : > { %6245 = vmatprep.mubr.msk.f32.mxu0 %vm2872_vm10, %v9869_v38 }
 0x47e   : > { %v3348_v61 = vpop.f32.mrb[68].mxu0 }
 0x47f   : > { %v3350_v37 = vpop.f32.mrb[69].mxu0  ;;  %v3349_v49 = vadd.f32 %v10014_v26, %v3348_v61  ;;  %v6882_v61 = vpack.c.bf16 %v3590_v41, %v3589_v56 }
 0x480   : > { %v2793_v62 = vpop.permute.xlu1 %2792 }
 0x481   : > { %v2935_v2 = vsel %vm2872_vm10, %v9858_v22, %v2793_v62  ;;  %v3551_v19 = vmax.f32 %v3349_v49, 0.0 }
 0x482   : > { %v3353_v55 = vpop.f32.mrb[70].mxu0  ;;  %3487 = vmatmul.mubr.f32.gmra.mrb[124].mxu0 %v2935_v2 }
 0x483   : > { %v3354_v12 = vadd.f32 %v10014_v26, %v3353_v55  ;;  %v3355_v33 = vpop.f32.mrb[71].mxu0  ;;  %6246 = vmatprep.mubr.msk.f32.mxu0 %vm2872_vm10, %v9896_v0  ;;  %6522 = vmatprep.mubr.f32.mxu1 %v3551_v19 }
 0x485   : > { %v3552_v38 = vmax.f32 %v3354_v12, 0.0 }
 0x486   : > { %v2795_v52 = vpop.permute.xlu0 %2794 }
 0x487   : > { %6523 = vmatmul.mubr.f32.vlgmr.msra.gmra.mrb[0].mxu1 %v3552_v38  ;;  %v2936_v30 = vsel %vm2872_vm10, %v9872_v16, %v2795_v52  ;;  %v3591_v38 = vld [vmem:[%s11531_s6 + $0x30] sm:$0xff]  ;;  %v3592_v52 = vld [vmem:[%s11531_s6 + $0x38] sm:$0xff] }
 0x488   : > { %3492 = vmatmul.mubr.f32.gmra.mrb[126].mxu0 %v2936_v30  ;;  %v6886_v30 = vpack.c.bf16 %v3592_v52, %v3591_v38 }
 0x489   : > { %6247 = vmatprep.mubr.msk.f32.mxu0 %vm2872_vm10, %v9910_v18 }
 0x493   : > { %v2797_v22 = vpop.permute.xlu1 %2796 }
 0x494   : > { %v2937_v44 = vsel %vm2872_vm10, %v9899_v36, %v2797_v22  ;;  %v3593_v22 = vld [vmem:[%s11531_s6 + $0x40] sm:$0xff] }
 0x495   : > { %3497 = vmatmul.mubr.f32.gmra.mrb[128].mxu0 %v2937_v44  ;;  %v3594_v44 = vld [vmem:[%s11531_s6 + $0x48] sm:$0xff] }
 0x496   : > { %6248 = vmatprep.mubr.msk.f32.mxu0 %vm2872_vm10, %v9937_v58 }
 0x498   : > { %v2799_v0 = vpop.permute.xlu0 %2798 }
 0x499   : > { %v2938_v48 = vsel %vm2872_vm10, %v9913_v27, %v2799_v0  ;;  %v2667_v27 = vsel %vm924_vm3, %v2658_v59, 0.0  ;;  %v3585_v59 = vld [vmem:[%s11531_s6] sm:$0xff]  ;;  %v6890_v0 = vpack.c.bf16 %v3594_v44, %v3593_v22 }
 0x49a   : > { %3502 = vmatmul.mubr.f32.gmra.mrb[130].mxu0 %v2938_v48 }
 0x49b   : > { %6249 = vmatprep.mubr.msk.f32.mxu0 %vm2872_vm10, %v9960_v6 }
 0x49c   : > { %v3358_v16 = vpop.f32.mrb[72].mxu0 }
 0x49d   : > { %v3359_v11 = vadd.f32 %v10014_v26, %v3358_v16  ;;  %v3360_v18 = vpop.f32.mrb[73].mxu0 }
 0x49f   : > { %v3553_v15 = vmax.f32 %v3359_v11, 0.0 }
 0x4a0   : > { %v3363_v34 = vpop.f32.mrb[74].mxu0 }
 0x4a1   : > { %v3364_v36 = vadd.f32 %v10014_v26, %v3363_v34  ;;  %v3365_v31 = vpop.f32.mrb[75].mxu0  ;;  %6525 = vmatprep.mubr.f32.mxu1 %v3553_v15 }
 0x4a3   : > { %v3554_v10 = vmax.f32 %v3364_v36, 0.0  ;;  %v2801_v58 = vpop.permute.xlu1 %2800 }
 0x4a4   : > { %v2939_v1 = vsel %vm2872_vm10, %v9943_v24, %v2801_v58  ;;  %v3596_v58 = vld [vmem:[%s11531_s6 + $0x58] sm:$0xff] }
 0x4a5   : > { %3507 = vmatmul.mubr.f32.gmra.mrb[132].mxu0 %v2939_v1  ;;  %6526 = vmatmul.mubr.f32.gmra.mrb[2].mxu1 %v3554_v10  ;;  %v3595_v10 = vld [vmem:[%s11531_s6 + $0x50] sm:$0xff] }
 0x4a6   : > { %6250 = vmatprep.mubr.msk.f32.mxu0 %vm2872_vm10, %v2667_v27  ;;  %v6894_v1 = vpack.c.bf16 %v3596_v58, %v3595_v10  ;;  %v3597_v27 = vld [vmem:[%s11531_s6 + $0x60] sm:$0xff] }
 0x4a9   : > { %v2803_v6 = vpop.permute.xlu0 %2802 }
 0x4aa   : > { %v2940_v63 = vsel %vm2872_vm10, %v9963_v54, %v2803_v6  ;;  %v3586_v54 = vld [vmem:[%s11531_s6 + $0x8] sm:$0xff] }
 0x4ab   : > { %3512 = vmatmul.mubr.f32.gmra.mrb[134].mxu0 %v2940_v63  ;;  %v6874_v32 = vpack.c.bf16 %v3586_v54, %v3585_v59  ;;  %v3598_v6 = vld [vmem:[%s11531_s6 + $0x68] sm:$0xff]  ;;  %v3599_v59 = vld [vmem:[%s11531_s6 + $0x70] sm:$0xff]  ;;  %v3600_v54 = vld [vmem:[%s11531_s6 + $0x78] sm:$0xff] }
 0x4ac   : > { %v6898_v63 = vpack.c.bf16 %v3598_v6, %v3597_v27 }
 0x4ad   : > { %6875 = vmatprep.subr.bf16.mxu1 %v6874_v32 }
 0x4ae   : > { %v3368_v23 = vpop.f32.mrb[76].mxu0  ;;  %6877 = vmatpush3.bf16.msra.mxu1 %v6874_v32  ;;  %v6902_v32 = vpack.c.bf16 %v3600_v54, %v3599_v59 }
 0x4af   : > { %v3369_v42 = vadd.f32 %v10014_v26, %v3368_v23  ;;  %v3370_v28 = vpop.f32.mrb[77].mxu0  ;;  %6879 = vmatprep.subr.bf16.mxu1 %v6878_v29 }
 0x4b1   : > { %v3555_v17 = vmax.f32 %v3369_v42, 0.0 }
 0x4b2   : > { %v3373_v45 = vpop.f32.mrb[78].mxu0  ;;  %6881 = vmatpush3.bf16.msra.mxu1 %v6878_v29 }
 0x4b3   : > { %v3374_v24 = vadd.f32 %v10014_v26, %v3373_v45  ;;  %v3375_v14 = vpop.f32.mrb[79].mxu0  ;;  %6528 = vmatprep.mubr.f32.mxu1 %v3555_v17  ;;  %6883 = vmatprep.subr.bf16.mxu1 %v6882_v61 }
 0x4b5   : > { %v3556_v43 = vmax.f32 %v3374_v24, 0.0 }
 0x4b6   : > { %6885 = vmatpush3.bf16.msra.mxu1 %v6882_v61 }
 0x4b7   : > { %6529 = vmatmul.mubr.f32.gmra.mrb[4].mxu1 %v3556_v43  ;;  %6887 = vmatprep.subr.bf16.mxu1 %v6886_v30 }
 0x4ba   : > { %6889 = vmatpush3.bf16.msra.mxu1 %v6886_v30 }
 0x4bb   : > { %6891 = vmatprep.subr.bf16.mxu1 %v6890_v0 }
 0x4be   : > { %6893 = vmatpush3.bf16.msra.mxu1 %v6890_v0 }
 0x4bf   : > { %v3378_v20 = vpop.f32.mrb[80].mxu0  ;;  %6895 = vmatprep.subr.bf16.mxu1 %v6894_v1 }
 0x4c0   : > { %v3379_v60 = vadd.f32 %v10014_v26, %v3378_v20  ;;  %v3380_v8 = vpop.f32.mrb[81].mxu0 }
 0x4c2   : > { %v3557_v9 = vmax.f32 %v3379_v60, 0.0  ;;  %6897 = vmatpush3.bf16.msra.mxu1 %v6894_v1 }
 0x4c3   : > { %v3383_v53 = vpop.f32.mrb[82].mxu0  ;;  %6899 = vmatprep.subr.bf16.mxu1 %v6898_v63 }
 0x4c4   : > { %v3384_v57 = vadd.f32 %v10014_v26, %v3383_v53  ;;  %v3385_v51 = vpop.f32.mrb[83].mxu0  ;;  %6531 = vmatprep.mubr.f32.mxu1 %v3557_v9  ;;  %v12071_v53 = vmov 0.0|0.0  }
 0x4c6   : > { %v3558_v39 = vmax.f32 %v3384_v57, 0.0  ;;  %6901 = vmatpush3.bf16.msra.mxu1 %v6898_v63 }
 0x4c7   : > { %6903 = vmatprep.subr.bf16.mxu1 %v6902_v32 }
 0x4c8   : > { %6532 = vmatmul.mubr.f32.gmra.mrb[6].mxu1 %v3558_v39 }
 0x4ca   : > { %6905 = vmatpush3.bf16.msra.mxu1 %v6902_v32 }
 0x4cb   : > { %6906 = vmatprep.subr.bf16.mxu1 %v12071_v53 }
 0x4d1   : > { %v3388_v37 = vpop.f32.mrb[84].mxu0 }
 0x4d2   : > { %v3389_v49 = vadd.f32 %v10014_v26, %v3388_v37  ;;  %v3390_v62 = vpop.f32.mrb[85].mxu0 }
 0x4d4   : > { %v3559_v2 = vmax.f32 %v3389_v49, 0.0 }
 0x4d5   : > { %v3393_v19 = vpop.f32.mrb[86].mxu0 }
 0x4d6   : > { %v3394_v55 = vadd.f32 %v10014_v26, %v3393_v19  ;;  %v3395_v12 = vpop.f32.mrb[87].mxu0  ;;  %6534 = vmatprep.mubr.f32.mxu1 %v3559_v2 }
 0x4d8   : > { %v3560_v33 = vmax.f32 %v3394_v55, 0.0 }
 0x4da   : > { %6535 = vmatmul.mubr.f32.gmra.mrb[8].mxu1 %v3560_v33 }
 0x4e2   : > { %v3398_v48 = vpop.f32.mrb[88].mxu0 }
 0x4e3   : > { %v3399_v16 = vadd.f32 %v10014_v26, %v3398_v48  ;;  %v3400_v11 = vpop.f32.mrb[89].mxu0 }
 0x4e5   : > { %v3561_v18 = vmax.f32 %v3399_v16, 0.0 }
 0x4e6   : > { %v3403_v15 = vpop.f32.mrb[90].mxu0 }
 0x4e7   : > { %v3404_v34 = vadd.f32 %v10014_v26, %v3403_v15  ;;  %v3405_v36 = vpop.f32.mrb[91].mxu0  ;;  %6537 = vmatprep.mubr.f32.mxu1 %v3561_v18 }
 0x4e9   : > { %v3562_v31 = vmax.f32 %v3404_v34, 0.0 }
 0x4eb   : > { %6538 = vmatmul.mubr.f32.gmra.mrb[10].mxu1 %v3562_v31 }
 0x4f4   : > { %v3408_v23 = vpop.f32.mrb[92].mxu0 }
 0x4f5   : > { %v3409_v42 = vadd.f32 %v10014_v26, %v3408_v23  ;;  %v3410_v28 = vpop.f32.mrb[93].mxu0 }
 0x4f7   : > { %v3563_v17 = vmax.f32 %v3409_v42, 0.0 }
 0x4f8   : > { %v3413_v45 = vpop.f32.mrb[94].mxu0 }
 0x4f9   : > { %v3414_v24 = vadd.f32 %v10014_v26, %v3413_v45  ;;  %v3415_v14 = vpop.f32.mrb[95].mxu0  ;;  %6540 = vmatprep.mubr.f32.mxu1 %v3563_v17 }
 0x4fb   : > { %v3564_v43 = vmax.f32 %v3414_v24, 0.0 }
 0x4fd   : > { %6541 = vmatmul.mubr.f32.gmra.mrb[12].mxu1 %v3564_v43 }
 0x503   : > { %v3418_v20 = vpop.f32.mrb[96].mxu0 }
 0x504   : > { %v3419_v60 = vadd.f32 %v10014_v26, %v3418_v20  ;;  %v3420_v8 = vpop.f32.mrb[97].mxu0 }
 0x506   : > { %v3565_v9 = vmax.f32 %v3419_v60, 0.0 }
 0x507   : > { %v3423_v57 = vpop.f32.mrb[98].mxu0 }
 0x508   : > { %v3424_v51 = vadd.f32 %v10014_v26, %v3423_v57  ;;  %v3425_v39 = vpop.f32.mrb[99].mxu0  ;;  %6543 = vmatprep.mubr.f32.mxu1 %v3565_v9 }
 0x50a   : > { %v3566_v50 = vmax.f32 %v3424_v51, 0.0 }
 0x50b   : > { %v3428_v40 = vpop.f32.mrb[100].mxu0 }
 0x50c   : > { %v3429_v29 = vadd.f32 %v10014_v26, %v3428_v40  ;;  %v3430_v56 = vpop.f32.mrb[101].mxu0  ;;  %6544 = vmatmul.mubr.f32.gmra.mrb[14].mxu1 %v3566_v50 }
 0x50e   : > { %v3567_v41 = vmax.f32 %v3429_v29, 0.0 }
 0x50f   : > { %v3433_v61 = vpop.f32.mrb[102].mxu0 }
 0x510   : > { %v3434_v37 = vadd.f32 %v10014_v26, %v3433_v61  ;;  %v3435_v49 = vpop.f32.mrb[103].mxu0  ;;  %6546 = vmatprep.mubr.f32.mxu1 %v3567_v41 }
 0x512   : > { %v3568_v62 = vmax.f32 %v3434_v37, 0.0 }
 0x513   : > { %v3438_v2 = vpop.f32.mrb[104].mxu0 }
 0x514   : > { %v3439_v19 = vadd.f32 %v10014_v26, %v3438_v2  ;;  %v3440_v55 = vpop.f32.mrb[105].mxu0  ;;  %6547 = vmatmul.mubr.f32.gmra.mrb[16].mxu1 %v3568_v62 }
 0x516   : > { %v3569_v12 = vmax.f32 %v3439_v19, 0.0 }
 0x517   : > { %v3443_v33 = vpop.f32.mrb[106].mxu0 }
 0x518   : > { %v3444_v38 = vadd.f32 %v10014_v26, %v3443_v33  ;;  %v3445_v52 = vpop.f32.mrb[107].mxu0  ;;  %6549 = vmatprep.mubr.f32.mxu1 %v3569_v12 }
 0x51a   : > { %v3570_v30 = vmax.f32 %v3444_v38, 0.0 }
 0x51b   : > { %v3448_v22 = vpop.f32.mrb[108].mxu0 }
 0x51c   : > { %v3449_v44 = vadd.f32 %v10014_v26, %v3448_v22  ;;  %v3450_v0 = vpop.f32.mrb[109].mxu0  ;;  %6550 = vmatmul.mubr.f32.gmra.mrb[18].mxu1 %v3570_v30  ;;  %v12072_v22 = vld [vmem:[#allocation76_spill] sm:$0xff] }
 0x51e   : > { %v3571_v48 = vmax.f32 %v3449_v44, 0.0  ;;  %v3179_v44 = vadd.f32 %v10014_v26, %v12072_v22 }
 0x51f   : > { %v3453_v16 = vpop.f32.mrb[110].mxu0 }
 0x520   : > { %v3454_v11 = vadd.f32 %v10014_v26, %v3453_v16  ;;  %v3455_v18 = vpop.f32.mrb[111].mxu0  ;;  %6552 = vmatprep.mubr.f32.mxu1 %v3571_v48 }
 0x522   : > { %v3572_v15 = vmax.f32 %v3454_v11, 0.0  ;;  %v12073_v11 = vld [vmem:[#allocation20_spill] sm:$0xff] }
 0x523   : > { %v3458_v34 = vpop.f32.mrb[112].mxu0  ;;  %v3184_v18 = vadd.f32 %v10014_v26, %v12073_v11 }
 0x524   : > { %v3459_v36 = vadd.f32 %v10014_v26, %v3458_v34  ;;  %v3460_v31 = vpop.f32.mrb[113].mxu0  ;;  %6553 = vmatmul.mubr.f32.gmra.mrb[20].mxu1 %v3572_v15  ;;  %v4434_v34 = vld [vmem:[%s11533_s8] sm:$0xff] }
 0x525   : > { %v3517_v31 = vmax.f32 %v3179_v44, 0.0  ;;  %v4444_v44 = vld [vmem:[%s11533_s8 + $0x50] sm:$0xff] }
 0x526   : > { %v3573_v10 = vmax.f32 %v3459_v36, 0.0  ;;  %v4435_v36 = vld [vmem:[%s11533_s8 + $0x8] sm:$0xff] }
 0x527   : > { %v3463_v58 = vpop.f32.mrb[114].mxu0 }
 0x528   : > { %v3464_v1 = vadd.f32 %v10014_v26, %v3463_v58  ;;  %v3465_v27 = vpop.f32.mrb[115].mxu0  ;;  %6555 = vmatprep.mubr.f32.mxu1 %v3573_v10  ;;  %v12074_v10 = vld [vmem:[#allocation22_spill] sm:$0xff] }
 0x529   : > { %v3189_v58 = vadd.f32 %v10014_v26, %v12074_v10  ;;  %v3518_v27 = vmax.f32 %v3184_v18, 0.0 }
 0x52a   : > { %v3574_v6 = vmax.f32 %v3464_v1, 0.0  ;;  %v6907_v1 = vpack.c.bf16 %v4435_v36, %v4434_v34  ;;  %v4446_v34 = vld [vmem:[%s11533_s8 + $0x60] sm:$0xff]  ;;  %v4447_v36 = vld [vmem:[%s11533_s8 + $0x68] sm:$0xff] }
 0x52b   : > { %v6925_v10 = vpack.c.bf16 %v4447_v36, %v4446_v34  ;;  %v12094_v36 = vld [vmem:[#allocation8_spill] sm:$0xff] }
 0x52c   : > { %6556 = vmatmul.mubr.f32.gmra.mrb[22].mxu1 %v3574_v6  ;;  %v12075_v6 = vld [vmem:[#allocation81_spill] sm:$0xff] }
 0x532   : > { %v3468_v63 = vpop.f32.mrb[116].mxu0 }
 0x533   : > { %v3469_v23 = vadd.f32 %v10014_v26, %v3468_v63  ;;  %v3470_v42 = vpop.f32.mrb[117].mxu0  ;;  %v3194_v63 = vadd.f32 %v10014_v26, %v12075_v6 }
 0x534   : > { %v4437_v42 = vld [vmem:[%s11533_s8 + $0x18] sm:$0xff] }
 0x535   : > { %v3575_v28 = vmax.f32 %v3469_v23, 0.0  ;;  %v4436_v23 = vld [vmem:[%s11533_s8 + $0x10] sm:$0xff] }
 0x537   : > { %6558 = vmatprep.mubr.f32.mxu1 %v3575_v28  ;;  %v3519_v28 = vmax.f32 %v3189_v58, 0.0 }
 0x538   : > { %v3473_v17 = vpop.f32.mrb[118].mxu0 }
 0x539   : > { %v3474_v45 = vadd.f32 %v10014_v26, %v3473_v17  ;;  %v3475_v24 = vpop.f32.mrb[119].mxu0  ;;  %v12076_v17 = vld [vmem:[#allocation86_spill] sm:$0xff] }
 0x53a   : > { %v6910_v24 = vpack.c.bf16 %v4437_v42, %v4436_v23 }
 0x53b   : > { %v3576_v14 = vmax.f32 %v3474_v45, 0.0  ;;  %v3199_v45 = vadd.f32 %v10014_v26, %v12076_v17  ;;  %v4451_v17 = vld [vmem:[%s11533_s8 + $0x88] sm:$0xff] }
 0x53d   : > { %6559 = vmatmul.mubr.f32.gmra.mrb[24].mxu1 %v3576_v14  ;;  %v3520_v14 = vmax.f32 %v3194_v63, 0.0 }
 0x545   : > { %v3478_v43 = vpop.f32.mrb[120].mxu0 }
 0x546   : > { %v3479_v59 = vadd.f32 %v10014_v26, %v3478_v43  ;;  %v3480_v54 = vpop.f32.mrb[121].mxu0  ;;  %v12077_v43 = vld [vmem:[#allocation63_spill] sm:$0xff] }
 0x547   : > { %v4438_v54 = vld [vmem:[%s11533_s8 + $0x20] sm:$0xff] }
 0x548   : > { %v3577_v32 = vmax.f32 %v3479_v59, 0.0  ;;  %v3204_v59 = vadd.f32 %v10014_v26, %v12077_v43 }
 0x54a   : > { %v3483_v20 = vpop.f32.mrb[122].mxu0  ;;  %6561 = vmatprep.mubr.f32.mxu1 %v3577_v32  ;;  %v4439_v32 = vld [vmem:[%s11533_s8 + $0x28] sm:$0xff] }
 0x54b   : > { %v3484_v60 = vadd.f32 %v10014_v26, %v3483_v20  ;;  %v3485_v8 = vpop.f32.mrb[123].mxu0  ;;  %v3521_v20 = vmax.f32 %v3199_v45, 0.0 }
 0x54d   : > { %v3578_v9 = vmax.f32 %v3484_v60, 0.0  ;;  %v12078_v60 = vld [vmem:[#allocation83_spill] sm:$0xff] }
 0x54e   : > { %v3209_v8 = vadd.f32 %v10014_v26, %v12078_v60 }
 0x54f   : > { %6562 = vmatmul.mubr.f32.gmra.mrb[26].mxu1 %v3578_v9  ;;  %v6913_v9 = vpack.c.bf16 %v4439_v32, %v4438_v54  ;;  %v4452_v32 = vld [vmem:[%s11533_s8 + $0x90] sm:$0xff] }
 0x555   : > { %v3488_v57 = vpop.f32.mrb[124].mxu0 }
 0x556   : > { %v3489_v51 = vadd.f32 %v10014_v26, %v3488_v57  ;;  %v3490_v39 = vpop.f32.mrb[125].mxu0  ;;  %v3522_v57 = vmax.f32 %v3204_v59, 0.0  ;;  %v12086_v59 = vld [vmem:[#allocation52_spill] sm:$0xff] }
 0x557   : > { %v3274_v54 = vadd.f32 %v10014_v26, %v12086_v59 }
 0x558   : > { %v3579_v50 = vmax.f32 %v3489_v51, 0.0  ;;  %v12079_v51 = vld [vmem:[#allocation85_spill] sm:$0xff] }
 0x559   : > { %v3214_v39 = vadd.f32 %v10014_v26, %v12079_v51  ;;  %v3536_v51 = vmax.f32 %v3274_v54, 0.0  ;;  %v4463_v54 = vld [vmem:[%s11533_s8 + $0xe8] sm:$0xff] }
 0x55a   : > { %6564 = vmatprep.mubr.f32.mxu1 %v3579_v50  ;;  %v4440_v50 = vld [vmem:[%s11533_s8 + $0x30] sm:$0xff] }
 0x55b   : > { %v3493_v40 = vpop.f32.mrb[126].mxu0 }
 0x55c   : > { %v3494_v29 = vadd.f32 %v10014_v26, %v3493_v40  ;;  %v3495_v56 = vpop.f32.mrb[127].mxu0  ;;  %v4441_v40 = vld [vmem:[%s11533_s8 + $0x38] sm:$0xff] }
 0x55d   : > { %v12080_v56 = vld [vmem:[#allocation40_spill] sm:$0xff] }
 0x55e   : > { %v3580_v41 = vmax.f32 %v3494_v29, 0.0  ;;  %v3523_v29 = vmax.f32 %v3209_v8, 0.0  ;;  %v12087_v8 = vld [vmem:[#allocation54_spill] sm:$0xff] }
 0x560   : > { %6565 = vmatmul.mubr.f32.gmra.mrb[28].mxu1 %v3580_v41  ;;  %v3219_v41 = vadd.f32 %v10014_v26, %v12080_v56 }
 0x568   : > { %v3498_v61 = vpop.f32.mrb[128].mxu0 }
 0x569   : > { %v3499_v37 = vadd.f32 %v10014_v26, %v3498_v61  ;;  %v3500_v49 = vpop.f32.mrb[129].mxu0  ;;  %v6916_v61 = vpack.c.bf16 %v4441_v40, %v4440_v50  ;;  %v4454_v40 = vld [vmem:[%s11533_s8 + $0xa0] sm:$0xff] }
 0x56a   : > { %v12081_v49 = vld [vmem:[#allocation43_spill] sm:$0xff] }
 0x56b   : > { %v3581_v62 = vmax.f32 %v3499_v37, 0.0  ;;  %v3524_v37 = vmax.f32 %v3214_v39, 0.0  ;;  %v12088_v39 = vld [vmem:[#allocation69_spill] sm:$0xff] }
 0x56c   : > { %v3284_v50 = vadd.f32 %v10014_v26, %v12088_v39 }
 0x56d   : > { %v3503_v2 = vpop.f32.mrb[130].mxu0  ;;  %6567 = vmatprep.mubr.f32.mxu1 %v3581_v62  ;;  %v3224_v62 = vadd.f32 %v10014_v26, %v12081_v49 }
 0x56e   : > { %v3504_v19 = vadd.f32 %v10014_v26, %v3503_v2  ;;  %v3505_v55 = vpop.f32.mrb[131].mxu0  ;;  %v4442_v2 = vld [vmem:[%s11533_s8 + $0x40] sm:$0xff]  ;;  %v3538_v49 = vmax.f32 %v3284_v50, 0.0 }
 0x56f   : > { %v3525_v55 = vmax.f32 %v3219_v41, 0.0  ;;  %v12089_v41 = vld [vmem:[#allocation7_spill] sm:$0xff] }
 0x570   : > { %v3582_v12 = vmax.f32 %v3504_v19, 0.0  ;;  %v4443_v19 = vld [vmem:[%s11533_s8 + $0x48] sm:$0xff] }
 0x572   : > { %6568 = vmatmul.mubr.f32.gmra.mrb[30].mxu1 %v3582_v12  ;;  %v12082_v12 = vld [vmem:[#allocation60_spill] sm:$0xff] }
 0x578   : > { %v3508_v33 = vpop.f32.mrb[132].mxu0 }
 0x579   : > { %v3509_v38 = vadd.f32 %v10014_v26, %v3508_v33  ;;  %v3510_v52 = vpop.f32.mrb[133].mxu0  ;;  %v3229_v33 = vadd.f32 %v10014_v26, %v12082_v12 }
 0x57a   : > { %v3526_v52 = vmax.f32 %v3224_v62, 0.0  ;;  %v12090_v62 = vld [vmem:[#allocation13_spill] sm:$0xff] }
 0x57b   : > { %v3583_v30 = vmax.f32 %v3509_v38, 0.0  ;;  %v6919_v38 = vpack.c.bf16 %v4443_v19, %v4442_v2  ;;  %v3294_v2 = vadd.f32 %v10014_v26, %v12090_v62  ;;  %v4456_v19 = vld [vmem:[%s11533_s8 + $0xb0] sm:$0xff] }
 0x57d   : > { %6570 = vmatprep.mubr.f32.mxu1 %v3583_v30  ;;  %v12083_v30 = vld [vmem:[#allocation58_spill] sm:$0xff] }
 0x57e   : > { %v3513_v0 = vpop.f32.mrb[134].mxu0  ;;  %v3234_v22 = vadd.f32 %v10014_v26, %v12083_v30  ;;  %v3540_v30 = vmax.f32 %v3294_v2, 0.0 }
 0x57f   : > { %v3514_v48 = vadd.f32 %v10014_v26, %v3513_v0  ;;  %v3515_v16 = vpop.f32.mrb[135].mxu0  ;;  %v4445_v0 = vld [vmem:[%s11533_s8 + $0x58] sm:$0xff] }
 0x580   : > { %v3239_v16 = vadd.f32 %v10014_v26, %v9403_v5  ;;  %v6922_v11 = vpack.c.bf16 %v4445_v0, %v4444_v44  ;;  %v3528_v18 = vmax.f32 %v3234_v22, 0.0  ;;  %v3249_v5 = vadd.f32 %v10014_v26, %v9445_v4  ;;  %v12092_v22 = vld [vmem:[#allocation6_spill] sm:$0xff] }
 0x581   : > { %v3584_v15 = vmax.f32 %v3514_v48, 0.0  ;;  %v3527_v48 = vmax.f32 %v3229_v33, 0.0  ;;  %v3259_v4 = vadd.f32 %v10014_v26, %v9482_v7  ;;  %v12085_v7 = vld [vmem:[#allocation64_spill] sm:$0xff]  ;;  %v3304_v44 = vadd.f32 %v10014_v26, %v12092_v22  ;;  %v4458_v0 = vld [vmem:[%s11533_s8 + $0xc0] sm:$0xff] }
 0x582   : > { %v3531_v6 = vmax.f32 %v3249_v5, 0.0  ;;  %v12091_v33 = vld [vmem:[#allocation72_spill] sm:$0xff] }
 0x583   : > { %6571 = vmatmul.mubr.f32.gmra.mrb[32].mxu1 %v3584_v15  ;;  %v3244_v15 = vadd.f32 %v10014_v26, %v9414_v25  ;;  %v3254_v25 = vadd.f32 %v10014_v26, %v9455_v47  ;;  %v12084_v47 = vld [vmem:[#allocation55_spill] sm:$0xff]  ;;  %v3533_v45 = vmax.f32 %v3259_v4, 0.0  ;;  %v3542_v34 = vmax.f32 %v3304_v44, 0.0  ;;  %v12096_v4 = vld [vmem:[#allocation9_spill] sm:$0xff] }
 0x584   : > { %6605 = vmatprep.mubr.f32.mxu1 %v3517_v31  ;;  %v3529_v31 = vmax.f32 %v3239_v16, 0.0  ;;  %v3264_v42 = vadd.f32 %v10014_v26, %v12084_v47  ;;  %v4460_v5 = vld [vmem:[%s11533_s8 + $0xd0] sm:$0xff]  ;;  %v12097_v47 = vld [vmem:[#allocation21_spill] sm:$0xff] }
 0x585   : > { %v3530_v58 = vmax.f32 %v3244_v15, 0.0  ;;  %v3532_v23 = vmax.f32 %v3254_v25, 0.0  ;;  %v12095_v25 = vld [vmem:[#allocation17_spill] sm:$0xff] }
 0x586   : > { %v3534_v43 = vmax.f32 %v3264_v42, 0.0  ;;  %v3329_v42 = vadd.f32 %v10014_v26, %v12097_v47 }
 0x587   : > { %6606 = vmatmul.mubr.f32.vlgmr.msra.gmra.mrb[0].mxu1 %v3518_v27  ;;  %v4449_v27 = vld [vmem:[%s11533_s8 + $0x78] sm:$0xff] }
 0x588   : > { %6608 = vmatprep.mubr.f32.mxu1 %v3519_v28  ;;  %6908 = vmatpush1.bf16.msra.mxu1 %v6907_v1  ;;  %v4448_v1 = vld [vmem:[%s11533_s8 + $0x70] sm:$0xff]  ;;  %v4450_v28 = vld [vmem:[%s11533_s8 + $0x80] sm:$0xff] }
 0x589   : > { %6909 = vmatprep.subr.bf16.mxu1 %v12071_v53  ;;  %v6928_v63 = vpack.c.bf16 %v4449_v27, %v4448_v1  ;;  %v3319_v1 = vadd.f32 %v10014_v26, %v12095_v25 }
 0x58b   : > { %6609 = vmatmul.mubr.f32.gmra.mrb[2].mxu1 %v3520_v14  ;;  %v6931_v14 = vpack.c.bf16 %v4451_v17, %v4450_v28  ;;  %v3334_v17 = vadd.f32 %v10014_v26, %v9882_v3  ;;  %v4462_v3 = vld [vmem:[%s11533_s8 + $0xe0] sm:$0xff] }
 0x58c   : > { %6611 = vmatprep.mubr.f32.mxu1 %v3521_v20  ;;  %6911 = vmatpush1.bf16.msra.mxu1 %v6910_v24  ;;  %v3269_v24 = vadd.f32 %v10014_v26, %v12085_v7  ;;  %v4453_v20 = vld [vmem:[%s11533_s8 + $0x98] sm:$0xff]  ;;  %v3339_v7 = vadd.f32 %v10014_v26, %v9927_v21  ;;  %v6949_v21 = vpack.c.bf16 %v4463_v54, %v4462_v3 }
 0x58d   : > { %6912 = vmatprep.subr.bf16.mxu1 %v12071_v53 }
 0x58e   : > { %v3535_v60 = vmax.f32 %v3269_v24, 0.0  ;;  %v3548_v24 = vmax.f32 %v3334_v17, 0.0 }
 0x58f   : > { %6612 = vmatmul.mubr.f32.gmra.mrb[4].mxu1 %v3522_v57  ;;  %v6934_v57 = vpack.c.bf16 %v4453_v20, %v4452_v32  ;;  %v4466_v20 = vld [vmem:[%s11533_s8 + $0x100] sm:$0xff] }
 0x590   : > { %6614 = vmatprep.mubr.f32.mxu1 %v3523_v29  ;;  %6914 = vmatpush1.bf16.msra.mxu1 %v6913_v9  ;;  %v3279_v9 = vadd.f32 %v10014_v26, %v12087_v8  ;;  %v4455_v29 = vld [vmem:[%s11533_s8 + $0xa8] sm:$0xff] }
 0x591   : > { %6915 = vmatprep.subr.bf16.mxu1 %v12071_v53 }
 0x592   : > { %v3537_v56 = vmax.f32 %v3279_v9, 0.0  ;;  %v5028_v9 = vld [vmem:[%s11535_s10 + $0x8] sm:$0xff] }
 0x593   : > { %6615 = vmatmul.mubr.f32.gmra.mrb[6].mxu1 %v3524_v37  ;;  %v6937_v37 = vpack.c.bf16 %v4455_v29, %v4454_v40 }
 0x594   : > { %6617 = vmatprep.mubr.f32.mxu1 %v3525_v55  ;;  %6917 = vmatpush1.bf16.msra.mxu1 %v6916_v61  ;;  %v3289_v61 = vadd.f32 %v10014_v26, %v12089_v41  ;;  %v4457_v55 = vld [vmem:[%s11533_s8 + $0xb8] sm:$0xff] }
 0x595   : > { %6918 = vmatprep.subr.bf16.mxu1 %v12071_v53 }
 0x596   : > { %v3539_v12 = vmax.f32 %v3289_v61, 0.0 }
 0x597   : > { %6618 = vmatmul.mubr.f32.gmra.mrb[8].mxu1 %v3526_v52  ;;  %v6940_v52 = vpack.c.bf16 %v4457_v55, %v4456_v19  ;;  %v4468_v19 = vld [vmem:[%s11533_s8 + $0x110] sm:$0xff]  ;;  %v4469_v55 = vld [vmem:[%s11533_s8 + $0x118] sm:$0xff] }
 0x598   : > { %6620 = vmatprep.mubr.f32.mxu1 %v3527_v48  ;;  %6920 = vmatpush1.bf16.msra.mxu1 %v6919_v38  ;;  %v3299_v38 = vadd.f32 %v10014_v26, %v12091_v33  ;;  %v4459_v48 = vld [vmem:[%s11533_s8 + $0xc8] sm:$0xff] }
 0x599   : > { %6921 = vmatprep.subr.bf16.mxu1 %v12071_v53  ;;  %v6943_v15 = vpack.c.bf16 %v4459_v48, %v4458_v0 }
 0x59a   : > { %v3541_v16 = vmax.f32 %v3299_v38, 0.0 }
 0x59b   : > { %6621 = vmatmul.mubr.f32.gmra.mrb[10].mxu1 %v3528_v18 }
 0x59c   : > { %6623 = vmatprep.mubr.f32.mxu1 %v3529_v31  ;;  %6923 = vmatpush1.bf16.msra.mxu1 %v6922_v11  ;;  %v12093_v11 = vld [vmem:[#allocation11_spill] sm:$0xff]  ;;  %v3314_v31 = vadd.f32 %v10014_v26, %v12094_v36 }
 0x59d   : > { %6924 = vmatprep.subr.bf16.mxu1 %v12071_v53  ;;  %v3309_v18 = vadd.f32 %v10014_v26, %v12093_v11  ;;  %v6958_v11 = vpack.c.bf16 %v4469_v55, %v4468_v19 }
 0x59f   : > { %6624 = vmatmul.mubr.f32.gmra.mrb[12].mxu1 %v3530_v58  ;;  %v3543_v58 = vmax.f32 %v3309_v18, 0.0 }
 0x5a0   : > { %6626 = vmatprep.mubr.f32.mxu1 %v3531_v6  ;;  %6926 = vmatpush1.bf16.msra.mxu1 %v6925_v10  ;;  %v4461_v10 = vld [vmem:[%s11533_s8 + $0xd8] sm:$0xff]  ;;  %v3544_v6 = vmax.f32 %v3314_v31, 0.0 }
 0x5a1   : > { %6927 = vmatprep.subr.bf16.mxu1 %v12071_v53  ;;  %v6946_v27 = vpack.c.bf16 %v4461_v10, %v4460_v5  ;;  %v4470_v5 = vld [vmem:[%s11533_s8 + $0x120] sm:$0xff]  ;;  %v4471_v10 = vld [vmem:[%s11533_s8 + $0x128] sm:$0xff] }
 0x5a3   : > { %6627 = vmatmul.mubr.f32.gmra.mrb[14].mxu1 %v3532_v23  ;;  %v3545_v23 = vmax.f32 %v3319_v1, 0.0 }
 0x5a4   : > { %6629 = vmatprep.mubr.f32.mxu1 %v3533_v45  ;;  %6929 = vmatpush1.bf16.msra.mxu1 %v6928_v63  ;;  %v3324_v63 = vadd.f32 %v10014_v26, %v12096_v4  ;;  %v3547_v45 = vmax.f32 %v3329_v42, 0.0  ;;  %v4473_v4 = vld [vmem:[%s11533_s8 + $0x138] sm:$0xff] }
 0x5a5   : > { %6930 = vmatprep.subr.bf16.mxu1 %v12071_v53 }
 0x5a6   : > { %v3546_v28 = vmax.f32 %v3324_v63, 0.0 }
 0x5a7   : > { %6630 = vmatmul.mubr.f32.gmra.mrb[16].mxu1 %v3534_v43  ;;  %v3549_v43 = vmax.f32 %v3339_v7, 0.0 }
 0x5a8   : > { %6632 = vmatprep.mubr.f32.mxu1 %v3535_v60  ;;  %6932 = vmatpush1.bf16.msra.mxu1 %v6931_v14  ;;  %v3344_v14 = vadd.f32 %v10014_v26, %v9939_v13  ;;  %v4464_v13 = vld [vmem:[%s11533_s8 + $0xf0] sm:$0xff]  ;;  %v4465_v26 = vld [vmem:[%s11533_s8 + $0xf8] sm:$0xff]  ;;  %v4467_v60 = vld [vmem:[%s11533_s8 + $0x108] sm:$0xff] }
 0x5a9   : > { %6933 = vmatprep.subr.bf16.mxu1 %v12071_v53  ;;  %v6952_v32 = vpack.c.bf16 %v4465_v26, %v4464_v13  ;;  %v6954_v8 = vpack.c.bf16 %v4467_v60, %v4466_v20  ;;  %v4474_v60 = vld [vmem:[%s11533_s8 + $0x140] sm:$0xff] }
 0x5aa   : > { %v3550_v59 = vmax.f32 %v3344_v14, 0.0  ;;  %v12104_v14 = vld [vmem:[#allocation67_spill] sm:$0xff] }
 0x5ab   : > { %6633 = vmatmul.mubr.f32.gmra.mrb[18].mxu1 %v3536_v51  ;;  %v10321_v51 = vld [vmem:[%s11532_s7] ss:$0 sm:$0xff] }
 0x5ac   : > { %6635 = vmatprep.mubr.f32.mxu1 %v3537_v56  ;;  %6935 = vmatpush1.bf16.msra.mxu1 %v6934_v57 }
 0x5ad   : > { %6936 = vmatprep.subr.bf16.mxu1 %v12071_v53 }
 0x5af   : > { %6636 = vmatmul.mubr.f32.gmra.mrb[20].mxu1 %v3538_v49 }
 0x5b0   : > { %6638 = vmatprep.mubr.f32.mxu1 %v3539_v12  ;;  %6938 = vmatpush1.bf16.msra.mxu1 %v6937_v37  ;;  %v12098_v37 = vld [vmem:[#allocation57_spill] sm:$0xff]  ;;  %v12099_v12 = vld [vmem:[#allocation56_spill] sm:$0xff] }
 0x5b1   : > { %6939 = vmatprep.subr.bf16.mxu1 %v12071_v53 }
 0x5b3   : > { %6639 = vmatmul.mubr.f32.gmra.mrb[22].mxu1 %v3540_v30  ;;  %v5032_v30 = vld [vmem:[%s11535_s10 + $0x28] sm:$0xff] }
 0x5b4   : > { %6641 = vmatprep.mubr.f32.mxu1 %v3541_v16  ;;  %6941 = vmatpush1.bf16.msra.mxu1 %v6940_v52 }
 0x5b5   : > { %6942 = vmatprep.subr.bf16.mxu1 %v12071_v53 }
 0x5b7   : > { %6642 = vmatmul.mubr.f32.gmra.mrb[24].mxu1 %v3542_v34 }
 0x5b8   : > { %6644 = vmatprep.mubr.f32.mxu1 %v3543_v58  ;;  %6944 = vmatpush1.bf16.msra.mxu1 %v6943_v15  ;;  %v12102_v15 = vld [vmem:[#allocation62_spill] sm:$0xff]  ;;  %v12103_v58 = vld [vmem:[#allocation59_spill] sm:$0xff] }
 0x5b9   : > { %6945 = vmatprep.subr.bf16.mxu1 %v12071_v53 }
 0x5bb   : > { %6645 = vmatmul.mubr.f32.gmra.mrb[26].mxu1 %v3544_v6  ;;  %v4472_v6 = vld [vmem:[%s11533_s8 + $0x130] sm:$0xff] }
 0x5bc   : > { %6647 = vmatprep.mubr.f32.mxu1 %v3545_v23  ;;  %6947 = vmatpush1.bf16.msra.mxu1 %v6946_v27  ;;  %v6966_v54 = vpack.c.bf16 %v4473_v4, %v4472_v6 }
 0x5bd   : > { %6948 = vmatprep.subr.bf16.mxu1 %v12071_v53 }
 0x5bf   : > { %6648 = vmatmul.mubr.f32.gmra.mrb[28].mxu1 %v3546_v28 }
 0x5c0   : > { %6650 = vmatprep.mubr.f32.mxu1 %v3547_v45  ;;  %6950 = vmatpush1.bf16.msra.mxu1 %v6949_v21  ;;  %v12105_v21 = vld [vmem:[#allocation65_spill] sm:$0xff] }
 0x5c1   : > { %6951 = vmatprep.subr.bf16.mxu1 %v12071_v53  ;;  %v5027_v53 = vld [vmem:[%s11535_s10] sm:$0xff] }
 0x5c2   : > { %v10314_v57 = vpack.c.bf16 %v5028_v9, %v5027_v53 }
 0x5c3   : > { %6651 = vmatmul.mubr.f32.gmra.mrb[30].mxu1 %v3548_v24  ;;  %v6962_v24 = vpack.c.bf16 %v4471_v10, %v4470_v5 }
 0x5c4   : > { %6653 = vmatprep.mubr.f32.mxu1 %v3549_v43  ;;  %6953 = vmatpush1.bf16.msra.mxu1 %v6952_v32 }
 0x5c5   : > { %6955 = vmatprep.subr.bf16.mxu1 %v6954_v8  ;;  %6987 = vmatprep.subr.bf16.mxu0 %v10314_v57 }
 0x5c6   : > { %6989 = vmatpush3.bf16.msra.mxu0 %v10314_v57 }
 0x5c7   : > { %6654 = vmatmul.mubr.f32.gmra.mrb[32].mxu1 %v3550_v59 }
 0x65a   : > { %v6607_v39 = vpop.f32.mrb[0].mxu1 }
 0x65b   : > { %v4095_v50 = vadd.f32 %v6607_v39, %v10321_v51  ;;  %v3918_v40 = vpop.f32.mrb[1].mxu1 }
 0x65c   : > { %v4094_v29 = vadd.f32 %v10321_v51, %v3918_v40 }
 0x65d   : > { %v4129_v56 = vmax.f32 %v4095_v50, 0.0 }
 0x65e   : > { %v4128_v41 = vmax.f32 %v4094_v29, 0.0  ;;  %v6610_v61 = vpop.f32.mrb[2].mxu1 }
 0x65f   : > { %v4163_v49 = vmul.f32 %v12098_v37, %v4129_v56  ;;  %v4097_v62 = vadd.f32 %v6610_v61, %v10321_v51  ;;  %v3928_v2 = vpop.f32.mrb[3].mxu1 }
 0x660   : > { %v4162_v33 = vmul.f32 %v12099_v12, %v4128_v41  ;;  %v4096_v38 = vadd.f32 %v10321_v51, %v3928_v2 }
 0x661   : > { %v4131_v52 = vmax.f32 %v4097_v62, 0.0  ;;  %v4231_v22 = vrot.slane %v4163_v49, 7  ;;  %v4333_v44 = vrot.slane %v4163_v49, 1 }
 0x662   : > { %v4230_v0 = vrot.slane %v4162_v33, 7  ;;  %v4130_v48 = vmax.f32 %v4096_v38, 0.0  ;;  %v6613_v16 = vpop.f32.mrb[4].mxu1  ;;  %4553 = vmatprep.mubr.f32.mxu1 %v4162_v33  ;;  %v4332_v18 = vrot.slane %v4162_v33, 1  ;;  %v12107_v33 = vld [vmem:[#allocation66_spill] sm:$0xff] }
 0x663   : > { %v10341_v34 = vmul.f32 %v12102_v15, %v4131_v52  ;;  %v4099_v36 = vadd.f32 %v6613_v16, %v10321_v51  ;;  %v3938_v31 = vpop.f32.mrb[5].mxu1 }
 0x664   : > { %v4164_v25 = vmul.f32 %v12103_v58, %v4130_v48  ;;  %v4098_v1 = vadd.f32 %v10321_v51, %v3938_v31  ;;  %6254 = vmatmul.mubr.msk.f32.vlgmr.msra.gmra.mrb[34].mxu1 %vm10336_vm1, %v4230_v0  ;;  %v4232_v27 = vsel %vm692_vm2, %v4230_v0, %v4231_v22  ;;  %v10362_v63 = vsel %vm924_vm3, %v4332_v18, %v4333_v44  ;;  %v4476_v0 = vld [vmem:[%s11533_s8 + $0x150] sm:$0xff]  ;;  %v4477_v48 = vld [vmem:[%s11533_s8 + $0x158] sm:$0xff] }
 0x665   : > { %v4133_v23 = vmax.f32 %v4099_v36, 0.0  ;;  %6957 = vmatpush3.bf16.msra.mxu1 %v6954_v8  ;;  %4558 = vmatprep.mubr.f32.mxu1 %v4163_v49  ;;  %v4235_v47 = vrot.slane %v10341_v34, 7  ;;  %v4337_v42 = vrot.slane %v10341_v34, 1  ;;  %v4475_v8 = vld [vmem:[%s11533_s8 + $0x148] sm:$0xff] }
 0x666   : > { %v4335_v28 = vrot.slane %v4164_v25, 1  ;;  %v4132_v17 = vmax.f32 %v4098_v1, 0.0  ;;  %v6616_v45 = vpop.f32.mrb[6].mxu1  ;;  %v4233_v7 = vrot.slane %v4164_v25, 7  ;;  %6959 = vmatprep.subr.bf16.mxu1 %v6958_v11  ;;  %v12106_v49 = vld [vmem:[#allocation70_spill] sm:$0xff]  ;;  %v6970_v55 = vpack.c.bf16 %v4475_v8, %v4474_v60 }
 0x667   : > { %v10367_v43 = vmul.f32 %v12104_v14, %v4133_v23  ;;  %v4101_v59 = vadd.f32 %v6616_v45, %v10321_v51  ;;  %v3948_v3 = vpop.f32.mrb[7].mxu1  ;;  %v6974_v23 = vpack.c.bf16 %v4477_v48, %v4476_v0  ;;  %v4480_v0 = vld [vmem:[%s11533_s8 + $0x170] sm:$0xff]  ;;  %v4481_v48 = vld [vmem:[%s11533_s8 + $0x178] sm:$0xff] }
 0x668   : > { %v4166_v13 = vmul.f32 %v12105_v21, %v4132_v17  ;;  %v4100_v26 = vadd.f32 %v10321_v51, %v3948_v3  ;;  %4559 = vmatmul.mubr.f32.gmra.mrb[36].mxu1 %v4232_v27  ;;  %v4234_v32 = vsel %vm692_vm2, %v4231_v22, %v4233_v7  ;;  %v4236_v20 = vsel %vm692_vm2, %v4233_v7, %v4235_v47  ;;  %v12108_v27 = vld [vmem:[#allocation71_spill] sm:$0xff]  ;;  %v4478_v7 = vld [vmem:[%s11533_s8 + $0x160] sm:$0xff] }
 0x669   : > { %v4135_v53 = vmax.f32 %v4101_v59, 0.0  ;;  %4563 = vmatprep.mubr.f32.mxu1 %v4164_v25  ;;  %6961 = vmatpush3.bf16.msra.mxu1 %v6958_v11  ;;  %v4239_v9 = vrot.slane %v10367_v43, 7  ;;  %v10382_v39 = vsel %vm924_vm3, %v4333_v44, %v4335_v28  ;;  %v10385_v50 = vsel %vm924_vm3, %v4335_v28, %v4337_v42 }
 0x66a   : > { %v4134_v40 = vmax.f32 %v4100_v26, 0.0  ;;  %v6619_v29 = vpop.f32.mrb[8].mxu1  ;;  %v4237_v56 = vrot.slane %v4166_v13, 7  ;;  %6963 = vmatprep.subr.bf16.mxu1 %v6962_v24  ;;  %v4339_v41 = vrot.slane %v4166_v13, 1  ;;  %v4341_v61 = vrot.slane %v10367_v43, 1 }
 0x66b   : > { %v10389_v62 = vmul.f32 %v12106_v49, %v4135_v53  ;;  %v4103_v2 = vadd.f32 %v6619_v29, %v10321_v51  ;;  %v3958_v19 = vpop.f32.mrb[9].mxu1 }
 0x66c   : > { %v10393_v38 = vmul.f32 %v12107_v33, %v4134_v40  ;;  %v4102_v52 = vadd.f32 %v10321_v51, %v3958_v19  ;;  %4564 = vmatmul.mubr.f32.gmra.mrb[38].mxu1 %v4234_v32  ;;  %v4238_v22 = vsel %vm692_vm2, %v4235_v47, %v4237_v56  ;;  %v10398_v44 = vsel %vm692_vm2, %v4237_v56, %v4239_v9  ;;  %v12109_v47 = vld [vmem:[#allocation68_spill] sm:$0xff]  ;;  %v12110_v40 = vld [vmem:[#allocation77_spill] sm:$0xff] }
 0x66d   : > { %v4137_v16 = vmax.f32 %v4103_v2, 0.0  ;;  %4568 = vmatprep.mubr.f32.mxu1 %v10341_v34  ;;  %v4243_v11 = vrot.slane %v10389_v62, 7  ;;  %6965 = vmatpush3.bf16.msra.mxu1 %v6962_v24  ;;  %v10409_v18 = vsel %vm924_vm3, %v4337_v42, %v4339_v41  ;;  %v10412_v36 = vsel %vm924_vm3, %v4339_v41, %v4341_v61  ;;  %v4479_v24 = vld [vmem:[%s11533_s8 + $0x168] sm:$0xff] }
 0x66e   : > { %v4136_v31 = vmax.f32 %v4102_v52, 0.0  ;;  %v6622_v5 = vpop.f32.mrb[10].mxu1  ;;  %v4241_v10 = vrot.slane %v10393_v38, 7  ;;  %6967 = vmatprep.subr.bf16.mxu1 %v6966_v54  ;;  %v4343_v25 = vrot.slane %v10393_v38, 1  ;;  %v4345_v1 = vrot.slane %v10389_v62, 1  ;;  %v12111_v41 = vld [vmem:[#allocation74_spill] sm:$0xff] }
 0x66f   : > { %v10418_v34 = vmul.f32 %v12108_v27, %v4137_v16  ;;  %v4105_v6 = vadd.f32 %v6622_v5, %v10321_v51  ;;  %v3968_v4 = vpop.f32.mrb[11].mxu1  ;;  %v6978_v56 = vpack.c.bf16 %v4479_v24, %v4478_v7  ;;  %v12113_v24 = vld [vmem:[#allocation79_spill] sm:$0xff] }
 0x670   : > { %v10422_v42 = vmul.f32 %v12109_v47, %v4136_v31  ;;  %v4104_v28 = vadd.f32 %v10321_v51, %v3968_v4  ;;  %4569 = vmatmul.mubr.f32.gmra.mrb[40].mxu1 %v4236_v20  ;;  %v10426_v17 = vsel %vm692_vm2, %v4239_v9, %v4241_v10  ;;  %v10429_v45 = vsel %vm692_vm2, %v4241_v10, %v4243_v11 }
 0x671   : > { %v4139_v59 = vmax.f32 %v4105_v6, 0.0  ;;  %4573 = vmatprep.mubr.f32.mxu1 %v4166_v13  ;;  %v4247_v3 = vrot.slane %v10418_v34, 7  ;;  %6969 = vmatpush3.bf16.msra.mxu1 %v6966_v54  ;;  %v10439_v26 = vsel %vm924_vm3, %v4341_v61, %v4343_v25  ;;  %v10442_v32 = vsel %vm924_vm3, %v4343_v25, %v4345_v1 }
 0x672   : > { %v4138_v20 = vmax.f32 %v4104_v28, 0.0  ;;  %v6625_v60 = vpop.f32.mrb[12].mxu1  ;;  %v4245_v8 = vrot.slane %v10422_v42, 7  ;;  %6971 = vmatprep.subr.bf16.mxu1 %v6970_v55  ;;  %v4347_v53 = vrot.slane %v10422_v42, 1  ;;  %v4349_v9 = vrot.slane %v10418_v34, 1  ;;  %v12112_v28 = vld [vmem:[#allocation80_spill] sm:$0xff] }
 0x673   : > { %v10448_v13 = vmul.f32 %v12110_v40, %v4139_v59  ;;  %v4107_v54 = vadd.f32 %v6625_v60, %v10321_v51  ;;  %v3978_v29 = vpop.f32.mrb[13].mxu1 }
 0x674   : > { %v10452_v61 = vmul.f32 %v12111_v41, %v4138_v20  ;;  %v4106_v2 = vadd.f32 %v10321_v51, %v3978_v29  ;;  %4574 = vmatmul.mubr.f32.gmra.mrb[42].mxu1 %v4238_v22  ;;  %v10456_v19 = vsel %vm692_vm2, %v4243_v11, %v4245_v8  ;;  %v10459_v52 = vsel %vm692_vm2, %v4245_v8, %v4247_v3  ;;  %v5029_v29 = vld [vmem:[%s11535_s10 + $0x10] sm:$0xff] }
 0x675   : > { %v4141_v16 = vmax.f32 %v4107_v54, 0.0  ;;  %4578 = vmatprep.mubr.f32.mxu1 %v10367_v43  ;;  %v4251_v31 = vrot.slane %v10448_v13, 7  ;;  %6973 = vmatpush3.bf16.msra.mxu1 %v6970_v55  ;;  %v10470_v22 = vsel %vm924_vm3, %v4345_v1, %v4347_v53  ;;  %v10473_v11 = vsel %vm924_vm3, %v4347_v53, %v4349_v9 }
 0x676   : > { %v4140_v5 = vmax.f32 %v4106_v2, 0.0  ;;  %v6628_v10 = vpop.f32.mrb[14].mxu1  ;;  %v4249_v25 = vrot.slane %v10452_v61, 7  ;;  %6975 = vmatprep.subr.bf16.mxu1 %v6974_v23  ;;  %v4351_v6 = vrot.slane %v10452_v61, 1  ;;  %v4353_v4 = vrot.slane %v10448_v13, 1 }
 0x677   : > { %v10479_v43 = vmul.f32 %v12112_v28, %v4141_v16  ;;  %v4109_v55 = vadd.f32 %v6628_v10, %v10321_v51  ;;  %v3988_v7 = vpop.f32.mrb[15].mxu1  ;;  %v6982_v1 = vpack.c.bf16 %v4481_v48, %v4480_v0 }
 0x678   : > { %v10483_v59 = vmul.f32 %v12113_v24, %v4140_v5  ;;  %v4108_v20 = vadd.f32 %v10321_v51, %v3988_v7  ;;  %4579 = vmatmul.mubr.f32.gmra.mrb[44].mxu1 %v10398_v44  ;;  %v10488_v60 = vsel %vm692_vm2, %v4247_v3, %v4249_v25  ;;  %v10491_v8 = vsel %vm692_vm2, %v4249_v25, %v4251_v31  ;;  %v5030_v44 = vld [vmem:[%s11535_s10 + $0x18] sm:$0xff] }
 0x679   : > { %v4143_v53 = vmax.f32 %v4109_v55, 0.0  ;;  %4583 = vmatprep.mubr.f32.mxu1 %v10393_v38  ;;  %v4255_v54 = vrot.slane %v10479_v43, 7  ;;  %6977 = vmatpush3.bf16.msra.mxu1 %v6974_v23  ;;  %v10502_v3 = vsel %vm924_vm3, %v4349_v9, %v4351_v6  ;;  %v10505_v2 = vsel %vm924_vm3, %v4351_v6, %v4353_v4  ;;  %v12115_v55 = vld [vmem:[#allocation82_spill] sm:$0xff] }
 0x67a   : > { %12114 = vst [vmem:[#allocation73_spill] sm:$0xff] %v10505_v2  ;;  %v4142_v0 = vmax.f32 %v4108_v20, 0.0  ;;  %v6631_v48 = vpop.f32.mrb[16].mxu1  ;;  %v4253_v38 = vrot.slane %v10483_v59, 7  ;;  %6979 = vmatprep.subr.bf16.mxu1 %v6978_v56  ;;  %v10508_v23 = vpack.c.bf16 %v5030_v44, %v5029_v29  ;;  %v4355_v16 = vrot.slane %v10483_v59, 1 }
 0x67b   : > { %v10512_v5 = vmul.f32 %v12030_v46, %v4143_v53  ;;  %v4111_v10 = vadd.f32 %v6631_v48, %v10321_v51  ;;  %v3998_v25 = vpop.f32.mrb[17].mxu1  ;;  %v4357_v9 = vrot.slane %v10479_v43, 1 }
 0x67c   : > { %v10517_v6 = vmul.f32 %v12115_v55, %v4142_v0  ;;  %v4110_v7 = vadd.f32 %v10321_v51, %v3998_v25  ;;  %4584 = vmatmul.mubr.f32.gmra.mrb[46].mxu1 %v10426_v17  ;;  %v10522_v20 = vsel %vm692_vm2, %v4251_v31, %v4253_v38  ;;  %v10525_v29 = vsel %vm692_vm2, %v4253_v38, %v4255_v54 }
 0x67d   : > { %v4145_v53 = vmax.f32 %v4111_v10, 0.0  ;;  %4588 = vmatprep.mubr.f32.mxu1 %v10389_v62  ;;  %v4259_v44 = vrot.slane %v10512_v5, 7  ;;  %6981 = vmatpush3.bf16.msra.mxu1 %v6978_v56  ;;  %v10530_v48 = vsel %vm924_vm3, %v4353_v4, %v4355_v16  ;;  %v10533_v0 = vsel %vm924_vm3, %v4355_v16, %v4357_v9 }
 0x67e   : > { %12116 = vst [vmem:[#allocation10_spill] sm:$0xff] %v10530_v48  ;;  %12117 = vst [vmem:[#allocation29_spill] sm:$0xff] %v10533_v0  ;;  %v4144_v25 = vmax.f32 %v4110_v7, 0.0  ;;  %v6634_v17 = vpop.f32.mrb[18].mxu1  ;;  %v4257_v31 = vrot.slane %v10517_v6, 7  ;;  %6983 = vmatprep.subr.bf16.mxu1 %v6982_v1  ;;  %6991 = vmatprep.subr.bf16.mxu0 %v10508_v23  ;;  %v4359_v38 = vrot.slane %v10517_v6, 1 }
 0x67f   : > { %v4361_v62 = vrot.slane %v10512_v5, 1  ;;  %v4113_v10 = vadd.f32 %v6634_v17, %v10321_v51  ;;  %v4008_v56 = vpop.f32.mrb[19].mxu1  ;;  %6993 = vmatpush3.bf16.msra.mxu0 %v10508_v23 }
 0x680   : > { %v10542_v4 = vmul.f32 %v12031_v35, %v4144_v25  ;;  %v4112_v16 = vadd.f32 %v10321_v51, %v4008_v56  ;;  %4589 = vmatmul.mubr.f32.gmra.mrb[48].mxu1 %v10429_v45  ;;  %v10547_v7 = vsel %vm692_vm2, %v4255_v54, %v4257_v31  ;;  %v10550_v0 = vsel %vm692_vm2, %v4257_v31, %v4259_v44 }
 0x681   : > { %v4147_v48 = vmax.f32 %v4113_v10, 0.0  ;;  %4593 = vmatprep.mubr.f32.mxu1 %v10422_v42  ;;  %6985 = vmatpush3.bf16.msra.mxu1 %v6982_v1  ;;  %v10554_v17 = vsel %vm924_vm3, %v4357_v9, %v4359_v38  ;;  %v10557_v25 = vsel %vm924_vm3, %v4359_v38, %v4361_v62  ;;  %v10560_v56 = vmul.f32 %v12099_v12, %v4145_v53 }
 0x682   : > { %12118 = vst [vmem:[#allocation26_spill] sm:$0xff] %v10554_v17  ;;  %12119 = vst [vmem:[#allocation32_spill] sm:$0xff] %v10557_v25  ;;  %v4146_v45 = vmax.f32 %v4112_v16, 0.0  ;;  %v6637_v2 = vpop.f32.mrb[20].mxu1  ;;  %v4261_v54 = vrot.slane %v10542_v4, 7  ;;  %v11710_v31 = vrot.slane %v10542_v4, 1  ;;  %7002 = vmatprep.subr.bf16.mxu1 %v10314_v57 }
 0x683   : > { %v10566_v42 = vmul.f32 %v12103_v58, %v4147_v48  ;;  %v4115_v1 = vadd.f32 %v6637_v2, %v10321_v51  ;;  %v4018_v9 = vpop.f32.mrb[21].mxu1 }
 0x684   : > { %v10570_v38 = vmul.f32 %v12098_v37, %v4146_v45  ;;  %v4114_v53 = vadd.f32 %v10321_v51, %v4018_v9  ;;  %4594 = vmatmul.mubr.f32.gmra.mrb[50].mxu1 %v10456_v19  ;;  %v10575_v10 = vsel %vm692_vm2, %v4259_v44, %v4261_v54  ;;  %v10580_v16 = vsel %vm924_vm3, %v4361_v62, %v11710_v31 }
 0x685   : > { %12120 = vst [vmem:[#allocation12_spill] sm:$0xff] %v10580_v16  ;;  %v4149_v48 = vmax.f32 %v4115_v1, 0.0  ;;  %4598 = vmatprep.mubr.f32.mxu1 %v10418_v34  ;;  %v4266_v2 = vrot.slane %v10566_v42, 7  ;;  %v4368_v45 = vrot.slane %v10566_v42, 1  ;;  %v11714_v9 = vrot.slane %v10560_v56, 7 }
 0x686   : > { %v4148_v58 = vmax.f32 %v4114_v53, 0.0  ;;  %v6640_v37 = vpop.f32.mrb[22].mxu1  ;;  %v4264_v19 = vrot.slane %v10570_v38, 7  ;;  %v4366_v44 = vrot.slane %v10570_v38, 1  ;;  %v4365_v34 = vrot.slane %v10560_v56, 1 }
 0x687   : > { %v10589_v54 = vmul.f32 %v12105_v21, %v4149_v48  ;;  %v4117_v62 = vadd.f32 %v6640_v37, %v10321_v51  ;;  %v4028_v1 = vpop.f32.mrb[23].mxu1 }
 0x688   : > { %v10594_v31 = vmul.f32 %v12102_v15, %v4148_v58  ;;  %v4116_v53 = vadd.f32 %v10321_v51, %v4028_v1  ;;  %4599 = vmatmul.mubr.f32.gmra.mrb[52].mxu1 %v10459_v52  ;;  %v10601_v12 = vsel %vm692_vm2, %v11714_v9, %v4264_v19  ;;  %v10604_v48 = vsel %vm692_vm2, %v4264_v19, %v4266_v2 }
 0x689   : > { %v4151_v21 = vmax.f32 %v4117_v62, 0.0  ;;  %4603 = vmatprep.mubr.f32.mxu1 %v10452_v61  ;;  %v4270_v37 = vrot.slane %v10589_v54, 7  ;;  %v10609_v58 = vsel %vm924_vm3, %v4365_v34, %v4366_v44  ;;  %v10612_v1 = vsel %vm924_vm3, %v4366_v44, %v4368_v45 }
 0x68a   : > { %12121 = vst [vmem:[#allocation15_spill] sm:$0xff] %v10609_v58  ;;  %12122 = vst [vmem:[#allocation19_spill] sm:$0xff] %v10612_v1  ;;  %v4150_v52 = vmax.f32 %v4116_v53, 0.0  ;;  %v6643_v15 = vpop.f32.mrb[24].mxu1  ;;  %v4268_v16 = vrot.slane %v10594_v31, 7  ;;  %v4370_v9 = vrot.slane %v10594_v31, 1 }
 0x68b   : > { %v4372_v19 = vrot.slane %v10589_v54, 1  ;;  %v10618_v62 = vmul.f32 %v12107_v33, %v4151_v21  ;;  %v4119_v61 = vadd.f32 %v6643_v15, %v10321_v51  ;;  %v4038_v25 = vpop.f32.mrb[25].mxu1 }
 0x68c   : > { %v10622_v34 = vmul.f32 %v12104_v14, %v4150_v52  ;;  %v4118_v44 = vadd.f32 %v10321_v51, %v4038_v25  ;;  %4604 = vmatmul.mubr.f32.gmra.mrb[54].mxu1 %v10488_v60  ;;  %v10627_v53 = vsel %vm692_vm2, %v4266_v2, %v4268_v16  ;;  %v10630_v1 = vsel %vm692_vm2, %v4268_v16, %v4270_v37 }
 0x68d   : > { %v4153_v58 = vmax.f32 %v4119_v61, 0.0  ;;  %4608 = vmatprep.mubr.f32.mxu1 %v10448_v13  ;;  %v4274_v21 = vrot.slane %v10618_v62, 7  ;;  %v10635_v15 = vsel %vm924_vm3, %v4368_v45, %v4370_v9  ;;  %v10638_v52 = vsel %vm924_vm3, %v4370_v9, %v4372_v19 }
 0x68e   : > { %12123 = vst [vmem:[#allocation75_spill] sm:$0xff] %v10635_v15  ;;  %12124 = vst [vmem:[#allocation16_spill] sm:$0xff] %v10638_v52  ;;  %v4152_v25 = vmax.f32 %v4118_v44, 0.0  ;;  %v6646_v33 = vpop.f32.mrb[26].mxu1  ;;  %v4272_v60 = vrot.slane %v10622_v34, 7  ;;  %v4374_v2 = vrot.slane %v10622_v34, 1 }
 0x68f   : > { %v4376_v16 = vrot.slane %v10618_v62, 1  ;;  %v10644_v61 = vmul.f32 %v12109_v47, %v4153_v58  ;;  %v4121_v13 = vadd.f32 %v6646_v33, %v10321_v51  ;;  %v4048_v14 = vpop.f32.mrb[27].mxu1 }
 0x690   : > { %v10648_v45 = vmul.f32 %v12106_v49, %v4152_v25  ;;  %v4120_v9 = vadd.f32 %v10321_v51, %v4048_v14  ;;  %4609 = vmatmul.mubr.f32.gmra.mrb[56].mxu1 %v10491_v8  ;;  %v10653_v44 = vsel %vm692_vm2, %v4270_v37, %v4272_v60  ;;  %v10656_v52 = vsel %vm692_vm2, %v4272_v60, %v4274_v21 }
 0x691   : > { %v4155_v15 = vmax.f32 %v4121_v13, 0.0  ;;  %4613 = vmatprep.mubr.f32.mxu1 %v10483_v59  ;;  %v4278_v58 = vrot.slane %v10644_v61, 7  ;;  %v10661_v33 = vsel %vm924_vm3, %v4372_v19, %v4374_v2  ;;  %v10664_v25 = vsel %vm924_vm3, %v4374_v2, %v4376_v16 }
 0x692   : > { %12125 = vst [vmem:[#allocation18_spill] sm:$0xff] %v10661_v33  ;;  %12126 = vst [vmem:[#allocation30_spill] sm:$0xff] %v10664_v25  ;;  %v4154_v14 = vmax.f32 %v4120_v9, 0.0  ;;  %v6649_v47 = vpop.f32.mrb[28].mxu1  ;;  %v4276_v8 = vrot.slane %v10648_v45, 7  ;;  %v4378_v37 = vrot.slane %v10648_v45, 1 }
 0x693   : > { %v4380_v60 = vrot.slane %v10644_v61, 1  ;;  %v10670_v13 = vmul.f32 %v12111_v41, %v4155_v15  ;;  %v4123_v59 = vadd.f32 %v6649_v47, %v10321_v51  ;;  %v4058_v49 = vpop.f32.mrb[29].mxu1 }
 0x694   : > { %v10674_v19 = vmul.f32 %v12108_v27, %v4154_v14  ;;  %v4122_v2 = vadd.f32 %v10321_v51, %v4058_v49  ;;  %4614 = vmatmul.mubr.f32.gmra.mrb[58].mxu1 %v10522_v20  ;;  %v10679_v9 = vsel %vm692_vm2, %v4274_v21, %v4276_v8  ;;  %v10682_v25 = vsel %vm692_vm2, %v4276_v8, %v4278_v58 }
 0x695   : > { %v4157_v33 = vmax.f32 %v4123_v59, 0.0  ;;  %4618 = vmatprep.mubr.f32.mxu1 %v10479_v43  ;;  %v4282_v15 = vrot.slane %v10670_v13, 7  ;;  %v10687_v47 = vsel %vm924_vm3, %v4376_v16, %v4378_v37  ;;  %v10690_v14 = vsel %vm924_vm3, %v4378_v37, %v4380_v60 }
 0x696   : > { %12127 = vst [vmem:[#allocation14_spill] sm:$0xff] %v10687_v47  ;;  %12128 = vst [vmem:[#allocation35_spill] sm:$0xff] %v10690_v14  ;;  %v4156_v49 = vmax.f32 %v4122_v2, 0.0  ;;  %v6652_v41 = vpop.f32.mrb[30].mxu1  ;;  %v4280_v20 = vrot.slane %v10674_v19, 7  ;;  %v4382_v21 = vrot.slane %v10674_v19, 1 }
 0x697   : > { %v4384_v8 = vrot.slane %v10670_v13, 1  ;;  %v10696_v59 = vmul.f32 %v12113_v24, %v4157_v33  ;;  %v4125_v43 = vadd.f32 %v6652_v41, %v10321_v51  ;;  %v4068_v27 = vpop.f32.mrb[31].mxu1 }
 0x698   : > { %v10700_v16 = vmul.f32 %v12110_v40, %v4156_v49  ;;  %v4124_v37 = vadd.f32 %v10321_v51, %v4068_v27  ;;  %4619 = vmatmul.mubr.f32.gmra.mrb[60].mxu1 %v10525_v29  ;;  %v4281_v2 = vsel %vm692_vm2, %v4278_v58, %v4280_v20  ;;  %v10706_v14 = vsel %vm692_vm2, %v4280_v20, %v4282_v15 }
 0x699   : > { %v4159_v47 = vmax.f32 %v4125_v43, 0.0  ;;  %4623 = vmatprep.mubr.f32.mxu1 %v10517_v6  ;;  %v4286_v33 = vrot.slane %v10696_v59, 7  ;;  %v10711_v41 = vsel %vm924_vm3, %v4380_v60, %v4382_v21  ;;  %v10714_v49 = vsel %vm924_vm3, %v4382_v21, %v4384_v8 }
 0x69a   : > { %12129 = vst [vmem:[#allocation33_spill] sm:$0xff] %v10711_v41  ;;  %12130 = vst [vmem:[#allocation36_spill] sm:$0xff] %v10714_v49  ;;  %v4158_v24 = vmax.f32 %v4124_v37, 0.0  ;;  %v6655_v27 = vpop.f32.mrb[32].mxu1  ;;  %v4284_v29 = vrot.slane %v10700_v16, 7  ;;  %v4386_v58 = vrot.slane %v10700_v16, 1 }
 0x69b   : > { %v4388_v20 = vrot.slane %v10696_v59, 1  ;;  %v4193_v43 = vmul.f32 %v12115_v55, %v4159_v47  ;;  %v4078_v40 = vpop.f32.mrb[33].mxu1 }
 0x69c   : > { %v4192_v6 = vmul.f32 %v12112_v28, %v4158_v24  ;;  %v4126_v17 = vadd.f32 %v10321_v51, %v4078_v40  ;;  %4624 = vmatmul.mubr.f32.gmra.mrb[62].mxu1 %v10547_v7  ;;  %v4285_v60 = vsel %vm692_vm2, %v4282_v15, %v4284_v29  ;;  %v4287_v21 = vsel %vm692_vm2, %v4284_v29, %v4286_v33 }
 0x69d   : > { %4628 = vmatprep.mubr.f32.mxu1 %v10512_v5  ;;  %v4290_v37 = vrot.slane %v4193_v43, 7  ;;  %v10727_v49 = vsel %vm924_vm3, %v4384_v8, %v4386_v58  ;;  %v10730_v41 = vsel %vm924_vm3, %v4386_v58, %v4388_v20  ;;  %v4392_v28 = vrot.slane %v4193_v43, 1 }
 0x69e   : > { %v4160_v47 = vmax.f32 %v4126_v17, 0.0  ;;  %v4288_v55 = vrot.slane %v4192_v6, 7  ;;  %v4390_v24 = vrot.slane %v4192_v6, 1 }
 0x6a0   : > { %v10733_v40 = vmul.f32 %v12030_v46, %v4160_v47  ;;  %4629 = vmatmul.mubr.f32.gmra.mrb[64].mxu1 %v10550_v0  ;;  %v4289_v7 = vsel %vm692_vm2, %v4286_v33, %v4288_v55  ;;  %v4291_v5 = vsel %vm692_vm2, %v4288_v55, %v4290_v37  ;;  %v10739_v15 = vsel %vm924_vm3, %v4388_v20, %v4390_v24 }
 0x6a1   : > { %4633 = vmatprep.mubr.f32.mxu1 %v10542_v4  ;;  %v10743_v8 = vsel %vm924_vm3, %v4390_v24, %v4392_v28  ;;  %v12131_v33 = vrot.slane %v10560_v56, 7 }
 0x6a2   : > { %v4292_v17 = vrot.slane %v10733_v40, 7  ;;  %v4394_v29 = vrot.slane %v10733_v40, 1 }
 0x6a4   : > { %4634 = vmatmul.mubr.f32.gmra.mrb[66].mxu1 %v10575_v10  ;;  %v4293_v0 = vsel %vm692_vm2, %v4290_v37, %v4292_v17  ;;  %v10752_v55 = vsel %vm924_vm3, %v4392_v28, %v4394_v29 }
 0x6a5   : > { %4638 = vmatprep.mubr.f32.mxu1 %v10560_v56  ;;  %v4127_v56 = vadd.f32 %v6655_v27, %v10321_v51  ;;  %v12133_v51 = vld [vmem:[#allocation10_spill] sm:$0xff] }
 0x6a8   : > { %6256 = vmatmul.mubr.msk.f32.gmra.mrb[68].mxu1 %vm10336_vm1, %v12131_v33 }
 0x6a9   : > { %4643 = vmatprep.mubr.f32.mxu1 %v10570_v38 }
 0x6ac   : > { %4644 = vmatmul.mubr.f32.gmra.mrb[70].mxu1 %v10601_v12  ;;  %v5031_v12 = vld [vmem:[%s11535_s10 + $0x20] sm:$0xff] }
 0x6ad   : > { %4648 = vmatprep.mubr.f32.mxu1 %v10566_v42  ;;  %v6994_v28 = vpack.c.bf16 %v5032_v30, %v5031_v12 }
 0x6af   : > { %6995 = vmatprep.subr.bf16.mxu0 %v6994_v28 }
 0x6b0   : > { %4649 = vmatmul.mubr.f32.gmra.mrb[72].mxu1 %v10604_v48  ;;  %6997 = vmatpush3.bf16.msra.mxu0 %v6994_v28  ;;  %v12143_v48 = vld [vmem:[#allocation18_spill] sm:$0xff] }
 0x6b1   : > { %4653 = vmatprep.mubr.f32.mxu1 %v10594_v31  ;;  %v4161_v31 = vmax.f32 %v4127_v56, 0.0 }
 0x6b3   : > { %v4195_v42 = vmul.f32 %v12031_v35, %v4161_v31 }
 0x6b4   : > { %4654 = vmatmul.mubr.f32.gmra.mrb[74].mxu1 %v10627_v53  ;;  %v12148_v53 = vld [vmem:[#allocation36_spill] sm:$0xff] }
 0x6b5   : > { %4658 = vmatprep.mubr.f32.mxu1 %v10589_v54  ;;  %v4294_v38 = vrot.slane %v4195_v42, 7  ;;  %v12142_v54 = vld [vmem:[#allocation16_spill] sm:$0xff] }
 0x6b7   : > { %v4295_v10 = vsel %vm692_vm2, %v4292_v17, %v4294_v38 }
 0x6b8   : > { %4659 = vmatmul.mubr.f32.gmra.mrb[76].mxu1 %v10630_v1  ;;  %v12144_v1 = vld [vmem:[#allocation30_spill] sm:$0xff] }
 0x6b9   : > { %4663 = vmatprep.mubr.f32.mxu1 %v10622_v34  ;;  %v12146_v34 = vld [vmem:[#allocation35_spill] sm:$0xff] }
 0x6bc   : > { %4664 = vmatmul.mubr.f32.gmra.mrb[78].mxu1 %v10653_v44 }
 0x6bd   : > { %4668 = vmatprep.mubr.f32.mxu1 %v10618_v62  ;;  %v12145_v62 = vld [vmem:[#allocation14_spill] sm:$0xff] }
 0x6c0   : > { %4669 = vmatmul.mubr.f32.gmra.mrb[80].mxu1 %v10656_v52  ;;  %v4396_v52 = vrot.slane %v4195_v42, 1 }
 0x6c1   : > { %4673 = vmatprep.mubr.f32.mxu1 %v10648_v45 }
 0x6c4   : > { %4674 = vmatmul.mubr.f32.gmra.mrb[82].mxu1 %v10679_v9 }
 0x6c5   : > { %4678 = vmatprep.mubr.f32.mxu1 %v10644_v61  ;;  %v4397_v61 = vsel %vm924_vm3, %v4394_v29, %v4396_v52 }
 0x6c8   : > { %4679 = vmatmul.mubr.f32.gmra.mrb[84].mxu1 %v10682_v25 }
 0x6c9   : > { %4683 = vmatprep.mubr.f32.mxu1 %v10674_v19 }
 0x6cc   : > { %4684 = vmatmul.mubr.f32.gmra.mrb[86].mxu1 %v4281_v2 }
 0x6cd   : > { %4688 = vmatprep.mubr.f32.mxu1 %v10670_v13 }
 0x6d0   : > { %4689 = vmatmul.mubr.f32.gmra.mrb[88].mxu1 %v10706_v14 }
 0x6d1   : > { %4693 = vmatprep.mubr.f32.mxu1 %v10700_v16 }
 0x6d4   : > { %4694 = vmatmul.mubr.f32.gmra.mrb[90].mxu1 %v4285_v60 }
 0x6d5   : > { %4698 = vmatprep.mubr.f32.mxu1 %v10696_v59 }
 0x6d8   : > { %4699 = vmatmul.mubr.f32.gmra.mrb[92].mxu1 %v4287_v21 }
 0x6d9   : > { %4703 = vmatprep.mubr.f32.mxu1 %v4192_v6 }
 0x6dc   : > { %4704 = vmatmul.mubr.f32.gmra.mrb[94].mxu1 %v4289_v7 }
 0x6dd   : > { %4708 = vmatprep.mubr.f32.mxu1 %v4193_v43 }
 0x6e0   : > { %4709 = vmatmul.mubr.f32.gmra.mrb[96].mxu1 %v4291_v5 }
 0x6e1   : > { %4713 = vmatprep.mubr.f32.mxu1 %v10733_v40 }
 0x6e4   : > { %4714 = vmatmul.mubr.f32.gmra.mrb[98].mxu1 %v4293_v0 }
 0x6e5   : > { %4718 = vmatprep.mubr.f32.mxu1 %v4195_v42 }
 0x6e8   : > { %4719 = vmatmul.mubr.f32.gmra.mrb[100].mxu1 %v4295_v10 }
 0x6e9   : > { %6688 = vmatprep.mubr.f32.mxu1 %v10362_v63  ;;  %v12134_v63 = vld [vmem:[#allocation29_spill] sm:$0xff] }
 0x6ec   : > { %6689 = vmatmul.mubr.f32.vlgmr.msra.gmra.mrb[102].mxu1 %v10382_v39  ;;  %v12135_v39 = vld [vmem:[#allocation26_spill] sm:$0xff] }
 0x6ed   : > { %6691 = vmatprep.mubr.f32.mxu1 %v10385_v50  ;;  %7006 = vmatpush3.bf16.msra.mxu1 %v10314_v57  ;;  %v12132_v57 = vld [vmem:[#allocation73_spill] sm:$0xff]  ;;  %v5033_v50 = vld [vmem:[%s11535_s10 + $0x30] sm:$0xff] }
 0x6ee   : > { %7003 = vmatprep.subr.bf16.mxu1 %v10508_v23 }
 0x6f0   : > { %6692 = vmatmul.mubr.f32.gmra.mrb[104].mxu1 %v10409_v18  ;;  %v5034_v18 = vld [vmem:[%s11535_s10 + $0x38] sm:$0xff] }
 0x6f1   : > { %6694 = vmatprep.mubr.f32.mxu1 %v10412_v36  ;;  %7007 = vmatpush3.bf16.msra.mxu1 %v10508_v23  ;;  %v12136_v36 = vld [vmem:[#allocation32_spill] sm:$0xff]  ;;  %v12141_v23 = vld [vmem:[#allocation75_spill] sm:$0xff] }
 0x6f2   : > { %7004 = vmatprep.subr.bf16.mxu1 %v6994_v28 }
 0x6f4   : > { %6695 = vmatmul.mubr.f32.gmra.mrb[106].mxu1 %v10439_v26  ;;  %v6998_v26 = vpack.c.bf16 %v5034_v18, %v5033_v50 }
 0x6f5   : > { %6697 = vmatprep.mubr.f32.mxu1 %v10442_v32  ;;  %7008 = vmatpush3.bf16.msra.mxu1 %v6994_v28  ;;  %v12137_v32 = vld [vmem:[#allocation12_spill] sm:$0xff] }
 0x6f6   : > { %6999 = vmatprep.subr.bf16.mxu0 %v6998_v26  ;;  %7005 = vmatprep.subr.bf16.mxu1 %v6998_v26 }
 0x6f7   : > { %7001 = vmatpush3.bf16.msra.mxu0 %v6998_v26 }
 0x6f8   : > { %6698 = vmatmul.mubr.f32.gmra.mrb[108].mxu1 %v10470_v22  ;;  %v12138_v22 = vrot.slane %v10542_v4, 1  ;;  %v12147_v4 = vld [vmem:[#allocation33_spill] sm:$0xff] }
 0x6f9   : > { %6700 = vmatprep.mubr.f32.mxu1 %v10473_v11  ;;  %7009 = vmatpush3.bf16.msra.mxu1 %v6998_v26  ;;  %v12139_v11 = vld [vmem:[#allocation15_spill] sm:$0xff] }
 0x6fc   : > { %6701 = vmatmul.mubr.f32.gmra.mrb[110].mxu1 %v10502_v3  ;;  %v12140_v3 = vld [vmem:[#allocation19_spill] sm:$0xff] }
 0x6fd   : > { %6703 = vmatprep.mubr.f32.mxu1 %v12132_v57 }
 0x700   : > { %6704 = vmatmul.mubr.f32.gmra.mrb[112].mxu1 %v12133_v51 }
 0x701   : > { %6706 = vmatprep.mubr.f32.mxu1 %v12134_v63 }
 0x704   : > { %6707 = vmatmul.mubr.f32.gmra.mrb[114].mxu1 %v12135_v39 }
 0x705   : > { %6709 = vmatprep.mubr.f32.mxu1 %v12136_v36 }
 0x708   : > { %6710 = vmatmul.mubr.f32.gmra.mrb[116].mxu1 %v12137_v32 }
 0x709   : > { %6712 = vmatprep.mubr.msk.f32.mxu1 %vm924_vm3, %v12138_v22 }
 0x70c   : > { %6713 = vmatmul.mubr.f32.gmra.mrb[118].mxu1 %v12139_v11 }
 0x70d   : > { %6715 = vmatprep.mubr.f32.mxu1 %v12140_v3 }
 0x710   : > { %6716 = vmatmul.mubr.f32.gmra.mrb[120].mxu1 %v12141_v23 }
 0x711   : > { %6718 = vmatprep.mubr.f32.mxu1 %v12142_v54 }
 0x714   : > { %6719 = vmatmul.mubr.f32.gmra.mrb[122].mxu1 %v12143_v48 }
 0x715   : > { %6721 = vmatprep.mubr.f32.mxu1 %v12144_v1 }
 0x718   : > { %6722 = vmatmul.mubr.f32.gmra.mrb[124].mxu1 %v12145_v62 }
 0x719   : > { %6724 = vmatprep.mubr.f32.mxu1 %v12146_v34 }
 0x71c   : > { %6725 = vmatmul.mubr.f32.gmra.mrb[126].mxu1 %v12147_v4 }
 0x71d   : > { %6727 = vmatprep.mubr.f32.mxu1 %v12148_v53 }
 0x720   : > { %6728 = vmatmul.mubr.f32.gmra.mrb[128].mxu1 %v10727_v49 }
 0x721   : > { %6730 = vmatprep.mubr.f32.mxu1 %v10730_v41 }
 0x724   : > { %6731 = vmatmul.mubr.f32.gmra.mrb[130].mxu1 %v10739_v15 }
 0x725   : > { %6733 = vmatprep.mubr.f32.mxu1 %v10743_v8 }
 0x728   : > { %6734 = vmatmul.mubr.f32.gmra.mrb[132].mxu1 %v10752_v55 }
 0x729   : > { %6736 = vmatprep.mubr.f32.mxu1 %v4397_v61 }
 0x72c   : > { %6737 = vmatmul.mubr.msk.f32.gmra.mrb[134].mxu1 %vm924_vm3, %v4396_v52 }
 0x737   : > { %v10837_v45 = vpop.f32.mrb[34].mxu1 }
 0x738   : > { %v4557_v44 = vpop.f32.mrb[35].mxu1 }
 0x73b   : > { %v10839_v25 = vpop.f32.mrb[36].mxu1 }
 0x73c   : > { %v4562_v13 = vpop.f32.mrb[37].mxu1 }
 0x73f   : > { %v10841_v19 = vpop.f32.mrb[38].mxu1 }
 0x740   : > { %v4567_v9 = vpop.f32.mrb[39].mxu1 }
 0x743   : > { %v10843_v14 = vpop.f32.mrb[40].mxu1 }
 0x744   : > { %v4572_v59 = vpop.f32.mrb[41].mxu1 }
 0x747   : > { %v10845_v16 = vpop.f32.mrb[42].mxu1 }
 0x748   : > { %v4577_v2 = vpop.f32.mrb[43].mxu1 }
 0x74b   : > { %v10847_v41 = vpop.f32.mrb[44].mxu1 }
 0x74c   : > { %v4582_v49 = vpop.f32.mrb[45].mxu1 }
 0x74d   : > { %v10908_v49 = vld [vmem:[%s11534_s9] ss:$0 sm:$0xff] }
 0x74f   : > { %v10849_v27 = vpop.f32.mrb[46].mxu1 }
 0x750   : > { %v4587_v58 = vpop.f32.mrb[47].mxu1 }
 0x753   : > { %v10851_v20 = vpop.f32.mrb[48].mxu1 }
 0x754   : > { %v4592_v43 = vpop.f32.mrb[49].mxu1 }
 0x755   : > { %v4561_v43 = vadd.f32 %v10908_v49, %v10839_v25 }
 0x757   : > { %v10853_v6 = vpop.f32.mrb[50].mxu1 }
 0x758   : > { %v4597_v60 = vpop.f32.mrb[51].mxu1 }
 0x759   : > { %v4556_v60 = vadd.f32 %v10908_v49, %v10837_v45  ;;  %v4581_v45 = vadd.f32 %v10908_v49, %v10847_v41  ;;  %v4591_v41 = vadd.f32 %v10908_v49, %v10851_v20 }
 0x75b   : > { %v10855_v21 = vpop.f32.mrb[52].mxu1 }
 0x75c   : > { %v4602_v37 = vpop.f32.mrb[53].mxu1  ;;  %v4601_v20 = vadd.f32 %v10908_v49, %v10855_v21 }
 0x75f   : > { %v10857_v47 = vpop.f32.mrb[54].mxu1 }
 0x760   : > { %v4607_v24 = vpop.f32.mrb[55].mxu1 }
 0x763   : > { %v10859_v40 = vpop.f32.mrb[56].mxu1 }
 0x764   : > { %v4612_v7 = vpop.f32.mrb[57].mxu1  ;;  %v4611_v21 = vadd.f32 %v10908_v49, %v10859_v40 }
 0x767   : > { %v10861_v5 = vpop.f32.mrb[58].mxu1 }
 0x768   : > { %v4617_v15 = vpop.f32.mrb[59].mxu1 }
 0x76b   : > { %v10863_v8 = vpop.f32.mrb[60].mxu1 }
 0x76c   : > { %v4622_v17 = vpop.f32.mrb[61].mxu1  ;;  %v4621_v40 = vadd.f32 %v10908_v49, %v10863_v8 }
 0x76d   : > { %v4571_v17 = vadd.f32 %v10908_v49, %v10843_v14  ;;  %v4576_v14 = vadd.f32 %v10908_v49, %v10845_v16  ;;  %v4586_v16 = vadd.f32 %v10908_v49, %v10849_v27  ;;  %v4596_v27 = vadd.f32 %v10908_v49, %v10853_v6 }
 0x76e   : > { %v4606_v6 = vadd.f32 %v10908_v49, %v10857_v47  ;;  %v4616_v47 = vadd.f32 %v10908_v49, %v10861_v5 }
 0x76f   : > { %v10865_v29 = vpop.f32.mrb[62].mxu1 }
 0x770   : > { %v4627_v0 = vpop.f32.mrb[63].mxu1  ;;  %v4626_v5 = vadd.f32 %v10908_v49, %v10865_v29 }
 0x773   : > { %v10867_v55 = vpop.f32.mrb[64].mxu1 }
 0x774   : > { %v4632_v33 = vpop.f32.mrb[65].mxu1  ;;  %v4631_v8 = vadd.f32 %v10908_v49, %v10867_v55 }
 0x775   : > { %v4566_v33 = vadd.f32 %v10908_v49, %v10841_v19 }
 0x777   : > { %v10869_v12 = vpop.f32.mrb[66].mxu1 }
 0x778   : > { %v4637_v30 = vpop.f32.mrb[67].mxu1  ;;  %v4636_v29 = vadd.f32 %v10908_v49, %v10869_v12 }
 0x77b   : > { %v10871_v28 = vpop.f32.mrb[68].mxu1 }
 0x77c   : > { %v4642_v56 = vpop.f32.mrb[69].mxu1  ;;  %v4641_v55 = vadd.f32 %v10908_v49, %v10871_v28 }
 0x77f   : > { %v10873_v31 = vpop.f32.mrb[70].mxu1 }
 0x780   : > { %v4647_v42 = vpop.f32.mrb[71].mxu1  ;;  %v4646_v12 = vadd.f32 %v10908_v49, %v10873_v31 }
 0x783   : > { %v10875_v38 = vpop.f32.mrb[72].mxu1 }
 0x784   : > { %v4652_v10 = vpop.f32.mrb[73].mxu1  ;;  %v4651_v28 = vadd.f32 %v10908_v49, %v10875_v38 }
 0x787   : > { %v10877_v57 = vpop.f32.mrb[74].mxu1 }
 0x788   : > { %v4657_v51 = vpop.f32.mrb[75].mxu1  ;;  %v4656_v31 = vadd.f32 %v10908_v49, %v10877_v57 }
 0x789   : > { %v12149_v51 = vld [vmem:[#allocation56_spill] sm:$0xff] }
 0x78b   : > { %v10879_v63 = vpop.f32.mrb[76].mxu1 }
 0x78c   : > { %v4662_v39 = vpop.f32.mrb[77].mxu1  ;;  %v4661_v38 = vadd.f32 %v10908_v49, %v10879_v63 }
 0x78f   : > { %v10881_v50 = vpop.f32.mrb[78].mxu1 }
 0x790   : > { %v4667_v18 = vpop.f32.mrb[79].mxu1  ;;  %v4666_v57 = vadd.f32 %v10908_v49, %v10881_v50 }
 0x791   : > { %v12150_v18 = vld [vmem:[#allocation57_spill] sm:$0xff] }
 0x793   : > { %v10883_v36 = vpop.f32.mrb[80].mxu1 }
 0x794   : > { %v4672_v26 = vpop.f32.mrb[81].mxu1  ;;  %v4671_v63 = vadd.f32 %v10908_v49, %v10883_v36 }
 0x797   : > { %v10885_v32 = vpop.f32.mrb[82].mxu1 }
 0x798   : > { %v4677_v22 = vpop.f32.mrb[83].mxu1  ;;  %v4676_v50 = vadd.f32 %v10908_v49, %v10885_v32 }
 0x79b   : > { %v10887_v11 = vpop.f32.mrb[84].mxu1 }
 0x79c   : > { %v4682_v3 = vpop.f32.mrb[85].mxu1  ;;  %v4681_v36 = vadd.f32 %v10908_v49, %v10887_v11 }
 0x79f   : > { %v10889_v23 = vpop.f32.mrb[86].mxu1 }
 0x7a0   : > { %v4687_v54 = vpop.f32.mrb[87].mxu1  ;;  %v4686_v32 = vadd.f32 %v10908_v49, %v10889_v23 }
 0x7a3   : > { %v10891_v48 = vpop.f32.mrb[88].mxu1 }
 0x7a4   : > { %v4692_v1 = vpop.f32.mrb[89].mxu1  ;;  %v4691_v11 = vadd.f32 %v10908_v49, %v10891_v48 }
 0x7a7   : > { %v10893_v62 = vpop.f32.mrb[90].mxu1 }
 0x7a8   : > { %v4697_v34 = vpop.f32.mrb[91].mxu1  ;;  %v4696_v23 = vadd.f32 %v10908_v49, %v10893_v62 }
 0x7a9   : > { %v12151_v34 = vld [vmem:[#allocation59_spill] sm:$0xff] }
 0x7ab   : > { %v10895_v4 = vpop.f32.mrb[92].mxu1 }
 0x7ac   : > { %v4702_v53 = vpop.f32.mrb[93].mxu1  ;;  %v4701_v48 = vadd.f32 %v10908_v49, %v10895_v4 }
 0x7af   : > { %v10897_v52 = vpop.f32.mrb[94].mxu1 }
 0x7b0   : > { %v4707_v61 = vpop.f32.mrb[95].mxu1  ;;  %v4706_v62 = vadd.f32 %v10908_v49, %v10897_v52 }
 0x7b3   : > { %v10899_v44 = vpop.f32.mrb[96].mxu1 }
 0x7b4   : > { %v4712_v13 = vpop.f32.mrb[97].mxu1  ;;  %v4711_v4 = vadd.f32 %v10908_v49, %v10899_v44 }
 0x7b5   : > { %v12152_v13 = vld [vmem:[#allocation62_spill] sm:$0xff] }
 0x7b7   : > { %v10901_v9 = vpop.f32.mrb[98].mxu1 }
 0x7b8   : > { %v4717_v59 = vpop.f32.mrb[99].mxu1  ;;  %v4716_v52 = vadd.f32 %v10908_v49, %v10901_v9 }
 0x7bb   : > { %v10903_v2 = vpop.f32.mrb[100].mxu1 }
 0x7bc   : > { %v4722_v58 = vpop.f32.mrb[101].mxu1  ;;  %v4721_v44 = vadd.f32 %v10908_v49, %v10903_v2 }
 0x7bf   : > { %v6690_v37 = vpop.f32.mrb[102].mxu1 }
 0x7c0   : > { %v4796_v24 = vadd.f32 %v6690_v37, %v4561_v43  ;;  %v4790_v7 = vpop.f32.mrb[103].mxu1 }
 0x7c1   : > { %v4791_v15 = vadd.f32 %v4790_v7, %v4556_v60  ;;  %v12153_v7 = vld [vmem:[#allocation65_spill] sm:$0xff] }
 0x7c2   : > { %v4960_v0 = vmax.f32 %v4796_v24, 0.0 }
 0x7c3   : > { %v4959_v30 = vmax.f32 %v4791_v15, 0.0  ;;  %v6693_v56 = vpop.f32.mrb[104].mxu1 }
 0x7c4   : > { %v4806_v42 = vadd.f32 %v6693_v56, %v4571_v17  ;;  %v4800_v10 = vpop.f32.mrb[105].mxu1  ;;  %v4994_v26 = vmul.f32 %v12150_v18, %v4960_v0  ;;  %v12154_v0 = vld [vmem:[#allocation67_spill] sm:$0xff] }
 0x7c5   : > { %v4993_v25 = vmul.f32 %v12149_v51, %v4959_v30  ;;  %v4801_v39 = vadd.f32 %v4800_v10, %v4566_v33 }
 0x7c6   : > { %v4962_v22 = vmax.f32 %v4806_v42, 0.0 }
 0x7c7   : > { %v4961_v3 = vmax.f32 %v4801_v39, 0.0  ;;  %v6696_v54 = vpop.f32.mrb[106].mxu1  ;;  %6755 = vmatprep.mubr.msk.f32.mxu0 %vm2872_vm10, %v4993_v25  ;;  %v12155_v39 = vld [vmem:[#allocation66_spill] sm:$0xff] }
 0x7c8   : > { %v4816_v19 = vadd.f32 %v6696_v54, %v4581_v45  ;;  %v4810_v1 = vpop.f32.mrb[107].mxu1  ;;  %6756 = vmatmul.mubr.msk.f32.vlgmr.msra.gmra.mrb[136].mxu0 %vm2872_vm10, %v4994_v26  ;;  %v4996_v59 = vmul.f32 %v12152_v13, %v4962_v22  ;;  %v12156_v22 = vld [vmem:[#allocation70_spill] sm:$0xff] }
 0x7c9   : > { %v4995_v53 = vmul.f32 %v12151_v34, %v4961_v3  ;;  %v4811_v61 = vadd.f32 %v4810_v1, %v4576_v14 }
 0x7ca   : > { %v4964_v58 = vmax.f32 %v4816_v19, 0.0 }
 0x7cb   : > { %v4963_v43 = vmax.f32 %v4811_v61, 0.0  ;;  %v6699_v60 = vpop.f32.mrb[108].mxu1  ;;  %6758 = vmatprep.mubr.msk.f32.mxu0 %vm2872_vm10, %v4995_v53  ;;  %v12157_v61 = vld [vmem:[#allocation68_spill] sm:$0xff] }
 0x7cc   : > { %v4826_v37 = vadd.f32 %v6699_v60, %v4591_v41  ;;  %v4820_v24 = vpop.f32.mrb[109].mxu1  ;;  %6759 = vmatmul.mubr.msk.f32.gmra.mrb[138].mxu0 %vm2872_vm10, %v4996_v59  ;;  %v4998_v33 = vmul.f32 %v12154_v0, %v4964_v58  ;;  %v12158_v58 = vld [vmem:[#allocation71_spill] sm:$0xff] }
 0x7cd   : > { %v4997_v15 = vmul.f32 %v12153_v7, %v4963_v43  ;;  %v4821_v17 = vadd.f32 %v4820_v24, %v4586_v16 }
 0x7ce   : > { %v4966_v30 = vmax.f32 %v4826_v37, 0.0 }
 0x7cf   : > { %v4965_v56 = vmax.f32 %v4821_v17, 0.0  ;;  %v6702_v42 = vpop.f32.mrb[110].mxu1  ;;  %6761 = vmatprep.mubr.msk.f32.mxu0 %vm2872_vm10, %v4997_v15  ;;  %v12159_v17 = vld [vmem:[#allocation74_spill] sm:$0xff] }
 0x7d0   : > { %v4836_v10 = vadd.f32 %v6702_v42, %v4601_v20  ;;  %v4830_v25 = vpop.f32.mrb[111].mxu1  ;;  %6762 = vmatmul.mubr.msk.f32.gmra.mrb[140].mxu0 %vm2872_vm10, %v4998_v33  ;;  %v5000_v14 = vmul.f32 %v12156_v22, %v4966_v30  ;;  %v12160_v30 = vld [vmem:[#allocation77_spill] sm:$0xff] }
 0x7d1   : > { %v4999_v45 = vmul.f32 %v12155_v39, %v4965_v56  ;;  %v4831_v26 = vadd.f32 %v4830_v25, %v4596_v27 }
 0x7d2   : > { %v4968_v3 = vmax.f32 %v4836_v10, 0.0 }
 0x7d3   : > { %v4967_v54 = vmax.f32 %v4831_v26, 0.0  ;;  %v6705_v19 = vpop.f32.mrb[112].mxu1  ;;  %6764 = vmatprep.mubr.msk.f32.mxu0 %vm2872_vm10, %v4999_v45  ;;  %v12161_v26 = vld [vmem:[#allocation79_spill] sm:$0xff] }
 0x7d4   : > { %v4846_v1 = vadd.f32 %v6705_v19, %v4611_v21  ;;  %v4840_v53 = vpop.f32.mrb[113].mxu1  ;;  %6765 = vmatmul.mubr.msk.f32.gmra.mrb[142].mxu0 %vm2872_vm10, %v5000_v14  ;;  %v5002_v16 = vmul.f32 %v12158_v58, %v4968_v3  ;;  %v12162_v3 = vld [vmem:[#allocation80_spill] sm:$0xff] }
 0x7d5   : > { %v5001_v41 = vmul.f32 %v12157_v61, %v4967_v54  ;;  %v4841_v59 = vadd.f32 %v4840_v53, %v4606_v6 }
 0x7d6   : > { %v4970_v43 = vmax.f32 %v4846_v1, 0.0 }
 0x7d7   : > { %v4969_v60 = vmax.f32 %v4841_v59, 0.0  ;;  %v6708_v37 = vpop.f32.mrb[114].mxu1  ;;  %6767 = vmatprep.mubr.msk.f32.mxu0 %vm2872_vm10, %v5001_v41  ;;  %v12163_v59 = vld [vmem:[#allocation82_spill] sm:$0xff] }
 0x7d8   : > { %v4856_v24 = vadd.f32 %v6708_v37, %v4621_v40  ;;  %v4850_v15 = vpop.f32.mrb[115].mxu1  ;;  %6768 = vmatmul.mubr.msk.f32.gmra.mrb[144].mxu0 %vm2872_vm10, %v5002_v16  ;;  %v5004_v27 = vmul.f32 %v12160_v30, %v4970_v43 }
 0x7d9   : > { %v5003_v20 = vmul.f32 %v12159_v17, %v4969_v60  ;;  %v4851_v33 = vadd.f32 %v4850_v15, %v4616_v47 }
 0x7da   : > { %v4972_v56 = vmax.f32 %v4856_v24, 0.0 }
 0x7db   : > { %v4971_v42 = vmax.f32 %v4851_v33, 0.0  ;;  %v6711_v10 = vpop.f32.mrb[116].mxu1  ;;  %6770 = vmatprep.mubr.msk.f32.mxu0 %vm2872_vm10, %v5003_v20 }
 0x7dc   : > { %v4866_v25 = vadd.f32 %v6711_v10, %v4631_v8  ;;  %v4860_v45 = vpop.f32.mrb[117].mxu1  ;;  %6771 = vmatmul.mubr.msk.f32.gmra.mrb[146].mxu0 %vm2872_vm10, %v5004_v27  ;;  %v5006_v6 = vmul.f32 %v12162_v3, %v4972_v56 }
 0x7dd   : > { %v5005_v21 = vmul.f32 %v12161_v26, %v4971_v42  ;;  %v4861_v14 = vadd.f32 %v4860_v45, %v4626_v5 }
 0x7de   : > { %v4974_v54 = vmax.f32 %v4866_v25, 0.0 }
 0x7df   : > { %v4973_v19 = vmax.f32 %v4861_v14, 0.0  ;;  %v6714_v1 = vpop.f32.mrb[118].mxu1  ;;  %6773 = vmatprep.mubr.msk.f32.mxu0 %vm2872_vm10, %v5005_v21 }
 0x7e0   : > { %v4876_v53 = vadd.f32 %v6714_v1, %v4641_v55  ;;  %v4870_v41 = vpop.f32.mrb[119].mxu1  ;;  %6774 = vmatmul.mubr.msk.f32.gmra.mrb[148].mxu0 %vm2872_vm10, %v5006_v6  ;;  %v5008_v43 = vmul.f32 %v12030_v46, %v4974_v54 }
 0x7e1   : > { %v5007_v40 = vmul.f32 %v12163_v59, %v4973_v19  ;;  %v4871_v16 = vadd.f32 %v4870_v41, %v4636_v29 }
 0x7e2   : > { %v4976_v47 = vmax.f32 %v4876_v53, 0.0 }
 0x7e3   : > { %v4975_v60 = vmax.f32 %v4871_v16, 0.0  ;;  %v6717_v37 = vpop.f32.mrb[120].mxu1  ;;  %6776 = vmatprep.mubr.msk.f32.mxu0 %vm2872_vm10, %v5007_v40 }
 0x7e4   : > { %v4886_v24 = vadd.f32 %v6717_v37, %v4651_v28  ;;  %v4880_v15 = vpop.f32.mrb[121].mxu1  ;;  %6777 = vmatmul.mubr.msk.f32.gmra.mrb[150].mxu0 %vm2872_vm10, %v5008_v43  ;;  %v5010_v8 = vmul.f32 %v12149_v51, %v4976_v47 }
 0x7e5   : > { %v5009_v20 = vmul.f32 %v12031_v35, %v4975_v60  ;;  %v4881_v33 = vadd.f32 %v4880_v15, %v4646_v12 }
 0x7e6   : > { %v4978_v27 = vmax.f32 %v4886_v24, 0.0 }
 0x7e7   : > { %v4977_v56 = vmax.f32 %v4881_v33, 0.0  ;;  %v6720_v5 = vpop.f32.mrb[122].mxu1  ;;  %6779 = vmatprep.mubr.msk.f32.mxu0 %vm2872_vm10, %v5009_v20 }
 0x7e8   : > { %v4896_v42 = vadd.f32 %v6720_v5, %v4661_v38  ;;  %v4890_v10 = vpop.f32.mrb[123].mxu1  ;;  %6780 = vmatmul.mubr.msk.f32.gmra.mrb[152].mxu0 %vm2872_vm10, %v5010_v8  ;;  %v5012_v51 = vmul.f32 %v12151_v34, %v4978_v27 }
 0x7e9   : > { %v5011_v25 = vmul.f32 %v12150_v18, %v4977_v56  ;;  %v4891_v45 = vadd.f32 %v4890_v10, %v4656_v31 }
 0x7ea   : > { %v4980_v21 = vmax.f32 %v4896_v42, 0.0 }
 0x7eb   : > { %v4979_v14 = vmax.f32 %v4891_v45, 0.0  ;;  %v6723_v55 = vpop.f32.mrb[124].mxu1  ;;  %6782 = vmatprep.mubr.msk.f32.mxu0 %vm2872_vm10, %v5011_v25 }
 0x7ec   : > { %v4906_v6 = vadd.f32 %v6723_v55, %v4671_v63  ;;  %v4900_v54 = vpop.f32.mrb[125].mxu1  ;;  %6783 = vmatmul.mubr.msk.f32.gmra.mrb[154].mxu0 %vm2872_vm10, %v5012_v51  ;;  %v5014_v34 = vmul.f32 %v12153_v7, %v4980_v21 }
 0x7ed   : > { %v5013_v18 = vmul.f32 %v12152_v13, %v4979_v14  ;;  %v4901_v29 = vadd.f32 %v4900_v54, %v4666_v57 }
 0x7ee   : > { %v4982_v19 = vmax.f32 %v4906_v6, 0.0 }
 0x7ef   : > { %v4981_v1 = vmax.f32 %v4901_v29, 0.0  ;;  %v6726_v53 = vpop.f32.mrb[126].mxu1  ;;  %6785 = vmatprep.mubr.msk.f32.mxu0 %vm2872_vm10, %v5013_v18 }
 0x7f0   : > { %v4916_v41 = vadd.f32 %v6726_v53, %v4681_v36  ;;  %v4910_v40 = vpop.f32.mrb[127].mxu1  ;;  %6786 = vmatmul.mubr.msk.f32.gmra.mrb[156].mxu0 %vm2872_vm10, %v5014_v34  ;;  %v5016_v7 = vmul.f32 %v12155_v39, %v4982_v19 }
 0x7f1   : > { %v5015_v13 = vmul.f32 %v12154_v0, %v4981_v1  ;;  %v4911_v16 = vadd.f32 %v4910_v40, %v4676_v50 }
 0x7f2   : > { %v4984_v28 = vmax.f32 %v4916_v41, 0.0 }
 0x7f3   : > { %v4983_v43 = vmax.f32 %v4911_v16, 0.0  ;;  %v6729_v47 = vpop.f32.mrb[128].mxu1  ;;  %6788 = vmatprep.mubr.msk.f32.mxu0 %vm2872_vm10, %v5015_v13 }
 0x7f4   : > { %v4926_v12 = vadd.f32 %v6729_v47, %v4691_v11  ;;  %v4920_v60 = vpop.f32.mrb[129].mxu1  ;;  %6789 = vmatmul.mubr.msk.f32.gmra.mrb[158].mxu0 %vm2872_vm10, %v5016_v7  ;;  %v5018_v39 = vmul.f32 %v12157_v61, %v4984_v28 }
 0x7f5   : > { %v5017_v0 = vmul.f32 %v12156_v22, %v4983_v43  ;;  %v4921_v37 = vadd.f32 %v4920_v60, %v4686_v32 }
 0x7f6   : > { %v4986_v24 = vmax.f32 %v4926_v12, 0.0 }
 0x7f7   : > { %v4985_v15 = vmax.f32 %v4921_v37, 0.0  ;;  %v6732_v20 = vpop.f32.mrb[130].mxu1  ;;  %6791 = vmatprep.mubr.msk.f32.mxu0 %vm2872_vm10, %v5017_v0 }
 0x7f8   : > { %v4936_v33 = vadd.f32 %v6732_v20, %v4701_v48  ;;  %v4930_v38 = vpop.f32.mrb[131].mxu1  ;;  %6792 = vmatmul.mubr.msk.f32.gmra.mrb[160].mxu0 %vm2872_vm10, %v5018_v39  ;;  %v5020_v61 = vmul.f32 %v12159_v17, %v4986_v24 }
 0x7f9   : > { %v5019_v22 = vmul.f32 %v12158_v58, %v4985_v15  ;;  %v4931_v8 = vadd.f32 %v4930_v38, %v4696_v23 }
 0x7fa   : > { %v4988_v27 = vmax.f32 %v4936_v33, 0.0 }
 0x7fb   : > { %v4987_v31 = vmax.f32 %v4931_v8, 0.0  ;;  %v6735_v56 = vpop.f32.mrb[132].mxu1  ;;  %6794 = vmatprep.mubr.msk.f32.mxu0 %vm2872_vm10, %v5019_v22 }
 0x7fc   : > { %v4946_v5 = vadd.f32 %v6735_v56, %v4711_v4  ;;  %v4940_v42 = vpop.f32.mrb[133].mxu1  ;;  %6795 = vmatmul.mubr.msk.f32.gmra.mrb[162].mxu0 %vm2872_vm10, %v5020_v61  ;;  %v5022_v17 = vmul.f32 %v12161_v26, %v4988_v27 }
 0x7fd   : > { %v5021_v58 = vmul.f32 %v12160_v30, %v4987_v31  ;;  %v4941_v10 = vadd.f32 %v4940_v42, %v4706_v62 }
 0x7fe   : > { %v4990_v25 = vmax.f32 %v4946_v5, 0.0 }
 0x7ff   : > { %v4989_v45 = vmax.f32 %v4941_v10, 0.0  ;;  %v6738_v63 = vpop.f32.mrb[134].mxu1  ;;  %6797 = vmatprep.mubr.msk.f32.mxu0 %vm2872_vm10, %v5021_v58 }
 0x800   : > { %v4956_v51 = vadd.f32 %v6738_v63, %v4721_v44  ;;  %v4950_v21 = vpop.f32.mrb[135].mxu1  ;;  %6798 = vmatmul.mubr.msk.f32.gmra.mrb[164].mxu0 %vm2872_vm10, %v5022_v17  ;;  %v5024_v14 = vmul.f32 %v12163_v59, %v4990_v25 }
 0x801   : > { %v5023_v30 = vmul.f32 %v12162_v3, %v4989_v45  ;;  %v4951_v57 = vadd.f32 %v4950_v21, %v4716_v52 }
 0x802   : > { %v4992_v2 = vmax.f32 %v4956_v51, 0.0 }
 0x803   : > { %v4991_v55 = vmax.f32 %v4951_v57, 0.0  ;;  %6800 = vmatprep.mubr.msk.f32.mxu1 %vm2872_vm10, %v5023_v30 }
 0x804   : > { %6801 = vmatmul.mubr.msk.f32.vlgmr.msra.gmra.mrb[136].mxu1 %vm2872_vm10, %v5024_v14  ;;  %v5026_v49 = vmul.f32 %v12031_v35, %v4992_v2 }
 0x805   : > { %v5025_v9 = vmul.f32 %v12030_v46, %v4991_v55 }
 0x807   : > { %6803 = vmatprep.mubr.msk.f32.mxu1 %vm2872_vm10, %v5025_v9 }
 0x808   : > { %6804 = vmatmul.mubr.msk.f32.gmra.mrb[138].mxu1 %vm2872_vm10, %v5026_v49  ;;  %vm6038_vm10 = vcmask 1014784  }
 0x89b   : > { %v6757_v26 = vpop.f32.mrb[136].mxu0 }
 0x89c   : > { %v5407_v6 = vrot.slane %v6757_v26, 7  ;;  %v5645_v3 = vrot.slane %v6757_v26, 1  ;;  %5510 = vrot.lane.b32.xlu0 %v6757_v26, %s12164_s21  ;;  %v11047_v59 = vpop.f32.mrb[137].mxu0 }
 0x89d   : > { %v11727_v54 = vrot.slane %v11047_v59, 7  ;;  %v5644_v18 = vrot.slane %v11047_v59, 1  ;;  %5508 = vrot.lane.b32.xlu1 %v11047_v59, %s12164_s21 }
 0x89f   : > { %v6760_v46 = vpop.f32.mrb[138].mxu0  ;;  %v5646_v35 = vsel %vm924_vm3, %v5644_v18, %v5645_v3  ;;  %v11057_v29 = vsel %vm692_vm2, %v11727_v54, %v5407_v6 }
 0x8a0   : > { %v5411_v36 = vrot.slane %v6760_v46, 7  ;;  %v5649_v34 = vrot.slane %v6760_v46, 1  ;;  %v5213_v19 = vpop.f32.mrb[139].mxu0 }
 0x8a1   : > { %v5409_v50 = vrot.slane %v5213_v19, 7  ;;  %v5647_v1 = vrot.slane %v5213_v19, 1  ;;  %5716 = vrot.lane.b32.xlu1 %v5646_v35, %s12165_s0  ;;  %5512 = vrot.lane.b32.xlu0 %v5213_v19, %s12164_s21 }
 0x8a3   : > { %v6763_v53 = vpop.f32.mrb[140].mxu0  ;;  %v5650_v41 = vsel %vm924_vm3, %v5647_v1, %v5649_v34  ;;  %v5648_v40 = vsel %vm924_vm3, %v5645_v3, %v5647_v1  ;;  %v11064_v13 = vsel %vm692_vm2, %v5407_v6, %v5409_v50  ;;  %v11067_v16 = vsel %vm692_vm2, %v5409_v50, %v5411_v36 }
 0x8a4   : > { %v5415_v11 = vrot.slane %v6763_v53, 7  ;;  %v5653_v7 = vrot.slane %v6763_v53, 1  ;;  %v5223_v28 = vpop.f32.mrb[141].mxu0 }
 0x8a5   : > { %v5413_v32 = vrot.slane %v5223_v28, 7  ;;  %v5651_v43 = vrot.slane %v5223_v28, 1  ;;  %5514 = vrot.lane.b32.xlu1 %v6760_v46, %s12164_s21  ;;  %5720 = vrot.lane.b32.xlu0 %v5650_v41, %s12165_s0 }
 0x8a7   : > { %v6766_v47 = vpop.f32.mrb[142].mxu0  ;;  %v5654_v12 = vsel %vm924_vm3, %v5651_v43, %v5653_v7  ;;  %v5652_v60 = vsel %vm924_vm3, %v5649_v34, %v5651_v43  ;;  %v11074_v0 = vsel %vm692_vm2, %v5411_v36, %v5413_v32  ;;  %v11077_v37 = vsel %vm692_vm2, %v5413_v32, %v5415_v11 }
 0x8a8   : > { %v5419_v48 = vrot.slane %v6766_v47, 7  ;;  %v5657_v39 = vrot.slane %v6766_v47, 1  ;;  %v5233_v24 = vpop.f32.mrb[143].mxu0 }
 0x8a9   : > { %v5417_v23 = vrot.slane %v5233_v24, 7  ;;  %v5655_v15 = vrot.slane %v5233_v24, 1  ;;  %5718 = vrot.lane.b32.xlu1 %v5648_v40, %s12165_s0  ;;  %5516 = vrot.lane.b32.xlu0 %v5223_v28, %s12164_s21 }
 0x8ab   : > { %v6769_v20 = vpop.f32.mrb[144].mxu0  ;;  %v5658_v33 = vsel %vm924_vm3, %v5655_v15, %v5657_v39  ;;  %v5656_v38 = vsel %vm924_vm3, %v5653_v7, %v5655_v15  ;;  %v11084_v22 = vsel %vm692_vm2, %v5415_v11, %v5417_v23  ;;  %v11087_v8 = vsel %vm692_vm2, %v5417_v23, %v5419_v48 }
 0x8ac   : > { %v5423_v4 = vrot.slane %v6769_v20, 7  ;;  %v5661_v61 = vrot.slane %v6769_v20, 1  ;;  %v5243_v27 = vpop.f32.mrb[145].mxu0 }
 0x8ad   : > { %v5421_v62 = vrot.slane %v5243_v27, 7  ;;  %v5659_v31 = vrot.slane %v5243_v27, 1  ;;  %5518 = vrot.lane.b32.xlu1 %v6763_v53, %s12164_s21  ;;  %5724 = vrot.lane.b32.xlu0 %v5654_v12, %s12165_s0 }
 0x8af   : > { %v11091_v56 = vpop.f32.mrb[146].mxu0  ;;  %v5662_v5 = vsel %vm924_vm3, %v5659_v31, %v5661_v61  ;;  %v5660_v42 = vsel %vm924_vm3, %v5657_v39, %v5659_v31  ;;  %v11096_v58 = vsel %vm692_vm2, %v5419_v48, %v5421_v62  ;;  %v11099_v10 = vsel %vm692_vm2, %v5421_v62, %v5423_v4 }
 0x8b0   : > { %v5427_v44 = vrot.slane %v11091_v56, 7  ;;  %v5665_v17 = vrot.slane %v11091_v56, 1  ;;  %v11103_v25 = vpop.f32.mrb[147].mxu0 }
 0x8b1   : > { %v5425_v52 = vrot.slane %v11103_v25, 7  ;;  %v5663_v45 = vrot.slane %v11103_v25, 1  ;;  %5722 = vrot.lane.b32.xlu1 %v5652_v60, %s12165_s0  ;;  %5520 = vrot.lane.b32.xlu0 %v5233_v24, %s12164_s21 }
 0x8b3   : > { %v11109_v63 = vpop.f32.mrb[148].mxu0  ;;  %v11112_v51 = vsel %vm924_vm3, %v5661_v61, %v5663_v45  ;;  %v11115_v21 = vsel %vm924_vm3, %v5663_v45, %v5665_v17  ;;  %v11118_v30 = vsel %vm692_vm2, %v5423_v4, %v5425_v52  ;;  %v11121_v57 = vsel %vm692_vm2, %v5425_v52, %v5427_v44 }
 0x8b4   : > { %12166 = vst [vmem:[#allocation23_spill] sm:$0xff] %v11118_v30  ;;  %12167 = vst [vmem:[#allocation34_spill] sm:$0xff] %v11121_v57  ;;  %v5431_v14 = vrot.slane %v11109_v63, 7  ;;  %v5669_v2 = vrot.slane %v11109_v63, 1  ;;  %v11125_v55 = vpop.f32.mrb[149].mxu0 }
 0x8b5   : > { %v5429_v9 = vrot.slane %v11125_v55, 7  ;;  %v5667_v49 = vrot.slane %v11125_v55, 1  ;;  %5522 = vrot.lane.b32.xlu1 %v6766_v47, %s12164_s21  ;;  %5728 = vrot.lane.b32.xlu0 %v5658_v33, %s12165_s0 }
 0x8b7   : > { %v11131_v26 = vpop.f32.mrb[150].mxu0  ;;  %v11134_v6 = vsel %vm924_vm3, %v5665_v17, %v5667_v49  ;;  %v11137_v3 = vsel %vm924_vm3, %v5667_v49, %v5669_v2  ;;  %v11140_v18 = vsel %vm692_vm2, %v5427_v44, %v5429_v9  ;;  %v11143_v46 = vsel %vm692_vm2, %v5429_v9, %v5431_v14 }
 0x8b8   : > { %12168 = vst [vmem:[#allocation44_spill] sm:$0xff] %v11140_v18  ;;  %12169 = vst [vmem:[#allocation24_spill] sm:$0xff] %v11143_v46  ;;  %v5435_v35 = vrot.slane %v11131_v26, 7  ;;  %v5673_v36 = vrot.slane %v11131_v26, 1  ;;  %v11147_v34 = vpop.f32.mrb[151].mxu0 }
 0x8b9   : > { %v5433_v19 = vrot.slane %v11147_v34, 7  ;;  %v5671_v50 = vrot.slane %v11147_v34, 1  ;;  %5726 = vrot.lane.b32.xlu1 %v5656_v38, %s12165_s0  ;;  %5524 = vrot.lane.b32.xlu0 %v5243_v27, %s12164_s21 }
 0x8bb   : > { %v11153_v1 = vpop.f32.mrb[152].mxu0  ;;  %v11156_v53 = vsel %vm924_vm3, %v5669_v2, %v5671_v50  ;;  %v11159_v41 = vsel %vm924_vm3, %v5671_v50, %v5673_v36  ;;  %v11162_v40 = vsel %vm692_vm2, %v5431_v14, %v5433_v19  ;;  %v11165_v11 = vsel %vm692_vm2, %v5433_v19, %v5435_v35 }
 0x8bc   : > { %12170 = vst [vmem:[#allocation45_spill] sm:$0xff] %v11162_v40  ;;  %12171 = vst [vmem:[#allocation28_spill] sm:$0xff] %v11165_v11  ;;  %v11167_v7 = vpop.f32.mrb[153].mxu0  ;;  %v5677_v24 = vrot.slane %v11153_v1, 1 }
 0x8bd   : > { %v5437_v28 = vrot.slane %v11167_v7, 7  ;;  %v11726_v32 = vrot.slane %v11167_v7, 1  ;;  %5526 = vrot.lane.b32.xlu1 %v6769_v20, %s12164_s21  ;;  %5732 = vrot.lane.b32.xlu0 %v5662_v5, %s12165_s0  ;;  %v11725_v20 = vrot.slane %v11153_v1, 7 }
 0x8bf   : > { %v6784_v43 = vpop.f32.mrb[154].mxu0  ;;  %v11176_v47 = vsel %vm924_vm3, %v5673_v36, %v11726_v32  ;;  %v11179_v12 = vsel %vm692_vm2, %v5435_v35, %v5437_v28 }
 0x8c0   : > { %12172 = vst [vmem:[#allocation48_spill] sm:$0xff] %v11179_v12  ;;  %v5442_v60 = vrot.slane %v6784_v43, 7  ;;  %v5680_v48 = vrot.slane %v6784_v43, 1  ;;  %v5293_v39 = vpop.f32.mrb[155].mxu0 }
 0x8c1   : > { %v5440_v23 = vrot.slane %v5293_v39, 7  ;;  %v5678_v15 = vrot.slane %v5293_v39, 1  ;;  %5730 = vrot.lane.b32.xlu1 %v5660_v42, %s12165_s0  ;;  %5546 = vrot.lane.b32.xlu0 %v6784_v43, %s12164_s21 }
 0x8c3   : > { %v6787_v33 = vpop.f32.mrb[156].mxu0  ;;  %v5679_v38 = vsel %vm924_vm3, %v5677_v24, %v5678_v15  ;;  %v5681_v4 = vsel %vm924_vm3, %v5678_v15, %v5680_v48  ;;  %v11188_v61 = vsel %vm692_vm2, %v5440_v23, %v5442_v60  ;;  %v11193_v27 = vsel %vm692_vm2, %v11725_v20, %v5440_v23 }
 0x8c4   : > { %v5446_v62 = vrot.slane %v6787_v33, 7  ;;  %v5684_v31 = vrot.slane %v6787_v33, 1  ;;  %v5303_v5 = vpop.f32.mrb[157].mxu0 }
 0x8c5   : > { %v5444_v42 = vrot.slane %v5303_v5, 7  ;;  %v5682_v44 = vrot.slane %v5303_v5, 1  ;;  %5542 = vrot.lane.b32.xlu1 %v11153_v1, %s12164_s21  ;;  %5544 = vrot.lane.b32.xlu0 %v5293_v39, %s12164_s21 }
 0x8c7   : > { %v6790_v17 = vpop.f32.mrb[158].mxu0  ;;  %v5683_v52 = vsel %vm924_vm3, %v5680_v48, %v5682_v44  ;;  %v5685_v45 = vsel %vm924_vm3, %v5682_v44, %v5684_v31  ;;  %v11201_v14 = vsel %vm692_vm2, %v5444_v42, %v5446_v62  ;;  %v11204_v2 = vsel %vm692_vm2, %v5442_v60, %v5444_v42 }
 0x8c8   : > { %v5450_v9 = vrot.slane %v6790_v17, 7  ;;  %v5688_v49 = vrot.slane %v6790_v17, 1  ;;  %v5313_v35 = vpop.f32.mrb[159].mxu0 }
 0x8c9   : > { %v5448_v36 = vrot.slane %v5313_v35, 7  ;;  %v5686_v19 = vrot.slane %v5313_v35, 1  ;;  %5750 = vrot.lane.b32.xlu1 %v5679_v38, %s12165_s0  ;;  %5550 = vrot.lane.b32.xlu0 %v6787_v33, %s12164_s21 }
 0x8cb   : > { %v6793_v50 = vpop.f32.mrb[160].mxu0  ;;  %v5687_v28 = vsel %vm924_vm3, %v5684_v31, %v5686_v19  ;;  %v5689_v43 = vsel %vm924_vm3, %v5686_v19, %v5688_v49  ;;  %v11211_v48 = vsel %vm692_vm2, %v5448_v36, %v5450_v9  ;;  %v11214_v60 = vsel %vm692_vm2, %v5446_v62, %v5448_v36 }
 0x8cc   : > { %v5454_v39 = vrot.slane %v6793_v50, 7  ;;  %v5692_v24 = vrot.slane %v6793_v50, 1  ;;  %v5323_v23 = vpop.f32.mrb[161].mxu0 }
 0x8cd   : > { %v5452_v15 = vrot.slane %v5323_v23, 7  ;;  %v5690_v42 = vrot.slane %v5323_v23, 1  ;;  %5752 = vrot.lane.b32.xlu1 %v5681_v4, %s12165_s0  ;;  %5548 = vrot.lane.b32.xlu0 %v5303_v5, %s12164_s21 }
 0x8cf   : > { %v6796_v33 = vpop.f32.mrb[162].mxu0  ;;  %v5691_v38 = vsel %vm924_vm3, %v5688_v49, %v5690_v42  ;;  %v5693_v31 = vsel %vm924_vm3, %v5690_v42, %v5692_v24  ;;  %v11221_v44 = vsel %vm692_vm2, %v5452_v15, %v5454_v39  ;;  %v11224_v62 = vsel %vm692_vm2, %v5450_v9, %v5452_v15 }
 0x8d0   : > { %12173 = vst [vmem:[#allocation41_spill] sm:$0xff] %v11221_v44  ;;  %v5458_v36 = vrot.slane %v6796_v33, 7  ;;  %v5696_v19 = vrot.slane %v6796_v33, 1  ;;  %v5333_v20 = vpop.f32.mrb[163].mxu0 }
 0x8d1   : > { %v5456_v32 = vrot.slane %v5333_v20, 7  ;;  %v5694_v54 = vrot.slane %v5333_v20, 1  ;;  %5754 = vrot.lane.b32.xlu1 %v5683_v52, %s12165_s0  ;;  %5554 = vrot.lane.b32.xlu0 %v6790_v17, %s12164_s21 }
 0x8d3   : > { %v6799_v4 = vpop.f32.mrb[164].mxu0  ;;  %v5695_v5 = vsel %vm924_vm3, %v5692_v24, %v5694_v54  ;;  %v5697_v49 = vsel %vm924_vm3, %v5694_v54, %v5696_v19  ;;  %v11231_v42 = vsel %vm692_vm2, %v5456_v32, %v5458_v36  ;;  %v11234_v9 = vsel %vm692_vm2, %v5454_v39, %v5456_v32 }
 0x8d4   : > { %12174 = vst [vmem:[#allocation39_spill] sm:$0xff] %v11231_v42  ;;  %12175 = vst [vmem:[#allocation42_spill] sm:$0xff] %v11234_v9  ;;  %v5462_v15 = vrot.slane %v6799_v4, 7  ;;  %v5700_v12 = vrot.slane %v6799_v4, 1  ;;  %v5343_v11 = vpop.f32.mrb[165].mxu0 }
 0x8d5   : > { %v5460_v40 = vrot.slane %v5343_v11, 7  ;;  %v5698_v46 = vrot.slane %v5343_v11, 1  ;;  %5756 = vrot.lane.b32.xlu1 %v5685_v45, %s12165_s0  ;;  %5552 = vrot.lane.b32.xlu0 %v5313_v35, %s12164_s21 }
 0x8d7   : > { %v6802_v17 = vpop.f32.mrb[136].mxu1  ;;  %v5699_v52 = vsel %vm924_vm3, %v5696_v19, %v5698_v46  ;;  %v5701_v54 = vsel %vm924_vm3, %v5698_v46, %v5700_v12  ;;  %v11241_v24 = vsel %vm692_vm2, %v5460_v40, %v5462_v15  ;;  %v11244_v32 = vsel %vm692_vm2, %v5458_v36, %v5460_v40 }
 0x8d8   : > { %12176 = vst [vmem:[#allocation53_spill] sm:$0xff] %v11241_v24  ;;  %12177 = vst [vmem:[#allocation78_spill] sm:$0xff] %v11244_v32  ;;  %v5466_v39 = vrot.slane %v6802_v17, 7  ;;  %v5704_v18 = vrot.slane %v6802_v17, 1  ;;  %v5353_v57 = vpop.f32.mrb[137].mxu1 }
 0x8d9   : > { %v5464_v30 = vrot.slane %v5353_v57, 7  ;;  %v5702_v42 = vrot.slane %v5353_v57, 1  ;;  %5758 = vrot.lane.b32.xlu1 %v5687_v28, %s12165_s0  ;;  %5558 = vrot.lane.b32.xlu0 %v6793_v50, %s12164_s21 }
 0x8db   : > { %v6805_v45 = vpop.f32.mrb[138].mxu1  ;;  %v5703_v35 = vsel %vm924_vm3, %v5700_v12, %v5702_v42  ;;  %v5705_v46 = vsel %vm924_vm3, %v5702_v42, %v5704_v18  ;;  %v11251_v19 = vsel %vm692_vm2, %v5464_v30, %v5466_v39  ;;  %v11254_v40 = vsel %vm692_vm2, %v5462_v15, %v5464_v30 }
 0x8dc   : > { %v5470_v36 = vrot.slane %v6805_v45, 7  ;;  %v5708_v24 = vrot.slane %v6805_v45, 1  ;;  %v5363_v32 = vpop.f32.mrb[139].mxu1 }
 0x8dd   : > { %v5468_v9 = vrot.slane %v5363_v32, 7  ;;  %v5706_v44 = vrot.slane %v5363_v32, 1  ;;  %5760 = vrot.lane.b32.xlu1 %v5689_v43, %s12165_s0  ;;  %5556 = vrot.lane.b32.xlu0 %v5323_v23, %s12164_s21 }
 0x8df   : > { %v5707_v50 = vsel %vm924_vm3, %v5704_v18, %v5706_v44  ;;  %v11260_v12 = vsel %vm924_vm3, %v5706_v44, %v5708_v24  ;;  %v11263_v28 = vsel %vm692_vm2, %v5466_v39, %v5468_v9  ;;  %v11266_v30 = vsel %vm692_vm2, %v5468_v9, %v5470_v36 }
 0x8e0   : > { %v5713_v18 = vsel %vm924_vm3, %v5708_v24, 0.0 }
 0x8e1   : > { %5762 = vrot.lane.b32.xlu1 %v5691_v38, %s12165_s0  ;;  %5562 = vrot.lane.b32.xlu0 %v6796_v33, %s12164_s21 }
 0x8e5   : > { %5764 = vrot.lane.b32.xlu1 %v5693_v31, %s12165_s0  ;;  %5560 = vrot.lane.b32.xlu0 %v5333_v20, %s12164_s21 }
 0x8e9   : > { %5766 = vrot.lane.b32.xlu1 %v5695_v5, %s12165_s0  ;;  %5566 = vrot.lane.b32.xlu0 %v6799_v4, %s12164_s21 }
 0x8ed   : > { %5768 = vrot.lane.b32.xlu1 %v5697_v49, %s12165_s0  ;;  %5564 = vrot.lane.b32.xlu0 %v5343_v11, %s12164_s21 }
 0x8f1   : > { %5570 = vrot.lane.b32.xlu0 %v6802_v17, %s12164_s21  ;;  %5770 = vrot.lane.b32.xlu1 %v5699_v52, %s12165_s0 }
 0x8f5   : > { %5568 = vrot.lane.b32.xlu0 %v5353_v57, %s12164_s21  ;;  %5772 = vrot.lane.b32.xlu1 %v5701_v54, %s12165_s0 }
 0x8f9   : > { %5774 = vrot.lane.b32.xlu1 %v5703_v35, %s12165_s0  ;;  %5572 = vrot.lane.b32.xlu0 %v5363_v32, %s12164_s21 }
 0x8fd   : > { %5776 = vrot.lane.b32.xlu1 %v5705_v46, %s12165_s0  ;;  %5782 = vrot.lane.b32.xlu0 %v5713_v18, %s12165_s0  ;;  %v12180_v46 = vrot.slane %v11153_v1, 7 }
 0x8ff   : > { %v5507_v36 = vsel %vm692_vm2, 0.0, %v12180_v46 }
 0x901   : > { %5574 = vrot.lane.b32.xlu1 %v6805_v45, %s12164_s21  ;;  %5778 = vrot.lane.b32.xlu0 %v5707_v50, %s12165_s0 }
 0x905   : > { %5734 = vrot.lane.b32.xlu1 %v11112_v51, %s12165_s0  ;;  %5528 = vrot.lane.b32.xlu0 %v11103_v25, %s12164_s21  ;;  %v12178_v51 = vrot.slane %v11047_v59, 7 }
 0x907   : > { %v5506_v25 = vsel %vm692_vm2, 0.0, %v12178_v51  ;;  %vm5920_vm2 = vcmask 7168  }
 0x909   : > { %5530 = vrot.lane.b32.xlu1 %v11091_v56, %s12164_s21  ;;  %5736 = vrot.lane.b32.xlu0 %v11115_v21, %s12165_s0 }
 0x90d   : > { %5738 = vrot.lane.b32.xlu1 %v11134_v6, %s12165_s0  ;;  %5532 = vrot.lane.b32.xlu0 %v11125_v55, %s12164_s21 }
 0x90e   : > { %v5511_v57 = vpop.permute.xlu0 %5510 }
 0x90f   : > { %v5611_v11 = vadd.f32 %v5511_v57, %v11057_v29  ;;  %v5509_v20 = vpop.permute.xlu1 %5508 }
 0x910   : > { %v5610_v43 = vadd.f32 %v5509_v20, %v5506_v25 }
 0x911   : > { %5534 = vrot.lane.b32.xlu1 %v11109_v63, %s12164_s21  ;;  %5740 = vrot.lane.b32.xlu0 %v11137_v3, %s12165_s0 }
 0x913   : > { %v5717_v56 = vpop.permute.xlu1 %5716  ;;  %v5513_v21 = vpop.permute.xlu0 %5512 }
 0x914   : > { %v11307_v6 = vadd.f32 %v5717_v56, %v5610_v43  ;;  %v5612_v55 = vadd.f32 %v5513_v21, %v11064_v13 }
 0x915   : > { %5742 = vrot.lane.b32.xlu1 %v11156_v53, %s12165_s0  ;;  %5536 = vrot.lane.b32.xlu0 %v11147_v34, %s12164_s21  ;;  %v12179_v34 = vrot.slane %v11167_v7, 1 }
 0x917   : > { %v5515_v59 = vpop.permute.xlu1 %5514  ;;  %v5721_v29 = vpop.permute.xlu0 %5720  ;;  %v5712_v38 = vsel %vm924_vm3, %v12179_v34, 0.0  ;;  %vm5938_vm3 = vcmask 15360  }
 0x918   : > { %v5613_v23 = vadd.f32 %v5515_v59, %v11067_v16  ;;  %v11315_v63 = vadd.f32 %v5721_v29, %v5612_v55 }
 0x919   : > { %5538 = vrot.lane.b32.xlu1 %v11131_v26, %s12164_s21  ;;  %5540 = vrot.lane.b32.xlu0 %v11167_v7, %s12164_s21 }
 0x91b   : > { %v5719_v3 = vpop.permute.xlu1 %5718  ;;  %v5517_v13 = vpop.permute.xlu0 %5516 }
 0x91c   : > { %v11321_v33 = vadd.f32 %v5719_v3, %v5611_v11  ;;  %v5614_v53 = vadd.f32 %v5517_v13, %v11074_v0 }
 0x91d   : > { %5744 = vrot.lane.b32.xlu1 %v11159_v41, %s12165_s0  ;;  %5748 = vrot.lane.b32.xlu0 %v5712_v38, %s12165_s0 }
 0x91f   : > { %v5519_v16 = vpop.permute.xlu1 %5518  ;;  %v5725_v26 = vpop.permute.xlu0 %5724 }
 0x920   : > { %v5615_v31 = vadd.f32 %v5519_v16, %v11077_v37  ;;  %v11331_v44 = vadd.f32 %v5725_v26, %v5614_v53 }
 0x921   : > { %5746 = vrot.lane.b32.xlu1 %v11176_v47, %s12165_s0 }
 0x923   : > { %v5723_v4 = vpop.permute.xlu1 %5722  ;;  %v5521_v0 = vpop.permute.xlu0 %5520 }
 0x924   : > { %v11335_v5 = vadd.f32 %v5723_v4, %v5613_v23  ;;  %v5616_v7 = vadd.f32 %v5521_v0, %v11084_v22 }
 0x925   : > { %5780 = vrot.lane.b32.xlu1 %v11260_v12, %s12165_s0  ;;  %s11478_s0 = scalar_lea.hbm %s11537_s12, %s6295_s22 }
 0x927   : > { %v5523_v41 = vpop.permute.xlu1 %5522  ;;  %v5729_v49 = vpop.permute.xlu0 %5728 }
 0x928   : > { %v5617_v42 = vadd.f32 %v5523_v41, %v11087_v8  ;;  %v11341_v9 = vadd.f32 %v5729_v49, %v5616_v7 }
 0x92b   : > { %v5727_v37 = vpop.permute.xlu1 %5726  ;;  %v5525_v15 = vpop.permute.xlu0 %5524 }
 0x92c   : > { %v11343_v17 = vadd.f32 %v5727_v37, %v5615_v31  ;;  %v5618_v47 = vadd.f32 %v5525_v15, %v11096_v58 }
 0x92f   : > { %v5527_v52 = vpop.permute.xlu1 %5526  ;;  %v5733_v54 = vpop.permute.xlu0 %5732 }
 0x930   : > { %v11347_v24 = vadd.f32 %v5527_v52, %v11099_v10  ;;  %v11349_v22 = vadd.f32 %v5733_v54, %v5618_v47 }
 0x933   : > { %v5731_v32 = vpop.permute.xlu1 %5730  ;;  %v5547_v39 = vpop.permute.xlu0 %5546 }
 0x934   : > { %v11351_v45 = vadd.f32 %v5731_v32, %v5617_v42  ;;  %v5629_v51 = vadd.f32 %v5547_v39, %v11188_v61 }
 0x937   : > { %v5543_v8 = vpop.permute.xlu1 %5542  ;;  %v5545_v35 = vpop.permute.xlu0 %5544 }
 0x938   : > { %v5627_v50 = vadd.f32 %v5543_v8, %v5507_v36  ;;  %v5628_v57 = vadd.f32 %v5545_v35, %v11193_v27  ;;  %v12184_v35 = vld [vmem:[#allocation78_spill] sm:$0xff] }
 0x93b   : > { %v5751_v12 = vpop.permute.xlu1 %5750  ;;  %v5551_v58 = vpop.permute.xlu0 %5550 }
 0x93c   : > { %v5835_v18 = vadd.f32 %v5751_v12, %v5627_v50  ;;  %v5631_v59 = vadd.f32 %v5551_v58, %v11201_v14  ;;  %v12185_v58 = vld [vmem:[#allocation53_spill] sm:$0xff] }
 0x93e   : > { %5869 = vrot.lane.b32.xlu0 %v5835_v18, %s7406_s20 }
 0x93f   : > { %v5753_v10 = vpop.permute.xlu1 %5752  ;;  %v5549_v11 = vpop.permute.xlu0 %5548 }
 0x940   : > { %v5836_v20 = vadd.f32 %v5753_v10, %v5628_v57  ;;  %v5630_v56 = vadd.f32 %v5549_v11, %v11204_v2 }
 0x942   : > { %5871 = vrot.lane.b32.xlu1 %v5836_v20, %s7406_s20 }
 0x943   : > { %v5755_v25 = vpop.permute.xlu1 %5754  ;;  %v5555_v1 = vpop.permute.xlu0 %5554 }
 0x944   : > { %v5837_v43 = vadd.f32 %v5755_v25, %v5629_v51  ;;  %v5633_v2 = vadd.f32 %v5555_v1, %v11211_v48  ;;  %v12182_v48 = vld [vmem:[#allocation42_spill] sm:$0xff] }
 0x946   : > { %5873 = vrot.lane.b32.xlu0 %v5837_v43, %s7406_s20 }
 0x947   : > { %v5757_v21 = vpop.permute.xlu1 %5756  ;;  %v5553_v55 = vpop.permute.xlu0 %5552 }
 0x948   : > { %v5838_v27 = vadd.f32 %v5757_v21, %v5630_v56  ;;  %v5632_v61 = vadd.f32 %v5553_v55, %v11214_v60  ;;  %v12181_v60 = vld [vmem:[#allocation41_spill] sm:$0xff] }
 0x94a   : > { %5875 = vrot.lane.b32.xlu1 %v5838_v27, %s7406_s20 }
 0x94b   : > { %v5759_v29 = vpop.permute.xlu1 %5758  ;;  %v5559_v23 = vpop.permute.xlu0 %5558 }
 0x94c   : > { %v5839_v3 = vadd.f32 %v5759_v29, %v5631_v59  ;;  %v5635_v7 = vadd.f32 %v5559_v23, %v12181_v60 }
 0x94e   : > { %5877 = vrot.lane.b32.xlu0 %v5839_v3, %s7406_s20  ;;  %v12186_v3 = vld [vmem:[#allocation23_spill] sm:$0xff] }
 0x94f   : > { %v5761_v13 = vpop.permute.xlu1 %5760  ;;  %v5557_v53 = vpop.permute.xlu0 %5556 }
 0x950   : > { %v5840_v34 = vadd.f32 %v5761_v13, %v5632_v61  ;;  %v5634_v14 = vadd.f32 %v5557_v53, %v11224_v62  ;;  %v12183_v62 = vld [vmem:[#allocation39_spill] sm:$0xff]  ;;  %v12187_v53 = vld [vmem:[#allocation34_spill] sm:$0xff] }
 0x952   : > { %5879 = vrot.lane.b32.xlu1 %v5840_v34, %s7406_s20 }
 0x953   : > { %v5763_v38 = vpop.permute.xlu1 %5762  ;;  %v5563_v16 = vpop.permute.xlu0 %5562 }
 0x954   : > { %v5841_v26 = vadd.f32 %v5763_v38, %v5633_v2  ;;  %v5637_v54 = vadd.f32 %v5563_v16, %v12183_v62  ;;  %v12188_v16 = vld [vmem:[#allocation44_spill] sm:$0xff] }
 0x956   : > { %5881 = vrot.lane.b32.xlu0 %v5841_v26, %s7406_s20 }
 0x957   : > { %v5765_v31 = vpop.permute.xlu1 %5764  ;;  %v5561_v4 = vpop.permute.xlu0 %5560 }
 0x958   : > { %v5842_v0 = vadd.f32 %v5765_v31, %v5634_v14  ;;  %v5636_v37 = vadd.f32 %v5561_v4, %v12182_v48  ;;  %v12189_v31 = vld [vmem:[#allocation24_spill] sm:$0xff] }
 0x95a   : > { %5883 = vrot.lane.b32.xlu1 %v5842_v0, %s7406_s20 }
 0x95b   : > { %v5767_v41 = vpop.permute.xlu1 %5766  ;;  %v5567_v49 = vpop.permute.xlu0 %5566 }
 0x95c   : > { %v5843_v42 = vadd.f32 %v5767_v41, %v5635_v7  ;;  %v5639_v18 = vadd.f32 %v5567_v49, %v12185_v58  ;;  %v12190_v41 = vld [vmem:[#allocation45_spill] sm:$0xff] }
 0x95e   : > { %5885 = vrot.lane.b32.xlu0 %v5843_v42, %s7406_s20 }
 0x95f   : > { %v5769_v15 = vpop.permute.xlu1 %5768  ;;  %v5565_v47 = vpop.permute.xlu0 %5564 }
 0x960   : > { %v5844_v52 = vadd.f32 %v5769_v15, %v5636_v37  ;;  %v5638_v46 = vadd.f32 %v5565_v47, %v12184_v35  ;;  %v12191_v37 = vld [vmem:[#allocation28_spill] sm:$0xff] }
 0x961   : > { %v12192_v47 = vld [vmem:[#allocation48_spill] sm:$0xff] }
 0x962   : > { %5887 = vrot.lane.b32.xlu1 %v5844_v52, %s7406_s20 }
 0x963   : > { %v5571_v32 = vpop.permute.xlu0 %5570  ;;  %v5771_v39 = vpop.permute.xlu1 %5770 }
 0x964   : > { %v5845_v8 = vadd.f32 %v5771_v39, %v5637_v54  ;;  %v5641_v43 = vadd.f32 %v5571_v32, %v11251_v19 }
 0x966   : > { %5889 = vrot.lane.b32.xlu0 %v5845_v8, %s7406_s20 }
 0x967   : > { %v5569_v36 = vpop.permute.xlu0 %5568  ;;  %v5773_v50 = vpop.permute.xlu1 %5772 }
 0x968   : > { %v5846_v12 = vadd.f32 %v5773_v50, %v5638_v46  ;;  %v5640_v20 = vadd.f32 %v5569_v36, %v11254_v40  ;;  %v6293_v36 = vld [vmem:[#allocation2] ss:$0 sm:$0xff] }
 0x96a   : > { %5891 = vrot.lane.b32.xlu1 %v5846_v12, %s7406_s20 }
 0x96b   : > { %v5775_v57 = vpop.permute.xlu1 %5774  ;;  %v5573_v10 = vpop.permute.xlu0 %5572 }
 0x96c   : > { %v5847_v11 = vadd.f32 %v5775_v57, %v5639_v18  ;;  %v5642_v8 = vadd.f32 %v5573_v10, %v11263_v28 }
 0x96e   : > { %5893 = vrot.lane.b32.xlu0 %v5847_v11, %s7406_s20 }
 0x96f   : > { %v5777_v51 = vpop.permute.xlu1 %5776  ;;  %v5783_v25 = vpop.permute.xlu0 %5782 }
 0x970   : > { %v5848_v1 = vadd.f32 %v5777_v51, %v5640_v20 }
 0x972   : > { %5895 = vrot.lane.b32.xlu0 %v5848_v1, %s7406_s20 }
 0x973   : > { %v5575_v56 = vpop.permute.xlu1 %5574  ;;  %v5779_v21 = vpop.permute.xlu0 %5778 }
 0x974   : > { %v5643_v55 = vadd.f32 %v5575_v56, %v11266_v30  ;;  %v5849_v27 = vadd.f32 %v5779_v21, %v5641_v43 }
 0x976   : > { %5897 = vrot.lane.b32.xlu1 %v5849_v27, %s7406_s20  ;;  %v5851_v23 = vadd.f32 %v5783_v25, %v5643_v55 }
 0x977   : > { %v5735_v59 = vpop.permute.xlu1 %5734  ;;  %v5529_v29 = vpop.permute.xlu0 %5528 }
 0x978   : > { %v11387_v40 = vadd.f32 %v5735_v59, %v11347_v24  ;;  %v11390_v61 = vadd.f32 %v5529_v29, %v12186_v3 }
 0x97a   : > { %5901 = vrot.lane.b32.xlu1 %v5851_v23, %s7406_s20 }
 0x97b   : > { %v5531_v19 = vpop.permute.xlu1 %5530  ;;  %v11393_v13 = vpop.permute.xlu0 %5736 }
 0x97c   : > { %v5621_v34 = vadd.f32 %v5531_v19, %v12187_v53 }
 0x97f   : > { %v5739_v30 = vpop.permute.xlu1 %5738  ;;  %v5533_v2 = vpop.permute.xlu0 %5532 }
 0x980   : > { %v11396_v38 = vadd.f32 %v5739_v30, %v5621_v34  ;;  %v11399_v26 = vadd.f32 %v5533_v2, %v12188_v16  ;;  %v5828_v30 = vadd.f32 %v11393_v13, %v11390_v61 }
 0x983   : > { %v5535_v14 = vpop.permute.xlu1 %5534  ;;  %v11401_v24 = vpop.permute.xlu0 %5740 }
 0x984   : > { %v5623_v4 = vadd.f32 %v5535_v14, %v12189_v31 }
 0x987   : > { %v5743_v0 = vpop.permute.xlu1 %5742  ;;  %v5537_v60 = vpop.permute.xlu0 %5536 }
 0x988   : > { %v11404_v7 = vadd.f32 %v5743_v0, %v5623_v4  ;;  %v5624_v49 = vadd.f32 %v5537_v60, %v12190_v41 }
 0x98b   : > { %v5539_v42 = vpop.permute.xlu1 %5538  ;;  %v5541_v48 = vpop.permute.xlu0 %5540 }
 0x98c   : > { %v5625_v15 = vadd.f32 %v5539_v42, %v12191_v37  ;;  %v11409_v52 = vadd.f32 %v5541_v48, %v12192_v47 }
 0x98f   : > { %v5745_v62 = vpop.permute.xlu1 %5744  ;;  %v11417_v50 = vpop.permute.xlu0 %5748 }
 0x990   : > { %v11411_v54 = vadd.f32 %v5745_v62, %v5624_v49 }
 0x993   : > { %v5747_v32 = vpop.permute.xlu1 %5746 }
 0x994   : > { %v11413_v39 = vadd.f32 %v5747_v32, %v5625_v15 }
 0x997   : > { %v5781_v35 = vpop.permute.xlu1 %5780 }
 0x998   : > { %v5850_v46 = vadd.f32 %v5781_v35, %v5642_v8 }
 0x99a   : > { %5899 = vrot.lane.b32.xlu0 %v5850_v46, %s7406_s20  ;;  %s6043_s20 = scalar_lea.sflag [#allocation4], %s435_s15 }
 0x99e   : > { %6027 = vperm.xlu0 %7301, %v6293_v36  }
 0x9b0   : > { %v5870_v12 = vpop.permute.xlu0 %5869 }
 0x9b1   : > { %v5921_v58 = vsel %vm5920_vm2, %v11307_v6, %v5870_v12 }
 0x9b2   : > { %v5939_v18 = vsel %vm5938_vm3, %v5921_v58, 0.0 }
 0x9b3   : > { %5956 = vxpose.xlu1.b32.start [1/16] (narrow) %v5939_v18, 8 }
 0x9b4   : > { %v5872_v57 = vpop.permute.xlu1 %5871 }
 0x9b5   : > { %v5922_v28 = vsel %vm5920_vm2, %v11321_v33, %v5872_v57 }
 0x9b6   : > { %v5940_v10 = vsel %vm5938_vm3, %v5922_v28, 0.0 }
 0x9b7   : > { %5957 = vxpose.xlu1.b32.cont [2/16] (narrow) %v5940_v10, 8 }
 0x9b8   : > { %v5874_v11 = vpop.permute.xlu0 %5873 }
 0x9b9   : > { %v5923_v20 = vsel %vm5920_vm2, %v11315_v63, %v5874_v11 }
 0x9ba   : > { %v5941_v51 = vsel %vm5938_vm3, %v5923_v20, 0.0 }
 0x9bb   : > { %5958 = vxpose.xlu1.b32.cont [3/16] (narrow) %v5941_v51, 8 }
 0x9bc   : > { %v5876_v25 = vpop.permute.xlu1 %5875 }
 0x9bd   : > { %v5924_v6 = vsel %vm5920_vm2, %v11335_v5, %v5876_v25 }
 0x9be   : > { %v5942_v1 = vsel %vm5938_vm3, %v5924_v6, 0.0 }
 0x9bf   : > { %5959 = vxpose.xlu1.b32.cont [4/16] (narrow) %v5942_v1, 8 }
 0x9c0   : > { %v5878_v43 = vpop.permute.xlu0 %5877 }
 0x9c1   : > { %v5925_v33 = vsel %vm5920_vm2, %v11331_v44, %v5878_v43 }
 0x9c2   : > { %v5943_v56 = vsel %vm5938_vm3, %v5925_v33, 0.0 }
 0x9c3   : > { %5960 = vxpose.xlu1.b32.cont [5/16] (narrow) %v5943_v56, 8 }
 0x9c4   : > { %v5880_v21 = vpop.permute.xlu1 %5879 }
 0x9c5   : > { %v5926_v63 = vsel %vm5920_vm2, %v11343_v17, %v5880_v21 }
 0x9c6   : > { %v5944_v55 = vsel %vm5938_vm3, %v5926_v63, 0.0 }
 0x9c7   : > { %5961 = vxpose.xlu1.b32.cont [6/16] (narrow) %v5944_v55, 8 }
 0x9c8   : > { %v5882_v27 = vpop.permute.xlu0 %5881 }
 0x9c9   : > { %v5927_v5 = vsel %vm5920_vm2, %v11341_v9, %v5882_v27 }
 0x9ca   : > { %v5945_v59 = vsel %vm5938_vm3, %v5927_v5, 0.0 }
 0x9cb   : > { %5962 = vxpose.xlu1.b32.cont [7/16] (narrow) %v5945_v59, 8 }
 0x9cc   : > { %v5884_v29 = vpop.permute.xlu1 %5883 }
 0x9cd   : > { %v5928_v44 = vsel %vm5920_vm2, %v11351_v45, %v5884_v29 }
 0x9ce   : > { %v5946_v23 = vsel %vm5938_vm3, %v5928_v44, 0.0 }
 0x9cf   : > { %5963 = vxpose.xlu1.b32.cont [8/16] (narrow) %v5946_v23, 8 }
 0x9d0   : > { %v5886_v3 = vpop.permute.xlu0 %5885 }
 0x9d1   : > { %v5929_v17 = vsel %vm5920_vm2, %v11349_v22, %v5886_v3 }
 0x9d2   : > { %v5947_v19 = vsel %vm5938_vm3, %v5929_v17, 0.0 }
 0x9d3   : > { %5964 = vxpose.xlu1.b32.cont [9/16] (narrow) %v5947_v19, 8 }
 0x9d4   : > { %v5888_v53 = vpop.permute.xlu1 %5887 }
 0x9d5   : > { %v5930_v9 = vsel %vm5920_vm2, %v11387_v40, %v5888_v53  ;;  %v5830_v40 = vadd.f32 %v11401_v24, %v11399_v26  ;;  %v5834_v24 = vadd.f32 %v11417_v50, %v11409_v52 }
 0x9d6   : > { %v5948_v34 = vsel %vm5938_vm3, %v5930_v9, 0.0 }
 0x9d7   : > { %5965 = vxpose.xlu1.b32.cont [10/16] (narrow) %v5948_v34, 8 }
 0x9d8   : > { %v5890_v45 = vpop.permute.xlu0 %5889 }
 0x9d9   : > { %v5931_v2 = vsel %vm5920_vm2, %v5828_v30, %v5890_v45 }
 0x9da   : > { %v5949_v16 = vsel %vm5938_vm3, %v5931_v2, 0.0 }
 0x9db   : > { %5966 = vxpose.xlu1.b32.cont [11/16] (narrow) %v5949_v16, 8 }
 0x9dc   : > { %v5892_v22 = vpop.permute.xlu1 %5891 }
 0x9dd   : > { %v5932_v14 = vsel %vm5920_vm2, %v11396_v38, %v5892_v22 }
 0x9de   : > { %v5950_v31 = vsel %vm5938_vm3, %v5932_v14, 0.0 }
 0x9df   : > { %5967 = vxpose.xlu1.b32.cont [12/16] (narrow) %v5950_v31, 8 }
 0x9e0   : > { %v5894_v4 = vpop.permute.xlu0 %5893 }
 0x9e1   : > { %v5933_v61 = vsel %vm5920_vm2, %v5830_v40, %v5894_v4 }
 0x9e2   : > { %v5951_v13 = vsel %vm5938_vm3, %v5933_v61, 0.0 }
 0x9e3   : > { %5968 = vxpose.xlu1.b32.cont [13/16] (narrow) %v5951_v13, 8 }
 0x9e4   : > { %v5896_v0 = vpop.permute.xlu0 %5895 }
 0x9e5   : > { %v5934_v60 = vsel %vm5920_vm2, %v11404_v7, %v5896_v0 }
 0x9e6   : > { %v5952_v41 = vsel %vm5938_vm3, %v5934_v60, 0.0 }
 0x9e7   : > { %5969 = vxpose.xlu1.b32.cont [14/16] (narrow) %v5952_v41, 8 }
 0x9e8   : > { %v5898_v38 = vpop.permute.xlu1 %5897 }
 0x9e9   : > { %v5935_v49 = vsel %vm5920_vm2, %v11411_v54, %v5898_v38 }
 0x9ea   : > { %v5953_v26 = vsel %vm5938_vm3, %v5935_v49, 0.0 }
 0x9eb   : > { %5970 = vxpose.xlu1.b32.cont [15/16] (narrow) %v5953_v26, 8 }
 0x9ec   : > { %v5902_v42 = vpop.permute.xlu1 %5901 }
 0x9ed   : > { %v5937_v48 = vsel %vm5920_vm2, %v5834_v24, %v5902_v42 }
 0x9ee   : > { %v5955_v37 = vsel %vm5938_vm3, %v5937_v48, 0.0 }
 0x9ef   : > { %5988 = vxpose.xlu0.b32.start.end [1/1] (short) (narrow) %v5955_v37, 8 }
 0xa0c   : > { %v5900_v7 = vpop.permute.xlu0 %5899 }
 0xa0d   : > { %v5936_v15 = vsel %vm5920_vm2, %v11413_v39, %v5900_v7 }
 0xa0e   : > { %v5954_v47 = vsel %vm5938_vm3, %v5936_v15, 0.0 }
 0xa0f   : > { %5971 = vxpose.xlu1.b32.end [16/16] (narrow) %v5954_v47, 8 }
 0xa1d   : > { %v6028_v62 = vpop.permute.xlu0 %6027 }
 0xa53   : > { %v5972_v54 = vpop.trf.xlu1 }
 0xa54   : > { %v6030_v32 = vadd.f32 %v6028_v62, %v5972_v54 }
 0xa56   : > { %6034 = vrot.lane.b32.xlu0 %v6030_v32, %s7407_s13 }
 0xa6f   : > { %v6004_v52 = vpop.trf.xlu0 }
 0xa70   : > { %v6031_v8 = vadd.f32 %v6028_v62, %v6004_v52 }
 0xa72   : > { %6036 = vrot.lane.b32.xlu0 %v6031_v8, %s7407_s13  ;;  %s7315_s13 = scalar_lea.vmem %s11480_s29, 32 }
 0xa73   : > { %p7316_p11 = scmp.ne.s32.totalorder %s11480_s29, %s7315_s13  ;;  %p7323_p1 = scmp.lt.s32.totalorder %s7321_s1, %s7315_s13 }
 0xa75   : > { %p7317_p12 = pnand %p7316_p11, %p7517_p4  ;;  %p7324_p2 = por %p7323_p1, %p7322_p0 }
 0xa77   : > { %p7318_p13 = pneg %p7317_p12 }
 0xa79   : > { %p7325_p3 = pnand %p7324_p2, %p7318_p13 }
 0xac8   : > { %v6035_v35 = vpop.permute.xlu0 %6034 }
 0xae4   : > { %v6037_v39 = vpop.permute.xlu0 %6036 }
 0xae5   : > { %v6039_v46 = vsel %vm6038_vm10, %v6035_v35, %v6037_v39 }
 0xae6   : > { %6041 = vst [vmem:[%s437_s11] sm:$0x3] %v6039_v46 }
 0xae7   : > { %7328 = shalt.err (!%p7325_p3)
}
 0xae8   : > { %s7329_s15 = scalar_lea.hbm %s11478_s0, 32  ;;  %s7333_s19 = scalar_lea.hbm %s11537_s12, 96 }
 0xae9   : > { %p7330_p5 = scmp.ne.s32.totalorder %s11478_s0, %s7329_s15  ;;  %p7334_p9 = scmp.lt.u32.totalorder %s11478_s0, %s11537_s12 }
 0xaea   : > { %p7335_p10 = scmp.lt.u32.totalorder %s7333_s19, %s7329_s15  ;;  %p7337_p12 = scmp.lt.u32.totalorder %s7329_s15, %s11478_s0 }
 0xaeb   : > { %p7331_p6 = pnand %p7330_p5, %p7517_p4 }
 0xaec   : > { %p7336_p11 = por %p7335_p10, %p7334_p9 }
 0xaed   : > { %p7332_p7 = pneg %p7331_p6 }
 0xaee   : > { %p7338_p13 = por %p7337_p12, %p7336_p11 }
 0xaf0   : > { %p7339_p0 = pnand %p7338_p13, %p7332_p7 }
 0xaf2   : > { %7342 = shalt.err (!%p7339_p0)
}
 0xaf3   : > { %7044 = dma.vmem_to_hbm [thread:$0]  (%p7517_p4), %s11480_s29, 32, %s11478_s0, %s6043_s20  }
 0xaf4 PF: > { %p7050_p1 = scmp.ge.s32.totalorder %s7393_s28, 2  ;;  %s6070_s1 = sand.u32 1, %s7373_s23  }
 0xaf5   : > { %s6071_s13 = scalar_lea.sflag [#allocation4], %s6070_s1 }
 0xaf6   : > { %p7047_p2 = pnand %p7050_p1, %p7524_p8 }
 0xaf8   : > { %7368 = dma.done.wait (!%p7047_p2), %s6071_s13, 32  }
 0xaf9   : > { %7370 = vsyncadd (!%p7047_p2), %s6071_s13, 4294967264  ;;  %s27_s28 = sadd.s32 1, %s7393_s28   ;;  %s12193_s23 = smov %s7377_s24 }
 0xafa   : > { %p24_p3 = scmp.ge.s32.totalorder %s27_s28, 5   ;;  %s12194_s24 = smov %s7381_s25 }
 0xafb   : > { %s12195_s25 = smov %s7530_s17  ;;  %s12196_s26 = smov %s7389_s27 }
 0xafc   : > { %s12197_s27 = smov %s12199_s30  ;;  %26 = sbr.rel (!%p24_p3) target bundleno = 7 (0x7), region = 108 }
 0xb03   :  { %6076 = vsyncpa [#allocation4], 1 }
 0xb04   :  { %6078 = vsyncpa [#allocation4 + $0x1], 1 }

</bundles_post_ra>
